<compile_context>
chip_gen: v5e
topology: v5e:2x2
jax: 0.10.0
libtpu: 0.0.40
codegen_flags: <defaults>
</compile_context>

<pallas_src>
import functools
import math

import jax
import jax.numpy as jnp
from jax.experimental import pallas as pl
from jax.experimental.pallas import tpu as pltpu


def _round_up(x, m):
    return ((x + m - 1) // m) * m


# PyTorch LSTM gate order [i, f, g, o] -> kernel order [i, f, o, g]
_GATE_PERM = (0, 1, 3, 2)


# -----------------------------------------------------------------------------
# Fused BiRNN kernel
# -----------------------------------------------------------------------------
def _birnn_fused_kernel(*refs, num_layers, seq, batch_p, hidden_p):
    # ref layout: emb, (w_ih_cat, w_hh_fw, w_hh_bw, b_cat) * L, dec_w, dec_b |
    #             out | slab_a, slab_b, gx
    emb_ref = refs[0]
    pos = 1
    layer_refs = []
    for _ in range(num_layers):
        layer_refs.append(refs[pos:pos + 4])
        pos += 4
    dec_w_ref = refs[pos]
    dec_b_ref = refs[pos + 1]
    out_ref = refs[pos + 2]
    slab_a, slab_b, gx_ref = refs[pos + 3:pos + 6]
    slabs = (slab_a, slab_b)

    Bp = batch_p
    Hp = hidden_p

    def cell(gates, c):
        # gates: (Bp, 4Hp) f32, kernel gate order [i, f, o, g].
        # sigmoid over 3Hp + tanh over Hp (instead of 4Hp each) -> half the EUP work.
        sfo = jax.nn.sigmoid(gates[:, 0:3 * Hp])
        g = jnp.tanh(gates[:, 3 * Hp:4 * Hp])
        i = sfo[:, 0 * Hp:1 * Hp]
        f = sfo[:, 1 * Hp:2 * Hp]
        o = sfo[:, 2 * Hp:3 * Hp]
        c_new = f * c + i * g
        h_new = o * jnp.tanh(c_new)
        return h_new, c_new

    for layer in range(num_layers):
        w_ih_ref, w_hh_fw_ref, w_hh_bw_ref, b_ref = layer_refs[layer]

        # Layer input: (seq*Bp, Din_pad) bf16 — embeddings or the previous slab.
        x = emb_ref[...] if layer == 0 else slabs[(layer - 1) % 2][...]

        # Hoisted, fused fw+bw input projection (+ folded biases), ALL timesteps:
        # one (rows, Din) @ (Din, 8Hp) pass over x per layer.
        gx_ref[...] = (
            jnp.dot(x, w_ih_ref[...], preferred_element_type=jnp.float32)
            + b_ref[...]
        ).astype(gx_ref.dtype)

        whf = w_hh_fw_ref[...]          # (Hp, 4Hp) bf16, hoisted out of the time loop
        whb = w_hh_bw_ref[...]
        out_slab = slabs[layer % 2]

        def step(t, carry, whf=whf, whb=whb, out_slab=out_slab):
            h_fw, c_fw, h_bw, c_bw = carry
            tb = seq - 1 - t
            rf = pl.multiple_of(t * Bp, Bp)
            rb = pl.multiple_of(tb * Bp, Bp)
            gf = gx_ref[pl.ds(rf, Bp), 0:4 * Hp].astype(jnp.float32) + jnp.dot(
                h_fw.astype(whf.dtype), whf, preferred_element_type=jnp.float32)
            gb = gx_ref[pl.ds(rb, Bp), 4 * Hp:8 * Hp].astype(jnp.float32) + jnp.dot(
                h_bw.astype(whb.dtype), whb, preferred_element_type=jnp.float32)
            h_fw, c_fw = cell(gf, c_fw)
            h_bw, c_bw = cell(gb, c_bw)
            out_slab[pl.ds(rf, Bp), 0:Hp] = h_fw.astype(out_slab.dtype)
            out_slab[pl.ds(rb, Bp), Hp:2 * Hp] = h_bw.astype(out_slab.dtype)
            return h_fw, c_fw, h_bw, c_bw

        init = (jnp.zeros((Bp, Hp), jnp.float32),) * 4
        _ = jax.lax.fori_loop(0, seq, step, init, unroll=True)

    # Decoder epilogue: hidden = concat(outputs[0], outputs[-1]) -> (Bp, 4Hp)
    last = slabs[(num_layers - 1) % 2]
    hidden = jnp.concatenate(
        [last[0:Bp, :], last[(seq - 1) * Bp:seq * Bp, :]], axis=-1)
    out_ref[...] = (
        jnp.dot(hidden, dec_w_ref[...], preferred_element_type=jnp.float32)
        + dec_b_ref[...]
    ).astype(out_ref.dtype)


# -----------------------------------------------------------------------------
# Wrapper
# -----------------------------------------------------------------------------
def birnn_forward(inputs, packed, num_layers):
    """inputs: (batch, seq) int32 token ids  ->  (batch, 2) logits."""
    Hp = packed["l0_whh_fw"].shape[0]

    # inputs.permute(1, 0) + embedding lookup (plain-JAX glue, like nn.Embedding)
    emb = jnp.take(packed["embedding"], inputs.T, axis=0)      # (seq, B, Ep) bf16
    seq, B, Ep = emb.shape
    Bp = _round_up(B, 8)
    if Bp != B:
        emb = jnp.pad(emb, ((0, 0), (0, Bp - B), (0, 0)))
    x2 = emb.reshape(seq * Bp, Ep)     # time-major rows, sublane-aligned per timestep

    args = [x2]
    for layer in range(num_layers):
        args += [packed[f"l{layer}_wih"], packed[f"l{layer}_whh_fw"],
                 packed[f"l{layer}_whh_bw"], packed[f"l{layer}_b"]]
    args += [packed["dec_w"], packed["dec_b"]]

    rows = seq * Bp
    arg_bytes = sum(int(a.size) * a.dtype.itemsize for a in args)
    scratch_bytes = (2 * rows * 2 * Hp + rows * 8 * Hp) * 2     # bf16 slabs
    out_bytes = Bp * 128 * 4
    vmem_limit = int(min(64 * 1024 * 1024,
                         max(16 * 1024 * 1024,
                             2 * (arg_bytes + scratch_bytes + out_bytes))))

    kernel = functools.partial(
        _birnn_fused_kernel, num_layers=num_layers, seq=seq,
        batch_p=Bp, hidden_p=Hp)

    vmem = pltpu.MemorySpace.VMEM
    out_p = pl.pallas_call(
        kernel,
        out_shape=jax.ShapeDtypeStruct((Bp, 128), jnp.float32),
        in_specs=[pl.BlockSpec(memory_space=vmem)] * len(args),
        out_specs=pl.BlockSpec(memory_space=vmem),
        scratch_shapes=[
            pltpu.VMEM((rows, 2 * Hp), jnp.bfloat16),   # layer output slab (even layers)
            pltpu.VMEM((rows, 2 * Hp), jnp.bfloat16),   # layer output slab (odd layers)
            pltpu.VMEM((rows, 8 * Hp), jnp.bfloat16),   # fused fw+bw hoisted gates
        ],
        compiler_params=pltpu.CompilerParams(vmem_limit_bytes=vmem_limit),
    )(*args)
    return out_p[:B, :2]


# -----------------------------------------------------------------------------
# Parameter construction / packing
# -----------------------------------------------------------------------------
def init_raw_params(key, vocab_size, embed_size, num_hiddens, num_layers):
    """PyTorch-layout raw params (f32, unpadded, gate order i,f,g,o)."""
    H = num_hiddens
    k = 1.0 / math.sqrt(H)
    params = {}

    key, sub = jax.random.split(key)
    params["embedding"] = jax.random.normal(
        sub, (vocab_size, embed_size), jnp.float32) * 0.1

    for layer in range(num_layers):
        din = embed_size if layer == 0 else 2 * H
        for d in ("fw", "bw"):
            key, k1, k2, k3, k4 = jax.random.split(key, 5)
            params[f"l{layer}_{d}"] = (
                jax.random.uniform(k1, (4 * H, din), jnp.float32, -k, k),   # w_ih
                jax.random.uniform(k2, (4 * H, H), jnp.float32, -k, k),     # w_hh
                jax.random.uniform(k3, (4 * H,), jnp.float32, -k, k),       # b_ih
                jax.random.uniform(k4, (4 * H,), jnp.float32, -k, k),       # b_hh
            )

    key, k1, k2 = jax.random.split(key, 3)
    kd = 1.0 / math.sqrt(4 * H)
    params["decoder"] = (
        jax.random.uniform(k1, (2, 4 * H), jnp.float32, -kd, kd),
        jax.random.uniform(k2, (2,), jnp.float32, -kd, kd),
    )
    return params


def _reorder_pad_gate_cols(w_t, H, Hp):
    """(Din, 4H) PyTorch gate order -> (Din, 4Hp) kernel order [i,f,o,g], zero-padded."""
    blocks = [w_t[:, g * H:(g + 1) * H] for g in _GATE_PERM]
    blocks = [jnp.pad(b, ((0, 0), (0, Hp - H))) for b in blocks]
    return jnp.concatenate(blocks, axis=1)


def _reorder_pad_gate_vec(b, H, Hp):
    blocks = [b[g * H:(g + 1) * H] for g in _GATE_PERM]
    blocks = [jnp.pad(x, (0, Hp - H)) for x in blocks]
    return jnp.concatenate(blocks)


def pack_params(raw, num_layers, embed_size, num_hiddens):
    """Pad to TPU-friendly shapes, reorder gates, fuse fw/bw projections, cast bf16."""
    E, H = embed_size, num_hiddens
    Ep, Hp = _round_up(E, 128), _round_up(H, 128)
    packed = {}

    packed["embedding"] = jnp.pad(
        raw["embedding"], ((0, 0), (0, Ep - E))).astype(jnp.bfloat16)

    for layer in range(num_layers):
        w_cats, b_cats = [], []
        for d in ("fw", "bw"):
            w_ih, w_hh, b_ih, b_hh = raw[f"l{layer}_{d}"]
            w_ih_t = _reorder_pad_gate_cols(w_ih.T, H, Hp)        # (Din, 4Hp)
            if layer == 0:
                w_ih_t = jnp.pad(w_ih_t, ((0, Ep - E), (0, 0)))   # (Ep, 4Hp)
            else:
                fw_rows = jnp.pad(w_ih_t[0:H], ((0, Hp - H), (0, 0)))
                bw_rows = jnp.pad(w_ih_t[H:2 * H], ((0, Hp - H), (0, 0)))
                w_ih_t = jnp.concatenate([fw_rows, bw_rows], axis=0)   # (2Hp, 4Hp)
            w_cats.append(w_ih_t)
            b_cats.append(_reorder_pad_gate_vec(b_ih + b_hh, H, Hp))

            w_hh_t = _reorder_pad_gate_cols(w_hh.T, H, Hp)        # (H, 4Hp)
            w_hh_t = jnp.pad(w_hh_t, ((0, Hp - H), (0, 0)))       # (Hp, 4Hp)
            packed[f"l{layer}_whh_{d}"] = w_hh_t.astype(jnp.bfloat16)

        packed[f"l{layer}_wih"] = jnp.concatenate(w_cats, axis=1).astype(jnp.bfloat16)
        packed[f"l{layer}_b"] = jnp.concatenate(b_cats)[None, :].astype(jnp.float32)

    dw, db = raw["decoder"]                                        # (2, 4H), (2,)
    dw_t = dw.T                                                    # (4H, 2)
    blocks = [jnp.pad(dw_t[k * H:(k + 1) * H], ((0, Hp - H), (0, 0))) for k in range(4)]
    dw_p = jnp.concatenate(blocks, axis=0)                         # (4Hp, 2)
    packed["dec_w"] = jnp.pad(dw_p, ((0, 0), (0, 128 - 2))).astype(jnp.bfloat16)
    packed["dec_b"] = jnp.pad(db, (0, 128 - 2))[None, :].astype(jnp.float32)
    return packed


# -----------------------------------------------------------------------------
# Pure-JAX reference (correctness check, f32, PyTorch layout)
# -----------------------------------------------------------------------------
def _lstm_dir_ref(x, w_ih, w_hh, b_ih, b_hh):
    B = x.shape[1]
    H = w_hh.shape[1]

    def step(carry, x_t):
        h, c = carry
        gates = x_t @ w_ih.T + h @ w_hh.T + b_ih + b_hh
        i, f, g, o = jnp.split(gates, 4, axis=-1)
        i, f, o = jax.nn.sigmoid(i), jax.nn.sigmoid(f), jax.nn.sigmoid(o)
        g = jnp.tanh(g)
        c = f * c + i * g
        h = o * jnp.tanh(c)
        return (h, c), h

    init = (jnp.zeros((B, H), jnp.float32),) * 2
    _, ys = jax.lax.scan(step, init, x)
    return ys


def birnn_ref(inputs, raw, num_layers):
    x = jnp.take(raw["embedding"], inputs.T, axis=0)
    for layer in range(num_layers):
        fw = _lstm_dir_ref(x, *raw[f"l{layer}_fw"])
        bw = _lstm_dir_ref(x[::-1], *raw[f"l{layer}_bw"])[::-1]
        x = jnp.concatenate([fw, bw], axis=-1)
    hidden = jnp.concatenate([x[0], x[-1]], axis=-1)
    dw, db = raw["decoder"]
    return hidden @ dw.T + db


if __name__ == "__main__":
    VOCAB, EMBED, HIDDEN, LAYERS = 50, 32, 32, 2
    BATCH, SEQ = 2, 8

    key = jax.random.PRNGKey(0)
    key, pkey, ikey = jax.random.split(key, 3)
    raw = init_raw_params(pkey, VOCAB, EMBED, HIDDEN, LAYERS)
    packed = pack_params(raw, LAYERS, EMBED, HIDDEN)
    inputs = jax.random.randint(ikey, (BATCH, SEQ), 0, VOCAB, dtype=jnp.int32)

    fwd = jax.jit(functools.partial(birnn_forward, num_layers=LAYERS))
    out = fwd(inputs, packed)
    jax.block_until_ready(out)

    ref = birnn_ref(inputs, raw, LAYERS)
    assert out.shape == (BATCH, 2), out.shape
    # bf16 matmul operands in the kernel vs f32 reference -> loose-ish tolerance.
    assert jnp.allclose(out, ref, atol=3e-2, rtol=3e-2), (out, ref)

    print("KERNEL_OK")
</pallas_src>

<mosaic_0001>
module attributes {stable_mosaic.version = 11 : i64} {
  func.func @_birnn_fused_kernel(%arg0: memref<64x128xbf16, #tpu.memory_space<vmem>>, %arg1: memref<128x1024xbf16, #tpu.memory_space<vmem>>, %arg2: memref<128x512xbf16, #tpu.memory_space<vmem>>, %arg3: memref<128x512xbf16, #tpu.memory_space<vmem>>, %arg4: memref<1x1024xf32, #tpu.memory_space<vmem>>, %arg5: memref<256x1024xbf16, #tpu.memory_space<vmem>>, %arg6: memref<128x512xbf16, #tpu.memory_space<vmem>>, %arg7: memref<128x512xbf16, #tpu.memory_space<vmem>>, %arg8: memref<1x1024xf32, #tpu.memory_space<vmem>>, %arg9: memref<512x128xbf16, #tpu.memory_space<vmem>>, %arg10: memref<1x128xf32, #tpu.memory_space<vmem>>, %arg11: memref<8x128xf32, #tpu.memory_space<vmem>>, %arg12: memref<64x256xbf16, #tpu.memory_space<vmem>>, %arg13: memref<64x256xbf16, #tpu.memory_space<vmem>>, %arg14: memref<64x1024xbf16, #tpu.memory_space<vmem>>) attributes {dimension_semantics = [], scalar_prefetch = 0 : i64, scratch_operands = 3 : i64, tpu.core_type = #tpu.core_type<tc>} {
    %c0 = arith.constant 0 : index
    %c0_0 = arith.constant 0 : index
    %0 = vector.load %arg0[%c0, %c0_0] : memref<64x128xbf16, #tpu.memory_space<vmem>>, vector<64x128xbf16>
    %c0_1 = arith.constant 0 : index
    %c0_2 = arith.constant 0 : index
    %1 = vector.load %arg1[%c0_1, %c0_2] : memref<128x1024xbf16, #tpu.memory_space<vmem>>, vector<128x1024xbf16>
    %cst = arith.constant dense<0.000000e+00> : vector<64x1024xf32>
    %2 = tpu.matmul %0, %1, %cst {dimension_numbers = #tpu.dot_dimension_numbers<[1], [0], [0], [1], [0, 0, 1, 1], [], []>} : vector<64x128xbf16>, vector<128x1024xbf16>, vector<64x1024xf32> -> vector<64x1024xf32>
    %c0_3 = arith.constant 0 : index
    %c0_4 = arith.constant 0 : index
    %3 = vector.load %arg4[%c0_3, %c0_4] : memref<1x1024xf32, #tpu.memory_space<vmem>>, vector<1x1024xf32>
    %4 = vector.broadcast %3 : vector<1x1024xf32> to vector<64x1024xf32>
    %5 = arith.addf %2, %4 : vector<64x1024xf32>
    %6 = arith.truncf %5 : vector<64x1024xf32> to vector<64x1024xbf16>
    %c0_5 = arith.constant 0 : index
    %c0_6 = arith.constant 0 : index
    %7 = vector.load %arg14[%c0_5, %c0_6] : memref<64x1024xbf16, #tpu.memory_space<vmem>>, vector<64x1024xbf16>
    tpu.vector_store %arg14[%c0_5, %c0_6], %6 {strides = array<i32>} : memref<64x1024xbf16, #tpu.memory_space<vmem>>, vector<64x1024xbf16>,
    %c0_7 = arith.constant 0 : index
    %c0_8 = arith.constant 0 : index
    %8 = vector.load %arg2[%c0_7, %c0_8] : memref<128x512xbf16, #tpu.memory_space<vmem>>, vector<128x512xbf16>
    %c0_9 = arith.constant 0 : index
    %c0_10 = arith.constant 0 : index
    %9 = vector.load %arg3[%c0_9, %c0_10] : memref<128x512xbf16, #tpu.memory_space<vmem>>, vector<128x512xbf16>
    %cst_11 = arith.constant 0.000000e+00 : f32
    %10 = vector.broadcast %cst_11 : f32 to vector<8x128xf32>
    %c0_i32 = arith.constant 0 : i32
    %c7_i32 = arith.constant 7 : i32
    %11 = arith.subi %c7_i32, %c0_i32 : i32
    %c8_i32 = arith.constant 8 : i32
    %12 = arith.muli %c0_i32, %c8_i32 : i32
    %13 = tpu.assume_multiple %12, 8 : i32
    %c8_i32_12 = arith.constant 8 : i32
    %14 = arith.muli %11, %c8_i32_12 : i32
    %15 = tpu.assume_multiple %14, 8 : i32
    %16 = arith.index_cast %13 : i32 to index
    %c0_13 = arith.constant 0 : index
    %17 = vector.load %arg14[%16, %c0_13] : memref<64x1024xbf16, #tpu.memory_space<vmem>>, vector<8x512xbf16>
    %18 = arith.extf %17 : vector<8x512xbf16> to vector<8x512xf32>
    %19 = arith.truncf %10 : vector<8x128xf32> to vector<8x128xbf16>
    %cst_14 = arith.constant dense<0.000000e+00> : vector<8x512xf32>
    %20 = tpu.matmul %19, %8, %cst_14 {dimension_numbers = #tpu.dot_dimension_numbers<[1], [0], [0], [1], [0, 0, 1, 1], [], []>} : vector<8x128xbf16>, vector<128x512xbf16>, vector<8x512xf32> -> vector<8x512xf32>
    %21 = arith.addf %18, %20 : vector<8x512xf32>
    %22 = arith.index_cast %15 : i32 to index
    %c512 = arith.constant 512 : index
    %23 = vector.load %arg14[%22, %c512] : memref<64x1024xbf16, #tpu.memory_space<vmem>>, vector<8x512xbf16>
    %24 = arith.extf %23 : vector<8x512xbf16> to vector<8x512xf32>
    %25 = arith.truncf %10 : vector<8x128xf32> to vector<8x128xbf16>
    %cst_15 = arith.constant dense<0.000000e+00> : vector<8x512xf32>
    %26 = tpu.matmul %25, %9, %cst_15 {dimension_numbers = #tpu.dot_dimension_numbers<[1], [0], [0], [1], [0, 0, 1, 1], [], []>} : vector<8x128xbf16>, vector<128x512xbf16>, vector<8x512xf32> -> vector<8x512xf32>
    %27 = arith.addf %24, %26 : vector<8x512xf32>
    %28 = vector.extract_strided_slice %21 {offsets = [0, 0], sizes = [8, 384], strides = [1, 1]} : vector<8x512xf32> to vector<8x384xf32>
    %29 = arith.negf %28 : vector<8x384xf32>
    %30 = math.exp %29 : vector<8x384xf32>
    %cst_16 = arith.constant 1.000000e+00 : f32
    %31 = vector.broadcast %cst_16 : f32 to vector<8x384xf32>
    %32 = arith.addf %31, %30 : vector<8x384xf32>
    %33 = arith.divf %31, %32 : vector<8x384xf32>
    %34 = vector.extract_strided_slice %21 {offsets = [0, 384], sizes = [8, 128], strides = [1, 1]} : vector<8x512xf32> to vector<8x128xf32>
    %35 = math.tanh %34 : vector<8x128xf32>
    %36 = vector.extract_strided_slice %33 {offsets = [0, 0], sizes = [8, 128], strides = [1, 1]} : vector<8x384xf32> to vector<8x128xf32>
    %37 = vector.extract_strided_slice %33 {offsets = [0, 128], sizes = [8, 128], strides = [1, 1]} : vector<8x384xf32> to vector<8x128xf32>
    %38 = vector.extract_strided_slice %33 {offsets = [0, 256], sizes = [8, 128], strides = [1, 1]} : vector<8x384xf32> to vector<8x128xf32>
    %39 = arith.mulf %37, %10 : vector<8x128xf32>
    %40 = arith.mulf %36, %35 : vector<8x128xf32>
    %41 = arith.addf %39, %40 : vector<8x128xf32>
    %42 = math.tanh %41 : vector<8x128xf32>
    %43 = arith.mulf %38, %42 : vector<8x128xf32>
    %44 = vector.extract_strided_slice %27 {offsets = [0, 0], sizes = [8, 384], strides = [1, 1]} : vector<8x512xf32> to vector<8x384xf32>
    %45 = arith.negf %44 : vector<8x384xf32>
    %46 = math.exp %45 : vector<8x384xf32>
    %cst_17 = arith.constant 1.000000e+00 : f32
    %47 = vector.broadcast %cst_17 : f32 to vector<8x384xf32>
    %48 = arith.addf %47, %46 : vector<8x384xf32>
    %49 = arith.divf %47, %48 : vector<8x384xf32>
    %50 = vector.extract_strided_slice %27 {offsets = [0, 384], sizes = [8, 128], strides = [1, 1]} : vector<8x512xf32> to vector<8x128xf32>
    %51 = math.tanh %50 : vector<8x128xf32>
    %52 = vector.extract_strided_slice %49 {offsets = [0, 0], sizes = [8, 128], strides = [1, 1]} : vector<8x384xf32> to vector<8x128xf32>
    %53 = vector.extract_strided_slice %49 {offsets = [0, 128], sizes = [8, 128], strides = [1, 1]} : vector<8x384xf32> to vector<8x128xf32>
    %54 = vector.extract_strided_slice %49 {offsets = [0, 256], sizes = [8, 128], strides = [1, 1]} : vector<8x384xf32> to vector<8x128xf32>
    %55 = arith.mulf %53, %10 : vector<8x128xf32>
    %56 = arith.mulf %52, %51 : vector<8x128xf32>
    %57 = arith.addf %55, %56 : vector<8x128xf32>
    %58 = math.tanh %57 : vector<8x128xf32>
    %59 = arith.mulf %54, %58 : vector<8x128xf32>
    %60 = arith.truncf %43 : vector<8x128xf32> to vector<8x128xbf16>
    %61 = arith.index_cast %13 : i32 to index
    %c0_18 = arith.constant 0 : index
    %62 = vector.load %arg12[%61, %c0_18] : memref<64x256xbf16, #tpu.memory_space<vmem>>, vector<8x128xbf16>
    tpu.vector_store %arg12[%61, %c0_18], %60 {strides = array<i32>} : memref<64x256xbf16, #tpu.memory_space<vmem>>, vector<8x128xbf16>,
    %63 = arith.truncf %59 : vector<8x128xf32> to vector<8x128xbf16>
    %64 = arith.index_cast %15 : i32 to index
    %c128 = arith.constant 128 : index
    %65 = vector.load %arg12[%64, %c128] : memref<64x256xbf16, #tpu.memory_space<vmem>>, vector<8x128xbf16>
    tpu.vector_store %arg12[%64, %c128], %63 {strides = array<i32>} : memref<64x256xbf16, #tpu.memory_space<vmem>>, vector<8x128xbf16>,
    %c1_i32 = arith.constant 1 : i32
    %c7_i32_19 = arith.constant 7 : i32
    %66 = arith.subi %c7_i32_19, %c1_i32 : i32
    %c8_i32_20 = arith.constant 8 : i32
    %67 = arith.muli %c1_i32, %c8_i32_20 : i32
    %68 = tpu.assume_multiple %67, 8 : i32
    %c8_i32_21 = arith.constant 8 : i32
    %69 = arith.muli %66, %c8_i32_21 : i32
    %70 = tpu.assume_multiple %69, 8 : i32
    %71 = arith.index_cast %68 : i32 to index
    %c0_22 = arith.constant 0 : index
    %72 = vector.load %arg14[%71, %c0_22] : memref<64x1024xbf16, #tpu.memory_space<vmem>>, vector<8x512xbf16>
    %73 = arith.extf %72 : vector<8x512xbf16> to vector<8x512xf32>
    %74 = arith.truncf %43 : vector<8x128xf32> to vector<8x128xbf16>
    %cst_23 = arith.constant dense<0.000000e+00> : vector<8x512xf32>
    %75 = tpu.matmul %74, %8, %cst_23 {dimension_numbers = #tpu.dot_dimension_numbers<[1], [0], [0], [1], [0, 0, 1, 1], [], []>} : vector<8x128xbf16>, vector<128x512xbf16>, vector<8x512xf32> -> vector<8x512xf32>
    %76 = arith.addf %73, %75 : vector<8x512xf32>
    %77 = arith.index_cast %70 : i32 to index
    %c512_24 = arith.constant 512 : index
    %78 = vector.load %arg14[%77, %c512_24] : memref<64x1024xbf16, #tpu.memory_space<vmem>>, vector<8x512xbf16>
    %79 = arith.extf %78 : vector<8x512xbf16> to vector<8x512xf32>
    %80 = arith.truncf %59 : vector<8x128xf32> to vector<8x128xbf16>
    %cst_25 = arith.constant dense<0.000000e+00> : vector<8x512xf32>
    %81 = tpu.matmul %80, %9, %cst_25 {dimension_numbers = #tpu.dot_dimension_numbers<[1], [0], [0], [1], [0, 0, 1, 1], [], []>} : vector<8x128xbf16>, vector<128x512xbf16>, vector<8x512xf32> -> vector<8x512xf32>
    %82 = arith.addf %79, %81 : vector<8x512xf32>
    %83 = vector.extract_strided_slice %76 {offsets = [0, 0], sizes = [8, 384], strides = [1, 1]} : vector<8x512xf32> to vector<8x384xf32>
    %84 = arith.negf %83 : vector<8x384xf32>
    %85 = math.exp %84 : vector<8x384xf32>
    %cst_26 = arith.constant 1.000000e+00 : f32
    %86 = vector.broadcast %cst_26 : f32 to vector<8x384xf32>
    %87 = arith.addf %86, %85 : vector<8x384xf32>
    %88 = arith.divf %86, %87 : vector<8x384xf32>
    %89 = vector.extract_strided_slice %76 {offsets = [0, 384], sizes = [8, 128], strides = [1, 1]} : vector<8x512xf32> to vector<8x128xf32>
    %90 = math.tanh %89 : vector<8x128xf32>
    %91 = vector.extract_strided_slice %88 {offsets = [0, 0], sizes = [8, 128], strides = [1, 1]} : vector<8x384xf32> to vector<8x128xf32>
    %92 = vector.extract_strided_slice %88 {offsets = [0, 128], sizes = [8, 128], strides = [1, 1]} : vector<8x384xf32> to vector<8x128xf32>
    %93 = vector.extract_strided_slice %88 {offsets = [0, 256], sizes = [8, 128], strides = [1, 1]} : vector<8x384xf32> to vector<8x128xf32>
    %94 = arith.mulf %92, %41 : vector<8x128xf32>
    %95 = arith.mulf %91, %90 : vector<8x128xf32>
    %96 = arith.addf %94, %95 : vector<8x128xf32>
    %97 = math.tanh %96 : vector<8x128xf32>
    %98 = arith.mulf %93, %97 : vector<8x128xf32>
    %99 = vector.extract_strided_slice %82 {offsets = [0, 0], sizes = [8, 384], strides = [1, 1]} : vector<8x512xf32> to vector<8x384xf32>
    %100 = arith.negf %99 : vector<8x384xf32>
    %101 = math.exp %100 : vector<8x384xf32>
    %cst_27 = arith.constant 1.000000e+00 : f32
    %102 = vector.broadcast %cst_27 : f32 to vector<8x384xf32>
    %103 = arith.addf %102, %101 : vector<8x384xf32>
    %104 = arith.divf %102, %103 : vector<8x384xf32>
    %105 = vector.extract_strided_slice %82 {offsets = [0, 384], sizes = [8, 128], strides = [1, 1]} : vector<8x512xf32> to vector<8x128xf32>
    %106 = math.tanh %105 : vector<8x128xf32>
    %107 = vector.extract_strided_slice %104 {offsets = [0, 0], sizes = [8, 128], strides = [1, 1]} : vector<8x384xf32> to vector<8x128xf32>
    %108 = vector.extract_strided_slice %104 {offsets = [0, 128], sizes = [8, 128], strides = [1, 1]} : vector<8x384xf32> to vector<8x128xf32>
    %109 = vector.extract_strided_slice %104 {offsets = [0, 256], sizes = [8, 128], strides = [1, 1]} : vector<8x384xf32> to vector<8x128xf32>
    %110 = arith.mulf %108, %57 : vector<8x128xf32>
    %111 = arith.mulf %107, %106 : vector<8x128xf32>
    %112 = arith.addf %110, %111 : vector<8x128xf32>
    %113 = math.tanh %112 : vector<8x128xf32>
    %114 = arith.mulf %109, %113 : vector<8x128xf32>
    %115 = arith.truncf %98 : vector<8x128xf32> to vector<8x128xbf16>
    %116 = arith.index_cast %68 : i32 to index
    %c0_28 = arith.constant 0 : index
    %117 = vector.load %arg12[%116, %c0_28] : memref<64x256xbf16, #tpu.memory_space<vmem>>, vector<8x128xbf16>
    tpu.vector_store %arg12[%116, %c0_28], %115 {strides = array<i32>} : memref<64x256xbf16, #tpu.memory_space<vmem>>, vector<8x128xbf16>,
    %118 = arith.truncf %114 : vector<8x128xf32> to vector<8x128xbf16>
    %119 = arith.index_cast %70 : i32 to index
    %c128_29 = arith.constant 128 : index
    %120 = vector.load %arg12[%119, %c128_29] : memref<64x256xbf16, #tpu.memory_space<vmem>>, vector<8x128xbf16>
    tpu.vector_store %arg12[%119, %c128_29], %118 {strides = array<i32>} : memref<64x256xbf16, #tpu.memory_space<vmem>>, vector<8x128xbf16>,
    %c2_i32 = arith.constant 2 : i32
    %c7_i32_30 = arith.constant 7 : i32
    %121 = arith.subi %c7_i32_30, %c2_i32 : i32
    %c8_i32_31 = arith.constant 8 : i32
    %122 = arith.muli %c2_i32, %c8_i32_31 : i32
    %123 = tpu.assume_multiple %122, 8 : i32
    %c8_i32_32 = arith.constant 8 : i32
    %124 = arith.muli %121, %c8_i32_32 : i32
    %125 = tpu.assume_multiple %124, 8 : i32
    %126 = arith.index_cast %123 : i32 to index
    %c0_33 = arith.constant 0 : index
    %127 = vector.load %arg14[%126, %c0_33] : memref<64x1024xbf16, #tpu.memory_space<vmem>>, vector<8x512xbf16>
    %128 = arith.extf %127 : vector<8x512xbf16> to vector<8x512xf32>
    %129 = arith.truncf %98 : vector<8x128xf32> to vector<8x128xbf16>
    %cst_34 = arith.constant dense<0.000000e+00> : vector<8x512xf32>
    %130 = tpu.matmul %129, %8, %cst_34 {dimension_numbers = #tpu.dot_dimension_numbers<[1], [0], [0], [1], [0, 0, 1, 1], [], []>} : vector<8x128xbf16>, vector<128x512xbf16>, vector<8x512xf32> -> vector<8x512xf32>
    %131 = arith.addf %128, %130 : vector<8x512xf32>
    %132 = arith.index_cast %125 : i32 to index
    %c512_35 = arith.constant 512 : index
    %133 = vector.load %arg14[%132, %c512_35] : memref<64x1024xbf16, #tpu.memory_space<vmem>>, vector<8x512xbf16>
    %134 = arith.extf %133 : vector<8x512xbf16> to vector<8x512xf32>
    %135 = arith.truncf %114 : vector<8x128xf32> to vector<8x128xbf16>
    %cst_36 = arith.constant dense<0.000000e+00> : vector<8x512xf32>
    %136 = tpu.matmul %135, %9, %cst_36 {dimension_numbers = #tpu.dot_dimension_numbers<[1], [0], [0], [1], [0, 0, 1, 1], [], []>} : vector<8x128xbf16>, vector<128x512xbf16>, vector<8x512xf32> -> vector<8x512xf32>
    %137 = arith.addf %134, %136 : vector<8x512xf32>
    %138 = vector.extract_strided_slice %131 {offsets = [0, 0], sizes = [8, 384], strides = [1, 1]} : vector<8x512xf32> to vector<8x384xf32>
    %139 = arith.negf %138 : vector<8x384xf32>
    %140 = math.exp %139 : vector<8x384xf32>
    %cst_37 = arith.constant 1.000000e+00 : f32
    %141 = vector.broadcast %cst_37 : f32 to vector<8x384xf32>
    %142 = arith.addf %141, %140 : vector<8x384xf32>
    %143 = arith.divf %141, %142 : vector<8x384xf32>
    %144 = vector.extract_strided_slice %131 {offsets = [0, 384], sizes = [8, 128], strides = [1, 1]} : vector<8x512xf32> to vector<8x128xf32>
    %145 = math.tanh %144 : vector<8x128xf32>
    %146 = vector.extract_strided_slice %143 {offsets = [0, 0], sizes = [8, 128], strides = [1, 1]} : vector<8x384xf32> to vector<8x128xf32>
    %147 = vector.extract_strided_slice %143 {offsets = [0, 128], sizes = [8, 128], strides = [1, 1]} : vector<8x384xf32> to vector<8x128xf32>
    %148 = vector.extract_strided_slice %143 {offsets = [0, 256], sizes = [8, 128], strides = [1, 1]} : vector<8x384xf32> to vector<8x128xf32>
    %149 = arith.mulf %147, %96 : vector<8x128xf32>
    %150 = arith.mulf %146, %145 : vector<8x128xf32>
    %151 = arith.addf %149, %150 : vector<8x128xf32>
    %152 = math.tanh %151 : vector<8x128xf32>
    %153 = arith.mulf %148, %152 : vector<8x128xf32>
    %154 = vector.extract_strided_slice %137 {offsets = [0, 0], sizes = [8, 384], strides = [1, 1]} : vector<8x512xf32> to vector<8x384xf32>
    %155 = arith.negf %154 : vector<8x384xf32>
    %156 = math.exp %155 : vector<8x384xf32>
    %cst_38 = arith.constant 1.000000e+00 : f32
    %157 = vector.broadcast %cst_38 : f32 to vector<8x384xf32>
    %158 = arith.addf %157, %156 : vector<8x384xf32>
    %159 = arith.divf %157, %158 : vector<8x384xf32>
    %160 = vector.extract_strided_slice %137 {offsets = [0, 384], sizes = [8, 128], strides = [1, 1]} : vector<8x512xf32> to vector<8x128xf32>
    %161 = math.tanh %160 : vector<8x128xf32>
    %162 = vector.extract_strided_slice %159 {offsets = [0, 0], sizes = [8, 128], strides = [1, 1]} : vector<8x384xf32> to vector<8x128xf32>
    %163 = vector.extract_strided_slice %159 {offsets = [0, 128], sizes = [8, 128], strides = [1, 1]} : vector<8x384xf32> to vector<8x128xf32>
    %164 = vector.extract_strided_slice %159 {offsets = [0, 256], sizes = [8, 128], strides = [1, 1]} : vector<8x384xf32> to vector<8x128xf32>
    %165 = arith.mulf %163, %112 : vector<8x128xf32>
    %166 = arith.mulf %162, %161 : vector<8x128xf32>
    %167 = arith.addf %165, %166 : vector<8x128xf32>
    %168 = math.tanh %167 : vector<8x128xf32>
    %169 = arith.mulf %164, %168 : vector<8x128xf32>
    %170 = arith.truncf %153 : vector<8x128xf32> to vector<8x128xbf16>
    %171 = arith.index_cast %123 : i32 to index
    %c0_39 = arith.constant 0 : index
    %172 = vector.load %arg12[%171, %c0_39] : memref<64x256xbf16, #tpu.memory_space<vmem>>, vector<8x128xbf16>
    tpu.vector_store %arg12[%171, %c0_39], %170 {strides = array<i32>} : memref<64x256xbf16, #tpu.memory_space<vmem>>, vector<8x128xbf16>,
    %173 = arith.truncf %169 : vector<8x128xf32> to vector<8x128xbf16>
    %174 = arith.index_cast %125 : i32 to index
    %c128_40 = arith.constant 128 : index
    %175 = vector.load %arg12[%174, %c128_40] : memref<64x256xbf16, #tpu.memory_space<vmem>>, vector<8x128xbf16>
    tpu.vector_store %arg12[%174, %c128_40], %173 {strides = array<i32>} : memref<64x256xbf16, #tpu.memory_space<vmem>>, vector<8x128xbf16>,
    %c3_i32 = arith.constant 3 : i32
    %c7_i32_41 = arith.constant 7 : i32
    %176 = arith.subi %c7_i32_41, %c3_i32 : i32
    %c8_i32_42 = arith.constant 8 : i32
    %177 = arith.muli %c3_i32, %c8_i32_42 : i32
    %178 = tpu.assume_multiple %177, 8 : i32
    %c8_i32_43 = arith.constant 8 : i32
    %179 = arith.muli %176, %c8_i32_43 : i32
    %180 = tpu.assume_multiple %179, 8 : i32
    %181 = arith.index_cast %178 : i32 to index
    %c0_44 = arith.constant 0 : index
    %182 = vector.load %arg14[%181, %c0_44] : memref<64x1024xbf16, #tpu.memory_space<vmem>>, vector<8x512xbf16>
    %183 = arith.extf %182 : vector<8x512xbf16> to vector<8x512xf32>
    %184 = arith.truncf %153 : vector<8x128xf32> to vector<8x128xbf16>
    %cst_45 = arith.constant dense<0.000000e+00> : vector<8x512xf32>
    %185 = tpu.matmul %184, %8, %cst_45 {dimension_numbers = #tpu.dot_dimension_numbers<[1], [0], [0], [1], [0, 0, 1, 1], [], []>} : vector<8x128xbf16>, vector<128x512xbf16>, vector<8x512xf32> -> vector<8x512xf32>
    %186 = arith.addf %183, %185 : vector<8x512xf32>
    %187 = arith.index_cast %180 : i32 to index
    %c512_46 = arith.constant 512 : index
    %188 = vector.load %arg14[%187, %c512_46] : memref<64x1024xbf16, #tpu.memory_space<vmem>>, vector<8x512xbf16>
    %189 = arith.extf %188 : vector<8x512xbf16> to vector<8x512xf32>
    %190 = arith.truncf %169 : vector<8x128xf32> to vector<8x128xbf16>
    %cst_47 = arith.constant dense<0.000000e+00> : vector<8x512xf32>
    %191 = tpu.matmul %190, %9, %cst_47 {dimension_numbers = #tpu.dot_dimension_numbers<[1], [0], [0], [1], [0, 0, 1, 1], [], []>} : vector<8x128xbf16>, vector<128x512xbf16>, vector<8x512xf32> -> vector<8x512xf32>
    %192 = arith.addf %189, %191 : vector<8x512xf32>
    %193 = vector.extract_strided_slice %186 {offsets = [0, 0], sizes = [8, 384], strides = [1, 1]} : vector<8x512xf32> to vector<8x384xf32>
    %194 = arith.negf %193 : vector<8x384xf32>
    %195 = math.exp %194 : vector<8x384xf32>
    %cst_48 = arith.constant 1.000000e+00 : f32
    %196 = vector.broadcast %cst_48 : f32 to vector<8x384xf32>
    %197 = arith.addf %196, %195 : vector<8x384xf32>
    %198 = arith.divf %196, %197 : vector<8x384xf32>
    %199 = vector.extract_strided_slice %186 {offsets = [0, 384], sizes = [8, 128], strides = [1, 1]} : vector<8x512xf32> to vector<8x128xf32>
    %200 = math.tanh %199 : vector<8x128xf32>
    %201 = vector.extract_strided_slice %198 {offsets = [0, 0], sizes = [8, 128], strides = [1, 1]} : vector<8x384xf32> to vector<8x128xf32>
    %202 = vector.extract_strided_slice %198 {offsets = [0, 128], sizes = [8, 128], strides = [1, 1]} : vector<8x384xf32> to vector<8x128xf32>
    %203 = vector.extract_strided_slice %198 {offsets = [0, 256], sizes = [8, 128], strides = [1, 1]} : vector<8x384xf32> to vector<8x128xf32>
    %204 = arith.mulf %202, %151 : vector<8x128xf32>
    %205 = arith.mulf %201, %200 : vector<8x128xf32>
    %206 = arith.addf %204, %205 : vector<8x128xf32>
    %207 = math.tanh %206 : vector<8x128xf32>
    %208 = arith.mulf %203, %207 : vector<8x128xf32>
    %209 = vector.extract_strided_slice %192 {offsets = [0, 0], sizes = [8, 384], strides = [1, 1]} : vector<8x512xf32> to vector<8x384xf32>
    %210 = arith.negf %209 : vector<8x384xf32>
    %211 = math.exp %210 : vector<8x384xf32>
    %cst_49 = arith.constant 1.000000e+00 : f32
    %212 = vector.broadcast %cst_49 : f32 to vector<8x384xf32>
    %213 = arith.addf %212, %211 : vector<8x384xf32>
    %214 = arith.divf %212, %213 : vector<8x384xf32>
    %215 = vector.extract_strided_slice %192 {offsets = [0, 384], sizes = [8, 128], strides = [1, 1]} : vector<8x512xf32> to vector<8x128xf32>
    %216 = math.tanh %215 : vector<8x128xf32>
    %217 = vector.extract_strided_slice %214 {offsets = [0, 0], sizes = [8, 128], strides = [1, 1]} : vector<8x384xf32> to vector<8x128xf32>
    %218 = vector.extract_strided_slice %214 {offsets = [0, 128], sizes = [8, 128], strides = [1, 1]} : vector<8x384xf32> to vector<8x128xf32>
    %219 = vector.extract_strided_slice %214 {offsets = [0, 256], sizes = [8, 128], strides = [1, 1]} : vector<8x384xf32> to vector<8x128xf32>
    %220 = arith.mulf %218, %167 : vector<8x128xf32>
    %221 = arith.mulf %217, %216 : vector<8x128xf32>
    %222 = arith.addf %220, %221 : vector<8x128xf32>
    %223 = math.tanh %222 : vector<8x128xf32>
    %224 = arith.mulf %219, %223 : vector<8x128xf32>
    %225 = arith.truncf %208 : vector<8x128xf32> to vector<8x128xbf16>
    %226 = arith.index_cast %178 : i32 to index
    %c0_50 = arith.constant 0 : index
    %227 = vector.load %arg12[%226, %c0_50] : memref<64x256xbf16, #tpu.memory_space<vmem>>, vector<8x128xbf16>
    tpu.vector_store %arg12[%226, %c0_50], %225 {strides = array<i32>} : memref<64x256xbf16, #tpu.memory_space<vmem>>, vector<8x128xbf16>,
    %228 = arith.truncf %224 : vector<8x128xf32> to vector<8x128xbf16>
    %229 = arith.index_cast %180 : i32 to index
    %c128_51 = arith.constant 128 : index
    %230 = vector.load %arg12[%229, %c128_51] : memref<64x256xbf16, #tpu.memory_space<vmem>>, vector<8x128xbf16>
    tpu.vector_store %arg12[%229, %c128_51], %228 {strides = array<i32>} : memref<64x256xbf16, #tpu.memory_space<vmem>>, vector<8x128xbf16>,
    %c4_i32 = arith.constant 4 : i32
    %c7_i32_52 = arith.constant 7 : i32
    %231 = arith.subi %c7_i32_52, %c4_i32 : i32
    %c8_i32_53 = arith.constant 8 : i32
    %232 = arith.muli %c4_i32, %c8_i32_53 : i32
    %233 = tpu.assume_multiple %232, 8 : i32
    %c8_i32_54 = arith.constant 8 : i32
    %234 = arith.muli %231, %c8_i32_54 : i32
    %235 = tpu.assume_multiple %234, 8 : i32
    %236 = arith.index_cast %233 : i32 to index
    %c0_55 = arith.constant 0 : index
    %237 = vector.load %arg14[%236, %c0_55] : memref<64x1024xbf16, #tpu.memory_space<vmem>>, vector<8x512xbf16>
    %238 = arith.extf %237 : vector<8x512xbf16> to vector<8x512xf32>
    %239 = arith.truncf %208 : vector<8x128xf32> to vector<8x128xbf16>
    %cst_56 = arith.constant dense<0.000000e+00> : vector<8x512xf32>
    %240 = tpu.matmul %239, %8, %cst_56 {dimension_numbers = #tpu.dot_dimension_numbers<[1], [0], [0], [1], [0, 0, 1, 1], [], []>} : vector<8x128xbf16>, vector<128x512xbf16>, vector<8x512xf32> -> vector<8x512xf32>
    %241 = arith.addf %238, %240 : vector<8x512xf32>
    %242 = arith.index_cast %235 : i32 to index
    %c512_57 = arith.constant 512 : index
    %243 = vector.load %arg14[%242, %c512_57] : memref<64x1024xbf16, #tpu.memory_space<vmem>>, vector<8x512xbf16>
    %244 = arith.extf %243 : vector<8x512xbf16> to vector<8x512xf32>
    %245 = arith.truncf %224 : vector<8x128xf32> to vector<8x128xbf16>
    %cst_58 = arith.constant dense<0.000000e+00> : vector<8x512xf32>
    %246 = tpu.matmul %245, %9, %cst_58 {dimension_numbers = #tpu.dot_dimension_numbers<[1], [0], [0], [1], [0, 0, 1, 1], [], []>} : vector<8x128xbf16>, vector<128x512xbf16>, vector<8x512xf32> -> vector<8x512xf32>
    %247 = arith.addf %244, %246 : vector<8x512xf32>
    %248 = vector.extract_strided_slice %241 {offsets = [0, 0], sizes = [8, 384], strides = [1, 1]} : vector<8x512xf32> to vector<8x384xf32>
    %249 = arith.negf %248 : vector<8x384xf32>
    %250 = math.exp %249 : vector<8x384xf32>
    %cst_59 = arith.constant 1.000000e+00 : f32
    %251 = vector.broadcast %cst_59 : f32 to vector<8x384xf32>
    %252 = arith.addf %251, %250 : vector<8x384xf32>
    %253 = arith.divf %251, %252 : vector<8x384xf32>
    %254 = vector.extract_strided_slice %241 {offsets = [0, 384], sizes = [8, 128], strides = [1, 1]} : vector<8x512xf32> to vector<8x128xf32>
    %255 = math.tanh %254 : vector<8x128xf32>
    %256 = vector.extract_strided_slice %253 {offsets = [0, 0], sizes = [8, 128], strides = [1, 1]} : vector<8x384xf32> to vector<8x128xf32>
    %257 = vector.extract_strided_slice %253 {offsets = [0, 128], sizes = [8, 128], strides = [1, 1]} : vector<8x384xf32> to vector<8x128xf32>
    %258 = vector.extract_strided_slice %253 {offsets = [0, 256], sizes = [8, 128], strides = [1, 1]} : vector<8x384xf32> to vector<8x128xf32>
    %259 = arith.mulf %257, %206 : vector<8x128xf32>
    %260 = arith.mulf %256, %255 : vector<8x128xf32>
    %261 = arith.addf %259, %260 : vector<8x128xf32>
    %262 = math.tanh %261 : vector<8x128xf32>
    %263 = arith.mulf %258, %262 : vector<8x128xf32>
    %264 = vector.extract_strided_slice %247 {offsets = [0, 0], sizes = [8, 384], strides = [1, 1]} : vector<8x512xf32> to vector<8x384xf32>
    %265 = arith.negf %264 : vector<8x384xf32>
    %266 = math.exp %265 : vector<8x384xf32>
    %cst_60 = arith.constant 1.000000e+00 : f32
    %267 = vector.broadcast %cst_60 : f32 to vector<8x384xf32>
    %268 = arith.addf %267, %266 : vector<8x384xf32>
    %269 = arith.divf %267, %268 : vector<8x384xf32>
    %270 = vector.extract_strided_slice %247 {offsets = [0, 384], sizes = [8, 128], strides = [1, 1]} : vector<8x512xf32> to vector<8x128xf32>
    %271 = math.tanh %270 : vector<8x128xf32>
    %272 = vector.extract_strided_slice %269 {offsets = [0, 0], sizes = [8, 128], strides = [1, 1]} : vector<8x384xf32> to vector<8x128xf32>
    %273 = vector.extract_strided_slice %269 {offsets = [0, 128], sizes = [8, 128], strides = [1, 1]} : vector<8x384xf32> to vector<8x128xf32>
    %274 = vector.extract_strided_slice %269 {offsets = [0, 256], sizes = [8, 128], strides = [1, 1]} : vector<8x384xf32> to vector<8x128xf32>
    %275 = arith.mulf %273, %222 : vector<8x128xf32>
    %276 = arith.mulf %272, %271 : vector<8x128xf32>
    %277 = arith.addf %275, %276 : vector<8x128xf32>
    %278 = math.tanh %277 : vector<8x128xf32>
    %279 = arith.mulf %274, %278 : vector<8x128xf32>
    %280 = arith.truncf %263 : vector<8x128xf32> to vector<8x128xbf16>
    %281 = arith.index_cast %233 : i32 to index
    %c0_61 = arith.constant 0 : index
    %282 = vector.load %arg12[%281, %c0_61] : memref<64x256xbf16, #tpu.memory_space<vmem>>, vector<8x128xbf16>
    tpu.vector_store %arg12[%281, %c0_61], %280 {strides = array<i32>} : memref<64x256xbf16, #tpu.memory_space<vmem>>, vector<8x128xbf16>,
    %283 = arith.truncf %279 : vector<8x128xf32> to vector<8x128xbf16>
    %284 = arith.index_cast %235 : i32 to index
    %c128_62 = arith.constant 128 : index
    %285 = vector.load %arg12[%284, %c128_62] : memref<64x256xbf16, #tpu.memory_space<vmem>>, vector<8x128xbf16>
    tpu.vector_store %arg12[%284, %c128_62], %283 {strides = array<i32>} : memref<64x256xbf16, #tpu.memory_space<vmem>>, vector<8x128xbf16>,
    %c5_i32 = arith.constant 5 : i32
    %c7_i32_63 = arith.constant 7 : i32
    %286 = arith.subi %c7_i32_63, %c5_i32 : i32
    %c8_i32_64 = arith.constant 8 : i32
    %287 = arith.muli %c5_i32, %c8_i32_64 : i32
    %288 = tpu.assume_multiple %287, 8 : i32
    %c8_i32_65 = arith.constant 8 : i32
    %289 = arith.muli %286, %c8_i32_65 : i32
    %290 = tpu.assume_multiple %289, 8 : i32
    %291 = arith.index_cast %288 : i32 to index
    %c0_66 = arith.constant 0 : index
    %292 = vector.load %arg14[%291, %c0_66] : memref<64x1024xbf16, #tpu.memory_space<vmem>>, vector<8x512xbf16>
    %293 = arith.extf %292 : vector<8x512xbf16> to vector<8x512xf32>
    %294 = arith.truncf %263 : vector<8x128xf32> to vector<8x128xbf16>
    %cst_67 = arith.constant dense<0.000000e+00> : vector<8x512xf32>
    %295 = tpu.matmul %294, %8, %cst_67 {dimension_numbers = #tpu.dot_dimension_numbers<[1], [0], [0], [1], [0, 0, 1, 1], [], []>} : vector<8x128xbf16>, vector<128x512xbf16>, vector<8x512xf32> -> vector<8x512xf32>
    %296 = arith.addf %293, %295 : vector<8x512xf32>
    %297 = arith.index_cast %290 : i32 to index
    %c512_68 = arith.constant 512 : index
    %298 = vector.load %arg14[%297, %c512_68] : memref<64x1024xbf16, #tpu.memory_space<vmem>>, vector<8x512xbf16>
    %299 = arith.extf %298 : vector<8x512xbf16> to vector<8x512xf32>
    %300 = arith.truncf %279 : vector<8x128xf32> to vector<8x128xbf16>
    %cst_69 = arith.constant dense<0.000000e+00> : vector<8x512xf32>
    %301 = tpu.matmul %300, %9, %cst_69 {dimension_numbers = #tpu.dot_dimension_numbers<[1], [0], [0], [1], [0, 0, 1, 1], [], []>} : vector<8x128xbf16>, vector<128x512xbf16>, vector<8x512xf32> -> vector<8x512xf32>
    %302 = arith.addf %299, %301 : vector<8x512xf32>
    %303 = vector.extract_strided_slice %296 {offsets = [0, 0], sizes = [8, 384], strides = [1, 1]} : vector<8x512xf32> to vector<8x384xf32>
    %304 = arith.negf %303 : vector<8x384xf32>
    %305 = math.exp %304 : vector<8x384xf32>
    %cst_70 = arith.constant 1.000000e+00 : f32
    %306 = vector.broadcast %cst_70 : f32 to vector<8x384xf32>
    %307 = arith.addf %306, %305 : vector<8x384xf32>
    %308 = arith.divf %306, %307 : vector<8x384xf32>
    %309 = vector.extract_strided_slice %296 {offsets = [0, 384], sizes = [8, 128], strides = [1, 1]} : vector<8x512xf32> to vector<8x128xf32>
    %310 = math.tanh %309 : vector<8x128xf32>
    %311 = vector.extract_strided_slice %308 {offsets = [0, 0], sizes = [8, 128], strides = [1, 1]} : vector<8x384xf32> to vector<8x128xf32>
    %312 = vector.extract_strided_slice %308 {offsets = [0, 128], sizes = [8, 128], strides = [1, 1]} : vector<8x384xf32> to vector<8x128xf32>
    %313 = vector.extract_strided_slice %308 {offsets = [0, 256], sizes = [8, 128], strides = [1, 1]} : vector<8x384xf32> to vector<8x128xf32>
    %314 = arith.mulf %312, %261 : vector<8x128xf32>
    %315 = arith.mulf %311, %310 : vector<8x128xf32>
    %316 = arith.addf %314, %315 : vector<8x128xf32>
    %317 = math.tanh %316 : vector<8x128xf32>
    %318 = arith.mulf %313, %317 : vector<8x128xf32>
    %319 = vector.extract_strided_slice %302 {offsets = [0, 0], sizes = [8, 384], strides = [1, 1]} : vector<8x512xf32> to vector<8x384xf32>
    %320 = arith.negf %319 : vector<8x384xf32>
    %321 = math.exp %320 : vector<8x384xf32>
    %cst_71 = arith.constant 1.000000e+00 : f32
    %322 = vector.broadcast %cst_71 : f32 to vector<8x384xf32>
    %323 = arith.addf %322, %321 : vector<8x384xf32>
    %324 = arith.divf %322, %323 : vector<8x384xf32>
    %325 = vector.extract_strided_slice %302 {offsets = [0, 384], sizes = [8, 128], strides = [1, 1]} : vector<8x512xf32> to vector<8x128xf32>
    %326 = math.tanh %325 : vector<8x128xf32>
    %327 = vector.extract_strided_slice %324 {offsets = [0, 0], sizes = [8, 128], strides = [1, 1]} : vector<8x384xf32> to vector<8x128xf32>
    %328 = vector.extract_strided_slice %324 {offsets = [0, 128], sizes = [8, 128], strides = [1, 1]} : vector<8x384xf32> to vector<8x128xf32>
    %329 = vector.extract_strided_slice %324 {offsets = [0, 256], sizes = [8, 128], strides = [1, 1]} : vector<8x384xf32> to vector<8x128xf32>
    %330 = arith.mulf %328, %277 : vector<8x128xf32>
    %331 = arith.mulf %327, %326 : vector<8x128xf32>
    %332 = arith.addf %330, %331 : vector<8x128xf32>
    %333 = math.tanh %332 : vector<8x128xf32>
    %334 = arith.mulf %329, %333 : vector<8x128xf32>
    %335 = arith.truncf %318 : vector<8x128xf32> to vector<8x128xbf16>
    %336 = arith.index_cast %288 : i32 to index
    %c0_72 = arith.constant 0 : index
    %337 = vector.load %arg12[%336, %c0_72] : memref<64x256xbf16, #tpu.memory_space<vmem>>, vector<8x128xbf16>
    tpu.vector_store %arg12[%336, %c0_72], %335 {strides = array<i32>} : memref<64x256xbf16, #tpu.memory_space<vmem>>, vector<8x128xbf16>,
    %338 = arith.truncf %334 : vector<8x128xf32> to vector<8x128xbf16>
    %339 = arith.index_cast %290 : i32 to index
    %c128_73 = arith.constant 128 : index
    %340 = vector.load %arg12[%339, %c128_73] : memref<64x256xbf16, #tpu.memory_space<vmem>>, vector<8x128xbf16>
    tpu.vector_store %arg12[%339, %c128_73], %338 {strides = array<i32>} : memref<64x256xbf16, #tpu.memory_space<vmem>>, vector<8x128xbf16>,
    %c6_i32 = arith.constant 6 : i32
    %c7_i32_74 = arith.constant 7 : i32
    %341 = arith.subi %c7_i32_74, %c6_i32 : i32
    %c8_i32_75 = arith.constant 8 : i32
    %342 = arith.muli %c6_i32, %c8_i32_75 : i32
    %343 = tpu.assume_multiple %342, 8 : i32
    %c8_i32_76 = arith.constant 8 : i32
    %344 = arith.muli %341, %c8_i32_76 : i32
    %345 = tpu.assume_multiple %344, 8 : i32
    %346 = arith.index_cast %343 : i32 to index
    %c0_77 = arith.constant 0 : index
    %347 = vector.load %arg14[%346, %c0_77] : memref<64x1024xbf16, #tpu.memory_space<vmem>>, vector<8x512xbf16>
    %348 = arith.extf %347 : vector<8x512xbf16> to vector<8x512xf32>
    %349 = arith.truncf %318 : vector<8x128xf32> to vector<8x128xbf16>
    %cst_78 = arith.constant dense<0.000000e+00> : vector<8x512xf32>
    %350 = tpu.matmul %349, %8, %cst_78 {dimension_numbers = #tpu.dot_dimension_numbers<[1], [0], [0], [1], [0, 0, 1, 1], [], []>} : vector<8x128xbf16>, vector<128x512xbf16>, vector<8x512xf32> -> vector<8x512xf32>
    %351 = arith.addf %348, %350 : vector<8x512xf32>
    %352 = arith.index_cast %345 : i32 to index
    %c512_79 = arith.constant 512 : index
    %353 = vector.load %arg14[%352, %c512_79] : memref<64x1024xbf16, #tpu.memory_space<vmem>>, vector<8x512xbf16>
    %354 = arith.extf %353 : vector<8x512xbf16> to vector<8x512xf32>
    %355 = arith.truncf %334 : vector<8x128xf32> to vector<8x128xbf16>
    %cst_80 = arith.constant dense<0.000000e+00> : vector<8x512xf32>
    %356 = tpu.matmul %355, %9, %cst_80 {dimension_numbers = #tpu.dot_dimension_numbers<[1], [0], [0], [1], [0, 0, 1, 1], [], []>} : vector<8x128xbf16>, vector<128x512xbf16>, vector<8x512xf32> -> vector<8x512xf32>
    %357 = arith.addf %354, %356 : vector<8x512xf32>
    %358 = vector.extract_strided_slice %351 {offsets = [0, 0], sizes = [8, 384], strides = [1, 1]} : vector<8x512xf32> to vector<8x384xf32>
    %359 = arith.negf %358 : vector<8x384xf32>
    %360 = math.exp %359 : vector<8x384xf32>
    %cst_81 = arith.constant 1.000000e+00 : f32
    %361 = vector.broadcast %cst_81 : f32 to vector<8x384xf32>
    %362 = arith.addf %361, %360 : vector<8x384xf32>
    %363 = arith.divf %361, %362 : vector<8x384xf32>
    %364 = vector.extract_strided_slice %351 {offsets = [0, 384], sizes = [8, 128], strides = [1, 1]} : vector<8x512xf32> to vector<8x128xf32>
    %365 = math.tanh %364 : vector<8x128xf32>
    %366 = vector.extract_strided_slice %363 {offsets = [0, 0], sizes = [8, 128], strides = [1, 1]} : vector<8x384xf32> to vector<8x128xf32>
    %367 = vector.extract_strided_slice %363 {offsets = [0, 128], sizes = [8, 128], strides = [1, 1]} : vector<8x384xf32> to vector<8x128xf32>
    %368 = vector.extract_strided_slice %363 {offsets = [0, 256], sizes = [8, 128], strides = [1, 1]} : vector<8x384xf32> to vector<8x128xf32>
    %369 = arith.mulf %367, %316 : vector<8x128xf32>
    %370 = arith.mulf %366, %365 : vector<8x128xf32>
    %371 = arith.addf %369, %370 : vector<8x128xf32>
    %372 = math.tanh %371 : vector<8x128xf32>
    %373 = arith.mulf %368, %372 : vector<8x128xf32>
    %374 = vector.extract_strided_slice %357 {offsets = [0, 0], sizes = [8, 384], strides = [1, 1]} : vector<8x512xf32> to vector<8x384xf32>
    %375 = arith.negf %374 : vector<8x384xf32>
    %376 = math.exp %375 : vector<8x384xf32>
    %cst_82 = arith.constant 1.000000e+00 : f32
    %377 = vector.broadcast %cst_82 : f32 to vector<8x384xf32>
    %378 = arith.addf %377, %376 : vector<8x384xf32>
    %379 = arith.divf %377, %378 : vector<8x384xf32>
    %380 = vector.extract_strided_slice %357 {offsets = [0, 384], sizes = [8, 128], strides = [1, 1]} : vector<8x512xf32> to vector<8x128xf32>
    %381 = math.tanh %380 : vector<8x128xf32>
    %382 = vector.extract_strided_slice %379 {offsets = [0, 0], sizes = [8, 128], strides = [1, 1]} : vector<8x384xf32> to vector<8x128xf32>
    %383 = vector.extract_strided_slice %379 {offsets = [0, 128], sizes = [8, 128], strides = [1, 1]} : vector<8x384xf32> to vector<8x128xf32>
    %384 = vector.extract_strided_slice %379 {offsets = [0, 256], sizes = [8, 128], strides = [1, 1]} : vector<8x384xf32> to vector<8x128xf32>
    %385 = arith.mulf %383, %332 : vector<8x128xf32>
    %386 = arith.mulf %382, %381 : vector<8x128xf32>
    %387 = arith.addf %385, %386 : vector<8x128xf32>
    %388 = math.tanh %387 : vector<8x128xf32>
    %389 = arith.mulf %384, %388 : vector<8x128xf32>
    %390 = arith.truncf %373 : vector<8x128xf32> to vector<8x128xbf16>
    %391 = arith.index_cast %343 : i32 to index
    %c0_83 = arith.constant 0 : index
    %392 = vector.load %arg12[%391, %c0_83] : memref<64x256xbf16, #tpu.memory_space<vmem>>, vector<8x128xbf16>
    tpu.vector_store %arg12[%391, %c0_83], %390 {strides = array<i32>} : memref<64x256xbf16, #tpu.memory_space<vmem>>, vector<8x128xbf16>,
    %393 = arith.truncf %389 : vector<8x128xf32> to vector<8x128xbf16>
    %394 = arith.index_cast %345 : i32 to index
    %c128_84 = arith.constant 128 : index
    %395 = vector.load %arg12[%394, %c128_84] : memref<64x256xbf16, #tpu.memory_space<vmem>>, vector<8x128xbf16>
    tpu.vector_store %arg12[%394, %c128_84], %393 {strides = array<i32>} : memref<64x256xbf16, #tpu.memory_space<vmem>>, vector<8x128xbf16>,
    %c7_i32_85 = arith.constant 7 : i32
    %c7_i32_86 = arith.constant 7 : i32
    %396 = arith.subi %c7_i32_86, %c7_i32_85 : i32
    %c8_i32_87 = arith.constant 8 : i32
    %397 = arith.muli %c7_i32_85, %c8_i32_87 : i32
    %398 = tpu.assume_multiple %397, 8 : i32
    %c8_i32_88 = arith.constant 8 : i32
    %399 = arith.muli %396, %c8_i32_88 : i32
    %400 = tpu.assume_multiple %399, 8 : i32
    %401 = arith.index_cast %398 : i32 to index
    %c0_89 = arith.constant 0 : index
    %402 = vector.load %arg14[%401, %c0_89] : memref<64x1024xbf16, #tpu.memory_space<vmem>>, vector<8x512xbf16>
    %403 = arith.extf %402 : vector<8x512xbf16> to vector<8x512xf32>
    %404 = arith.truncf %373 : vector<8x128xf32> to vector<8x128xbf16>
    %cst_90 = arith.constant dense<0.000000e+00> : vector<8x512xf32>
    %405 = tpu.matmul %404, %8, %cst_90 {dimension_numbers = #tpu.dot_dimension_numbers<[1], [0], [0], [1], [0, 0, 1, 1], [], []>} : vector<8x128xbf16>, vector<128x512xbf16>, vector<8x512xf32> -> vector<8x512xf32>
    %406 = arith.addf %403, %405 : vector<8x512xf32>
    %407 = arith.index_cast %400 : i32 to index
    %c512_91 = arith.constant 512 : index
    %408 = vector.load %arg14[%407, %c512_91] : memref<64x1024xbf16, #tpu.memory_space<vmem>>, vector<8x512xbf16>
    %409 = arith.extf %408 : vector<8x512xbf16> to vector<8x512xf32>
    %410 = arith.truncf %389 : vector<8x128xf32> to vector<8x128xbf16>
    %cst_92 = arith.constant dense<0.000000e+00> : vector<8x512xf32>
    %411 = tpu.matmul %410, %9, %cst_92 {dimension_numbers = #tpu.dot_dimension_numbers<[1], [0], [0], [1], [0, 0, 1, 1], [], []>} : vector<8x128xbf16>, vector<128x512xbf16>, vector<8x512xf32> -> vector<8x512xf32>
    %412 = arith.addf %409, %411 : vector<8x512xf32>
    %413 = vector.extract_strided_slice %406 {offsets = [0, 0], sizes = [8, 384], strides = [1, 1]} : vector<8x512xf32> to vector<8x384xf32>
    %414 = arith.negf %413 : vector<8x384xf32>
    %415 = math.exp %414 : vector<8x384xf32>
    %cst_93 = arith.constant 1.000000e+00 : f32
    %416 = vector.broadcast %cst_93 : f32 to vector<8x384xf32>
    %417 = arith.addf %416, %415 : vector<8x384xf32>
    %418 = arith.divf %416, %417 : vector<8x384xf32>
    %419 = vector.extract_strided_slice %406 {offsets = [0, 384], sizes = [8, 128], strides = [1, 1]} : vector<8x512xf32> to vector<8x128xf32>
    %420 = math.tanh %419 : vector<8x128xf32>
    %421 = vector.extract_strided_slice %418 {offsets = [0, 0], sizes = [8, 128], strides = [1, 1]} : vector<8x384xf32> to vector<8x128xf32>
    %422 = vector.extract_strided_slice %418 {offsets = [0, 128], sizes = [8, 128], strides = [1, 1]} : vector<8x384xf32> to vector<8x128xf32>
    %423 = vector.extract_strided_slice %418 {offsets = [0, 256], sizes = [8, 128], strides = [1, 1]} : vector<8x384xf32> to vector<8x128xf32>
    %424 = arith.mulf %422, %371 : vector<8x128xf32>
    %425 = arith.mulf %421, %420 : vector<8x128xf32>
    %426 = arith.addf %424, %425 : vector<8x128xf32>
    %427 = math.tanh %426 : vector<8x128xf32>
    %428 = arith.mulf %423, %427 : vector<8x128xf32>
    %429 = vector.extract_strided_slice %412 {offsets = [0, 0], sizes = [8, 384], strides = [1, 1]} : vector<8x512xf32> to vector<8x384xf32>
    %430 = arith.negf %429 : vector<8x384xf32>
    %431 = math.exp %430 : vector<8x384xf32>
    %cst_94 = arith.constant 1.000000e+00 : f32
    %432 = vector.broadcast %cst_94 : f32 to vector<8x384xf32>
    %433 = arith.addf %432, %431 : vector<8x384xf32>
    %434 = arith.divf %432, %433 : vector<8x384xf32>
    %435 = vector.extract_strided_slice %412 {offsets = [0, 384], sizes = [8, 128], strides = [1, 1]} : vector<8x512xf32> to vector<8x128xf32>
    %436 = math.tanh %435 : vector<8x128xf32>
    %437 = vector.extract_strided_slice %434 {offsets = [0, 0], sizes = [8, 128], strides = [1, 1]} : vector<8x384xf32> to vector<8x128xf32>
    %438 = vector.extract_strided_slice %434 {offsets = [0, 128], sizes = [8, 128], strides = [1, 1]} : vector<8x384xf32> to vector<8x128xf32>
    %439 = vector.extract_strided_slice %434 {offsets = [0, 256], sizes = [8, 128], strides = [1, 1]} : vector<8x384xf32> to vector<8x128xf32>
    %440 = arith.mulf %438, %387 : vector<8x128xf32>
    %441 = arith.mulf %437, %436 : vector<8x128xf32>
    %442 = arith.addf %440, %441 : vector<8x128xf32>
    %443 = math.tanh %442 : vector<8x128xf32>
    %444 = arith.mulf %439, %443 : vector<8x128xf32>
    %445 = arith.truncf %428 : vector<8x128xf32> to vector<8x128xbf16>
    %446 = arith.index_cast %398 : i32 to index
    %c0_95 = arith.constant 0 : index
    %447 = vector.load %arg12[%446, %c0_95] : memref<64x256xbf16, #tpu.memory_space<vmem>>, vector<8x128xbf16>
    tpu.vector_store %arg12[%446, %c0_95], %445 {strides = array<i32>} : memref<64x256xbf16, #tpu.memory_space<vmem>>, vector<8x128xbf16>,
    %448 = arith.truncf %444 : vector<8x128xf32> to vector<8x128xbf16>
    %449 = arith.index_cast %400 : i32 to index
    %c128_96 = arith.constant 128 : index
    %450 = vector.load %arg12[%449, %c128_96] : memref<64x256xbf16, #tpu.memory_space<vmem>>, vector<8x128xbf16>
    tpu.vector_store %arg12[%449, %c128_96], %448 {strides = array<i32>} : memref<64x256xbf16, #tpu.memory_space<vmem>>, vector<8x128xbf16>,
    %c8_i32_97 = arith.constant 8 : i32
    %c0_98 = arith.constant 0 : index
    %c0_99 = arith.constant 0 : index
    %451 = vector.load %arg12[%c0_98, %c0_99] : memref<64x256xbf16, #tpu.memory_space<vmem>>, vector<64x256xbf16>
    %c0_100 = arith.constant 0 : index
    %c0_101 = arith.constant 0 : index
    %452 = vector.load %arg5[%c0_100, %c0_101] : memref<256x1024xbf16, #tpu.memory_space<vmem>>, vector<256x1024xbf16>
    %cst_102 = arith.constant dense<0.000000e+00> : vector<64x1024xf32>
    %453 = tpu.matmul %451, %452, %cst_102 {dimension_numbers = #tpu.dot_dimension_numbers<[1], [0], [0], [1], [0, 0, 1, 1], [], []>} : vector<64x256xbf16>, vector<256x1024xbf16>, vector<64x1024xf32> -> vector<64x1024xf32>
    %c0_103 = arith.constant 0 : index
    %c0_104 = arith.constant 0 : index
    %454 = vector.load %arg8[%c0_103, %c0_104] : memref<1x1024xf32, #tpu.memory_space<vmem>>, vector<1x1024xf32>
    %455 = vector.broadcast %454 : vector<1x1024xf32> to vector<64x1024xf32>
    %456 = arith.addf %453, %455 : vector<64x1024xf32>
    %457 = arith.truncf %456 : vector<64x1024xf32> to vector<64x1024xbf16>
    %c0_105 = arith.constant 0 : index
    %c0_106 = arith.constant 0 : index
    %458 = vector.load %arg14[%c0_105, %c0_106] : memref<64x1024xbf16, #tpu.memory_space<vmem>>, vector<64x1024xbf16>
    tpu.vector_store %arg14[%c0_105, %c0_106], %457 {strides = array<i32>} : memref<64x1024xbf16, #tpu.memory_space<vmem>>, vector<64x1024xbf16>,
    %c0_107 = arith.constant 0 : index
    %c0_108 = arith.constant 0 : index
    %459 = vector.load %arg6[%c0_107, %c0_108] : memref<128x512xbf16, #tpu.memory_space<vmem>>, vector<128x512xbf16>
    %c0_109 = arith.constant 0 : index
    %c0_110 = arith.constant 0 : index
    %460 = vector.load %arg7[%c0_109, %c0_110] : memref<128x512xbf16, #tpu.memory_space<vmem>>, vector<128x512xbf16>
    %cst_111 = arith.constant 0.000000e+00 : f32
    %461 = vector.broadcast %cst_111 : f32 to vector<8x128xf32>
    %c0_i32_112 = arith.constant 0 : i32
    %c7_i32_113 = arith.constant 7 : i32
    %462 = arith.subi %c7_i32_113, %c0_i32_112 : i32
    %c8_i32_114 = arith.constant 8 : i32
    %463 = arith.muli %c0_i32_112, %c8_i32_114 : i32
    %464 = tpu.assume_multiple %463, 8 : i32
    %c8_i32_115 = arith.constant 8 : i32
    %465 = arith.muli %462, %c8_i32_115 : i32
    %466 = tpu.assume_multiple %465, 8 : i32
    %467 = arith.index_cast %464 : i32 to index
    %c0_116 = arith.constant 0 : index
    %468 = vector.load %arg14[%467, %c0_116] : memref<64x1024xbf16, #tpu.memory_space<vmem>>, vector<8x512xbf16>
    %469 = arith.extf %468 : vector<8x512xbf16> to vector<8x512xf32>
    %470 = arith.truncf %461 : vector<8x128xf32> to vector<8x128xbf16>
    %cst_117 = arith.constant dense<0.000000e+00> : vector<8x512xf32>
    %471 = tpu.matmul %470, %459, %cst_117 {dimension_numbers = #tpu.dot_dimension_numbers<[1], [0], [0], [1], [0, 0, 1, 1], [], []>} : vector<8x128xbf16>, vector<128x512xbf16>, vector<8x512xf32> -> vector<8x512xf32>
    %472 = arith.addf %469, %471 : vector<8x512xf32>
    %473 = arith.index_cast %466 : i32 to index
    %c512_118 = arith.constant 512 : index
    %474 = vector.load %arg14[%473, %c512_118] : memref<64x1024xbf16, #tpu.memory_space<vmem>>, vector<8x512xbf16>
    %475 = arith.extf %474 : vector<8x512xbf16> to vector<8x512xf32>
    %476 = arith.truncf %461 : vector<8x128xf32> to vector<8x128xbf16>
    %cst_119 = arith.constant dense<0.000000e+00> : vector<8x512xf32>
    %477 = tpu.matmul %476, %460, %cst_119 {dimension_numbers = #tpu.dot_dimension_numbers<[1], [0], [0], [1], [0, 0, 1, 1], [], []>} : vector<8x128xbf16>, vector<128x512xbf16>, vector<8x512xf32> -> vector<8x512xf32>
    %478 = arith.addf %475, %477 : vector<8x512xf32>
    %479 = vector.extract_strided_slice %472 {offsets = [0, 0], sizes = [8, 384], strides = [1, 1]} : vector<8x512xf32> to vector<8x384xf32>
    %480 = arith.negf %479 : vector<8x384xf32>
    %481 = math.exp %480 : vector<8x384xf32>
    %cst_120 = arith.constant 1.000000e+00 : f32
    %482 = vector.broadcast %cst_120 : f32 to vector<8x384xf32>
    %483 = arith.addf %482, %481 : vector<8x384xf32>
    %484 = arith.divf %482, %483 : vector<8x384xf32>
    %485 = vector.extract_strided_slice %472 {offsets = [0, 384], sizes = [8, 128], strides = [1, 1]} : vector<8x512xf32> to vector<8x128xf32>
    %486 = math.tanh %485 : vector<8x128xf32>
    %487 = vector.extract_strided_slice %484 {offsets = [0, 0], sizes = [8, 128], strides = [1, 1]} : vector<8x384xf32> to vector<8x128xf32>
    %488 = vector.extract_strided_slice %484 {offsets = [0, 128], sizes = [8, 128], strides = [1, 1]} : vector<8x384xf32> to vector<8x128xf32>
    %489 = vector.extract_strided_slice %484 {offsets = [0, 256], sizes = [8, 128], strides = [1, 1]} : vector<8x384xf32> to vector<8x128xf32>
    %490 = arith.mulf %488, %461 : vector<8x128xf32>
    %491 = arith.mulf %487, %486 : vector<8x128xf32>
    %492 = arith.addf %490, %491 : vector<8x128xf32>
    %493 = math.tanh %492 : vector<8x128xf32>
    %494 = arith.mulf %489, %493 : vector<8x128xf32>
    %495 = vector.extract_strided_slice %478 {offsets = [0, 0], sizes = [8, 384], strides = [1, 1]} : vector<8x512xf32> to vector<8x384xf32>
    %496 = arith.negf %495 : vector<8x384xf32>
    %497 = math.exp %496 : vector<8x384xf32>
    %cst_121 = arith.constant 1.000000e+00 : f32
    %498 = vector.broadcast %cst_121 : f32 to vector<8x384xf32>
    %499 = arith.addf %498, %497 : vector<8x384xf32>
    %500 = arith.divf %498, %499 : vector<8x384xf32>
    %501 = vector.extract_strided_slice %478 {offsets = [0, 384], sizes = [8, 128], strides = [1, 1]} : vector<8x512xf32> to vector<8x128xf32>
    %502 = math.tanh %501 : vector<8x128xf32>
    %503 = vector.extract_strided_slice %500 {offsets = [0, 0], sizes = [8, 128], strides = [1, 1]} : vector<8x384xf32> to vector<8x128xf32>
    %504 = vector.extract_strided_slice %500 {offsets = [0, 128], sizes = [8, 128], strides = [1, 1]} : vector<8x384xf32> to vector<8x128xf32>
    %505 = vector.extract_strided_slice %500 {offsets = [0, 256], sizes = [8, 128], strides = [1, 1]} : vector<8x384xf32> to vector<8x128xf32>
    %506 = arith.mulf %504, %461 : vector<8x128xf32>
    %507 = arith.mulf %503, %502 : vector<8x128xf32>
    %508 = arith.addf %506, %507 : vector<8x128xf32>
    %509 = math.tanh %508 : vector<8x128xf32>
    %510 = arith.mulf %505, %509 : vector<8x128xf32>
    %511 = arith.truncf %494 : vector<8x128xf32> to vector<8x128xbf16>
    %512 = arith.index_cast %464 : i32 to index
    %c0_122 = arith.constant 0 : index
    %513 = vector.load %arg13[%512, %c0_122] : memref<64x256xbf16, #tpu.memory_space<vmem>>, vector<8x128xbf16>
    tpu.vector_store %arg13[%512, %c0_122], %511 {strides = array<i32>} : memref<64x256xbf16, #tpu.memory_space<vmem>>, vector<8x128xbf16>,
    %514 = arith.truncf %510 : vector<8x128xf32> to vector<8x128xbf16>
    %515 = arith.index_cast %466 : i32 to index
    %c128_123 = arith.constant 128 : index
    %516 = vector.load %arg13[%515, %c128_123] : memref<64x256xbf16, #tpu.memory_space<vmem>>, vector<8x128xbf16>
    tpu.vector_store %arg13[%515, %c128_123], %514 {strides = array<i32>} : memref<64x256xbf16, #tpu.memory_space<vmem>>, vector<8x128xbf16>,
    %c1_i32_124 = arith.constant 1 : i32
    %c7_i32_125 = arith.constant 7 : i32
    %517 = arith.subi %c7_i32_125, %c1_i32_124 : i32
    %c8_i32_126 = arith.constant 8 : i32
    %518 = arith.muli %c1_i32_124, %c8_i32_126 : i32
    %519 = tpu.assume_multiple %518, 8 : i32
    %c8_i32_127 = arith.constant 8 : i32
    %520 = arith.muli %517, %c8_i32_127 : i32
    %521 = tpu.assume_multiple %520, 8 : i32
    %522 = arith.index_cast %519 : i32 to index
    %c0_128 = arith.constant 0 : index
    %523 = vector.load %arg14[%522, %c0_128] : memref<64x1024xbf16, #tpu.memory_space<vmem>>, vector<8x512xbf16>
    %524 = arith.extf %523 : vector<8x512xbf16> to vector<8x512xf32>
    %525 = arith.truncf %494 : vector<8x128xf32> to vector<8x128xbf16>
    %cst_129 = arith.constant dense<0.000000e+00> : vector<8x512xf32>
    %526 = tpu.matmul %525, %459, %cst_129 {dimension_numbers = #tpu.dot_dimension_numbers<[1], [0], [0], [1], [0, 0, 1, 1], [], []>} : vector<8x128xbf16>, vector<128x512xbf16>, vector<8x512xf32> -> vector<8x512xf32>
    %527 = arith.addf %524, %526 : vector<8x512xf32>
    %528 = arith.index_cast %521 : i32 to index
    %c512_130 = arith.constant 512 : index
    %529 = vector.load %arg14[%528, %c512_130] : memref<64x1024xbf16, #tpu.memory_space<vmem>>, vector<8x512xbf16>
    %530 = arith.extf %529 : vector<8x512xbf16> to vector<8x512xf32>
    %531 = arith.truncf %510 : vector<8x128xf32> to vector<8x128xbf16>
    %cst_131 = arith.constant dense<0.000000e+00> : vector<8x512xf32>
    %532 = tpu.matmul %531, %460, %cst_131 {dimension_numbers = #tpu.dot_dimension_numbers<[1], [0], [0], [1], [0, 0, 1, 1], [], []>} : vector<8x128xbf16>, vector<128x512xbf16>, vector<8x512xf32> -> vector<8x512xf32>
    %533 = arith.addf %530, %532 : vector<8x512xf32>
    %534 = vector.extract_strided_slice %527 {offsets = [0, 0], sizes = [8, 384], strides = [1, 1]} : vector<8x512xf32> to vector<8x384xf32>
    %535 = arith.negf %534 : vector<8x384xf32>
    %536 = math.exp %535 : vector<8x384xf32>
    %cst_132 = arith.constant 1.000000e+00 : f32
    %537 = vector.broadcast %cst_132 : f32 to vector<8x384xf32>
    %538 = arith.addf %537, %536 : vector<8x384xf32>
    %539 = arith.divf %537, %538 : vector<8x384xf32>
    %540 = vector.extract_strided_slice %527 {offsets = [0, 384], sizes = [8, 128], strides = [1, 1]} : vector<8x512xf32> to vector<8x128xf32>
    %541 = math.tanh %540 : vector<8x128xf32>
    %542 = vector.extract_strided_slice %539 {offsets = [0, 0], sizes = [8, 128], strides = [1, 1]} : vector<8x384xf32> to vector<8x128xf32>
    %543 = vector.extract_strided_slice %539 {offsets = [0, 128], sizes = [8, 128], strides = [1, 1]} : vector<8x384xf32> to vector<8x128xf32>
    %544 = vector.extract_strided_slice %539 {offsets = [0, 256], sizes = [8, 128], strides = [1, 1]} : vector<8x384xf32> to vector<8x128xf32>
    %545 = arith.mulf %543, %492 : vector<8x128xf32>
    %546 = arith.mulf %542, %541 : vector<8x128xf32>
    %547 = arith.addf %545, %546 : vector<8x128xf32>
    %548 = math.tanh %547 : vector<8x128xf32>
    %549 = arith.mulf %544, %548 : vector<8x128xf32>
    %550 = vector.extract_strided_slice %533 {offsets = [0, 0], sizes = [8, 384], strides = [1, 1]} : vector<8x512xf32> to vector<8x384xf32>
    %551 = arith.negf %550 : vector<8x384xf32>
    %552 = math.exp %551 : vector<8x384xf32>
    %cst_133 = arith.constant 1.000000e+00 : f32
    %553 = vector.broadcast %cst_133 : f32 to vector<8x384xf32>
    %554 = arith.addf %553, %552 : vector<8x384xf32>
    %555 = arith.divf %553, %554 : vector<8x384xf32>
    %556 = vector.extract_strided_slice %533 {offsets = [0, 384], sizes = [8, 128], strides = [1, 1]} : vector<8x512xf32> to vector<8x128xf32>
    %557 = math.tanh %556 : vector<8x128xf32>
    %558 = vector.extract_strided_slice %555 {offsets = [0, 0], sizes = [8, 128], strides = [1, 1]} : vector<8x384xf32> to vector<8x128xf32>
    %559 = vector.extract_strided_slice %555 {offsets = [0, 128], sizes = [8, 128], strides = [1, 1]} : vector<8x384xf32> to vector<8x128xf32>
    %560 = vector.extract_strided_slice %555 {offsets = [0, 256], sizes = [8, 128], strides = [1, 1]} : vector<8x384xf32> to vector<8x128xf32>
    %561 = arith.mulf %559, %508 : vector<8x128xf32>
    %562 = arith.mulf %558, %557 : vector<8x128xf32>
    %563 = arith.addf %561, %562 : vector<8x128xf32>
    %564 = math.tanh %563 : vector<8x128xf32>
    %565 = arith.mulf %560, %564 : vector<8x128xf32>
    %566 = arith.truncf %549 : vector<8x128xf32> to vector<8x128xbf16>
    %567 = arith.index_cast %519 : i32 to index
    %c0_134 = arith.constant 0 : index
    %568 = vector.load %arg13[%567, %c0_134] : memref<64x256xbf16, #tpu.memory_space<vmem>>, vector<8x128xbf16>
    tpu.vector_store %arg13[%567, %c0_134], %566 {strides = array<i32>} : memref<64x256xbf16, #tpu.memory_space<vmem>>, vector<8x128xbf16>,
    %569 = arith.truncf %565 : vector<8x128xf32> to vector<8x128xbf16>
    %570 = arith.index_cast %521 : i32 to index
    %c128_135 = arith.constant 128 : index
    %571 = vector.load %arg13[%570, %c128_135] : memref<64x256xbf16, #tpu.memory_space<vmem>>, vector<8x128xbf16>
    tpu.vector_store %arg13[%570, %c128_135], %569 {strides = array<i32>} : memref<64x256xbf16, #tpu.memory_space<vmem>>, vector<8x128xbf16>,
    %c2_i32_136 = arith.constant 2 : i32
    %c7_i32_137 = arith.constant 7 : i32
    %572 = arith.subi %c7_i32_137, %c2_i32_136 : i32
    %c8_i32_138 = arith.constant 8 : i32
    %573 = arith.muli %c2_i32_136, %c8_i32_138 : i32
    %574 = tpu.assume_multiple %573, 8 : i32
    %c8_i32_139 = arith.constant 8 : i32
    %575 = arith.muli %572, %c8_i32_139 : i32
    %576 = tpu.assume_multiple %575, 8 : i32
    %577 = arith.index_cast %574 : i32 to index
    %c0_140 = arith.constant 0 : index
    %578 = vector.load %arg14[%577, %c0_140] : memref<64x1024xbf16, #tpu.memory_space<vmem>>, vector<8x512xbf16>
    %579 = arith.extf %578 : vector<8x512xbf16> to vector<8x512xf32>
    %580 = arith.truncf %549 : vector<8x128xf32> to vector<8x128xbf16>
    %cst_141 = arith.constant dense<0.000000e+00> : vector<8x512xf32>
    %581 = tpu.matmul %580, %459, %cst_141 {dimension_numbers = #tpu.dot_dimension_numbers<[1], [0], [0], [1], [0, 0, 1, 1], [], []>} : vector<8x128xbf16>, vector<128x512xbf16>, vector<8x512xf32> -> vector<8x512xf32>
    %582 = arith.addf %579, %581 : vector<8x512xf32>
    %583 = arith.index_cast %576 : i32 to index
    %c512_142 = arith.constant 512 : index
    %584 = vector.load %arg14[%583, %c512_142] : memref<64x1024xbf16, #tpu.memory_space<vmem>>, vector<8x512xbf16>
    %585 = arith.extf %584 : vector<8x512xbf16> to vector<8x512xf32>
    %586 = arith.truncf %565 : vector<8x128xf32> to vector<8x128xbf16>
    %cst_143 = arith.constant dense<0.000000e+00> : vector<8x512xf32>
    %587 = tpu.matmul %586, %460, %cst_143 {dimension_numbers = #tpu.dot_dimension_numbers<[1], [0], [0], [1], [0, 0, 1, 1], [], []>} : vector<8x128xbf16>, vector<128x512xbf16>, vector<8x512xf32> -> vector<8x512xf32>
    %588 = arith.addf %585, %587 : vector<8x512xf32>
    %589 = vector.extract_strided_slice %582 {offsets = [0, 0], sizes = [8, 384], strides = [1, 1]} : vector<8x512xf32> to vector<8x384xf32>
    %590 = arith.negf %589 : vector<8x384xf32>
    %591 = math.exp %590 : vector<8x384xf32>
    %cst_144 = arith.constant 1.000000e+00 : f32
    %592 = vector.broadcast %cst_144 : f32 to vector<8x384xf32>
    %593 = arith.addf %592, %591 : vector<8x384xf32>
    %594 = arith.divf %592, %593 : vector<8x384xf32>
    %595 = vector.extract_strided_slice %582 {offsets = [0, 384], sizes = [8, 128], strides = [1, 1]} : vector<8x512xf32> to vector<8x128xf32>
    %596 = math.tanh %595 : vector<8x128xf32>
    %597 = vector.extract_strided_slice %594 {offsets = [0, 0], sizes = [8, 128], strides = [1, 1]} : vector<8x384xf32> to vector<8x128xf32>
    %598 = vector.extract_strided_slice %594 {offsets = [0, 128], sizes = [8, 128], strides = [1, 1]} : vector<8x384xf32> to vector<8x128xf32>
    %599 = vector.extract_strided_slice %594 {offsets = [0, 256], sizes = [8, 128], strides = [1, 1]} : vector<8x384xf32> to vector<8x128xf32>
    %600 = arith.mulf %598, %547 : vector<8x128xf32>
    %601 = arith.mulf %597, %596 : vector<8x128xf32>
    %602 = arith.addf %600, %601 : vector<8x128xf32>
    %603 = math.tanh %602 : vector<8x128xf32>
    %604 = arith.mulf %599, %603 : vector<8x128xf32>
    %605 = vector.extract_strided_slice %588 {offsets = [0, 0], sizes = [8, 384], strides = [1, 1]} : vector<8x512xf32> to vector<8x384xf32>
    %606 = arith.negf %605 : vector<8x384xf32>
    %607 = math.exp %606 : vector<8x384xf32>
    %cst_145 = arith.constant 1.000000e+00 : f32
    %608 = vector.broadcast %cst_145 : f32 to vector<8x384xf32>
    %609 = arith.addf %608, %607 : vector<8x384xf32>
    %610 = arith.divf %608, %609 : vector<8x384xf32>
    %611 = vector.extract_strided_slice %588 {offsets = [0, 384], sizes = [8, 128], strides = [1, 1]} : vector<8x512xf32> to vector<8x128xf32>
    %612 = math.tanh %611 : vector<8x128xf32>
    %613 = vector.extract_strided_slice %610 {offsets = [0, 0], sizes = [8, 128], strides = [1, 1]} : vector<8x384xf32> to vector<8x128xf32>
    %614 = vector.extract_strided_slice %610 {offsets = [0, 128], sizes = [8, 128], strides = [1, 1]} : vector<8x384xf32> to vector<8x128xf32>
    %615 = vector.extract_strided_slice %610 {offsets = [0, 256], sizes = [8, 128], strides = [1, 1]} : vector<8x384xf32> to vector<8x128xf32>
    %616 = arith.mulf %614, %563 : vector<8x128xf32>
    %617 = arith.mulf %613, %612 : vector<8x128xf32>
    %618 = arith.addf %616, %617 : vector<8x128xf32>
    %619 = math.tanh %618 : vector<8x128xf32>
    %620 = arith.mulf %615, %619 : vector<8x128xf32>
    %621 = arith.truncf %604 : vector<8x128xf32> to vector<8x128xbf16>
    %622 = arith.index_cast %574 : i32 to index
    %c0_146 = arith.constant 0 : index
    %623 = vector.load %arg13[%622, %c0_146] : memref<64x256xbf16, #tpu.memory_space<vmem>>, vector<8x128xbf16>
    tpu.vector_store %arg13[%622, %c0_146], %621 {strides = array<i32>} : memref<64x256xbf16, #tpu.memory_space<vmem>>, vector<8x128xbf16>,
    %624 = arith.truncf %620 : vector<8x128xf32> to vector<8x128xbf16>
    %625 = arith.index_cast %576 : i32 to index
    %c128_147 = arith.constant 128 : index
    %626 = vector.load %arg13[%625, %c128_147] : memref<64x256xbf16, #tpu.memory_space<vmem>>, vector<8x128xbf16>
    tpu.vector_store %arg13[%625, %c128_147], %624 {strides = array<i32>} : memref<64x256xbf16, #tpu.memory_space<vmem>>, vector<8x128xbf16>,
    %c3_i32_148 = arith.constant 3 : i32
    %c7_i32_149 = arith.constant 7 : i32
    %627 = arith.subi %c7_i32_149, %c3_i32_148 : i32
    %c8_i32_150 = arith.constant 8 : i32
    %628 = arith.muli %c3_i32_148, %c8_i32_150 : i32
    %629 = tpu.assume_multiple %628, 8 : i32
    %c8_i32_151 = arith.constant 8 : i32
    %630 = arith.muli %627, %c8_i32_151 : i32
    %631 = tpu.assume_multiple %630, 8 : i32
    %632 = arith.index_cast %629 : i32 to index
    %c0_152 = arith.constant 0 : index
    %633 = vector.load %arg14[%632, %c0_152] : memref<64x1024xbf16, #tpu.memory_space<vmem>>, vector<8x512xbf16>
    %634 = arith.extf %633 : vector<8x512xbf16> to vector<8x512xf32>
    %635 = arith.truncf %604 : vector<8x128xf32> to vector<8x128xbf16>
    %cst_153 = arith.constant dense<0.000000e+00> : vector<8x512xf32>
    %636 = tpu.matmul %635, %459, %cst_153 {dimension_numbers = #tpu.dot_dimension_numbers<[1], [0], [0], [1], [0, 0, 1, 1], [], []>} : vector<8x128xbf16>, vector<128x512xbf16>, vector<8x512xf32> -> vector<8x512xf32>
    %637 = arith.addf %634, %636 : vector<8x512xf32>
    %638 = arith.index_cast %631 : i32 to index
    %c512_154 = arith.constant 512 : index
    %639 = vector.load %arg14[%638, %c512_154] : memref<64x1024xbf16, #tpu.memory_space<vmem>>, vector<8x512xbf16>
    %640 = arith.extf %639 : vector<8x512xbf16> to vector<8x512xf32>
    %641 = arith.truncf %620 : vector<8x128xf32> to vector<8x128xbf16>
    %cst_155 = arith.constant dense<0.000000e+00> : vector<8x512xf32>
    %642 = tpu.matmul %641, %460, %cst_155 {dimension_numbers = #tpu.dot_dimension_numbers<[1], [0], [0], [1], [0, 0, 1, 1], [], []>} : vector<8x128xbf16>, vector<128x512xbf16>, vector<8x512xf32> -> vector<8x512xf32>
    %643 = arith.addf %640, %642 : vector<8x512xf32>
    %644 = vector.extract_strided_slice %637 {offsets = [0, 0], sizes = [8, 384], strides = [1, 1]} : vector<8x512xf32> to vector<8x384xf32>
    %645 = arith.negf %644 : vector<8x384xf32>
    %646 = math.exp %645 : vector<8x384xf32>
    %cst_156 = arith.constant 1.000000e+00 : f32
    %647 = vector.broadcast %cst_156 : f32 to vector<8x384xf32>
    %648 = arith.addf %647, %646 : vector<8x384xf32>
    %649 = arith.divf %647, %648 : vector<8x384xf32>
    %650 = vector.extract_strided_slice %637 {offsets = [0, 384], sizes = [8, 128], strides = [1, 1]} : vector<8x512xf32> to vector<8x128xf32>
    %651 = math.tanh %650 : vector<8x128xf32>
    %652 = vector.extract_strided_slice %649 {offsets = [0, 0], sizes = [8, 128], strides = [1, 1]} : vector<8x384xf32> to vector<8x128xf32>
    %653 = vector.extract_strided_slice %649 {offsets = [0, 128], sizes = [8, 128], strides = [1, 1]} : vector<8x384xf32> to vector<8x128xf32>
    %654 = vector.extract_strided_slice %649 {offsets = [0, 256], sizes = [8, 128], strides = [1, 1]} : vector<8x384xf32> to vector<8x128xf32>
    %655 = arith.mulf %653, %602 : vector<8x128xf32>
    %656 = arith.mulf %652, %651 : vector<8x128xf32>
    %657 = arith.addf %655, %656 : vector<8x128xf32>
    %658 = math.tanh %657 : vector<8x128xf32>
    %659 = arith.mulf %654, %658 : vector<8x128xf32>
    %660 = vector.extract_strided_slice %643 {offsets = [0, 0], sizes = [8, 384], strides = [1, 1]} : vector<8x512xf32> to vector<8x384xf32>
    %661 = arith.negf %660 : vector<8x384xf32>
    %662 = math.exp %661 : vector<8x384xf32>
    %cst_157 = arith.constant 1.000000e+00 : f32
    %663 = vector.broadcast %cst_157 : f32 to vector<8x384xf32>
    %664 = arith.addf %663, %662 : vector<8x384xf32>
    %665 = arith.divf %663, %664 : vector<8x384xf32>
    %666 = vector.extract_strided_slice %643 {offsets = [0, 384], sizes = [8, 128], strides = [1, 1]} : vector<8x512xf32> to vector<8x128xf32>
    %667 = math.tanh %666 : vector<8x128xf32>
    %668 = vector.extract_strided_slice %665 {offsets = [0, 0], sizes = [8, 128], strides = [1, 1]} : vector<8x384xf32> to vector<8x128xf32>
    %669 = vector.extract_strided_slice %665 {offsets = [0, 128], sizes = [8, 128], strides = [1, 1]} : vector<8x384xf32> to vector<8x128xf32>
    %670 = vector.extract_strided_slice %665 {offsets = [0, 256], sizes = [8, 128], strides = [1, 1]} : vector<8x384xf32> to vector<8x128xf32>
    %671 = arith.mulf %669, %618 : vector<8x128xf32>
    %672 = arith.mulf %668, %667 : vector<8x128xf32>
    %673 = arith.addf %671, %672 : vector<8x128xf32>
    %674 = math.tanh %673 : vector<8x128xf32>
    %675 = arith.mulf %670, %674 : vector<8x128xf32>
    %676 = arith.truncf %659 : vector<8x128xf32> to vector<8x128xbf16>
    %677 = arith.index_cast %629 : i32 to index
    %c0_158 = arith.constant 0 : index
    %678 = vector.load %arg13[%677, %c0_158] : memref<64x256xbf16, #tpu.memory_space<vmem>>, vector<8x128xbf16>
    tpu.vector_store %arg13[%677, %c0_158], %676 {strides = array<i32>} : memref<64x256xbf16, #tpu.memory_space<vmem>>, vector<8x128xbf16>,
    %679 = arith.truncf %675 : vector<8x128xf32> to vector<8x128xbf16>
    %680 = arith.index_cast %631 : i32 to index
    %c128_159 = arith.constant 128 : index
    %681 = vector.load %arg13[%680, %c128_159] : memref<64x256xbf16, #tpu.memory_space<vmem>>, vector<8x128xbf16>
    tpu.vector_store %arg13[%680, %c128_159], %679 {strides = array<i32>} : memref<64x256xbf16, #tpu.memory_space<vmem>>, vector<8x128xbf16>,
    %c4_i32_160 = arith.constant 4 : i32
    %c7_i32_161 = arith.constant 7 : i32
    %682 = arith.subi %c7_i32_161, %c4_i32_160 : i32
    %c8_i32_162 = arith.constant 8 : i32
    %683 = arith.muli %c4_i32_160, %c8_i32_162 : i32
    %684 = tpu.assume_multiple %683, 8 : i32
    %c8_i32_163 = arith.constant 8 : i32
    %685 = arith.muli %682, %c8_i32_163 : i32
    %686 = tpu.assume_multiple %685, 8 : i32
    %687 = arith.index_cast %684 : i32 to index
    %c0_164 = arith.constant 0 : index
    %688 = vector.load %arg14[%687, %c0_164] : memref<64x1024xbf16, #tpu.memory_space<vmem>>, vector<8x512xbf16>
    %689 = arith.extf %688 : vector<8x512xbf16> to vector<8x512xf32>
    %690 = arith.truncf %659 : vector<8x128xf32> to vector<8x128xbf16>
    %cst_165 = arith.constant dense<0.000000e+00> : vector<8x512xf32>
    %691 = tpu.matmul %690, %459, %cst_165 {dimension_numbers = #tpu.dot_dimension_numbers<[1], [0], [0], [1], [0, 0, 1, 1], [], []>} : vector<8x128xbf16>, vector<128x512xbf16>, vector<8x512xf32> -> vector<8x512xf32>
    %692 = arith.addf %689, %691 : vector<8x512xf32>
    %693 = arith.index_cast %686 : i32 to index
    %c512_166 = arith.constant 512 : index
    %694 = vector.load %arg14[%693, %c512_166] : memref<64x1024xbf16, #tpu.memory_space<vmem>>, vector<8x512xbf16>
    %695 = arith.extf %694 : vector<8x512xbf16> to vector<8x512xf32>
    %696 = arith.truncf %675 : vector<8x128xf32> to vector<8x128xbf16>
    %cst_167 = arith.constant dense<0.000000e+00> : vector<8x512xf32>
    %697 = tpu.matmul %696, %460, %cst_167 {dimension_numbers = #tpu.dot_dimension_numbers<[1], [0], [0], [1], [0, 0, 1, 1], [], []>} : vector<8x128xbf16>, vector<128x512xbf16>, vector<8x512xf32> -> vector<8x512xf32>
    %698 = arith.addf %695, %697 : vector<8x512xf32>
    %699 = vector.extract_strided_slice %692 {offsets = [0, 0], sizes = [8, 384], strides = [1, 1]} : vector<8x512xf32> to vector<8x384xf32>
    %700 = arith.negf %699 : vector<8x384xf32>
    %701 = math.exp %700 : vector<8x384xf32>
    %cst_168 = arith.constant 1.000000e+00 : f32
    %702 = vector.broadcast %cst_168 : f32 to vector<8x384xf32>
    %703 = arith.addf %702, %701 : vector<8x384xf32>
    %704 = arith.divf %702, %703 : vector<8x384xf32>
    %705 = vector.extract_strided_slice %692 {offsets = [0, 384], sizes = [8, 128], strides = [1, 1]} : vector<8x512xf32> to vector<8x128xf32>
    %706 = math.tanh %705 : vector<8x128xf32>
    %707 = vector.extract_strided_slice %704 {offsets = [0, 0], sizes = [8, 128], strides = [1, 1]} : vector<8x384xf32> to vector<8x128xf32>
    %708 = vector.extract_strided_slice %704 {offsets = [0, 128], sizes = [8, 128], strides = [1, 1]} : vector<8x384xf32> to vector<8x128xf32>
    %709 = vector.extract_strided_slice %704 {offsets = [0, 256], sizes = [8, 128], strides = [1, 1]} : vector<8x384xf32> to vector<8x128xf32>
    %710 = arith.mulf %708, %657 : vector<8x128xf32>
    %711 = arith.mulf %707, %706 : vector<8x128xf32>
    %712 = arith.addf %710, %711 : vector<8x128xf32>
    %713 = math.tanh %712 : vector<8x128xf32>
    %714 = arith.mulf %709, %713 : vector<8x128xf32>
    %715 = vector.extract_strided_slice %698 {offsets = [0, 0], sizes = [8, 384], strides = [1, 1]} : vector<8x512xf32> to vector<8x384xf32>
    %716 = arith.negf %715 : vector<8x384xf32>
    %717 = math.exp %716 : vector<8x384xf32>
    %cst_169 = arith.constant 1.000000e+00 : f32
    %718 = vector.broadcast %cst_169 : f32 to vector<8x384xf32>
    %719 = arith.addf %718, %717 : vector<8x384xf32>
    %720 = arith.divf %718, %719 : vector<8x384xf32>
    %721 = vector.extract_strided_slice %698 {offsets = [0, 384], sizes = [8, 128], strides = [1, 1]} : vector<8x512xf32> to vector<8x128xf32>
    %722 = math.tanh %721 : vector<8x128xf32>
    %723 = vector.extract_strided_slice %720 {offsets = [0, 0], sizes = [8, 128], strides = [1, 1]} : vector<8x384xf32> to vector<8x128xf32>
    %724 = vector.extract_strided_slice %720 {offsets = [0, 128], sizes = [8, 128], strides = [1, 1]} : vector<8x384xf32> to vector<8x128xf32>
    %725 = vector.extract_strided_slice %720 {offsets = [0, 256], sizes = [8, 128], strides = [1, 1]} : vector<8x384xf32> to vector<8x128xf32>
    %726 = arith.mulf %724, %673 : vector<8x128xf32>
    %727 = arith.mulf %723, %722 : vector<8x128xf32>
    %728 = arith.addf %726, %727 : vector<8x128xf32>
    %729 = math.tanh %728 : vector<8x128xf32>
    %730 = arith.mulf %725, %729 : vector<8x128xf32>
    %731 = arith.truncf %714 : vector<8x128xf32> to vector<8x128xbf16>
    %732 = arith.index_cast %684 : i32 to index
    %c0_170 = arith.constant 0 : index
    %733 = vector.load %arg13[%732, %c0_170] : memref<64x256xbf16, #tpu.memory_space<vmem>>, vector<8x128xbf16>
    tpu.vector_store %arg13[%732, %c0_170], %731 {strides = array<i32>} : memref<64x256xbf16, #tpu.memory_space<vmem>>, vector<8x128xbf16>,
    %734 = arith.truncf %730 : vector<8x128xf32> to vector<8x128xbf16>
    %735 = arith.index_cast %686 : i32 to index
    %c128_171 = arith.constant 128 : index
    %736 = vector.load %arg13[%735, %c128_171] : memref<64x256xbf16, #tpu.memory_space<vmem>>, vector<8x128xbf16>
    tpu.vector_store %arg13[%735, %c128_171], %734 {strides = array<i32>} : memref<64x256xbf16, #tpu.memory_space<vmem>>, vector<8x128xbf16>,
    %c5_i32_172 = arith.constant 5 : i32
    %c7_i32_173 = arith.constant 7 : i32
    %737 = arith.subi %c7_i32_173, %c5_i32_172 : i32
    %c8_i32_174 = arith.constant 8 : i32
    %738 = arith.muli %c5_i32_172, %c8_i32_174 : i32
    %739 = tpu.assume_multiple %738, 8 : i32
    %c8_i32_175 = arith.constant 8 : i32
    %740 = arith.muli %737, %c8_i32_175 : i32
    %741 = tpu.assume_multiple %740, 8 : i32
    %742 = arith.index_cast %739 : i32 to index
    %c0_176 = arith.constant 0 : index
    %743 = vector.load %arg14[%742, %c0_176] : memref<64x1024xbf16, #tpu.memory_space<vmem>>, vector<8x512xbf16>
    %744 = arith.extf %743 : vector<8x512xbf16> to vector<8x512xf32>
    %745 = arith.truncf %714 : vector<8x128xf32> to vector<8x128xbf16>
    %cst_177 = arith.constant dense<0.000000e+00> : vector<8x512xf32>
    %746 = tpu.matmul %745, %459, %cst_177 {dimension_numbers = #tpu.dot_dimension_numbers<[1], [0], [0], [1], [0, 0, 1, 1], [], []>} : vector<8x128xbf16>, vector<128x512xbf16>, vector<8x512xf32> -> vector<8x512xf32>
    %747 = arith.addf %744, %746 : vector<8x512xf32>
    %748 = arith.index_cast %741 : i32 to index
    %c512_178 = arith.constant 512 : index
    %749 = vector.load %arg14[%748, %c512_178] : memref<64x1024xbf16, #tpu.memory_space<vmem>>, vector<8x512xbf16>
    %750 = arith.extf %749 : vector<8x512xbf16> to vector<8x512xf32>
    %751 = arith.truncf %730 : vector<8x128xf32> to vector<8x128xbf16>
    %cst_179 = arith.constant dense<0.000000e+00> : vector<8x512xf32>
    %752 = tpu.matmul %751, %460, %cst_179 {dimension_numbers = #tpu.dot_dimension_numbers<[1], [0], [0], [1], [0, 0, 1, 1], [], []>} : vector<8x128xbf16>, vector<128x512xbf16>, vector<8x512xf32> -> vector<8x512xf32>
    %753 = arith.addf %750, %752 : vector<8x512xf32>
    %754 = vector.extract_strided_slice %747 {offsets = [0, 0], sizes = [8, 384], strides = [1, 1]} : vector<8x512xf32> to vector<8x384xf32>
    %755 = arith.negf %754 : vector<8x384xf32>
    %756 = math.exp %755 : vector<8x384xf32>
    %cst_180 = arith.constant 1.000000e+00 : f32
    %757 = vector.broadcast %cst_180 : f32 to vector<8x384xf32>
    %758 = arith.addf %757, %756 : vector<8x384xf32>
    %759 = arith.divf %757, %758 : vector<8x384xf32>
    %760 = vector.extract_strided_slice %747 {offsets = [0, 384], sizes = [8, 128], strides = [1, 1]} : vector<8x512xf32> to vector<8x128xf32>
    %761 = math.tanh %760 : vector<8x128xf32>
    %762 = vector.extract_strided_slice %759 {offsets = [0, 0], sizes = [8, 128], strides = [1, 1]} : vector<8x384xf32> to vector<8x128xf32>
    %763 = vector.extract_strided_slice %759 {offsets = [0, 128], sizes = [8, 128], strides = [1, 1]} : vector<8x384xf32> to vector<8x128xf32>
    %764 = vector.extract_strided_slice %759 {offsets = [0, 256], sizes = [8, 128], strides = [1, 1]} : vector<8x384xf32> to vector<8x128xf32>
    %765 = arith.mulf %763, %712 : vector<8x128xf32>
    %766 = arith.mulf %762, %761 : vector<8x128xf32>
    %767 = arith.addf %765, %766 : vector<8x128xf32>
    %768 = math.tanh %767 : vector<8x128xf32>
    %769 = arith.mulf %764, %768 : vector<8x128xf32>
    %770 = vector.extract_strided_slice %753 {offsets = [0, 0], sizes = [8, 384], strides = [1, 1]} : vector<8x512xf32> to vector<8x384xf32>
    %771 = arith.negf %770 : vector<8x384xf32>
    %772 = math.exp %771 : vector<8x384xf32>
    %cst_181 = arith.constant 1.000000e+00 : f32
    %773 = vector.broadcast %cst_181 : f32 to vector<8x384xf32>
    %774 = arith.addf %773, %772 : vector<8x384xf32>
    %775 = arith.divf %773, %774 : vector<8x384xf32>
    %776 = vector.extract_strided_slice %753 {offsets = [0, 384], sizes = [8, 128], strides = [1, 1]} : vector<8x512xf32> to vector<8x128xf32>
    %777 = math.tanh %776 : vector<8x128xf32>
    %778 = vector.extract_strided_slice %775 {offsets = [0, 0], sizes = [8, 128], strides = [1, 1]} : vector<8x384xf32> to vector<8x128xf32>
    %779 = vector.extract_strided_slice %775 {offsets = [0, 128], sizes = [8, 128], strides = [1, 1]} : vector<8x384xf32> to vector<8x128xf32>
    %780 = vector.extract_strided_slice %775 {offsets = [0, 256], sizes = [8, 128], strides = [1, 1]} : vector<8x384xf32> to vector<8x128xf32>
    %781 = arith.mulf %779, %728 : vector<8x128xf32>
    %782 = arith.mulf %778, %777 : vector<8x128xf32>
    %783 = arith.addf %781, %782 : vector<8x128xf32>
    %784 = math.tanh %783 : vector<8x128xf32>
    %785 = arith.mulf %780, %784 : vector<8x128xf32>
    %786 = arith.truncf %769 : vector<8x128xf32> to vector<8x128xbf16>
    %787 = arith.index_cast %739 : i32 to index
    %c0_182 = arith.constant 0 : index
    %788 = vector.load %arg13[%787, %c0_182] : memref<64x256xbf16, #tpu.memory_space<vmem>>, vector<8x128xbf16>
    tpu.vector_store %arg13[%787, %c0_182], %786 {strides = array<i32>} : memref<64x256xbf16, #tpu.memory_space<vmem>>, vector<8x128xbf16>,
    %789 = arith.truncf %785 : vector<8x128xf32> to vector<8x128xbf16>
    %790 = arith.index_cast %741 : i32 to index
    %c128_183 = arith.constant 128 : index
    %791 = vector.load %arg13[%790, %c128_183] : memref<64x256xbf16, #tpu.memory_space<vmem>>, vector<8x128xbf16>
    tpu.vector_store %arg13[%790, %c128_183], %789 {strides = array<i32>} : memref<64x256xbf16, #tpu.memory_space<vmem>>, vector<8x128xbf16>,
    %c6_i32_184 = arith.constant 6 : i32
    %c7_i32_185 = arith.constant 7 : i32
    %792 = arith.subi %c7_i32_185, %c6_i32_184 : i32
    %c8_i32_186 = arith.constant 8 : i32
    %793 = arith.muli %c6_i32_184, %c8_i32_186 : i32
    %794 = tpu.assume_multiple %793, 8 : i32
    %c8_i32_187 = arith.constant 8 : i32
    %795 = arith.muli %792, %c8_i32_187 : i32
    %796 = tpu.assume_multiple %795, 8 : i32
    %797 = arith.index_cast %794 : i32 to index
    %c0_188 = arith.constant 0 : index
    %798 = vector.load %arg14[%797, %c0_188] : memref<64x1024xbf16, #tpu.memory_space<vmem>>, vector<8x512xbf16>
    %799 = arith.extf %798 : vector<8x512xbf16> to vector<8x512xf32>
    %800 = arith.truncf %769 : vector<8x128xf32> to vector<8x128xbf16>
    %cst_189 = arith.constant dense<0.000000e+00> : vector<8x512xf32>
    %801 = tpu.matmul %800, %459, %cst_189 {dimension_numbers = #tpu.dot_dimension_numbers<[1], [0], [0], [1], [0, 0, 1, 1], [], []>} : vector<8x128xbf16>, vector<128x512xbf16>, vector<8x512xf32> -> vector<8x512xf32>
    %802 = arith.addf %799, %801 : vector<8x512xf32>
    %803 = arith.index_cast %796 : i32 to index
    %c512_190 = arith.constant 512 : index
    %804 = vector.load %arg14[%803, %c512_190] : memref<64x1024xbf16, #tpu.memory_space<vmem>>, vector<8x512xbf16>
    %805 = arith.extf %804 : vector<8x512xbf16> to vector<8x512xf32>
    %806 = arith.truncf %785 : vector<8x128xf32> to vector<8x128xbf16>
    %cst_191 = arith.constant dense<0.000000e+00> : vector<8x512xf32>
    %807 = tpu.matmul %806, %460, %cst_191 {dimension_numbers = #tpu.dot_dimension_numbers<[1], [0], [0], [1], [0, 0, 1, 1], [], []>} : vector<8x128xbf16>, vector<128x512xbf16>, vector<8x512xf32> -> vector<8x512xf32>
    %808 = arith.addf %805, %807 : vector<8x512xf32>
    %809 = vector.extract_strided_slice %802 {offsets = [0, 0], sizes = [8, 384], strides = [1, 1]} : vector<8x512xf32> to vector<8x384xf32>
    %810 = arith.negf %809 : vector<8x384xf32>
    %811 = math.exp %810 : vector<8x384xf32>
    %cst_192 = arith.constant 1.000000e+00 : f32
    %812 = vector.broadcast %cst_192 : f32 to vector<8x384xf32>
    %813 = arith.addf %812, %811 : vector<8x384xf32>
    %814 = arith.divf %812, %813 : vector<8x384xf32>
    %815 = vector.extract_strided_slice %802 {offsets = [0, 384], sizes = [8, 128], strides = [1, 1]} : vector<8x512xf32> to vector<8x128xf32>
    %816 = math.tanh %815 : vector<8x128xf32>
    %817 = vector.extract_strided_slice %814 {offsets = [0, 0], sizes = [8, 128], strides = [1, 1]} : vector<8x384xf32> to vector<8x128xf32>
    %818 = vector.extract_strided_slice %814 {offsets = [0, 128], sizes = [8, 128], strides = [1, 1]} : vector<8x384xf32> to vector<8x128xf32>
    %819 = vector.extract_strided_slice %814 {offsets = [0, 256], sizes = [8, 128], strides = [1, 1]} : vector<8x384xf32> to vector<8x128xf32>
    %820 = arith.mulf %818, %767 : vector<8x128xf32>
    %821 = arith.mulf %817, %816 : vector<8x128xf32>
    %822 = arith.addf %820, %821 : vector<8x128xf32>
    %823 = math.tanh %822 : vector<8x128xf32>
    %824 = arith.mulf %819, %823 : vector<8x128xf32>
    %825 = vector.extract_strided_slice %808 {offsets = [0, 0], sizes = [8, 384], strides = [1, 1]} : vector<8x512xf32> to vector<8x384xf32>
    %826 = arith.negf %825 : vector<8x384xf32>
    %827 = math.exp %826 : vector<8x384xf32>
    %cst_193 = arith.constant 1.000000e+00 : f32
    %828 = vector.broadcast %cst_193 : f32 to vector<8x384xf32>
    %829 = arith.addf %828, %827 : vector<8x384xf32>
    %830 = arith.divf %828, %829 : vector<8x384xf32>
    %831 = vector.extract_strided_slice %808 {offsets = [0, 384], sizes = [8, 128], strides = [1, 1]} : vector<8x512xf32> to vector<8x128xf32>
    %832 = math.tanh %831 : vector<8x128xf32>
    %833 = vector.extract_strided_slice %830 {offsets = [0, 0], sizes = [8, 128], strides = [1, 1]} : vector<8x384xf32> to vector<8x128xf32>
    %834 = vector.extract_strided_slice %830 {offsets = [0, 128], sizes = [8, 128], strides = [1, 1]} : vector<8x384xf32> to vector<8x128xf32>
    %835 = vector.extract_strided_slice %830 {offsets = [0, 256], sizes = [8, 128], strides = [1, 1]} : vector<8x384xf32> to vector<8x128xf32>
    %836 = arith.mulf %834, %783 : vector<8x128xf32>
    %837 = arith.mulf %833, %832 : vector<8x128xf32>
    %838 = arith.addf %836, %837 : vector<8x128xf32>
    %839 = math.tanh %838 : vector<8x128xf32>
    %840 = arith.mulf %835, %839 : vector<8x128xf32>
    %841 = arith.truncf %824 : vector<8x128xf32> to vector<8x128xbf16>
    %842 = arith.index_cast %794 : i32 to index
    %c0_194 = arith.constant 0 : index
    %843 = vector.load %arg13[%842, %c0_194] : memref<64x256xbf16, #tpu.memory_space<vmem>>, vector<8x128xbf16>
    tpu.vector_store %arg13[%842, %c0_194], %841 {strides = array<i32>} : memref<64x256xbf16, #tpu.memory_space<vmem>>, vector<8x128xbf16>,
    %844 = arith.truncf %840 : vector<8x128xf32> to vector<8x128xbf16>
    %845 = arith.index_cast %796 : i32 to index
    %c128_195 = arith.constant 128 : index
    %846 = vector.load %arg13[%845, %c128_195] : memref<64x256xbf16, #tpu.memory_space<vmem>>, vector<8x128xbf16>
    tpu.vector_store %arg13[%845, %c128_195], %844 {strides = array<i32>} : memref<64x256xbf16, #tpu.memory_space<vmem>>, vector<8x128xbf16>,
    %c7_i32_196 = arith.constant 7 : i32
    %c7_i32_197 = arith.constant 7 : i32
    %847 = arith.subi %c7_i32_197, %c7_i32_196 : i32
    %c8_i32_198 = arith.constant 8 : i32
    %848 = arith.muli %c7_i32_196, %c8_i32_198 : i32
    %849 = tpu.assume_multiple %848, 8 : i32
    %c8_i32_199 = arith.constant 8 : i32
    %850 = arith.muli %847, %c8_i32_199 : i32
    %851 = tpu.assume_multiple %850, 8 : i32
    %852 = arith.index_cast %849 : i32 to index
    %c0_200 = arith.constant 0 : index
    %853 = vector.load %arg14[%852, %c0_200] : memref<64x1024xbf16, #tpu.memory_space<vmem>>, vector<8x512xbf16>
    %854 = arith.extf %853 : vector<8x512xbf16> to vector<8x512xf32>
    %855 = arith.truncf %824 : vector<8x128xf32> to vector<8x128xbf16>
    %cst_201 = arith.constant dense<0.000000e+00> : vector<8x512xf32>
    %856 = tpu.matmul %855, %459, %cst_201 {dimension_numbers = #tpu.dot_dimension_numbers<[1], [0], [0], [1], [0, 0, 1, 1], [], []>} : vector<8x128xbf16>, vector<128x512xbf16>, vector<8x512xf32> -> vector<8x512xf32>
    %857 = arith.addf %854, %856 : vector<8x512xf32>
    %858 = arith.index_cast %851 : i32 to index
    %c512_202 = arith.constant 512 : index
    %859 = vector.load %arg14[%858, %c512_202] : memref<64x1024xbf16, #tpu.memory_space<vmem>>, vector<8x512xbf16>
    %860 = arith.extf %859 : vector<8x512xbf16> to vector<8x512xf32>
    %861 = arith.truncf %840 : vector<8x128xf32> to vector<8x128xbf16>
    %cst_203 = arith.constant dense<0.000000e+00> : vector<8x512xf32>
    %862 = tpu.matmul %861, %460, %cst_203 {dimension_numbers = #tpu.dot_dimension_numbers<[1], [0], [0], [1], [0, 0, 1, 1], [], []>} : vector<8x128xbf16>, vector<128x512xbf16>, vector<8x512xf32> -> vector<8x512xf32>
    %863 = arith.addf %860, %862 : vector<8x512xf32>
    %864 = vector.extract_strided_slice %857 {offsets = [0, 0], sizes = [8, 384], strides = [1, 1]} : vector<8x512xf32> to vector<8x384xf32>
    %865 = arith.negf %864 : vector<8x384xf32>
    %866 = math.exp %865 : vector<8x384xf32>
    %cst_204 = arith.constant 1.000000e+00 : f32
    %867 = vector.broadcast %cst_204 : f32 to vector<8x384xf32>
    %868 = arith.addf %867, %866 : vector<8x384xf32>
    %869 = arith.divf %867, %868 : vector<8x384xf32>
    %870 = vector.extract_strided_slice %857 {offsets = [0, 384], sizes = [8, 128], strides = [1, 1]} : vector<8x512xf32> to vector<8x128xf32>
    %871 = math.tanh %870 : vector<8x128xf32>
    %872 = vector.extract_strided_slice %869 {offsets = [0, 0], sizes = [8, 128], strides = [1, 1]} : vector<8x384xf32> to vector<8x128xf32>
    %873 = vector.extract_strided_slice %869 {offsets = [0, 128], sizes = [8, 128], strides = [1, 1]} : vector<8x384xf32> to vector<8x128xf32>
    %874 = vector.extract_strided_slice %869 {offsets = [0, 256], sizes = [8, 128], strides = [1, 1]} : vector<8x384xf32> to vector<8x128xf32>
    %875 = arith.mulf %873, %822 : vector<8x128xf32>
    %876 = arith.mulf %872, %871 : vector<8x128xf32>
    %877 = arith.addf %875, %876 : vector<8x128xf32>
    %878 = math.tanh %877 : vector<8x128xf32>
    %879 = arith.mulf %874, %878 : vector<8x128xf32>
    %880 = vector.extract_strided_slice %863 {offsets = [0, 0], sizes = [8, 384], strides = [1, 1]} : vector<8x512xf32> to vector<8x384xf32>
    %881 = arith.negf %880 : vector<8x384xf32>
    %882 = math.exp %881 : vector<8x384xf32>
    %cst_205 = arith.constant 1.000000e+00 : f32
    %883 = vector.broadcast %cst_205 : f32 to vector<8x384xf32>
    %884 = arith.addf %883, %882 : vector<8x384xf32>
    %885 = arith.divf %883, %884 : vector<8x384xf32>
    %886 = vector.extract_strided_slice %863 {offsets = [0, 384], sizes = [8, 128], strides = [1, 1]} : vector<8x512xf32> to vector<8x128xf32>
    %887 = math.tanh %886 : vector<8x128xf32>
    %888 = vector.extract_strided_slice %885 {offsets = [0, 0], sizes = [8, 128], strides = [1, 1]} : vector<8x384xf32> to vector<8x128xf32>
    %889 = vector.extract_strided_slice %885 {offsets = [0, 128], sizes = [8, 128], strides = [1, 1]} : vector<8x384xf32> to vector<8x128xf32>
    %890 = vector.extract_strided_slice %885 {offsets = [0, 256], sizes = [8, 128], strides = [1, 1]} : vector<8x384xf32> to vector<8x128xf32>
    %891 = arith.mulf %889, %838 : vector<8x128xf32>
    %892 = arith.mulf %888, %887 : vector<8x128xf32>
    %893 = arith.addf %891, %892 : vector<8x128xf32>
    %894 = math.tanh %893 : vector<8x128xf32>
    %895 = arith.mulf %890, %894 : vector<8x128xf32>
    %896 = arith.truncf %879 : vector<8x128xf32> to vector<8x128xbf16>
    %897 = arith.index_cast %849 : i32 to index
    %c0_206 = arith.constant 0 : index
    %898 = vector.load %arg13[%897, %c0_206] : memref<64x256xbf16, #tpu.memory_space<vmem>>, vector<8x128xbf16>
    tpu.vector_store %arg13[%897, %c0_206], %896 {strides = array<i32>} : memref<64x256xbf16, #tpu.memory_space<vmem>>, vector<8x128xbf16>,
    %899 = arith.truncf %895 : vector<8x128xf32> to vector<8x128xbf16>
    %900 = arith.index_cast %851 : i32 to index
    %c128_207 = arith.constant 128 : index
    %901 = vector.load %arg13[%900, %c128_207] : memref<64x256xbf16, #tpu.memory_space<vmem>>, vector<8x128xbf16>
    tpu.vector_store %arg13[%900, %c128_207], %899 {strides = array<i32>} : memref<64x256xbf16, #tpu.memory_space<vmem>>, vector<8x128xbf16>,
    %c8_i32_208 = arith.constant 8 : i32
    %c0_209 = arith.constant 0 : index
    %c0_210 = arith.constant 0 : index
    %902 = vector.load %arg13[%c0_209, %c0_210] : memref<64x256xbf16, #tpu.memory_space<vmem>>, vector<8x256xbf16>
    %c56 = arith.constant 56 : index
    %c0_211 = arith.constant 0 : index
    %903 = vector.load %arg13[%c56, %c0_211] : memref<64x256xbf16, #tpu.memory_space<vmem>>, vector<8x256xbf16>
    %904 = tpu.concatenate %902, %903 in 1 : vector<8x256xbf16>, vector<8x256xbf16> -> vector<8x512xbf16>
    %c0_212 = arith.constant 0 : index
    %c0_213 = arith.constant 0 : index
    %905 = vector.load %arg9[%c0_212, %c0_213] : memref<512x128xbf16, #tpu.memory_space<vmem>>, vector<512x128xbf16>
    %cst_214 = arith.constant dense<0.000000e+00> : vector<8x128xf32>
    %906 = tpu.matmul %904, %905, %cst_214 {dimension_numbers = #tpu.dot_dimension_numbers<[1], [0], [0], [1], [0, 0, 1, 1], [], []>} : vector<8x512xbf16>, vector<512x128xbf16>, vector<8x128xf32> -> vector<8x128xf32>
    %c0_215 = arith.constant 0 : index
    %c0_216 = arith.constant 0 : index
    %907 = vector.load %arg10[%c0_215, %c0_216] : memref<1x128xf32, #tpu.memory_space<vmem>>, vector<1x128xf32>
    %908 = vector.broadcast %907 : vector<1x128xf32> to vector<8x128xf32>
    %909 = arith.addf %906, %908 : vector<8x128xf32>
    %c0_217 = arith.constant 0 : index
    %c0_218 = arith.constant 0 : index
    %910 = vector.load %arg11[%c0_217, %c0_218] : memref<8x128xf32, #tpu.memory_space<vmem>>, vector<8x128xf32>
    tpu.vector_store %arg11[%c0_217, %c0_218], %909 {strides = array<i32>} : memref<8x128xf32, #tpu.memory_space<vmem>>, vector<8x128xf32>,
    return
  }
}

</mosaic_0001>

<bundles_post_ra>
// kernel: birnn_forward.1
= control target key start
LH: loop header
LB: loop body
LE: loop exit
PB: predicated region body
PF: predicated region fallthrough
CT: control target
= control target key end

     0   :  { %16 = vsyncpa [#allocation6], 0  ;;  %s12916_s0 = inlined_call_operand.vmem [shape: bf16[64,128], index: 0, kind: input, shape index: {}]   ;;  %s12917_s1 = inlined_call_operand.hbm [shape: bf16[128,1024], index: 1, kind: input, shape index: {}]   ;;  %s12918_s2 = inlined_call_operand.hbm [shape: bf16[128,512], index: 2, kind: input, shape index: {}]   ;;  %s12919_s3 = inlined_call_operand.hbm [shape: bf16[128,512], index: 3, kind: input, shape index: {}]   ;;  %s12920_s4 = inlined_call_operand.vmem [shape: f32[1,1024], index: 4, kind: input, shape index: {}]   ;;  %s12921_s5 = inlined_call_operand.hbm [shape: bf16[256,1024], index: 5, kind: input, shape index: {}]   ;;  %s12922_s6 = inlined_call_operand.hbm [shape: bf16[128,512], index: 6, kind: input, shape index: {}]   ;;  %s12923_s7 = inlined_call_operand.hbm [shape: bf16[128,512], index: 7, kind: input, shape index: {}]   ;;  %s12924_s8 = inlined_call_operand.vmem [shape: f32[1,1024], index: 8, kind: input, shape index: {}]   ;;  %s12925_s9 = inlined_call_operand.hbm [shape: bf16[512,128], index: 9, kind: input, shape index: {}]   ;;  %s12926_s10 = inlined_call_operand.vmem [shape: f32[1,128], index: 10, kind: input, shape index: {}]   ;;  %s12927_s11 = inlined_call_operand.vmem [shape: f32[8,128], index: 11, kind: output, shape index: {}]  }
   0x1   :  { %17 = vsyncpa [#allocation8], 0 }
   0x2   :  { %18 = vsyncpa [#allocation11], 0  ;;  %s39_s19 = sshll.u32 %s12918_s2, 4  ;;  %s40_s19 = int_to_ptr.hbm [resolvable:$true] %s39_s19 }
   0x3   :  { %19 = vsyncpa [#allocation14], 0  ;;  %s10113_s20 = smov [#allocation7]   ;;  %s10114_s22 = smov 256  }
   0x4   :  { %s41_s21 = sshll.u32 %s10113_s20, 4  ;;  %s10115_s23 = smov 16   ;;  %s42_s21 = int_to_ptr.vmem [resolvable:$true] %s41_s21 }
   0x5   :  { %47 = dma.hbm_to_vmem [thread:$0]  %s40_s19, 4096, %s42_s21, [#allocation8], %s10114_s22, %s10114_s22, %s10115_s23  }
   0x6   :  { %s67_s26 = sshll.u32 %s12921_s5, 4  ;;  %s10116_s27 = smov [#allocation10]   ;;  %s68_s26 = int_to_ptr.hbm [resolvable:$true] %s67_s26 }
   0x7   :  { %s69_s28 = sshll.u32 %s10116_s27, 4  ;;  %s93_s30 = sshll.u32 %s12923_s7, 4  ;;  %s70_s28 = int_to_ptr.vmem [resolvable:$true] %s69_s28  ;;  %s94_s30 = int_to_ptr.hbm [resolvable:$true] %s93_s30 }
   0x8   :  { %s10117_s12 = smov 512   ;;  %s10118_s13 = smov 32  }
   0x9   :  { %75 = dma.hbm_to_vmem [thread:$0]  %s68_s26, 16384, %s70_s28, [#allocation11], %s10117_s12, %s10117_s12, %s10118_s13  }
   0xa   :  { %s26_s16 = sshll.u32 %s12917_s1, 4  ;;  %s10119_s17 = smov [#allocation13]   ;;  %s27_s16 = int_to_ptr.hbm [resolvable:$true] %s26_s16 }
   0xb   :  { %s95_s18 = sshll.u32 %s10119_s17, 4  ;;  %s10120_s5 = smov [#allocation5]   ;;  %s96_s18 = int_to_ptr.vmem [resolvable:$true] %s95_s18 }
   0xc   :  { %101 = dma.hbm_to_vmem [thread:$0]  %s94_s30, 4096, %s96_s18, [#allocation14], %s10114_s22, %s10114_s22, %s10115_s23  }
   0xd   :  { %s28_s19 = sshll.u32 %s10120_s5, 4  ;;  %s52_s21 = sshll.u32 %s12919_s3, 4  ;;  %s29_s19 = int_to_ptr.vmem [resolvable:$true] %s28_s19  ;;  %s53_s21 = int_to_ptr.hbm [resolvable:$true] %s52_s21 }
   0xe   :  { %34 = dma.hbm_to_vmem [thread:$0]  %s27_s16, 8192, %s29_s19, [#allocation6], %s10117_s12, %s10117_s12, %s10118_s13  }
   0xf   :  { %s80_s1 = sshll.u32 %s12922_s6, 4  ;;  %s10121_s26 = smov [#allocation9]   ;;  %s81_s1 = int_to_ptr.hbm [resolvable:$true] %s80_s1 }
  0x10   :  { %s54_s27 = sshll.u32 %s10121_s26, 4  ;;  %s10122_s28 = smov [#allocation12]   ;;  %s55_s27 = int_to_ptr.vmem [resolvable:$true] %s54_s27 }
  0x11   :  { %60 = dma.hbm_to_vmem [thread:$0]  %s53_s21, 4096, %s55_s27, [#allocation8], %s10114_s22, %s10114_s22, %s10115_s23  }
  0x12   :  { %s82_s29 = sshll.u32 %s10122_s28, 4  ;;  %s108_s3 = sshll.u32 %s12925_s9, 4  ;;  %s83_s29 = int_to_ptr.vmem [resolvable:$true] %s82_s29  ;;  %s109_s3 = int_to_ptr.hbm [resolvable:$true] %s108_s3 }
  0x13   :  { %88 = dma.hbm_to_vmem [thread:$0]  %s81_s1, 4096, %s83_s29, [#allocation11], %s10114_s22, %s10114_s22, %s10115_s23  }
  0x14   :  { %s10123_s6 = smov [#allocation15]   ;;  %s10124_s13 = smov 64  }
  0x15   :  { %s110_s12 = sshll.u32 %s10123_s6, 4  ;;  %s10125_s14 = smov 4   ;;  %s111_s12 = int_to_ptr.vmem [resolvable:$true] %s110_s12 }
  0x16   :  { %116 = dma.hbm_to_vmem [thread:$0]  %s109_s3, 4096, %s111_s12, [#allocation14], %s10124_s13, %s10124_s13, %s10125_s14  }
  0x17   :  { %10105 = dma.done.wait [#allocation6], 8192  }
  0x18   :  { %10106 = vsyncadd [#allocation6], 4294959104 }
  0x19   :  { %10107 = dma.done.wait [#allocation8], 8192  }
  0x1a   :  { %10108 = vsyncadd [#allocation8], 4294959104 }
  0x1b   :  { %10109 = dma.done.wait [#allocation11], 20480  }
  0x1c   :  { %10110 = vsyncadd [#allocation11], 4294946816 }
  0x1d   :  { %10111 = dma.done.wait [#allocation14], 8192  }
  0x1e   :  { %10112 = vsyncadd [#allocation14], 4294959104  ;;  %v7736_v0 = vld [vmem:[#allocation5 + $0x1c0] sm:$0xf]  ;;  %v9106_v2 = vld [vmem:[#allocation5 + $0x1c4] sm:$0xf] }
  0x1f   :  { %v9110_v1 = vld [vmem:[#allocation5 + $0x1dc] sm:$0xf0]  ;;  %v7738_v4 = vld [vmem:[#allocation5 + $0x1e0] sm:$0xf0]  ;;  %v7744_v5 = vld [vmem:[#allocation5 + $0x1c8] sm:$0xf] }
  0x20   :  { %v7737_v3 = vor.u32 %v9110_v1, %v7736_v0  ;;  %v9111_v6 = vld [vmem:[#allocation5 + $0x1e4] sm:$0xf0]  ;;  %v7741_v7 = vor.u32 %v9106_v2, %v7738_v4  ;;  %v9107_v9 = vld [vmem:[#allocation5 + $0x1cc] sm:$0xf]  ;;  %v7704_v11 = vld [vmem:[#allocation5 + $0x180] sm:$0xf] }
  0x21   :  { %v7745_v8 = vor.u32 %v9111_v6, %v7744_v5  ;;  %v7746_v10 = vld [vmem:[#allocation5 + $0x1e8] sm:$0xf0]  ;;  %v9102_v13 = vld [vmem:[#allocation5 + $0x19c] sm:$0xf0]  ;;  %v9098_v14 = vld [vmem:[#allocation5 + $0x184] sm:$0xf] }
  0x22   :  { %582 = vmatpush.bf16.msra.mxu0 %v7737_v3  ;;  %v7749_v12 = vor.u32 %v9107_v9, %v7746_v10  ;;  %v7706_v15 = vld [vmem:[#allocation5 + $0x1a0] sm:$0xf0]  ;;  %611 = vmatpush.bf16.msra.mxu1 %v7741_v7  ;;  %v7705_v16 = vor.u32 %v9102_v13, %v7704_v11  ;;  %v7712_v18 = vld [vmem:[#allocation5 + $0x188] sm:$0xf]  ;;  %v9099_v20 = vld [vmem:[#allocation5 + $0x18c] sm:$0xf] }
  0x23   :  { %640 = vmatpush.bf16.msra.mxu2 %v7745_v8  ;;  %v7709_v17 = vor.u32 %v9098_v14, %v7706_v15  ;;  %v9103_v19 = vld [vmem:[#allocation5 + $0x1a4] sm:$0xf0]  ;;  %v7714_v22 = vld [vmem:[#allocation5 + $0x1a8] sm:$0xf0]  ;;  %v7672_v23 = vld [vmem:[#allocation5 + $0x140] sm:$0xf] }
  0x24   :  { %669 = vmatpush.bf16.msra.mxu3 %v7749_v12  ;;  %v7713_v21 = vor.u32 %v9103_v19, %v7712_v18  ;;  %v9094_v24 = vld [vmem:[#allocation5 + $0x15c] sm:$0xf0]  ;;  %v7717_v25 = vor.u32 %v9099_v20, %v7714_v22  ;;  %v9090_v26 = vld [vmem:[#allocation5 + $0x144] sm:$0xf]  ;;  %v7680_v28 = vld [vmem:[#allocation5 + $0x148] sm:$0xf] }
  0x25   :  { %v7674_v27 = vld [vmem:[#allocation5 + $0x160] sm:$0xf0]  ;;  %v7673_v29 = vor.u32 %v9094_v24, %v7672_v23  ;;  %v9095_v30 = vld [vmem:[#allocation5 + $0x164] sm:$0xf0]  ;;  %v9091_v31 = vld [vmem:[#allocation5 + $0x14c] sm:$0xf] }
  0x26   :  { %583 = vmatpush.bf16.msra.mxu0 %v7705_v16  ;;  %v7682_v32 = vld [vmem:[#allocation5 + $0x168] sm:$0xf0]  ;;  %612 = vmatpush.bf16.msra.mxu1 %v7709_v17  ;;  %v7677_v33 = vor.u32 %v9090_v26, %v7674_v27  ;;  %v7681_v34 = vor.u32 %v9095_v30, %v7680_v28  ;;  %v7640_v35 = vld [vmem:[#allocation5 + $0x100] sm:$0xf]  ;;  %v9082_v37 = vld [vmem:[#allocation5 + $0x104] sm:$0xf] }
  0x27   :  { %641 = vmatpush.bf16.msra.mxu2 %v7713_v21  ;;  %v9086_v36 = vld [vmem:[#allocation5 + $0x11c] sm:$0xf0]  ;;  %v7685_v38 = vor.u32 %v9091_v31, %v7682_v32  ;;  %v7642_v39 = vld [vmem:[#allocation5 + $0x120] sm:$0xf0]  ;;  %v7648_v40 = vld [vmem:[#allocation5 + $0x108] sm:$0xf] }
  0x28   :  { %670 = vmatpush.bf16.msra.mxu3 %v7717_v25  ;;  %v9087_v41 = vld [vmem:[#allocation5 + $0x124] sm:$0xf0]  ;;  %v9083_v42 = vld [vmem:[#allocation5 + $0x10c] sm:$0xf]  ;;  %v7641_v44 = vor.u32 %v9086_v36, %v7640_v35  ;;  %v7645_v45 = vor.u32 %v9082_v37, %v7642_v39  ;;  %v7608_v47 = vld [vmem:[#allocation5 + $0xc0] sm:$0xf] }
  0x29   :  { %v7650_v43 = vld [vmem:[#allocation5 + $0x128] sm:$0xf0]  ;;  %v7649_v46 = vor.u32 %v9087_v41, %v7648_v40  ;;  %v9078_v48 = vld [vmem:[#allocation5 + $0xdc] sm:$0xf0]  ;;  %v9074_v49 = vld [vmem:[#allocation5 + $0xc4] sm:$0xf] }
  0x2a   :  { %584 = vmatpush.bf16.msra.mxu0 %v7673_v29  ;;  %613 = vmatpush.bf16.msra.mxu1 %v7677_v33  ;;  %v7653_v50 = vor.u32 %v9083_v42, %v7650_v43  ;;  %v7610_v51 = vld [vmem:[#allocation5 + $0xe0] sm:$0xf0]  ;;  %v7616_v52 = vld [vmem:[#allocation5 + $0xc8] sm:$0xf]  ;;  %v9075_v54 = vld [vmem:[#allocation5 + $0xcc] sm:$0xf]  ;;  %v7609_v56 = vor.u32 %v9078_v48, %v7608_v47 }
  0x2b   :  { %642 = vmatpush.bf16.msra.mxu2 %v7681_v34  ;;  %v9079_v53 = vld [vmem:[#allocation5 + $0xe4] sm:$0xf0]  ;;  %v7618_v55 = vld [vmem:[#allocation5 + $0xe8] sm:$0xf0]  ;;  %v7613_v57 = vor.u32 %v9074_v49, %v7610_v51  ;;  %v7576_v59 = vld [vmem:[#allocation5 + $0x80] sm:$0xf] }
  0x2c   :  { %671 = vmatpush.bf16.msra.mxu3 %v7685_v38  ;;  %v7617_v58 = vor.u32 %v9079_v53, %v7616_v52  ;;  %v9070_v60 = vld [vmem:[#allocation5 + $0x9c] sm:$0xf0]  ;;  %v9066_v61 = vld [vmem:[#allocation5 + $0x84] sm:$0xf]  ;;  %v7621_v62 = vor.u32 %v9075_v54, %v7618_v55  ;;  %v7584_v0 = vld [vmem:[#allocation5 + $0x88] sm:$0xf] }
  0x2d   :  { %v7578_v63 = vld [vmem:[#allocation5 + $0xa0] sm:$0xf0]  ;;  %v9071_v1 = vld [vmem:[#allocation5 + $0xa4] sm:$0xf0]  ;;  %v9067_v2 = vld [vmem:[#allocation5 + $0x8c] sm:$0xf]  ;;  %v7577_v4 = vor.u32 %v9070_v60, %v7576_v59 }
  0x2e   :  { %585 = vmatpush.bf16.msra.mxu0 %v7641_v44  ;;  %614 = vmatpush.bf16.msra.mxu1 %v7645_v45  ;;  %v7586_v3 = vld [vmem:[#allocation5 + $0xa8] sm:$0xf0]  ;;  %v7581_v5 = vor.u32 %v9066_v61, %v7578_v63  ;;  %v7585_v6 = vor.u32 %v9071_v1, %v7584_v0  ;;  %v7544_v7 = vld [vmem:[#allocation5 + $0x40] sm:$0xf]  ;;  %v9058_v9 = vld [vmem:[#allocation5 + $0x44] sm:$0xf] }
  0x2f   :  { %643 = vmatpush.bf16.msra.mxu2 %v7649_v46  ;;  %v9062_v8 = vld [vmem:[#allocation5 + $0x5c] sm:$0xf0]  ;;  %v7589_v10 = vor.u32 %v9067_v2, %v7586_v3  ;;  %v7546_v11 = vld [vmem:[#allocation5 + $0x60] sm:$0xf0]  ;;  %v7552_v12 = vld [vmem:[#allocation5 + $0x48] sm:$0xf] }
  0x30   :  { %672 = vmatpush.bf16.msra.mxu3 %v7653_v50  ;;  %v9063_v13 = vld [vmem:[#allocation5 + $0x64] sm:$0xf0]  ;;  %v9059_v14 = vld [vmem:[#allocation5 + $0x4c] sm:$0xf]  ;;  %v7545_v16 = vor.u32 %v9062_v8, %v7544_v7  ;;  %v7512_v17 = vld [vmem:[#allocation5] sm:$0xf]  ;;  %v7549_v18 = vor.u32 %v9058_v9, %v7546_v11 }
  0x31   :  { %v7554_v15 = vld [vmem:[#allocation5 + $0x68] sm:$0xf0]  ;;  %v7553_v19 = vor.u32 %v9063_v13, %v7552_v12  ;;  %v9054_v20 = vld [vmem:[#allocation5 + $0x1c] sm:$0xf0]  ;;  %v9050_v21 = vld [vmem:[#allocation5 + $0x4] sm:$0xf] }
  0x32   :  { %586 = vmatpush.bf16.msra.mxu0 %v7609_v56  ;;  %615 = vmatpush.bf16.msra.mxu1 %v7613_v57  ;;  %v7514_v22 = vld [vmem:[#allocation5 + $0x20] sm:$0xf0]  ;;  %v7557_v23 = vor.u32 %v9059_v14, %v7554_v15  ;;  %v7520_v24 = vld [vmem:[#allocation5 + $0x8] sm:$0xf]  ;;  %v9051_v26 = vld [vmem:[#allocation5 + $0xc] sm:$0xf]  ;;  %v7513_v30 = vor.u32 %v9054_v20, %v7512_v17 }
  0x33   :  { %644 = vmatpush.bf16.msra.mxu2 %v7617_v58  ;;  %v9055_v25 = vld [vmem:[#allocation5 + $0x24] sm:$0xf0]  ;;  %v7522_v27 = vld [vmem:[#allocation5 + $0x28] sm:$0xf0]  ;;  %v7752_v28 = vld [vmem:[#allocation5 + $0x1d0] sm:$0xf]  ;;  %v7517_v33 = vor.u32 %v9050_v21, %v7514_v22 }
  0x34   :  { %673 = vmatpush.bf16.msra.mxu3 %v7621_v62  ;;  %v9112_v29 = vld [vmem:[#allocation5 + $0x1ec] sm:$0xf0]  ;;  %v9108_v31 = vld [vmem:[#allocation5 + $0x1d4] sm:$0xf]  ;;  %v7521_v34 = vor.u32 %v9055_v25, %v7520_v24  ;;  %v10223_v35 = vld [vmem:[%s12916_s0] sm:$0xff]  ;;  %v7525_v36 = vor.u32 %v9051_v26, %v7522_v27 }
  0x35   :  { %v7754_v32 = vld [vmem:[#allocation5 + $0x1f0] sm:$0xf0]  ;;  %v7753_v37 = vor.u32 %v9112_v29, %v7752_v28  ;;  %v7760_v38 = vld [vmem:[#allocation5 + $0x1d8] sm:$0xf]  ;;  %v7720_v40 = vld [vmem:[#allocation5 + $0x190] sm:$0xf] }
  0x36   :  { %587 = vmatpush.bf16.msra.mxu0 %v7577_v4  ;;  %616 = vmatpush.bf16.msra.mxu1 %v7581_v5  ;;  %v9113_v39 = vld [vmem:[#allocation5 + $0x1f4] sm:$0xf0]  ;;  %v7757_v41 = vor.u32 %v9108_v31, %v7754_v32  ;;  %v9104_v42 = vld [vmem:[#allocation5 + $0x1ac] sm:$0xf0]  ;;  %v9109_v43 = vld [vmem:[#allocation5 + $0x1dc] sm:$0xf] }
  0x37   :  { %645 = vmatpush.bf16.msra.mxu2 %v7585_v6  ;;  %v7762_v44 = vld [vmem:[#allocation5 + $0x1f8] sm:$0xf0]  ;;  %v9100_v45 = vld [vmem:[#allocation5 + $0x194] sm:$0xf]  ;;  %v7761_v47 = vor.u32 %v9113_v39, %v7760_v38  ;;  %v7721_v48 = vor.u32 %v9104_v42, %v7720_v40  ;;  %v7728_v49 = vld [vmem:[#allocation5 + $0x198] sm:$0xf] }
  0x38   :  { %674 = vmatpush.bf16.msra.mxu3 %v7589_v10  ;;  %v7722_v46 = vld [vmem:[#allocation5 + $0x1b0] sm:$0xf0]  ;;  %v9105_v50 = vld [vmem:[#allocation5 + $0x1b4] sm:$0xf0]  ;;  %v7765_v51 = vor.u32 %v9109_v43, %v7762_v44  ;;  %v7688_v52 = vld [vmem:[#allocation5 + $0x150] sm:$0xf] }
  0x39   :  { %v7725_v53 = vor.u32 %v9100_v45, %v7722_v46  ;;  %v9096_v54 = vld [vmem:[#allocation5 + $0x16c] sm:$0xf0]  ;;  %v9101_v55 = vld [vmem:[#allocation5 + $0x19c] sm:$0xf]  ;;  %v9092_v57 = vld [vmem:[#allocation5 + $0x154] sm:$0xf]  ;;  %v7729_v59 = vor.u32 %v9105_v50, %v7728_v49 }
  0x3a   :  { %588 = vmatpush.bf16.msra.mxu0 %v7545_v16  ;;  %617 = vmatpush.bf16.msra.mxu1 %v7549_v18  ;;  %v7730_v56 = vld [vmem:[#allocation5 + $0x1b8] sm:$0xf0]  ;;  %v7690_v58 = vld [vmem:[#allocation5 + $0x170] sm:$0xf0]  ;;  %v7689_v60 = vor.u32 %v9096_v54, %v7688_v52  ;;  %v7696_v61 = vld [vmem:[#allocation5 + $0x158] sm:$0xf] }
  0x3b   :  { %646 = vmatpush.bf16.msra.mxu2 %v7553_v19  ;;  %v9097_v62 = vld [vmem:[#allocation5 + $0x174] sm:$0xf0]  ;;  %v7733_v63 = vor.u32 %v9101_v55, %v7730_v56  ;;  %v7656_v0 = vld [vmem:[#allocation5 + $0x110] sm:$0xf]  ;;  %v7693_v1 = vor.u32 %v9092_v57, %v7690_v58  ;;  %v9093_v3 = vld [vmem:[#allocation5 + $0x15c] sm:$0xf] }
  0x3c   :  { %675 = vmatpush.bf16.msra.mxu3 %v7557_v23  ;;  %v9088_v2 = vld [vmem:[#allocation5 + $0x12c] sm:$0xf0]  ;;  %v7698_v4 = vld [vmem:[#allocation5 + $0x178] sm:$0xf0]  ;;  %v9084_v5 = vld [vmem:[#allocation5 + $0x114] sm:$0xf]  ;;  %v7697_v7 = vor.u32 %v9097_v62, %v7696_v61 }
  0x3d   :  { %v7658_v6 = vld [vmem:[#allocation5 + $0x130] sm:$0xf0]  ;;  %v7657_v8 = vor.u32 %v9088_v2, %v7656_v0  ;;  %v7664_v9 = vld [vmem:[#allocation5 + $0x118] sm:$0xf]  ;;  %v7701_v11 = vor.u32 %v9093_v3, %v7698_v4  ;;  %v7624_v12 = vld [vmem:[#allocation5 + $0xd0] sm:$0xf] }
  0x3e   :  { %589 = vmatpush.bf16.msra.mxu0 %v7513_v30  ;;  %618 = vmatpush.bf16.msra.mxu1 %v7517_v33  ;;  %v9089_v10 = vld [vmem:[#allocation5 + $0x134] sm:$0xf0]  ;;  %v7661_v13 = vor.u32 %v9084_v5, %v7658_v6  ;;  %v9080_v14 = vld [vmem:[#allocation5 + $0xec] sm:$0xf0]  ;;  %v9085_v15 = vld [vmem:[#allocation5 + $0x11c] sm:$0xf] }
  0x3f   :  { %647 = vmatpush.bf16.msra.mxu2 %v7521_v34  ;;  %v7666_v16 = vld [vmem:[#allocation5 + $0x138] sm:$0xf0]  ;;  %v9076_v17 = vld [vmem:[#allocation5 + $0xd4] sm:$0xf]  ;;  %v10232_v19 = vld [vmem:[%s12916_s0 + $0x8] sm:$0xff]  ;;  %v7665_v20 = vor.u32 %v9089_v10, %v7664_v9  ;;  %v7625_v21 = vor.u32 %v9080_v14, %v7624_v12 }
  0x40   :  { %676 = vmatpush.bf16.msra.mxu3 %v7525_v36  ;;  %v7626_v18 = vld [vmem:[#allocation5 + $0xf0] sm:$0xf0]  ;;  %v7632_v22 = vld [vmem:[#allocation5 + $0xd8] sm:$0xf]  ;;  %v7669_v24 = vor.u32 %v9085_v15, %v7666_v16  ;;  %v7592_v25 = vld [vmem:[#allocation5 + $0x90] sm:$0xf] }
  0x41   :  { %590 = vmatmul.bf16.vlgmr.msra.gmra.mxu0 %v10223_v35  ;;  %619 = vmatmul.bf16.vlgmr.msra.gmra.mxu1 %v10223_v35  ;;  %v9081_v23 = vld [vmem:[#allocation5 + $0xf4] sm:$0xf0]  ;;  %v7629_v26 = vor.u32 %v9076_v17, %v7626_v18  ;;  %v9072_v27 = vld [vmem:[#allocation5 + $0xac] sm:$0xf0]  ;;  %v9077_v28 = vld [vmem:[#allocation5 + $0xdc] sm:$0xf] }
  0x42   :  { %698 = vmatpush.bf16.msrb.mxu0 %v7753_v37  ;;  %727 = vmatpush.bf16.msrb.mxu1 %v7757_v41  ;;  %v7634_v29 = vld [vmem:[#allocation5 + $0xf8] sm:$0xf0]  ;;  %v9068_v30 = vld [vmem:[#allocation5 + $0x94] sm:$0xf]  ;;  %v7633_v32 = vor.u32 %v9081_v23, %v7632_v22  ;;  %v7593_v33 = vor.u32 %v9072_v27, %v7592_v25  ;;  %v7600_v34 = vld [vmem:[#allocation5 + $0x98] sm:$0xf] }
  0x43   :  { %648 = vmatmul.bf16.vlgmr.msra.gmra.mxu2 %v10223_v35  ;;  %677 = vmatmul.bf16.vlgmr.msra.gmra.mxu3 %v10223_v35  ;;  %v7594_v31 = vld [vmem:[#allocation5 + $0xb0] sm:$0xf0]  ;;  %v9073_v36 = vld [vmem:[#allocation5 + $0xb4] sm:$0xf0]  ;;  %v7637_v37 = vor.u32 %v9077_v28, %v7634_v29  ;;  %v7560_v40 = vld [vmem:[#allocation5 + $0x50] sm:$0xf] }
  0x44   :  { %756 = vmatpush.bf16.msrb.mxu2 %v7761_v47  ;;  %785 = vmatpush.bf16.msrb.mxu3 %v7765_v51  ;;  %v7597_v38 = vor.u32 %v9068_v30, %v7594_v31  ;;  %v7601_v39 = vor.u32 %v9073_v36, %v7600_v34  ;;  %v9064_v41 = vld [vmem:[#allocation5 + $0x6c] sm:$0xf0]  ;;  %v9060_v42 = vld [vmem:[#allocation5 + $0x54] sm:$0xf]  ;;  %v7568_v45 = vld [vmem:[#allocation5 + $0x58] sm:$0xf] }
  0x45   :  { %v7561_v43 = vor.u32 %v9064_v41, %v7560_v40  ;;  %v7562_v44 = vld [vmem:[#allocation5 + $0x70] sm:$0xf0]  ;;  %v9065_v46 = vld [vmem:[#allocation5 + $0x74] sm:$0xf0]  ;;  %v7602_v49 = vld [vmem:[#allocation5 + $0xb8] sm:$0xf0] }
  0x46   :  { %699 = vmatpush.bf16.msrb.mxu0 %v7721_v48  ;;  %728 = vmatpush.bf16.msrb.mxu1 %v7725_v53  ;;  %v7565_v47 = vor.u32 %v9060_v42, %v7562_v44  ;;  %v9069_v48 = vld [vmem:[#allocation5 + $0x9c] sm:$0xf]  ;;  %v7528_v50 = vld [vmem:[#allocation5 + $0x10] sm:$0xf]  ;;  %v9052_v53 = vld [vmem:[#allocation5 + $0x14] sm:$0xf]  ;;  %v7569_v55 = vor.u32 %v9065_v46, %v7568_v45 }
  0x47   :  { %v7605_v51 = vor.u32 %v9069_v48, %v7602_v49  ;;  %v9056_v52 = vld [vmem:[#allocation5 + $0x2c] sm:$0xf0]  ;;  %v7530_v54 = vld [vmem:[#allocation5 + $0x30] sm:$0xf0]  ;;  %v9061_v56 = vld [vmem:[#allocation5 + $0x5c] sm:$0xf] }
  0x48   :  { %757 = vmatpush.bf16.msrb.mxu2 %v7729_v59  ;;  %786 = vmatpush.bf16.msrb.mxu3 %v7733_v63  ;;  %v7570_v57 = vld [vmem:[#allocation5 + $0x78] sm:$0xf0]  ;;  %v7529_v58 = vor.u32 %v9056_v52, %v7528_v50  ;;  %v9057_v61 = vld [vmem:[#allocation5 + $0x34] sm:$0xf0]  ;;  %v7533_v62 = vor.u32 %v9052_v53, %v7530_v54  ;;  %v10241_v3 = vld [vmem:[%s12916_s0 + $0x10] sm:$0xff] }
  0x49   :  { %v7573_v59 = vor.u32 %v9061_v56, %v7570_v57  ;;  %v9053_v63 = vld [vmem:[#allocation5 + $0x1c] sm:$0xf]  ;;  %v7880_v4 = vld [vmem:[#allocation7 + $0xe0] sm:$0xf]  ;;  %v9144_v5 = vld [vmem:[#allocation7 + $0xec] sm:$0xf0] }
  0x4a   :  { %700 = vmatpush.bf16.msrb.mxu0 %v7689_v60  ;;  %729 = vmatpush.bf16.msrb.mxu1 %v7693_v1  ;;  %v7536_v60 = vld [vmem:[#allocation5 + $0x18] sm:$0xf]  ;;  %v7538_v0 = vld [vmem:[#allocation5 + $0x38] sm:$0xf0]  ;;  %v9142_v6 = vld [vmem:[#allocation7 + $0xe4] sm:$0xf] }
  0x4b   :  { %v7537_v1 = vor.u32 %v9057_v61, %v7536_v60  ;;  %v7541_v2 = vor.u32 %v9053_v63, %v7538_v0  ;;  %v7888_v9 = vld [vmem:[#allocation7 + $0xe8] sm:$0xf]  ;;  %v9145_v10 = vld [vmem:[#allocation7 + $0xf4] sm:$0xf0]  ;;  %v9140_v14 = vld [vmem:[#allocation7 + $0xcc] sm:$0xf0] }
  0x4c   :  { %758 = vmatpush.bf16.msrb.mxu2 %v7697_v7  ;;  %787 = vmatpush.bf16.msrb.mxu3 %v7701_v11  ;;  %v10247_v7 = vor.u32 %v9144_v5, %v7880_v4  ;;  %v10251_v12 = vor.u32 %v9145_v10, %v7888_v9  ;;  %v9138_v15 = vld [vmem:[#allocation7 + $0xc4] sm:$0xf]  ;;  %v7866_v17 = vld [vmem:[#allocation7 + $0xd0] sm:$0xf0]  ;;  %v7872_v18 = vld [vmem:[#allocation7 + $0xc8] sm:$0xf] }
  0x4d   :  { %v9143_v23 = vld [vmem:[#allocation7 + $0xec] sm:$0xf]  ;;  %v7848_v27 = vld [vmem:[#allocation7 + $0xa0] sm:$0xf]  ;;  %v9136_v28 = vld [vmem:[#allocation7 + $0xac] sm:$0xf0] }
  0x4e   :  { %701 = vmatpush.bf16.msrb.mxu0 %v7657_v8  ;;  %730 = vmatpush.bf16.msrb.mxu1 %v7661_v13  ;;  %13195 = vst [vmem:[#allocation20_spill] sm:$0xff] %v10247_v7  ;;  %v7882_v8 = vld [vmem:[#allocation7 + $0xf0] sm:$0xf0]  ;;  %v7864_v13 = vld [vmem:[#allocation7 + $0xc0] sm:$0xf]  ;;  %v10277_v30 = vor.u32 %v9136_v28, %v7848_v27 }
  0x4f   :  { %v10249_v11 = vor.u32 %v9142_v6, %v7882_v8  ;;  %13196 = vst [vmem:[#allocation21_spill] sm:$0xff] %v10251_v12  ;;  %v10254_v16 = vor.u32 %v9140_v14, %v7864_v13  ;;  %v9134_v29 = vld [vmem:[#allocation7 + $0xa4] sm:$0xf]  ;;  %v7850_v31 = vld [vmem:[#allocation7 + $0xb0] sm:$0xf0] }
  0x50   :  { %759 = vmatpush.bf16.msrb.mxu2 %v7665_v20  ;;  %788 = vmatpush.bf16.msrb.mxu3 %v7669_v24  ;;  %v9141_v20 = vld [vmem:[#allocation7 + $0xd4] sm:$0xf0]  ;;  %v7890_v24 = vld [vmem:[#allocation7 + $0xf8] sm:$0xf0]  ;;  %v10279_v34 = vor.u32 %v9134_v29, %v7850_v31  ;;  %v9132_v41 = vld [vmem:[#allocation7 + $0x8c] sm:$0xf0] }
  0x51   :  { %595 = vmatmul.bf16.gmra.mxu0 %v10232_v19  ;;  %624 = vmatmul.bf16.gmra.mxu1 %v10232_v19  ;;  %v10260_v22 = vor.u32 %v9141_v20, %v7872_v18  ;;  %v10262_v25 = vor.u32 %v9143_v23, %v7890_v24  ;;  %v9130_v42 = vld [vmem:[#allocation7 + $0x84] sm:$0xf]  ;;  %v9135_v46 = vld [vmem:[#allocation7 + $0xac] sm:$0xf]  ;;  %v7840_v48 = vld [vmem:[#allocation7 + $0x88] sm:$0xf] }
  0x52   :  { %702 = vmatpush.bf16.msrb.mxu0 %v7625_v21  ;;  %731 = vmatpush.bf16.msrb.mxu1 %v7629_v26  ;;  %v10258_v21 = vor.u32 %v9138_v15, %v7866_v17  ;;  %v10271_v26 = vld [vmem:[%s12916_s0 + $0x18] sm:$0xff]  ;;  %v9131_v52 = vld [vmem:[#allocation7 + $0x8c] sm:$0xf]  ;;  %v9128_v56 = vld [vmem:[#allocation7 + $0x6c] sm:$0xf0] }
  0x53   :  { %653 = vmatmul.bf16.gmra.mxu2 %v10232_v19  ;;  %682 = vmatmul.bf16.gmra.mxu3 %v10232_v19  ;;  %v9133_v50 = vld [vmem:[#allocation7 + $0x94] sm:$0xf0]  ;;  %v7842_v53 = vld [vmem:[#allocation7 + $0x98] sm:$0xf0]  ;;  %v9126_v57 = vld [vmem:[#allocation7 + $0x64] sm:$0xf] }
  0x54   :  { %760 = vmatpush.bf16.msrb.mxu2 %v7633_v32  ;;  %789 = vmatpush.bf16.msrb.mxu3 %v7637_v37  ;;  %13197 = vst [vmem:[#allocation22_spill] sm:$0xff] %v10258_v21  ;;  %v7856_v32 = vld [vmem:[#allocation7 + $0xa8] sm:$0xf]  ;;  %v9139_v37 = vld [vmem:[#allocation7 + $0xcc] sm:$0xf]  ;;  %v10302_v54 = vor.u32 %v9131_v52, %v7842_v53 }
  0x55   :  { %v7824_v60 = vld [vmem:[#allocation7 + $0x68] sm:$0xf]  ;;  %v9129_v61 = vld [vmem:[#allocation7 + $0x74] sm:$0xf0]  ;;  %v9127_v0 = vld [vmem:[#allocation7 + $0x6c] sm:$0xf] }
  0x56   :  { %703 = vmatpush.bf16.msrb.mxu0 %v7593_v33  ;;  %732 = vmatpush.bf16.msrb.mxu1 %v7597_v38  ;;  %v9137_v33 = vld [vmem:[#allocation7 + $0xb4] sm:$0xf0]  ;;  %v7874_v38 = vld [vmem:[#allocation7 + $0xd8] sm:$0xf0]  ;;  %v10312_v63 = vor.u32 %v9129_v61, %v7824_v60  ;;  %v9124_v4 = vld [vmem:[#allocation7 + $0x4c] sm:$0xf0] }
  0x57   :  { %v10281_v36 = vor.u32 %v9137_v33, %v7856_v32  ;;  %v10284_v40 = vor.u32 %v9139_v37, %v7874_v38  ;;  %v9122_v5 = vld [vmem:[#allocation7 + $0x44] sm:$0xf]  ;;  %v7802_v6 = vld [vmem:[#allocation7 + $0x50] sm:$0xf0]  ;;  %v7808_v10 = vld [vmem:[#allocation7 + $0x48] sm:$0xf] }
  0x58   :  { %761 = vmatpush.bf16.msrb.mxu2 %v7601_v39  ;;  %790 = vmatpush.bf16.msrb.mxu3 %v7605_v51  ;;  %v7832_v39 = vld [vmem:[#allocation7 + $0x80] sm:$0xf]  ;;  %v10295_v51 = vor.u32 %v9133_v50, %v7840_v48  ;;  %v10321_v9 = vor.u32 %v9122_v5, %v7802_v6  ;;  %v9125_v13 = vld [vmem:[#allocation7 + $0x54] sm:$0xf0]  ;;  %v9123_v14 = vld [vmem:[#allocation7 + $0x4c] sm:$0xf] }
  0x59   :  { %13198 = vst [vmem:[#allocation23_spill] sm:$0xff] %v10284_v40  ;;  %v10288_v44 = vor.u32 %v9132_v41, %v7832_v39  ;;  %v10324_v15 = vor.u32 %v9125_v13, %v7808_v10  ;;  %v7810_v17 = vld [vmem:[#allocation7 + $0x58] sm:$0xf0]  ;;  %v7784_v18 = vld [vmem:[#allocation7 + $0x20] sm:$0xf] }
  0x5a   :  { %704 = vmatpush.bf16.msrb.mxu0 %v7561_v43  ;;  %733 = vmatpush.bf16.msrb.mxu1 %v7565_v47  ;;  %v7834_v43 = vld [vmem:[#allocation7 + $0x90] sm:$0xf0]  ;;  %v7858_v47 = vld [vmem:[#allocation7 + $0xb8] sm:$0xf0]  ;;  %v9120_v20 = vld [vmem:[#allocation7 + $0x2c] sm:$0xf0]  ;;  %v10326_v23 = vor.u32 %v9123_v14, %v7810_v17 }
  0x5b   :  { %v10290_v45 = vor.u32 %v9130_v42, %v7834_v43  ;;  %v10293_v49 = vor.u32 %v9135_v46, %v7858_v47  ;;  %v9118_v24 = vld [vmem:[#allocation7 + $0x24] sm:$0xf]  ;;  %v7786_v27 = vld [vmem:[#allocation7 + $0x30] sm:$0xf0]  ;;  %v7792_v28 = vld [vmem:[#allocation7 + $0x28] sm:$0xf]  ;;  %v10329_v29 = vor.u32 %v9120_v20, %v7784_v18 }
  0x5c   :  { %762 = vmatpush.bf16.msrb.mxu2 %v7569_v55  ;;  %791 = vmatpush.bf16.msrb.mxu3 %v7573_v59  ;;  %v7816_v55 = vld [vmem:[#allocation7 + $0x60] sm:$0xf]  ;;  %v7818_v59 = vld [vmem:[#allocation7 + $0x70] sm:$0xf0]  ;;  %v9121_v31 = vld [vmem:[#allocation7 + $0x34] sm:$0xf0]  ;;  %v10333_v37 = vor.u32 %v9118_v24, %v7786_v27 }
  0x5d   :  { %v9119_v32 = vld [vmem:[#allocation7 + $0x2c] sm:$0xf]  ;;  %v7794_v33 = vld [vmem:[#allocation7 + $0x38] sm:$0xf0]  ;;  %v10335_v38 = vor.u32 %v9121_v31, %v7792_v28  ;;  %v7768_v41 = vld [vmem:[#allocation7] sm:$0xf] }
  0x5e   :  { %705 = vmatpush.bf16.msrb.mxu0 %v7529_v58  ;;  %734 = vmatpush.bf16.msrb.mxu1 %v7533_v62  ;;  %v10307_v58 = vor.u32 %v9128_v56, %v7816_v55  ;;  %v10310_v62 = vor.u32 %v9126_v57, %v7818_v59  ;;  %v10338_v39 = vor.u32 %v9119_v32, %v7794_v33  ;;  %v9116_v42 = vld [vmem:[#allocation7 + $0xc] sm:$0xf0]  ;;  %v9114_v43 = vld [vmem:[#allocation7 + $0x4] sm:$0xf]  ;;  %v7770_v47 = vld [vmem:[#allocation7 + $0x10] sm:$0xf0] }
  0x5f   :  { %v10345_v46 = vor.u32 %v9116_v42, %v7768_v41  ;;  %v7776_v48 = vld [vmem:[#allocation7 + $0x8] sm:$0xf]  ;;  %v9117_v50 = vld [vmem:[#allocation7 + $0x14] sm:$0xf0]  ;;  %v10349_v52 = vor.u32 %v9114_v43, %v7770_v47  ;;  %v9115_v55 = vld [vmem:[#allocation7 + $0xc] sm:$0xf] }
  0x60   :  { %763 = vmatpush.bf16.msrb.mxu2 %v7537_v1  ;;  %792 = vmatpush.bf16.msrb.mxu3 %v7541_v2  ;;  %v7826_v1 = vld [vmem:[#allocation7 + $0x78] sm:$0xf0]  ;;  %v7800_v2 = vld [vmem:[#allocation7 + $0x40] sm:$0xf]  ;;  %v10351_v53 = vor.u32 %v9117_v50, %v7776_v48  ;;  %v9176_v60 = vld [vmem:[#allocation9 + $0xec] sm:$0xf0] }
  0x61   :  { %600 = vmatmul.bf16.gmra.mxu0 %v10241_v3  ;;  %629 = vmatmul.bf16.gmra.mxu1 %v10241_v3  ;;  %v10319_v8 = vor.u32 %v9124_v4, %v7800_v2  ;;  %13199 = vst [vmem:[#allocation24_spill] sm:$0xff] %v10349_v52  ;;  %v7778_v56 = vld [vmem:[#allocation7 + $0x18] sm:$0xf0]  ;;  %v8008_v57 = vld [vmem:[#allocation9 + $0xe0] sm:$0xf] }
  0x62   :  { %1111 = vmatpush.bf16.msra.mxu0 %v10247_v7  ;;  %1124 = vmatpush.bf16.msra.mxu1 %v10249_v11  ;;  %13200 = vst [vmem:[#allocation25_spill] sm:$0xff] %v10351_v53  ;;  %v10355_v59 = vor.u32 %v9115_v55, %v7778_v56  ;;  %v9174_v61 = vld [vmem:[#allocation9 + $0xe4] sm:$0xf]  ;;  %v8016_v4 = vld [vmem:[#allocation9 + $0xe8] sm:$0xf] }
  0x63   :  { %658 = vmatmul.bf16.gmra.mxu2 %v10241_v3  ;;  %687 = vmatmul.bf16.gmra.mxu3 %v10241_v3  ;;  %v9177_v5 = vld [vmem:[#allocation9 + $0xf4] sm:$0xf0]  ;;  %v9175_v6 = vld [vmem:[#allocation9 + $0xec] sm:$0xf]  ;;  %v8018_v10 = vld [vmem:[#allocation9 + $0xf8] sm:$0xf0] }
  0x64   :  { %1137 = vmatpush.bf16.msra.mxu2 %v10251_v12  ;;  %1150 = vmatpush.bf16.msra.mxu3 %v10262_v25  ;;  %13201 = vst [vmem:[#allocation26_spill] sm:$0xff] %v10355_v59  ;;  %v7992_v13 = vld [vmem:[#allocation9 + $0xc0] sm:$0xf]  ;;  %v9172_v14 = vld [vmem:[#allocation9 + $0xcc] sm:$0xf0]  ;;  %v10368_v17 = vor.u32 %v9175_v6, %v8018_v10 }
  0x65   :  { %v10370_v18 = vor.u32 %v9172_v14, %v7992_v13  ;;  %v9170_v20 = vld [vmem:[#allocation9 + $0xc4] sm:$0xf]  ;;  %v7994_v24 = vld [vmem:[#allocation9 + $0xd0] sm:$0xf0]  ;;  %v8000_v27 = vld [vmem:[#allocation9 + $0xc8] sm:$0xf] }
  0x66   :  { %1112 = vmatpush.bf16.msra.mxu0 %v10254_v16  ;;  %1125 = vmatpush.bf16.msra.mxu1 %v10258_v21  ;;  %13205 = vst [vmem:[#allocation30_spill] sm:$0xff] %v10368_v17  ;;  %v10373_v28 = vor.u32 %v9170_v20, %v7994_v24  ;;  %v9173_v31 = vld [vmem:[#allocation9 + $0xd4] sm:$0xf0]  ;;  %v9171_v32 = vld [vmem:[#allocation9 + $0xcc] sm:$0xf] }
  0x67   :  { %13206 = vst [vmem:[#allocation31_spill] sm:$0xff] %v10370_v18  ;;  %v8002_v33 = vld [vmem:[#allocation9 + $0xd8] sm:$0xf0]  ;;  %v10376_v41 = vor.u32 %v9173_v31, %v8000_v27  ;;  %v7976_v43 = vld [vmem:[#allocation9 + $0xa0] sm:$0xf] }
  0x68   :  { %1138 = vmatpush.bf16.msra.mxu2 %v10260_v22  ;;  %1151 = vmatpush.bf16.msra.mxu3 %v10284_v40  ;;  %13207 = vst [vmem:[#allocation32_spill] sm:$0xff] %v10373_v28  ;;  %v10378_v42 = vor.u32 %v9171_v32, %v8002_v33  ;;  %v9168_v47 = vld [vmem:[#allocation9 + $0xac] sm:$0xf0]  ;;  %v9166_v48 = vld [vmem:[#allocation9 + $0xa4] sm:$0xf] }
  0x69   :  { %13208 = vst [vmem:[#allocation33_spill] sm:$0xff] %v10376_v41  ;;  %v7978_v50 = vld [vmem:[#allocation9 + $0xb0] sm:$0xf0]  ;;  %v7984_v55 = vld [vmem:[#allocation9 + $0xa8] sm:$0xf] }
  0x6a   :  { %1113 = vmatpush.bf16.msra.mxu0 %v10277_v30  ;;  %1126 = vmatpush.bf16.msra.mxu1 %v10279_v34  ;;  %13209 = vst [vmem:[#allocation34_spill] sm:$0xff] %v10378_v42  ;;  %v9169_v56 = vld [vmem:[#allocation9 + $0xb4] sm:$0xf0]  ;;  %v7960_v6 = vld [vmem:[#allocation9 + $0x80] sm:$0xf] }
  0x6b   :  { %v9164_v10 = vld [vmem:[#allocation9 + $0x8c] sm:$0xf0]  ;;  %v9162_v13 = vld [vmem:[#allocation9 + $0x84] sm:$0xf]  ;;  %v7962_v14 = vld [vmem:[#allocation9 + $0x90] sm:$0xf0] }
  0x6c   :  { %1139 = vmatpush.bf16.msra.mxu2 %v10281_v36  ;;  %1152 = vmatpush.bf16.msra.mxu3 %v10293_v49  ;;  %v7968_v20 = vld [vmem:[#allocation9 + $0x88] sm:$0xf]  ;;  %v9165_v24 = vld [vmem:[#allocation9 + $0x94] sm:$0xf0]  ;;  %v10395_v27 = vor.u32 %v9164_v10, %v7960_v6  ;;  %v9163_v31 = vld [vmem:[#allocation9 + $0x8c] sm:$0xf]  ;;  %v10398_v33 = vor.u32 %v9162_v13, %v7962_v14 }
  0x6d   :  { %v7970_v32 = vld [vmem:[#allocation9 + $0x98] sm:$0xf0]  ;;  %v9161_v6 = vld [vmem:[#allocation9 + $0x74] sm:$0xf0]  ;;  %v9159_v10 = vld [vmem:[#allocation9 + $0x6c] sm:$0xf] }
  0x6e   :  { %1114 = vmatpush.bf16.msra.mxu0 %v10288_v44  ;;  %1127 = vmatpush.bf16.msra.mxu1 %v10290_v45  ;;  %13214 = vst [vmem:[#allocation39_spill] sm:$0xff] %v10395_v27  ;;  %v7954_v13 = vld [vmem:[#allocation9 + $0x78] sm:$0xf0] }
  0x6f   :  { %13215 = vst [vmem:[#allocation40_spill] sm:$0xff] %v10398_v33 }
  0x70   :  { %1140 = vmatpush.bf16.msra.mxu2 %v10295_v51  ;;  %1153 = vmatpush.bf16.msra.mxu3 %v10302_v54 }
  0x71   :  { %605 = vmatmul.bf16.gmra.mxu0 %v10271_v26  ;;  %634 = vmatmul.bf16.gmra.mxu1 %v10271_v26 }
  0x72   :  { %1115 = vmatpush.bf16.msra.mxu0 %v10307_v58  ;;  %1128 = vmatpush.bf16.msra.mxu1 %v10310_v62 }
  0x73   :  { %663 = vmatmul.bf16.gmra.mxu2 %v10271_v26  ;;  %692 = vmatmul.bf16.gmra.mxu3 %v10271_v26 }
  0x74   :  { %1141 = vmatpush.bf16.msra.mxu2 %v10312_v63 }
  0x76   :  { %1116 = vmatpush.bf16.msra.mxu0 %v10319_v8  ;;  %1129 = vmatpush.bf16.msra.mxu1 %v10321_v9 }
  0x78   :  { %1142 = vmatpush.bf16.msra.mxu2 %v10324_v15 }
  0x7a   :  { %1117 = vmatpush.bf16.msra.mxu0 %v10329_v29  ;;  %1130 = vmatpush.bf16.msra.mxu1 %v10333_v37 }
  0x7c   :  { %1143 = vmatpush.bf16.msra.mxu2 %v10335_v38 }
  0x7e   :  { %1118 = vmatpush.bf16.msra.mxu0 %v10345_v46  ;;  %1131 = vmatpush.bf16.msra.mxu1 %v10349_v52 }
  0x80   :  { %1144 = vmatpush.bf16.msra.mxu2 %v10351_v53 }
  0x81   :  { %706 = vmatmul.bf16.vlgmr.msrb.gmra.mxu0 %v10223_v35  ;;  %735 = vmatmul.bf16.vlgmr.msrb.gmra.mxu1 %v10223_v35 }
  0x83   :  { %764 = vmatmul.bf16.vlgmr.msrb.gmra.mxu2 %v10223_v35  ;;  %793 = vmatmul.bf16.vlgmr.msrb.gmra.mxu3 %v10223_v35  ;;  %v10315_v35 = vor.u32 %v9127_v0, %v7826_v1  ;;  %v8010_v0 = vld [vmem:[#allocation9 + $0xf0] sm:$0xf0]  ;;  %v10359_v1 = vor.u32 %v9176_v60, %v8008_v57  ;;  %v10382_v57 = vor.u32 %v9168_v47, %v7976_v43 }
  0x84   :  { %v10361_v2 = vor.u32 %v9174_v61, %v8010_v0  ;;  %v10384_v60 = vor.u32 %v9166_v48, %v7978_v50  ;;  %v9167_v61 = vld [vmem:[#allocation9 + $0xac] sm:$0xf]  ;;  %v7986_v0 = vld [vmem:[#allocation9 + $0xb8] sm:$0xf0]  ;;  %v10400_v43 = vor.u32 %v9165_v24, %v7968_v20  ;;  %v10403_v47 = vor.u32 %v9163_v31, %v7970_v32  ;;  %v7944_v48 = vld [vmem:[#allocation9 + $0x60] sm:$0xf] }
  0x85   :  { %1154 = vmatpush.bf16.msra.mxu3 %v10315_v35  ;;  %13202 = vst [vmem:[#allocation27_spill] sm:$0xff] %v10359_v1  ;;  %1336 = vmatpush.bf16.msrb.mxu0 %v10359_v1  ;;  %v9160_v50 = vld [vmem:[#allocation9 + $0x6c] sm:$0xf0]  ;;  %v10418_v24 = vor.u32 %v9159_v10, %v7954_v13  ;;  %v9154_v32 = vld [vmem:[#allocation9 + $0x44] sm:$0xf] }
  0x86   :  { %13203 = vst [vmem:[#allocation28_spill] sm:$0xff] %v10361_v2  ;;  %1349 = vmatpush.bf16.msrb.mxu1 %v10361_v2  ;;  %v9156_v31 = vld [vmem:[#allocation9 + $0x4c] sm:$0xf0]  ;;  %v9150_v13 = vld [vmem:[#allocation9 + $0x24] sm:$0xf] }
  0x87   :  { %13210 = vst [vmem:[#allocation35_spill] sm:$0xff] %v10382_v57  ;;  %v9152_v10 = vld [vmem:[#allocation9 + $0x2c] sm:$0xf0] }
  0x88   :  { %13211 = vst [vmem:[#allocation36_spill] sm:$0xff] %v10384_v60 }
  0x89   :  { %1155 = vmatpush.bf16.msra.mxu3 %v10326_v23  ;;  %1337 = vmatpush.bf16.msrb.mxu0 %v10370_v18  ;;  %13216 = vst [vmem:[#allocation41_spill] sm:$0xff] %v10400_v43 }
  0x8a   :  { %1350 = vmatpush.bf16.msrb.mxu1 %v10373_v28  ;;  %13217 = vst [vmem:[#allocation42_spill] sm:$0xff] %v10403_v47 }
  0x8b   :  { %13221 = vst [vmem:[#allocation46_spill] sm:$0xff] %v10418_v24 }
  0x8d   :  { %1156 = vmatpush.bf16.msra.mxu3 %v10338_v39  ;;  %1338 = vmatpush.bf16.msrb.mxu0 %v10382_v57 }
  0x8e   :  { %1351 = vmatpush.bf16.msrb.mxu1 %v10384_v60 }
  0x91   :  { %711 = vmatmul.bf16.gmra.mxu0 %v10232_v19  ;;  %740 = vmatmul.bf16.gmra.mxu1 %v10232_v19 }
  0x92   :  { %1157 = vmatpush.bf16.msra.mxu3 %v10355_v59  ;;  %1339 = vmatpush.bf16.msrb.mxu0 %v10395_v27 }
  0x93   :  { %769 = vmatmul.bf16.gmra.mxu2 %v10232_v19  ;;  %798 = vmatmul.bf16.gmra.mxu3 %v10232_v19  ;;  %v10364_v19 = vor.u32 %v9177_v5, %v8016_v4  ;;  %v10387_v4 = vor.u32 %v9169_v56, %v7984_v55  ;;  %v10390_v5 = vor.u32 %v9167_v61, %v7986_v0  ;;  %v9158_v55 = vld [vmem:[#allocation9 + $0x64] sm:$0xf]  ;;  %v7946_v56 = vld [vmem:[#allocation9 + $0x70] sm:$0xf0]  ;;  %v7952_v61 = vld [vmem:[#allocation9 + $0x68] sm:$0xf] }
  0x94   :  { %v10409_v0 = vor.u32 %v9160_v50, %v7944_v48  ;;  %1352 = vmatpush.bf16.msrb.mxu1 %v10398_v33  ;;  %v10413_v14 = vor.u32 %v9158_v55, %v7946_v56  ;;  %v10415_v20 = vor.u32 %v9161_v6, %v7952_v61  ;;  %v7930_v48 = vld [vmem:[#allocation9 + $0x50] sm:$0xf0]  ;;  %v7936_v50 = vld [vmem:[#allocation9 + $0x48] sm:$0xf]  ;;  %v9157_v33 = vld [vmem:[#allocation9 + $0x54] sm:$0xf0] }
  0x95   :  { %13204 = vst [vmem:[#allocation29_spill] sm:$0xff] %v10364_v19  ;;  %1362 = vmatpush.bf16.msrb.mxu2 %v10364_v19  ;;  %v10425_v55 = vor.u32 %v9154_v32, %v7930_v48  ;;  %v10427_v56 = vor.u32 %v9157_v33, %v7936_v50  ;;  %v7912_v6 = vld [vmem:[#allocation9 + $0x20] sm:$0xf]  ;;  %v9148_v48 = vld [vmem:[#allocation9 + $0xc] sm:$0xf0] }
  0x96   :  { %1375 = vmatpush.bf16.msrb.mxu3 %v10368_v17  ;;  %13212 = vst [vmem:[#allocation37_spill] sm:$0xff] %v10387_v4  ;;  %1340 = vmatpush.bf16.msrb.mxu0 %v10409_v0  ;;  %v7896_v32 = vld [vmem:[#allocation9] sm:$0xf]  ;;  %v9146_v50 = vld [vmem:[#allocation9 + $0x4] sm:$0xf] }
  0x97   :  { %13213 = vst [vmem:[#allocation38_spill] sm:$0xff] %v10390_v5 }
  0x98   :  { %13218 = vst [vmem:[#allocation43_spill] sm:$0xff] %v10409_v0  ;;  %1353 = vmatpush.bf16.msrb.mxu1 %v10413_v14  ;;  %v9153_v0 = vld [vmem:[#allocation9 + $0x34] sm:$0xf0] }
  0x99   :  { %1363 = vmatpush.bf16.msrb.mxu2 %v10376_v41  ;;  %13219 = vst [vmem:[#allocation44_spill] sm:$0xff] %v10413_v14  ;;  %v9151_v14 = vld [vmem:[#allocation9 + $0x2c] sm:$0xf] }
  0x9a   :  { %1376 = vmatpush.bf16.msrb.mxu3 %v10378_v42  ;;  %13220 = vst [vmem:[#allocation45_spill] sm:$0xff] %v10415_v20 }
  0x9b   :  { %13223 = vst [vmem:[#allocation48_spill] sm:$0xff] %v10425_v55 }
  0x9c   :  { %13224 = vst [vmem:[#allocation49_spill] sm:$0xff] %v10427_v56  ;;  %1354 = vmatpush.bf16.msrb.mxu1 %v10425_v55  ;;  %v9147_v55 = vld [vmem:[#allocation9 + $0xc] sm:$0xf] }
  0x9d   :  { %1364 = vmatpush.bf16.msrb.mxu2 %v10387_v4 }
  0x9e   :  { %1377 = vmatpush.bf16.msrb.mxu3 %v10390_v5  ;;  %v9155_v5 = vld [vmem:[#allocation9 + $0x4c] sm:$0xf] }
  0xa1   :  { %716 = vmatmul.bf16.gmra.mxu0 %v10241_v3  ;;  %745 = vmatmul.bf16.gmra.mxu1 %v10241_v3 }
  0xa2   :  { %1365 = vmatpush.bf16.msrb.mxu2 %v10400_v43  ;;  %1378 = vmatpush.bf16.msrb.mxu3 %v10403_v47  ;;  %v7938_v43 = vld [vmem:[#allocation9 + $0x58] sm:$0xf0]  ;;  %v10433_v47 = vor.u32 %v9152_v10, %v7912_v6  ;;  %v7904_v6 = vld [vmem:[#allocation9 + $0x8] sm:$0xf]  ;;  %v9149_v10 = vld [vmem:[#allocation9 + $0x14] sm:$0xf0] }
  0xa3   :  { %774 = vmatmul.bf16.gmra.mxu2 %v10241_v3  ;;  %803 = vmatmul.bf16.gmra.mxu3 %v10241_v3  ;;  %v7928_v3 = vld [vmem:[#allocation9 + $0x40] sm:$0xf]  ;;  %v10430_v61 = vor.u32 %v9155_v5, %v7938_v43 }
  0xa4   :  { %v10421_v27 = vor.u32 %v9156_v31, %v7928_v3  ;;  %v7914_v3 = vld [vmem:[#allocation9 + $0x30] sm:$0xf0]  ;;  %v7920_v31 = vld [vmem:[#allocation9 + $0x28] sm:$0xf]  ;;  %13226 = vst [vmem:[#allocation51_spill] sm:$0xff] %v10433_v47 }
  0xa5   :  { %13225 = vst [vmem:[#allocation50_spill] sm:$0xff] %v10430_v61  ;;  %v10437_v33 = vor.u32 %v9150_v13, %v7914_v3  ;;  %v10439_v5 = vor.u32 %v9153_v0, %v7920_v31 }
  0xa6   :  { %13222 = vst [vmem:[#allocation47_spill] sm:$0xff] %v10421_v27  ;;  %1366 = vmatpush.bf16.msrb.mxu2 %v10415_v20  ;;  %1379 = vmatpush.bf16.msrb.mxu3 %v10418_v24  ;;  %v7922_v20 = vld [vmem:[#allocation9 + $0x38] sm:$0xf0]  ;;  %v10445_v24 = vor.u32 %v9148_v48, %v7896_v32  ;;  %v12952_v32 = vmov 0  }
  0xa7   :  { %1341 = vmatpush.bf16.msrb.mxu0 %v10421_v27  ;;  %13227 = vst [vmem:[#allocation52_spill] sm:$0xff] %v10437_v33  ;;  %v10442_v43 = vor.u32 %v9151_v14, %v7922_v20  ;;  %v7898_v27 = vld [vmem:[#allocation9 + $0x10] sm:$0xf0]  ;;  %1355 = vmatpush.bf16.msrb.mxu1 %v10437_v33  ;;  %v10451_v14 = vor.u32 %v9149_v10, %v7904_v6 }
  0xa8   :  { %13228 = vst [vmem:[#allocation53_spill] sm:$0xff] %v10439_v5  ;;  %v10449_v0 = vor.u32 %v9146_v50, %v7898_v27  ;;  %v10467_v27 = vld [vmem:[%s12920_s4] sm:$0xff] }
  0xa9   :  { %13229 = vst [vmem:[#allocation54_spill] sm:$0xff] %v10442_v43  ;;  %v10483_v50 = vperm.slane %v10467_v27, 2  ;;  %v10487_v6 = vperm.slane %v10467_v27, 3 }
  0xaa   :  { %1367 = vmatpush.bf16.msrb.mxu2 %v10427_v56  ;;  %1380 = vmatpush.bf16.msrb.mxu3 %v10430_v61  ;;  %13230 = vst [vmem:[#allocation55_spill] sm:$0xff] %v10445_v24  ;;  %v7906_v56 = vld [vmem:[#allocation9 + $0x18] sm:$0xf0] }
  0xab   :  { %1342 = vmatpush.bf16.msrb.mxu0 %v10433_v47  ;;  %13231 = vst [vmem:[#allocation56_spill] sm:$0xff] %v10449_v0  ;;  %v10455_v20 = vor.u32 %v9147_v55, %v7906_v56  ;;  %1356 = vmatpush.bf16.msrb.mxu1 %v10449_v0  ;;  %v10470_v55 = vperm.slane %v10467_v27, 0  ;;  %v10473_v56 = vperm.slane %v10467_v27, 1 }
  0xac   :  { %13232 = vst [vmem:[#allocation57_spill] sm:$0xff] %v10451_v14 }
  0xad   :  { %13233 = vst [vmem:[#allocation58_spill] sm:$0xff] %v10455_v20 }
  0xae   :  { %1368 = vmatpush.bf16.msrb.mxu2 %v10439_v5  ;;  %1381 = vmatpush.bf16.msrb.mxu3 %v10442_v43 }
  0xaf   :  { %1343 = vmatpush.bf16.msrb.mxu0 %v10445_v24 }
  0xb1   :  { %721 = vmatmul.bf16.gmra.mxu0 %v10271_v26  ;;  %750 = vmatmul.bf16.gmra.mxu1 %v10271_v26 }
  0xb2   :  { %1369 = vmatpush.bf16.msrb.mxu2 %v10451_v14  ;;  %1382 = vmatpush.bf16.msrb.mxu3 %v10455_v20 }
  0xb3   :  { %779 = vmatmul.bf16.gmra.mxu2 %v10271_v26  ;;  %808 = vmatmul.bf16.gmra.mxu3 %v10271_v26 }
  0xbe   :  { %v591_v26 = vpop.f32.mrf.mxu0  ;;  %v620_v3 = vpop.f32.mrf.mxu1 }
  0xbf   :  { %v592_v13 = vadd.f32 %v591_v26, %v10470_v55  ;;  %v621_v31 = vadd.f32 %v620_v3, %v10473_v56 }
  0xc1   :  { %1119 = vmatmul.bf16.vlgmr.msra.gmra.mxu0 %v12952_v32  ;;  %v10478_v48 = vpack.c.bf16 %v621_v31, %v592_v13  ;;  %1132 = vmatmul.bf16.vlgmr.msra.gmra.mxu1 %v12952_v32 }
  0xc2   :  { %1537 = vmatpush.bf16.msra.mxu0 %v10247_v7  ;;  %1550 = vmatpush.bf16.msra.mxu1 %v10249_v11 }
  0xc3   :  { %13234 = vst [vmem:[#allocation59_spill] sm:$0xff] %v10478_v48  ;;  %1145 = vmatmul.bf16.vlgmr.msra.gmra.mxu2 %v12952_v32  ;;  %1158 = vmatmul.bf16.vlgmr.msra.gmra.mxu3 %v12952_v32 }
  0xc4   :  { %1563 = vmatpush.bf16.msra.mxu2 %v10251_v12  ;;  %1576 = vmatpush.bf16.msra.mxu3 %v10262_v25 }
  0xc6   :  { %v649_v10 = vpop.f32.mrf.mxu2  ;;  %v678_v13 = vpop.f32.mrf.mxu3  ;;  %1538 = vmatpush.bf16.msra.mxu0 %v10254_v16  ;;  %1551 = vmatpush.bf16.msra.mxu1 %v10258_v21 }
  0xc7   :  { %v650_v26 = vadd.f32 %v649_v10, %v10483_v50  ;;  %v593_v3 = vpop.f32.mrf.mxu0  ;;  %v679_v31 = vadd.f32 %v678_v13, %v10487_v6  ;;  %v622_v48 = vpop.f32.mrf.mxu1 }
  0xc8   :  { %v594_v32 = vadd.f32 %v593_v3, %v10470_v55  ;;  %v623_v7 = vadd.f32 %v622_v48, %v10473_v56  ;;  %1564 = vmatpush.bf16.msra.mxu2 %v10260_v22  ;;  %1577 = vmatpush.bf16.msra.mxu3 %v10284_v40 }
  0xc9   :  { %v10500_v12 = vpack.c.bf16 %v679_v31, %v650_v26 }
  0xca   :  { %v10503_v10 = vpack.c.bf16 %v623_v7, %v594_v32  ;;  %1539 = vmatpush.bf16.msra.mxu0 %v10277_v30  ;;  %1552 = vmatpush.bf16.msra.mxu1 %v10279_v34 }
  0xcc   :  { %13235 = vst [vmem:[#allocation60_spill] sm:$0xff] %v10503_v10  ;;  %1565 = vmatpush.bf16.msra.mxu2 %v10281_v36  ;;  %1578 = vmatpush.bf16.msra.mxu3 %v10293_v49  ;;  %v13237_v10 = vmov 0  }
  0xce   :  { %v651_v13 = vpop.f32.mrf.mxu2  ;;  %v680_v3 = vpop.f32.mrf.mxu3  ;;  %1540 = vmatpush.bf16.msra.mxu0 %v10288_v44  ;;  %1553 = vmatpush.bf16.msra.mxu1 %v10290_v45 }
  0xcf   :  { %v652_v48 = vadd.f32 %v651_v13, %v10483_v50  ;;  %v596_v21 = vpop.f32.mrf.mxu0  ;;  %v681_v26 = vadd.f32 %v680_v3, %v10487_v6  ;;  %v625_v40 = vpop.f32.mrf.mxu1 }
  0xd0   :  { %v597_v31 = vadd.f32 %v596_v21, %v10470_v55  ;;  %v626_v7 = vadd.f32 %v625_v40, %v10473_v56  ;;  %1566 = vmatpush.bf16.msra.mxu2 %v10295_v51  ;;  %1579 = vmatpush.bf16.msra.mxu3 %v10302_v54 }
  0xd1   :  { %v10516_v32 = vpack.c.bf16 %v681_v26, %v652_v48  ;;  %1344 = vmatmul.bf16.vlgmr.msrb.gmra.mxu0 %v13237_v10  ;;  %1357 = vmatmul.bf16.vlgmr.msrb.gmra.mxu1 %v13237_v10 }
  0xd2   :  { %v10520_v13 = vpack.c.bf16 %v626_v7, %v597_v31  ;;  %1541 = vmatpush.bf16.msra.mxu0 %v10307_v58  ;;  %1554 = vmatpush.bf16.msra.mxu1 %v10310_v62 }
  0xd3   :  { %13236 = vst [vmem:[#allocation61_spill] sm:$0xff] %v10516_v32  ;;  %1370 = vmatmul.bf16.vlgmr.msrb.gmra.mxu2 %v13237_v10  ;;  %1383 = vmatmul.bf16.vlgmr.msrb.gmra.mxu3 %v13237_v10 }
  0xd4   :  { %13238 = vst [vmem:[#allocation62_spill] sm:$0xff] %v10520_v13  ;;  %1567 = vmatpush.bf16.msra.mxu2 %v10312_v63  ;;  %1580 = vmatpush.bf16.msra.mxu3 %v10315_v35 }
  0xd6   :  { %v654_v21 = vpop.f32.mrf.mxu2  ;;  %v683_v48 = vpop.f32.mrf.mxu3  ;;  %1542 = vmatpush.bf16.msra.mxu0 %v10319_v8  ;;  %1555 = vmatpush.bf16.msra.mxu1 %v10321_v9 }
  0xd7   :  { %v655_v40 = vadd.f32 %v654_v21, %v10483_v50  ;;  %v598_v3 = vpop.f32.mrf.mxu0  ;;  %v684_v26 = vadd.f32 %v683_v48, %v10487_v6  ;;  %v627_v7 = vpop.f32.mrf.mxu1 }
  0xd8   :  { %v599_v31 = vadd.f32 %v598_v3, %v10470_v55  ;;  %v628_v10 = vadd.f32 %v627_v7, %v10473_v56  ;;  %1568 = vmatpush.bf16.msra.mxu2 %v10324_v15  ;;  %1581 = vmatpush.bf16.msra.mxu3 %v10326_v23 }
  0xd9   :  { %v10536_v13 = vpack.c.bf16 %v684_v26, %v655_v40 }
  0xda   :  { %v10539_v21 = vpack.c.bf16 %v628_v10, %v599_v31  ;;  %1543 = vmatpush.bf16.msra.mxu0 %v10329_v29  ;;  %1556 = vmatpush.bf16.msra.mxu1 %v10333_v37 }
  0xdb   :  { %13239 = vst [vmem:[#allocation63_spill] sm:$0xff] %v10536_v13 }
  0xdc   :  { %13240 = vst [vmem:[#allocation64_spill] sm:$0xff] %v10539_v21  ;;  %1569 = vmatpush.bf16.msra.mxu2 %v10335_v38  ;;  %1582 = vmatpush.bf16.msra.mxu3 %v10338_v39  ;;  %v13245_v21 = vld [vmem:[#allocation38_spill] sm:$0xff] }
  0xde   :  { %v656_v48 = vpop.f32.mrf.mxu2  ;;  %v685_v7 = vpop.f32.mrf.mxu3  ;;  %1544 = vmatpush.bf16.msra.mxu0 %v10345_v46  ;;  %1557 = vmatpush.bf16.msra.mxu1 %v10349_v52 }
  0xdf   :  { %v657_v3 = vadd.f32 %v656_v48, %v10483_v50  ;;  %v601_v32 = vpop.f32.mrf.mxu0  ;;  %v686_v40 = vadd.f32 %v685_v7, %v10487_v6  ;;  %v630_v13 = vpop.f32.mrf.mxu1 }
  0xe0   :  { %v602_v26 = vadd.f32 %v601_v32, %v10470_v55  ;;  %v631_v10 = vadd.f32 %v630_v13, %v10473_v56  ;;  %1570 = vmatpush.bf16.msra.mxu2 %v10351_v53  ;;  %1583 = vmatpush.bf16.msra.mxu3 %v10355_v59 }
  0xe1   :  { %v10552_v31 = vpack.c.bf16 %v686_v40, %v657_v3 }
  0xe2   :  { %1602 = vmatpush.bf16.msrb.mxu0 %v10359_v1  ;;  %v10556_v48 = vpack.c.bf16 %v631_v10, %v602_v26  ;;  %1615 = vmatpush.bf16.msrb.mxu1 %v10361_v2 }
  0xe3   :  { %13241 = vst [vmem:[#allocation65_spill] sm:$0xff] %v10552_v31 }
  0xe4   :  { %13242 = vst [vmem:[#allocation66_spill] sm:$0xff] %v10556_v48  ;;  %1628 = vmatpush.bf16.msrb.mxu2 %v10364_v19  ;;  %1641 = vmatpush.bf16.msrb.mxu3 %v10368_v17 }
  0xe6   :  { %v659_v32 = vpop.f32.mrf.mxu2  ;;  %1603 = vmatpush.bf16.msrb.mxu0 %v10370_v18  ;;  %v688_v7 = vpop.f32.mrf.mxu3  ;;  %1616 = vmatpush.bf16.msrb.mxu1 %v10373_v28 }
  0xe7   :  { %v660_v13 = vadd.f32 %v659_v32, %v10483_v50  ;;  %v603_v3 = vpop.f32.mrf.mxu0  ;;  %v689_v40 = vadd.f32 %v688_v7, %v10487_v6  ;;  %v632_v10 = vpop.f32.mrf.mxu1 }
  0xe8   :  { %1629 = vmatpush.bf16.msrb.mxu2 %v10376_v41  ;;  %v604_v26 = vadd.f32 %v603_v3, %v10470_v55  ;;  %1642 = vmatpush.bf16.msrb.mxu3 %v10378_v42  ;;  %v633_v48 = vadd.f32 %v632_v10, %v10473_v56  ;;  %v13246_v41 = vld [vmem:[#allocation39_spill] sm:$0xff]  ;;  %v13247_v10 = vld [vmem:[#allocation40_spill] sm:$0xff] }
  0xe9   :  { %v10569_v31 = vpack.c.bf16 %v689_v40, %v660_v13  ;;  %v13248_v13 = vld [vmem:[#allocation41_spill] sm:$0xff] }
  0xea   :  { %1604 = vmatpush.bf16.msrb.mxu0 %v10382_v57  ;;  %v10572_v32 = vpack.c.bf16 %v633_v48, %v604_v26  ;;  %1617 = vmatpush.bf16.msrb.mxu1 %v10384_v60  ;;  %v13256_v60 = vld [vmem:[#allocation47_spill] sm:$0xff] }
  0xeb   :  { %13243 = vst [vmem:[#allocation67_spill] sm:$0xff] %v10569_v31 }
  0xec   :  { %13244 = vst [vmem:[#allocation68_spill] sm:$0xff] %v10572_v32  ;;  %1630 = vmatpush.bf16.msrb.mxu2 %v10387_v4  ;;  %1643 = vmatpush.bf16.msrb.mxu3 %v13245_v21  ;;  %v13249_v32 = vld [vmem:[#allocation42_spill] sm:$0xff]  ;;  %v13253_v4 = vld [vmem:[#allocation44_spill] sm:$0xff] }
  0xee   :  { %v661_v7 = vpop.f32.mrf.mxu2  ;;  %1605 = vmatpush.bf16.msrb.mxu0 %v13246_v41  ;;  %v690_v42 = vpop.f32.mrf.mxu3  ;;  %1618 = vmatpush.bf16.msrb.mxu1 %v13247_v10  ;;  %v13251_v41 = vld [vmem:[#allocation43_spill] sm:$0xff]  ;;  %v13254_v10 = vld [vmem:[#allocation45_spill] sm:$0xff] }
  0xef   :  { %v662_v3 = vadd.f32 %v661_v7, %v10483_v50  ;;  %v606_v28 = vpop.f32.mrf.mxu0  ;;  %v691_v48 = vadd.f32 %v690_v42, %v10487_v6  ;;  %v635_v26 = vpop.f32.mrf.mxu1 }
  0xf0   :  { %1631 = vmatpush.bf16.msrb.mxu2 %v13248_v13  ;;  %v607_v40 = vadd.f32 %v606_v28, %v10470_v55  ;;  %1644 = vmatpush.bf16.msrb.mxu3 %v13249_v32  ;;  %v636_v31 = vadd.f32 %v635_v26, %v10473_v56  ;;  %v13255_v13 = vld [vmem:[#allocation46_spill] sm:$0xff]  ;;  %v13257_v26 = vld [vmem:[#allocation48_spill] sm:$0xff] }
  0xf1   :  { %v10585_v21 = vpack.c.bf16 %v691_v48, %v662_v3  ;;  %v13258_v3 = vld [vmem:[#allocation49_spill] sm:$0xff] }
  0xf2   :  { %1606 = vmatpush.bf16.msrb.mxu0 %v13251_v41  ;;  %v10588_v7 = vpack.c.bf16 %v636_v31, %v607_v40  ;;  %1619 = vmatpush.bf16.msrb.mxu1 %v13253_v4 }
  0xf3   :  { %13250 = vst [vmem:[#allocation69_spill] sm:$0xff] %v10585_v21 }
  0xf4   :  { %13252 = vst [vmem:[#allocation70_spill] sm:$0xff] %v10588_v7  ;;  %1632 = vmatpush.bf16.msrb.mxu2 %v13254_v10  ;;  %1645 = vmatpush.bf16.msrb.mxu3 %v13255_v13 }
  0xf6   :  { %v664_v42 = vpop.f32.mrf.mxu2  ;;  %1607 = vmatpush.bf16.msrb.mxu0 %v13256_v60  ;;  %v693_v32 = vpop.f32.mrf.mxu3  ;;  %1620 = vmatpush.bf16.msrb.mxu1 %v13257_v26 }
  0xf7   :  { %v665_v28 = vadd.f32 %v664_v42, %v10483_v50  ;;  %v608_v57 = vpop.f32.mrf.mxu0  ;;  %v694_v31 = vadd.f32 %v693_v32, %v10487_v6  ;;  %v637_v40 = vpop.f32.mrf.mxu1 }
  0xf8   :  { %1633 = vmatpush.bf16.msrb.mxu2 %v13258_v3  ;;  %v609_v48 = vadd.f32 %v608_v57, %v10470_v55  ;;  %1646 = vmatpush.bf16.msrb.mxu3 %v10430_v61  ;;  %v638_v7 = vadd.f32 %v637_v40, %v10473_v56  ;;  %v10609_v3 = vperm.slane %v10467_v27, 4  ;;  %v10613_v57 = vperm.slane %v10467_v27, 5 }
  0xf9   :  { %v10601_v21 = vpack.c.bf16 %v694_v31, %v665_v28 }
  0xfa   :  { %1608 = vmatpush.bf16.msrb.mxu0 %v10433_v47  ;;  %v10604_v42 = vpack.c.bf16 %v638_v7, %v609_v48  ;;  %1621 = vmatpush.bf16.msrb.mxu1 %v10437_v33 }
  0xfb   :  { %13259 = vst [vmem:[#allocation71_spill] sm:$0xff] %v10601_v21 }
  0xfc   :  { %13260 = vst [vmem:[#allocation72_spill] sm:$0xff] %v10604_v42  ;;  %1634 = vmatpush.bf16.msrb.mxu2 %v10439_v5  ;;  %1647 = vmatpush.bf16.msrb.mxu3 %v10442_v43 }
  0xfe   :  { %v666_v55 = vpop.f32.mrf.mxu2  ;;  %1609 = vmatpush.bf16.msrb.mxu0 %v10445_v24  ;;  %v695_v32 = vpop.f32.mrf.mxu3  ;;  %1622 = vmatpush.bf16.msrb.mxu1 %v10449_v0 }
  0xff   :  { %v667_v56 = vadd.f32 %v666_v55, %v10483_v50  ;;  %v707_v7 = vpop.f32.mrf.mxu0  ;;  %v696_v28 = vadd.f32 %v695_v32, %v10487_v6  ;;  %v736_v48 = vpop.f32.mrf.mxu1  ;;  %v10628_v50 = vperm.slane %v10467_v27, 6  ;;  %v10631_v55 = vperm.slane %v10467_v27, 7 }
 0x100   :  { %1635 = vmatpush.bf16.msrb.mxu2 %v10451_v14  ;;  %v708_v31 = vadd.f32 %v707_v7, %v10609_v3  ;;  %1648 = vmatpush.bf16.msrb.mxu3 %v10455_v20  ;;  %v737_v40 = vadd.f32 %v736_v48, %v10613_v57 }
 0x101   :  { %v10623_v42 = vpack.c.bf16 %v696_v28, %v667_v56 }
 0x102   :  { %v10625_v21 = vpack.c.bf16 %v737_v40, %v708_v31 }
 0x103   :  { %13261 = vst [vmem:[#allocation73_spill] sm:$0xff] %v10623_v42 }
 0x104   :  { %13262 = vst [vmem:[#allocation74_spill] sm:$0xff] %v10625_v21 }
 0x106   :  { %v765_v14 = vpop.f32.mrf.mxu2  ;;  %v794_v32 = vpop.f32.mrf.mxu3 }
 0x107   :  { %v766_v6 = vadd.f32 %v765_v14, %v10628_v50  ;;  %v709_v7 = vpop.f32.mrf.mxu0  ;;  %v795_v0 = vadd.f32 %v794_v32, %v10631_v55  ;;  %v738_v48 = vpop.f32.mrf.mxu1 }
 0x108   :  { %v710_v20 = vadd.f32 %v709_v7, %v10609_v3  ;;  %v739_v56 = vadd.f32 %v738_v48, %v10613_v57 }
 0x109   :  { %v10637_v28 = vpack.c.bf16 %v795_v0, %v766_v6 }
 0x10a   :  { %v10639_v31 = vpack.c.bf16 %v739_v56, %v710_v20 }
 0x10b   :  { %13263 = vst [vmem:[#allocation75_spill] sm:$0xff] %v10637_v28 }
 0x10c   :  { %13264 = vst [vmem:[#allocation76_spill] sm:$0xff] %v10639_v31 }
 0x10e   :  { %v767_v40 = vpop.f32.mrf.mxu2  ;;  %v796_v21 = vpop.f32.mrf.mxu3 }
 0x10f   :  { %v768_v27 = vadd.f32 %v767_v40, %v10628_v50  ;;  %v712_v42 = vpop.f32.mrf.mxu0  ;;  %v797_v14 = vadd.f32 %v796_v21, %v10631_v55  ;;  %v741_v43 = vpop.f32.mrf.mxu1 }
 0x110   :  { %v713_v24 = vadd.f32 %v712_v42, %v10609_v3  ;;  %v742_v32 = vadd.f32 %v741_v43, %v10613_v57 }
 0x111   :  { %v10645_v7 = vpack.c.bf16 %v797_v14, %v768_v27 }
 0x112   :  { %v10647_v5 = vpack.c.bf16 %v742_v32, %v713_v24 }
 0x113   :  { %13265 = vst [vmem:[#allocation77_spill] sm:$0xff] %v10645_v7 }
 0x114   :  { %13266 = vst [vmem:[#allocation78_spill] sm:$0xff] %v10647_v5 }
 0x116   :  { %v770_v0 = vpop.f32.mrf.mxu2  ;;  %v799_v6 = vpop.f32.mrf.mxu3 }
 0x117   :  { %v771_v20 = vadd.f32 %v770_v0, %v10628_v50  ;;  %v714_v48 = vpop.f32.mrf.mxu0  ;;  %v800_v56 = vadd.f32 %v799_v6, %v10631_v55  ;;  %v743_v28 = vpop.f32.mrf.mxu1 }
 0x118   :  { %v715_v40 = vadd.f32 %v714_v48, %v10609_v3  ;;  %v744_v21 = vadd.f32 %v743_v28, %v10613_v57 }
 0x119   :  { %v10653_v42 = vpack.c.bf16 %v800_v56, %v771_v20 }
 0x11a   :  { %v10655_v31 = vpack.c.bf16 %v744_v21, %v715_v40 }
 0x11b   :  { %13267 = vst [vmem:[#allocation79_spill] sm:$0xff] %v10653_v42 }
 0x11c   :  { %13268 = vst [vmem:[#allocation80_spill] sm:$0xff] %v10655_v31 }
 0x11e   :  { %v772_v43 = vpop.f32.mrf.mxu2  ;;  %v801_v27 = vpop.f32.mrf.mxu3 }
 0x11f   :  { %v773_v24 = vadd.f32 %v772_v43, %v10628_v50  ;;  %v717_v14 = vpop.f32.mrf.mxu0  ;;  %v802_v32 = vadd.f32 %v801_v27, %v10631_v55  ;;  %v746_v7 = vpop.f32.mrf.mxu1 }
 0x120   :  { %v718_v0 = vadd.f32 %v717_v14, %v10609_v3  ;;  %v747_v6 = vadd.f32 %v746_v7, %v10613_v57 }
 0x121   :  { %v10661_v48 = vpack.c.bf16 %v802_v32, %v773_v24 }
 0x122   :  { %v10663_v5 = vpack.c.bf16 %v747_v6, %v718_v0 }
 0x123   :  { %13269 = vst [vmem:[#allocation81_spill] sm:$0xff] %v10661_v48 }
 0x124   :  { %13270 = vst [vmem:[#allocation82_spill] sm:$0xff] %v10663_v5 }
 0x126   :  { %v775_v28 = vpop.f32.mrf.mxu2  ;;  %v804_v56 = vpop.f32.mrf.mxu3 }
 0x127   :  { %v776_v20 = vadd.f32 %v775_v28, %v10628_v50  ;;  %v719_v40 = vpop.f32.mrf.mxu0  ;;  %v805_v21 = vadd.f32 %v804_v56, %v10631_v55  ;;  %v748_v42 = vpop.f32.mrf.mxu1 }
 0x128   :  { %v720_v43 = vadd.f32 %v719_v40, %v10609_v3  ;;  %v749_v27 = vadd.f32 %v748_v42, %v10613_v57 }
 0x129   :  { %v10669_v14 = vpack.c.bf16 %v805_v21, %v776_v20 }
 0x12a   :  { %v10671_v31 = vpack.c.bf16 %v749_v27, %v720_v43 }
 0x12b   :  { %13271 = vst [vmem:[#allocation83_spill] sm:$0xff] %v10669_v14 }
 0x12c   :  { %13272 = vst [vmem:[#allocation84_spill] sm:$0xff] %v10671_v31  ;;  %v13276_v31 = vld [vmem:[#allocation59_spill] sm:$0xff] }
 0x12e   :  { %v777_v7 = vpop.f32.mrf.mxu2  ;;  %v806_v32 = vpop.f32.mrf.mxu3 }
 0x12f   :  { %v778_v24 = vadd.f32 %v777_v7, %v10628_v50  ;;  %v722_v0 = vpop.f32.mrf.mxu0  ;;  %v807_v6 = vadd.f32 %v806_v32, %v10631_v55  ;;  %v751_v48 = vpop.f32.mrf.mxu1 }
 0x130   :  { %v723_v28 = vadd.f32 %v722_v0, %v10609_v3  ;;  %v752_v56 = vadd.f32 %v751_v48, %v10613_v57  ;;  %v947_v0 = vunpack.c.l.bf16 %v13276_v31  ;;  %v948_v48 = vunpack.c.h.bf16 %v13276_v31 }
 0x131   :  { %v10677_v40 = vpack.c.bf16 %v807_v6, %v778_v24 }
 0x132   :  { %v10679_v5 = vpack.c.bf16 %v752_v56, %v723_v28 }
 0x133   :  { %13273 = vst [vmem:[#allocation85_spill] sm:$0xff] %v10677_v40 }
 0x134   :  { %13274 = vst [vmem:[#allocation86_spill] sm:$0xff] %v10679_v5 }
 0x136   :  { %v780_v42 = vpop.f32.mrf.mxu2  ;;  %v809_v21 = vpop.f32.mrf.mxu3 }
 0x137   :  { %v781_v20 = vadd.f32 %v780_v42, %v10628_v50  ;;  %v724_v43 = vpop.f32.mrf.mxu0  ;;  %v810_v27 = vadd.f32 %v809_v21, %v10631_v55  ;;  %v753_v7 = vpop.f32.mrf.mxu1  ;;  %v949_v42 = vunpack.c.l.bf16 %v10500_v12 }
 0x138   :  { %v725_v21 = vadd.f32 %v724_v43, %v10609_v3  ;;  %v950_v43 = vunpack.c.h.bf16 %v10500_v12 }
 0x139   :  { %v10683_v14 = vpack.c.bf16 %v810_v27, %v781_v20  ;;  %v754_v20 = vadd.f32 %v753_v7, %v10613_v57 }
 0x13b   :  { %13275 = vst [vmem:[#allocation87_spill] sm:$0xff] %v10683_v14 }
 0x13e   :  { %v782_v32 = vpop.f32.mrf.mxu2  ;;  %v811_v33 = vpop.f32.mrf.mxu3 }
 0x13f   :  { %v1120_v47 = vpop.f32.mrf.mxu0  ;;  %v1133_v6 = vpop.f32.mrf.mxu1 }
 0x140   :  { %v1163_v24 = vadd.f32 %v1120_v47, %v947_v0  ;;  %v1164_v28 = vadd.f32 %v1133_v6, %v948_v48  ;;  %v844_v47 = vpack.c.bf16 %v754_v20, %v725_v21  ;;  %v812_v6 = vadd.f32 %v811_v33, %v10631_v55 }
 0x142   :  { %v8022_v56 = vmul.f32 -1.442695, %v1163_v24  ;;  %v8023_v40 = vmul.f32 -1.442695, %v1164_v28  ;;  %v1172_v57 = vunpack.c.l.bf16 %v844_v47 }
 0x144   :  { %9425 = vpow2.f32 %v8022_v56 }
 0x145   :  { %9427 = vpow2.f32 %v8023_v40  ;;  %v783_v40 = vadd.f32 %v782_v32, %v10628_v50 }
 0x146   :  { %v1146_v27 = vpop.f32.mrf.mxu2  ;;  %v1159_v5 = vpop.f32.mrf.mxu3 }
 0x147   :  { %v1165_v14 = vadd.f32 %v1146_v27, %v949_v42  ;;  %v1122_v61 = vpop.f32.mrf.mxu0  ;;  %v1135_v26 = vpop.f32.mrf.mxu1  ;;  %v10693_v42 = vpack.c.bf16 %v812_v6, %v783_v40 }
 0x148   :  { %v1173_v26 = vunpack.c.h.bf16 %v844_v47 }
 0x149   :  { %v8024_v60 = vmul.f32 -1.442695, %v1165_v14 }
 0x14a   :  { %v9426_v31 = vpop.eup %9425 }
 0x14b   :  { %v9428_v0 = vpop.eup %9427  ;;  %v1401_v48 = vadd.f32 1.0, %v9426_v31  ;;  %9429 = vpow2.f32 %v8024_v60  ;;  %v1166_v60 = vadd.f32 %v1159_v5, %v950_v43  ;;  %v1174_v31 = vunpack.c.l.bf16 %v10693_v42 }
 0x14c   :  { %v1402_v24 = vadd.f32 1.0, %v9428_v0 }
 0x14d   :  { %9431 = vrcp.f32 %v1401_v48  ;;  %v1413_v0 = vand.u32 2147483647, %v1401_v48  ;;  %v1415_v5 = vand.u32 2147483648, %v1401_v48  ;;  %vm1409_vm3 = vweird.f32 %v1401_v48 }
 0x14e   :  { %9433 = vrcp.f32 %v1402_v24  ;;  %v1148_v3 = vpop.f32.mrf.mxu2  ;;  %v1161_v7 = vpop.f32.mrf.mxu3  ;;  %vm1424_vm2 = vweird.f32 %v1402_v24 }
 0x14f   :  { %v1345_v61 = vpop.f32.mrf.mxu0  ;;  %v1358_v28 = vpop.f32.mrf.mxu1  ;;  %v1430_v7 = vand.u32 2147483648, %v1402_v24  ;;  %vm1414_vm5 = vcmp.eq.f32.partialorder %v1413_v0, 8.507059e+37 }
 0x150   :  { %v1388_v14 = vadd.f32 %v1345_v61, %v1172_v57  ;;  %v1389_v21 = vadd.f32 %v1358_v28, %v1173_v26  ;;  %v1428_v26 = vand.u32 2147483647, %v1402_v24 }
 0x151   :  { %v9430_v56 = vpop.eup %9429 }
 0x152   :  { %v10695_v20 = vadd.f32 1.0, %v9430_v56  ;;  %v8025_v50 = vmul.f32 -1.442695, %v1388_v14  ;;  %v8026_v55 = vmul.f32 -1.442695, %v1389_v21  ;;  %vm1429_vm7 = vcmp.eq.f32.partialorder %v1428_v26, 8.507059e+37 }
 0x153   :  { %v9432_v33 = vpop.eup %9431  ;;  %v1175_v26 = vunpack.c.h.bf16 %v10693_v42 }
 0x154   :  { %v9434_v32 = vpop.eup %9433  ;;  %v1405_v27 = vmul.f32 %v9432_v33, %v1401_v48  ;;  %9435 = vrcp.f32 %v10695_v20  ;;  %vm1410_vm0 = vweird.f32 %v9432_v33  ;;  %vm1439_vm9 = vweird.f32 %v10695_v20 }
 0x155   :  { %v1420_v12 = vmul.f32 %v9434_v32, %v1402_v24  ;;  %9437 = vtanh.f32 %v1166_v60  ;;  %vm1425_vm1 = vweird.f32 %v9434_v32  ;;  %vm1411_vm4 = vmor %vm1409_vm3, %vm1410_vm0 }
 0x156   :  { %v1406_v47 = vsub.f32 1.0, %v1405_v27  ;;  %9439 = vpow2.f32 %v8025_v50  ;;  %v1371_v40 = vpop.f32.mrf.mxu2  ;;  %v1384_v57 = vpop.f32.mrf.mxu3  ;;  %vm1426_vm6 = vmor %vm1424_vm2, %vm1425_vm1 }
 0x157   :  { %v1421_v6 = vsub.f32 1.0, %v1420_v12  ;;  %9441 = vpow2.f32 %v8026_v55  ;;  %v1390_v3 = vadd.f32 %v1371_v40, %v1174_v31  ;;  %v1347_v43 = vpop.f32.mrf.mxu0  ;;  %v1360_v14 = vpop.f32.mrf.mxu1  ;;  %v1416_v55 = vor.u32 1.1754944e-38, %v1415_v5 }
 0x158   :  { %v1407_v61 = vmul.f32 %v9432_v33, %v1406_v47  ;;  %v1431_v40 = vor.u32 1.1754944e-38, %v1430_v7 }
 0x159   :  { %v1422_v28 = vmul.f32 %v9434_v32, %v1421_v6  ;;  %v8027_v56 = vmul.f32 -1.442695, %v1390_v3 }
 0x15a   :  { %v9436_v60 = vpop.eup %9435  ;;  %v1408_v21 = vadd.f32 %v9432_v33, %v1407_v61 }
 0x15b   :  { %v9438_v50 = vpop.eup %9437  ;;  %v1435_v27 = vmul.f32 %v9436_v60, %v10695_v20  ;;  %v1423_v12 = vadd.f32 %v9434_v32, %v1422_v28  ;;  %9443 = vpow2.f32 %v8027_v56  ;;  %vm1440_vm8 = vweird.f32 %v9436_v60 }
 0x15c   :  { %v9440_v31 = vpop.eup %9439  ;;  %v1412_v47 = vsel %vm1411_vm4, %v9432_v33, %v1408_v21  ;;  %v1391_v21 = vadd.f32 %v1384_v57, %v1175_v26  ;;  %vm1441_vm10 = vmor %vm1439_vm9, %vm1440_vm8 }
 0x15d   :  { %v9442_v6 = vpop.eup %9441  ;;  %v1436_v3 = vsub.f32 1.0, %v1435_v27  ;;  %v1417_v43 = vsel %vm1414_vm5, %v1416_v55, %v1412_v47  ;;  %v1427_v24 = vsel %vm1426_vm6, %v9434_v32, %v1423_v12  ;;  %v1464_v61 = vadd.f32 1.0, %v9440_v31 }
 0x15e   :  { %v1432_v48 = vsel %vm1429_vm7, %v1431_v40, %v1427_v24  ;;  %v1451_v14 = vmul.f32 %v9438_v50, %v1417_v43  ;;  %v1465_v13 = vadd.f32 1.0, %v9442_v6  ;;  %v1373_v10 = vpop.f32.mrf.mxu2  ;;  %v1386_v28 = vpop.f32.mrf.mxu3  ;;  %v1445_v32 = vand.u32 2147483648, %v10695_v20 }
 0x15f   :  { %v1437_v4 = vmul.f32 %v9436_v60, %v1436_v3  ;;  %v1450_v5 = vmul.f32 0.0, %v1432_v48  ;;  %9445 = vrcp.f32 %v1464_v61  ;;  %v1443_v10 = vand.u32 2147483647, %v10695_v20 }
 0x160   :  { %9447 = vrcp.f32 %v1465_v13  ;;  %v1446_v31 = vor.u32 1.1754944e-38, %v1445_v32  ;;  %v1493_v6 = vand.u32 2147483648, %v1465_v13  ;;  %v1478_v3 = vand.u32 2147483648, %v1464_v61 }
 0x161   :  { %v9444_v7 = vpop.eup %9443  ;;  %v10701_v33 = vadd.f32 %v1451_v14, %v1450_v5  ;;  %v1438_v56 = vadd.f32 %v9436_v60, %v1437_v4  ;;  %vm1444_vm11 = vcmp.eq.f32.partialorder %v1443_v10, 8.507059e+37  ;;  %v1476_v48 = vand.u32 2147483647, %v1464_v61 }
 0x162   :  { %v10703_v0 = vadd.f32 1.0, %v9444_v7  ;;  %vm1472_vm14 = vweird.f32 %v1464_v61  ;;  %vm1487_vm15 = vweird.f32 %v1465_v13 }
 0x163   :  { %9449 = vtanh.f32 %v10701_v33  ;;  %v1442_v12 = vsel %vm1441_vm10, %v9436_v60, %v1438_v56  ;;  %v1491_v60 = vand.u32 2147483647, %v1465_v13  ;;  %v1479_v56 = vor.u32 1.1754944e-38, %v1478_v3 }
 0x164   :  { %9451 = vrcp.f32 %v10703_v0  ;;  %v1447_v43 = vsel %vm1444_vm11, %v1446_v31, %v1442_v12  ;;  %vm1477_vm1 = vcmp.eq.f32.partialorder %v1476_v48, 8.507059e+37  ;;  %v1508_v3 = vand.u32 2147483648, %v10703_v0 }
 0x165   :  { %v9446_v50 = vpop.eup %9445  ;;  %9453 = vtanh.f32 %v1391_v21  ;;  %v1494_v21 = vor.u32 1.1754944e-38, %v1493_v6  ;;  %vm1492_vm3 = vcmp.eq.f32.partialorder %v1491_v60, 8.507059e+37  ;;  %vm1502_vm5 = vweird.f32 %v10703_v0 }
 0x166   :  { %v9448_v27 = vpop.eup %9447  ;;  %v1468_v55 = vmul.f32 %v9446_v50, %v1464_v61  ;;  %vm1473_vm12 = vweird.f32 %v9446_v50 }
 0x167   :  { %v1483_v40 = vmul.f32 %v9448_v27, %v1465_v13  ;;  %vm1488_vm13 = vweird.f32 %v9448_v27  ;;  %vm1474_vm0 = vmor %vm1472_vm14, %vm1473_vm12 }
 0x168   :  { %v1469_v42 = vsub.f32 1.0, %v1468_v55  ;;  %vm1489_vm2 = vmor %vm1487_vm15, %vm1488_vm13 }
 0x169   :  { %v9450_v4 = vpop.eup %9449  ;;  %v1484_v47 = vsub.f32 1.0, %v1483_v40 }
 0x16a   :  { %v9452_v24 = vpop.eup %9451  ;;  %v1470_v20 = vmul.f32 %v9446_v50, %v1469_v42  ;;  %v1454_v57 = vmul.f32 %v9450_v4, %v1447_v43  ;;  %v13277_v42 = vld [vmem:[#allocation20_spill] sm:$0xff]  ;;  %v13280_v43 = vld [vmem:[#allocation23_spill] sm:$0xff] }
 0x16b   :  { %v1485_v14 = vmul.f32 %v9448_v27, %v1484_v47  ;;  %v1498_v5 = vmul.f32 %v9452_v24, %v10703_v0  ;;  %v9454_v10 = vpop.eup %9453  ;;  %v13278_v47 = vld [vmem:[#allocation21_spill] sm:$0xff]  ;;  %vm1503_vm4 = vweird.f32 %v9452_v24 }
 0x16c   :  { %v1471_v28 = vadd.f32 %v9446_v50, %v1470_v20  ;;  %v1518_v7 = vpack.c.bf16 %v1454_v57, %v1454_v57  ;;  %v1506_v20 = vand.u32 2147483647, %v10703_v0  ;;  %vm1504_vm6 = vmor %vm1502_vm5, %vm1503_vm4  ;;  %v1509_v57 = vor.u32 1.1754944e-38, %v1508_v3  ;;  %v13297_v3 = vld [vmem:[#allocation49_spill] sm:$0xff] }
 0x16d   :  { %v1499_v26 = vsub.f32 1.0, %v1498_v5  ;;  %v1486_v32 = vadd.f32 %v9448_v27, %v1485_v14 }
 0x16e   :  { %v1475_v55 = vsel %vm1474_vm0, %v9446_v50, %v1471_v28  ;;  %1522 = vst [vmem:[#allocation2] sm:$0xf] %v1518_v7  ;;  %1545 = vmatmul.bf16.vlgmr.msra.gmra.mxu0 %v1518_v7  ;;  %1558 = vmatmul.bf16.vlgmr.msra.gmra.mxu1 %v1518_v7  ;;  %vm1507_vm7 = vcmp.eq.f32.partialorder %v1506_v20, 8.507059e+37  ;;  %v13282_v28 = vld [vmem:[#allocation33_spill] sm:$0xff]  ;;  %v13298_v20 = vld [vmem:[#allocation50_spill] sm:$0xff] }
 0x16f   :  { %v1480_v12 = vsel %vm1477_vm1, %v1479_v56, %v1475_v55  ;;  %v1490_v31 = vsel %vm1489_vm2, %v9448_v27, %v1486_v32  ;;  %1571 = vmatmul.bf16.vlgmr.msra.gmra.mxu2 %v1518_v7  ;;  %1584 = vmatmul.bf16.vlgmr.msra.gmra.mxu3 %v1518_v7  ;;  %v1500_v61 = vmul.f32 %v9452_v24, %v1499_v26  ;;  %v13279_v27 = vld [vmem:[#allocation22_spill] sm:$0xff]  ;;  %v13284_v26 = vld [vmem:[#allocation35_spill] sm:$0xff]  ;;  %v13285_v56 = vld [vmem:[#allocation36_spill] sm:$0xff] }
 0x170   :  { %v1495_v40 = vsel %vm1492_vm3, %v1494_v21, %v1490_v31  ;;  %v1514_v13 = vmul.f32 %v9454_v10, %v1480_v12  ;;  %1803 = vmatpush.bf16.msra.mxu0 %v13277_v42  ;;  %1816 = vmatpush.bf16.msra.mxu1 %v10249_v11  ;;  %v13283_v7 = vld [vmem:[#allocation34_spill] sm:$0xff]  ;;  %v13286_v32 = vld [vmem:[#allocation37_spill] sm:$0xff]  ;;  %v13288_v21 = vld [vmem:[#allocation39_spill] sm:$0xff] }
 0x171   :  { %v1513_v4 = vmul.f32 0.0, %v1495_v40  ;;  %1829 = vmatpush.bf16.msra.mxu2 %v13278_v47  ;;  %1842 = vmatpush.bf16.msra.mxu3 %v10262_v25  ;;  %v1501_v6 = vadd.f32 %v9452_v24, %v1500_v61  ;;  %v13287_v10 = vld [vmem:[#allocation38_spill] sm:$0xff]  ;;  %v13289_v55 = vld [vmem:[#allocation40_spill] sm:$0xff]  ;;  %v13290_v12 = vld [vmem:[#allocation41_spill] sm:$0xff] }
 0x172   :  { %v13291_v31 = vld [vmem:[#allocation42_spill] sm:$0xff]  ;;  %v13292_v61 = vld [vmem:[#allocation44_spill] sm:$0xff]  ;;  %v13293_v40 = vld [vmem:[#allocation45_spill] sm:$0xff] }
 0x173   :  { %v10716_v50 = vadd.f32 %v1514_v13, %v1513_v4  ;;  %v1505_v48 = vsel %vm1504_vm6, %v9452_v24, %v1501_v6  ;;  %v13281_v24 = vld [vmem:[#allocation32_spill] sm:$0xff]  ;;  %v13294_v13 = vld [vmem:[#allocation46_spill] sm:$0xff]  ;;  %v13295_v4 = vld [vmem:[#allocation47_spill] sm:$0xff] }
 0x174   :  { %1804 = vmatpush.bf16.msra.mxu0 %v10254_v16  ;;  %1817 = vmatpush.bf16.msra.mxu1 %v13279_v27  ;;  %v1510_v5 = vsel %vm1507_vm7, %v1509_v57, %v1505_v48  ;;  %v13296_v6 = vld [vmem:[#allocation48_spill] sm:$0xff]  ;;  %v13299_v48 = vld [vmem:[#allocation51_spill] sm:$0xff] }
 0x175   :  { %9455 = vtanh.f32 %v10716_v50  ;;  %1830 = vmatpush.bf16.msra.mxu2 %v10260_v22  ;;  %1843 = vmatpush.bf16.msra.mxu3 %v13280_v43  ;;  %v13300_v57 = vld [vmem:[#allocation52_spill] sm:$0xff] }
 0x178   :  { %1805 = vmatpush.bf16.msra.mxu0 %v10277_v30  ;;  %1818 = vmatpush.bf16.msra.mxu1 %v10279_v34 }
 0x179   :  { %1831 = vmatpush.bf16.msra.mxu2 %v10281_v36  ;;  %1844 = vmatpush.bf16.msra.mxu3 %v10293_v49 }
 0x17b   :  { %v9456_v14 = vpop.eup %9455 }
 0x17c   :  { %v1517_v60 = vmul.f32 %v9456_v14, %v1510_v5  ;;  %1806 = vmatpush.bf16.msra.mxu0 %v10288_v44  ;;  %1819 = vmatpush.bf16.msra.mxu1 %v10290_v45  ;;  %v13301_v14 = vld [vmem:[#allocation53_spill] sm:$0xff]  ;;  %v13302_v5 = vld [vmem:[#allocation54_spill] sm:$0xff] }
 0x17d   :  { %1832 = vmatpush.bf16.msra.mxu2 %v10295_v51  ;;  %1845 = vmatpush.bf16.msra.mxu3 %v10302_v54 }
 0x17e   :  { %v1523_v0 = vpack.c.bf16 %v1517_v60, %v1517_v60  ;;  %v13303_v60 = vld [vmem:[#allocation55_spill] sm:$0xff] }
 0x180   :  { %1527 = vst [vmem:[#allocation2 + $0x3c] sm:$0xf] %v1523_v0  ;;  %1610 = vmatmul.bf16.vlgmr.msrb.gmra.mxu0 %v1523_v0  ;;  %1623 = vmatmul.bf16.vlgmr.msrb.gmra.mxu1 %v1523_v0 }
 0x181   :  { %1636 = vmatmul.bf16.vlgmr.msrb.gmra.mxu2 %v1523_v0  ;;  %1649 = vmatmul.bf16.vlgmr.msrb.gmra.mxu3 %v1523_v0  ;;  %v13304_v0 = vld [vmem:[#allocation56_spill] sm:$0xff] }
 0x182   :  { %1807 = vmatpush.bf16.msra.mxu0 %v10307_v58  ;;  %1820 = vmatpush.bf16.msra.mxu1 %v10310_v62 }
 0x183   :  { %1833 = vmatpush.bf16.msra.mxu2 %v10312_v63  ;;  %1846 = vmatpush.bf16.msra.mxu3 %v10315_v35 }
 0x186   :  { %1808 = vmatpush.bf16.msra.mxu0 %v10319_v8  ;;  %1821 = vmatpush.bf16.msra.mxu1 %v10321_v9 }
 0x187   :  { %1834 = vmatpush.bf16.msra.mxu2 %v10324_v15  ;;  %1847 = vmatpush.bf16.msra.mxu3 %v10326_v23 }
 0x18a   :  { %1809 = vmatpush.bf16.msra.mxu0 %v10329_v29  ;;  %1822 = vmatpush.bf16.msra.mxu1 %v10333_v37 }
 0x18b   :  { %1835 = vmatpush.bf16.msra.mxu2 %v10335_v38  ;;  %1848 = vmatpush.bf16.msra.mxu3 %v10338_v39 }
 0x18e   :  { %1810 = vmatpush.bf16.msra.mxu0 %v10345_v46  ;;  %1823 = vmatpush.bf16.msra.mxu1 %v10349_v52 }
 0x18f   :  { %1836 = vmatpush.bf16.msra.mxu2 %v10351_v53  ;;  %1849 = vmatpush.bf16.msra.mxu3 %v10355_v59 }
 0x192   :  { %1868 = vmatpush.bf16.msrb.mxu0 %v10359_v1  ;;  %1881 = vmatpush.bf16.msrb.mxu1 %v10361_v2 }
 0x193   :  { %1894 = vmatpush.bf16.msrb.mxu2 %v10364_v19  ;;  %1907 = vmatpush.bf16.msrb.mxu3 %v10368_v17 }
 0x196   :  { %1869 = vmatpush.bf16.msrb.mxu0 %v10370_v18  ;;  %1882 = vmatpush.bf16.msrb.mxu1 %v13281_v24 }
 0x197   :  { %1895 = vmatpush.bf16.msrb.mxu2 %v13282_v28  ;;  %1908 = vmatpush.bf16.msrb.mxu3 %v13283_v7 }
 0x19a   :  { %1870 = vmatpush.bf16.msrb.mxu0 %v13284_v26  ;;  %1883 = vmatpush.bf16.msrb.mxu1 %v13285_v56 }
 0x19b   :  { %1896 = vmatpush.bf16.msrb.mxu2 %v13286_v32  ;;  %1909 = vmatpush.bf16.msrb.mxu3 %v13287_v10 }
 0x19e   :  { %1871 = vmatpush.bf16.msrb.mxu0 %v13288_v21  ;;  %1884 = vmatpush.bf16.msrb.mxu1 %v13289_v55 }
 0x19f   :  { %1897 = vmatpush.bf16.msrb.mxu2 %v13290_v12  ;;  %1910 = vmatpush.bf16.msrb.mxu3 %v13291_v31 }
 0x1a2   :  { %1872 = vmatpush.bf16.msrb.mxu0 %v13251_v41  ;;  %1885 = vmatpush.bf16.msrb.mxu1 %v13292_v61 }
 0x1a3   :  { %1898 = vmatpush.bf16.msrb.mxu2 %v13293_v40  ;;  %1911 = vmatpush.bf16.msrb.mxu3 %v13294_v13  ;;  %v13305_v13 = vld [vmem:[#allocation57_spill] sm:$0xff] }
 0x1a6   :  { %1873 = vmatpush.bf16.msrb.mxu0 %v13295_v4  ;;  %1886 = vmatpush.bf16.msrb.mxu1 %v13296_v6  ;;  %v13306_v4 = vld [vmem:[#allocation58_spill] sm:$0xff]  ;;  %v13307_v6 = vld [vmem:[#allocation60_spill] sm:$0xff] }
 0x1a7   :  { %1899 = vmatpush.bf16.msrb.mxu2 %v13297_v3  ;;  %1912 = vmatpush.bf16.msrb.mxu3 %v13298_v20  ;;  %v1533_v3 = vunpack.c.l.bf16 %v13307_v6  ;;  %v1534_v20 = vunpack.c.h.bf16 %v13307_v6 }
 0x1aa   :  { %1874 = vmatpush.bf16.msrb.mxu0 %v13299_v48  ;;  %1887 = vmatpush.bf16.msrb.mxu1 %v13300_v57 }
 0x1ab   :  { %1900 = vmatpush.bf16.msrb.mxu2 %v13301_v14  ;;  %1913 = vmatpush.bf16.msrb.mxu3 %v13302_v5  ;;  %v13308_v5 = vld [vmem:[#allocation61_spill] sm:$0xff] }
 0x1ae   :  { %1875 = vmatpush.bf16.msrb.mxu0 %v13303_v60  ;;  %1888 = vmatpush.bf16.msrb.mxu1 %v13304_v0  ;;  %v1535_v60 = vunpack.c.l.bf16 %v13308_v5 }
 0x1af   :  { %1901 = vmatpush.bf16.msrb.mxu2 %v13305_v13  ;;  %1914 = vmatpush.bf16.msrb.mxu3 %v13306_v4 }
 0x1eb   :  { %v1546_v40 = vpop.f32.mrf.mxu0  ;;  %v1559_v48 = vpop.f32.mrf.mxu1 }
 0x1ec   :  { %v1589_v61 = vadd.f32 %v1546_v40, %v1533_v3  ;;  %v1590_v57 = vadd.f32 %v1559_v48, %v1534_v20  ;;  %v13309_v3 = vld [vmem:[#allocation86_spill] sm:$0xff] }
 0x1ed   :  { %v1598_v20 = vunpack.c.l.bf16 %v13309_v3  ;;  %v1599_v48 = vunpack.c.h.bf16 %v13309_v3 }
 0x1ee   :  { %v8028_v41 = vmul.f32 -1.442695, %v1589_v61  ;;  %v8029_v14 = vmul.f32 -1.442695, %v1590_v57 }
 0x1f0   :  { %9457 = vpow2.f32 %v8028_v41  ;;  %v1536_v41 = vunpack.c.h.bf16 %v13308_v5 }
 0x1f1   :  { %9459 = vpow2.f32 %v8029_v14 }
 0x1f2   :  { %v1572_v31 = vpop.f32.mrf.mxu2  ;;  %v1585_v0 = vpop.f32.mrf.mxu3 }
 0x1f3   :  { %v1591_v12 = vadd.f32 %v1572_v31, %v1535_v60  ;;  %v1548_v13 = vpop.f32.mrf.mxu0  ;;  %v1561_v55 = vpop.f32.mrf.mxu1 }
 0x1f5   :  { %v8030_v4 = vmul.f32 -1.442695, %v1591_v12  ;;  %v1592_v12 = vadd.f32 %v1585_v0, %v1536_v41 }
 0x1f6   :  { %v9458_v21 = vpop.eup %9457 }
 0x1f7   :  { %v9460_v10 = vpop.eup %9459  ;;  %v1667_v32 = vadd.f32 1.0, %v9458_v21  ;;  %9461 = vpow2.f32 %v8030_v4 }
 0x1f8   :  { %v1668_v6 = vadd.f32 1.0, %v9460_v10 }
 0x1f9   :  { %9463 = vrcp.f32 %v1667_v32  ;;  %v1679_v24 = vand.u32 2147483647, %v1667_v32  ;;  %vm1675_vm11 = vweird.f32 %v1667_v32 }
 0x1fa   :  { %9465 = vrcp.f32 %v1668_v6  ;;  %v1574_v40 = vpop.f32.mrf.mxu2  ;;  %v1587_v61 = vpop.f32.mrf.mxu3  ;;  %v1696_v28 = vand.u32 2147483648, %v1668_v6  ;;  %v1694_v0 = vand.u32 2147483647, %v1668_v6  ;;  %vm1690_vm10 = vweird.f32 %v1668_v6 }
 0x1fb   :  { %v13310_v61 = vld [vmem:[#allocation87_spill] sm:$0xff]  ;;  %vm1680_vm14 = vcmp.eq.f32.partialorder %v1679_v24, 8.507059e+37 }
 0x1fc   :  { %v1600_v5 = vunpack.c.l.bf16 %v13310_v61  ;;  %vm1695_vm15 = vcmp.eq.f32.partialorder %v1694_v0, 8.507059e+37 }
 0x1fd   :  { %v9462_v57 = vpop.eup %9461  ;;  %v1611_v31 = vpop.f32.mrf.mxu0 }
 0x1fe   :  { %v1624_v13 = vpop.f32.mrf.mxu1  ;;  %v10788_v55 = vadd.f32 1.0, %v9462_v57  ;;  %v1654_v14 = vadd.f32 %v1611_v31, %v1598_v20  ;;  %v1681_v57 = vand.u32 2147483648, %v1667_v32 }
 0x1ff   :  { %v1655_v21 = vadd.f32 %v1624_v13, %v1599_v48  ;;  %v9464_v4 = vpop.eup %9463 }
 0x200   :  { %v9466_v10 = vpop.eup %9465  ;;  %v1671_v60 = vmul.f32 %v9464_v4, %v1667_v32  ;;  %9467 = vrcp.f32 %v10788_v55  ;;  %v8031_v26 = vmul.f32 -1.442695, %v1654_v14  ;;  %vm1676_vm8 = vweird.f32 %v9464_v4 }
 0x201   :  { %v1686_v40 = vmul.f32 %v9466_v10, %v1668_v6  ;;  %9469 = vtanh.f32 %v1592_v12  ;;  %v8032_v3 = vmul.f32 -1.442695, %v1655_v21  ;;  %vm1691_vm9 = vweird.f32 %v9466_v10  ;;  %vm1677_vm12 = vmor %vm1675_vm11, %vm1676_vm8 }
 0x202   :  { %v1672_v56 = vsub.f32 1.0, %v1671_v60  ;;  %9471 = vpow2.f32 %v8031_v26  ;;  %vm1692_vm13 = vmor %vm1690_vm10, %vm1691_vm9  ;;  %v1711_v24 = vand.u32 2147483648, %v10788_v55  ;;  %vm1705_vm1 = vweird.f32 %v10788_v55 }
 0x203   :  { %v1687_v7 = vsub.f32 1.0, %v1686_v40  ;;  %9473 = vpow2.f32 %v8032_v3 }
 0x204   :  { %v1673_v18 = vmul.f32 %v9464_v4, %v1672_v56  ;;  %v1637_v41 = vpop.f32.mrf.mxu2  ;;  %v1650_v20 = vpop.f32.mrf.mxu3  ;;  %v1682_v56 = vor.u32 1.1754944e-38, %v1681_v57 }
 0x205   :  { %v1688_v48 = vmul.f32 %v9466_v10, %v1687_v7  ;;  %v1656_v31 = vadd.f32 %v1637_v41, %v1600_v5  ;;  %v1613_v13 = vpop.f32.mrf.mxu0  ;;  %v1697_v7 = vor.u32 1.1754944e-38, %v1696_v28 }
 0x206   :  { %v1626_v17 = vpop.f32.mrf.mxu1  ;;  %v9468_v60 = vpop.eup %9467  ;;  %v1674_v12 = vadd.f32 %v9464_v4, %v1673_v18 }
 0x207   :  { %v1701_v14 = vmul.f32 %v9468_v60, %v10788_v55  ;;  %v1689_v21 = vadd.f32 %v9466_v10, %v1688_v48  ;;  %v8033_v40 = vmul.f32 -1.442695, %v1656_v31  ;;  %v9470_v26 = vpop.eup %9469  ;;  %vm1706_vm0 = vweird.f32 %v9468_v60 }
 0x208   :  { %v1678_v19 = vsel %vm1677_vm12, %v9464_v4, %v1674_v12  ;;  %v9472_v18 = vpop.eup %9471  ;;  %vm1707_vm2 = vmor %vm1705_vm1, %vm1706_vm0  ;;  %v1712_v12 = vor.u32 1.1754944e-38, %v1711_v24 }
 0x209   :  { %v1702_v5 = vsub.f32 1.0, %v1701_v14  ;;  %v1683_v17 = vsel %vm1680_vm14, %v1682_v56, %v1678_v19  ;;  %v1693_v3 = vsel %vm1692_vm13, %v9466_v10, %v1689_v21  ;;  %9475 = vpow2.f32 %v8033_v40  ;;  %v9474_v41 = vpop.eup %9473 }
 0x20a   :  { %v1698_v32 = vsel %vm1695_vm15, %v1697_v7, %v1693_v3  ;;  %v1717_v6 = vmul.f32 %v9470_v26, %v1683_v17  ;;  %v1730_v48 = vadd.f32 1.0, %v9472_v18  ;;  %v10796_v31 = vadd.f32 1.0, %v9474_v41 }
 0x20b   :  { %v1703_v13 = vmul.f32 %v9468_v60, %v1702_v5  ;;  %v1716_v57 = vmul.f32 %v1698_v32, %v10701_v33  ;;  %v1709_v33 = vand.u32 2147483647, %v10788_v55 }
 0x20c   :  { %v1639_v2 = vpop.f32.mrf.mxu2  ;;  %v1652_v1 = vpop.f32.mrf.mxu3  ;;  %9477 = vrcp.f32 %v1730_v48  ;;  %v1742_v3 = vand.u32 2147483647, %v1730_v48  ;;  %v1744_v18 = vand.u32 2147483648, %v1730_v48  ;;  %v1759_v32 = vand.u32 2147483648, %v10796_v31 }
 0x20d   :  { %v10798_v28 = vadd.f32 %v1717_v6, %v1716_v57  ;;  %9479 = vrcp.f32 %v10796_v31  ;;  %v1704_v4 = vadd.f32 %v9468_v60, %v1703_v13  ;;  %v1601_v1 = vunpack.c.h.bf16 %v13310_v61 }
 0x20e   :  { %vm1710_vm3 = vcmp.eq.f32.partialorder %v1709_v33, 8.507059e+37  ;;  %v1757_v13 = vand.u32 2147483647, %v10796_v31  ;;  %vm1738_vm6 = vweird.f32 %v1730_v48  ;;  %vm1753_vm7 = vweird.f32 %v10796_v31 }
 0x20f   :  { %v9476_v19 = vpop.eup %9475  ;;  %9481 = vtanh.f32 %v10798_v28  ;;  %v1708_v2 = vsel %vm1707_vm2, %v9468_v60, %v1704_v4  ;;  %v1657_v14 = vadd.f32 %v1650_v20, %v1601_v1  ;;  %v1745_v24 = vor.u32 1.1754944e-38, %v1744_v18  ;;  %v13311_v18 = vld [vmem:[#allocation27_spill] sm:$0xff] }
 0x210   :  { %v10805_v10 = vadd.f32 1.0, %v9476_v19  ;;  %v1713_v7 = vsel %vm1710_vm3, %v1712_v12, %v1708_v2  ;;  %v1760_v33 = vor.u32 1.1754944e-38, %v1759_v32  ;;  %vm1743_vm10 = vcmp.eq.f32.partialorder %v1742_v3, 8.507059e+37  ;;  %v13313_v32 = vld [vmem:[#allocation29_spill] sm:$0xff] }
 0x211   :  { %vm1758_vm11 = vcmp.eq.f32.partialorder %v1757_v13, 8.507059e+37  ;;  %v13318_v13 = vld [vmem:[#allocation34_spill] sm:$0xff] }
 0x212   :  { %9483 = vrcp.f32 %v10805_v10  ;;  %v9478_v0 = vpop.eup %9477  ;;  %vm1768_vm13 = vweird.f32 %v10805_v10 }
 0x213   :  { %v9480_v56 = vpop.eup %9479  ;;  %v1734_v21 = vmul.f32 %v9478_v0, %v1730_v48  ;;  %9485 = vtanh.f32 %v1657_v14  ;;  %vm1739_vm4 = vweird.f32 %v9478_v0 }
 0x214   :  { %v1749_v26 = vmul.f32 %v9480_v56, %v10796_v31  ;;  %vm1754_vm5 = vweird.f32 %v9480_v56  ;;  %vm1740_vm8 = vmor %vm1738_vm6, %vm1739_vm4 }
 0x215   :  { %v9482_v40 = vpop.eup %9481  ;;  %v1735_v5 = vsub.f32 1.0, %v1734_v21  ;;  %vm1755_vm9 = vmor %vm1753_vm7, %vm1754_vm5 }
 0x216   :  { %v1720_v55 = vmul.f32 %v9482_v40, %v1713_v7  ;;  %v1750_v17 = vsub.f32 1.0, %v1749_v26  ;;  %v1774_v26 = vand.u32 2147483648, %v10805_v10 }
 0x217   :  { %v1736_v60 = vmul.f32 %v9478_v0, %v1735_v5 }
 0x218   :  { %v9484_v61 = vpop.eup %9483  ;;  %v1784_v6 = vpack.c.bf16 %v1720_v55, %v1720_v55  ;;  %v1751_v20 = vmul.f32 %v9480_v56, %v1750_v17  ;;  %v1775_v5 = vor.u32 1.1754944e-38, %v1774_v26  ;;  %v13333_v26 = vld [vmem:[#allocation49_spill] sm:$0xff] }
 0x219   :  { %v1764_v41 = vmul.f32 %v9484_v61, %v10805_v10  ;;  %v1737_v57 = vadd.f32 %v9478_v0, %v1736_v60  ;;  %v9486_v48 = vpop.eup %9485  ;;  %vm1769_vm12 = vweird.f32 %v9484_v61  ;;  %v13314_v60 = vld [vmem:[#allocation30_spill] sm:$0xff] }
 0x21a   :  { %1788 = vst [vmem:[#allocation2 + $0x8] sm:$0xf] %v1784_v6  ;;  %1811 = vmatmul.bf16.vlgmr.msra.gmra.mxu0 %v1784_v6  ;;  %1824 = vmatmul.bf16.vlgmr.msra.gmra.mxu1 %v1784_v6  ;;  %v1752_v4 = vadd.f32 %v9480_v56, %v1751_v20  ;;  %vm1770_vm14 = vmor %vm1768_vm13, %vm1769_vm12  ;;  %v13316_v20 = vld [vmem:[#allocation32_spill] sm:$0xff] }
 0x21b   :  { %v1765_v19 = vsub.f32 1.0, %v1764_v41  ;;  %1837 = vmatmul.bf16.vlgmr.msra.gmra.mxu2 %v1784_v6  ;;  %1850 = vmatmul.bf16.vlgmr.msra.gmra.mxu3 %v1784_v6  ;;  %v1741_v1 = vsel %vm1740_vm8, %v9478_v0, %v1737_v57  ;;  %v13315_v6 = vld [vmem:[#allocation31_spill] sm:$0xff]  ;;  %v13317_v41 = vld [vmem:[#allocation33_spill] sm:$0xff] }
 0x21c   :  { %2069 = vmatpush.bf16.msra.mxu0 %v13277_v42  ;;  %2082 = vmatpush.bf16.msra.mxu1 %v10249_v11  ;;  %v1746_v2 = vsel %vm1743_vm10, %v1745_v24, %v1741_v1  ;;  %v1756_v12 = vsel %vm1755_vm9, %v9480_v56, %v1752_v4  ;;  %v13319_v57 = vld [vmem:[#allocation35_spill] sm:$0xff]  ;;  %v13321_v24 = vld [vmem:[#allocation37_spill] sm:$0xff]  ;;  %v13322_v4 = vld [vmem:[#allocation38_spill] sm:$0xff] }
 0x21d   :  { %2095 = vmatpush.bf16.msra.mxu2 %v13278_v47  ;;  %2108 = vmatpush.bf16.msra.mxu3 %v10262_v25  ;;  %v1766_v31 = vmul.f32 %v9484_v61, %v1765_v19  ;;  %v1761_v14 = vsel %vm1758_vm11, %v1760_v33, %v1756_v12  ;;  %v1780_v21 = vmul.f32 %v9486_v48, %v1746_v2  ;;  %v13320_v19 = vld [vmem:[#allocation36_spill] sm:$0xff]  ;;  %v13323_v33 = vld [vmem:[#allocation39_spill] sm:$0xff]  ;;  %v13325_v48 = vld [vmem:[#allocation41_spill] sm:$0xff] }
 0x21e   :  { %v1779_v40 = vmul.f32 %v1761_v14, %v10716_v50  ;;  %v1772_v50 = vand.u32 2147483647, %v10805_v10  ;;  %v13324_v1 = vld [vmem:[#allocation40_spill] sm:$0xff]  ;;  %v13326_v2 = vld [vmem:[#allocation42_spill] sm:$0xff]  ;;  %v13327_v12 = vld [vmem:[#allocation43_spill] sm:$0xff] }
 0x21f   :  { %v1767_v56 = vadd.f32 %v9484_v61, %v1766_v31  ;;  %v13328_v31 = vld [vmem:[#allocation44_spill] sm:$0xff]  ;;  %v13329_v14 = vld [vmem:[#allocation45_spill] sm:$0xff] }
 0x220   :  { %2070 = vmatpush.bf16.msra.mxu0 %v10254_v16  ;;  %2083 = vmatpush.bf16.msra.mxu1 %v13279_v27  ;;  %v10822_v0 = vadd.f32 %v1780_v21, %v1779_v40  ;;  %vm1773_vm15 = vcmp.eq.f32.partialorder %v1772_v50, 8.507059e+37  ;;  %v13330_v21 = vld [vmem:[#allocation46_spill] sm:$0xff]  ;;  %v13331_v40 = vld [vmem:[#allocation47_spill] sm:$0xff] }
 0x221   :  { %2096 = vmatpush.bf16.msra.mxu2 %v10260_v22  ;;  %2109 = vmatpush.bf16.msra.mxu3 %v13280_v43  ;;  %v1771_v7 = vsel %vm1770_vm14, %v9484_v61, %v1767_v56  ;;  %v13312_v61 = vld [vmem:[#allocation28_spill] sm:$0xff]  ;;  %v13334_v50 = vld [vmem:[#allocation50_spill] sm:$0xff] }
 0x222   :  { %9487 = vtanh.f32 %v10822_v0  ;;  %v1776_v17 = vsel %vm1773_vm15, %v1775_v5, %v1771_v7  ;;  %v13332_v56 = vld [vmem:[#allocation48_spill] sm:$0xff]  ;;  %v13335_v7 = vld [vmem:[#allocation51_spill] sm:$0xff] }
 0x223   :  { %v13336_v5 = vld [vmem:[#allocation52_spill] sm:$0xff] }
 0x224   :  { %2071 = vmatpush.bf16.msra.mxu0 %v10277_v30  ;;  %2084 = vmatpush.bf16.msra.mxu1 %v10279_v34 }
 0x225   :  { %2097 = vmatpush.bf16.msra.mxu2 %v10281_v36  ;;  %2110 = vmatpush.bf16.msra.mxu3 %v10293_v49 }
 0x228   :  { %2072 = vmatpush.bf16.msra.mxu0 %v10288_v44  ;;  %2085 = vmatpush.bf16.msra.mxu1 %v10290_v45  ;;  %v9488_v55 = vpop.eup %9487 }
 0x229   :  { %2098 = vmatpush.bf16.msra.mxu2 %v10295_v51  ;;  %2111 = vmatpush.bf16.msra.mxu3 %v10302_v54  ;;  %v1783_v10 = vmul.f32 %v9488_v55, %v1776_v17  ;;  %v13337_v55 = vld [vmem:[#allocation53_spill] sm:$0xff]  ;;  %v13338_v17 = vld [vmem:[#allocation54_spill] sm:$0xff] }
 0x22b   :  { %v1789_v3 = vpack.c.bf16 %v1783_v10, %v1783_v10  ;;  %v13339_v10 = vld [vmem:[#allocation55_spill] sm:$0xff] }
 0x22c   :  { %2073 = vmatpush.bf16.msra.mxu0 %v10307_v58  ;;  %2086 = vmatpush.bf16.msra.mxu1 %v10310_v62 }
 0x22d   :  { %2099 = vmatpush.bf16.msra.mxu2 %v10312_v63  ;;  %2112 = vmatpush.bf16.msra.mxu3 %v10315_v35  ;;  %1793 = vst [vmem:[#allocation2 + $0x34] sm:$0xf] %v1789_v3 }
 0x22e   :  { %1876 = vmatmul.bf16.vlgmr.msrb.gmra.mxu0 %v1789_v3  ;;  %1889 = vmatmul.bf16.vlgmr.msrb.gmra.mxu1 %v1789_v3 }
 0x22f   :  { %1902 = vmatmul.bf16.vlgmr.msrb.gmra.mxu2 %v1789_v3  ;;  %1915 = vmatmul.bf16.vlgmr.msrb.gmra.mxu3 %v1789_v3  ;;  %v13340_v3 = vld [vmem:[#allocation56_spill] sm:$0xff] }
 0x230   :  { %2074 = vmatpush.bf16.msra.mxu0 %v10319_v8  ;;  %2087 = vmatpush.bf16.msra.mxu1 %v10321_v9 }
 0x231   :  { %2100 = vmatpush.bf16.msra.mxu2 %v10324_v15  ;;  %2113 = vmatpush.bf16.msra.mxu3 %v10326_v23 }
 0x234   :  { %2075 = vmatpush.bf16.msra.mxu0 %v10329_v29  ;;  %2088 = vmatpush.bf16.msra.mxu1 %v10333_v37 }
 0x235   :  { %2101 = vmatpush.bf16.msra.mxu2 %v10335_v38  ;;  %2114 = vmatpush.bf16.msra.mxu3 %v10338_v39 }
 0x238   :  { %2076 = vmatpush.bf16.msra.mxu0 %v10345_v46  ;;  %2089 = vmatpush.bf16.msra.mxu1 %v10349_v52 }
 0x239   :  { %2102 = vmatpush.bf16.msra.mxu2 %v10351_v53  ;;  %2115 = vmatpush.bf16.msra.mxu3 %v10355_v59 }
 0x23c   :  { %2134 = vmatpush.bf16.msrb.mxu0 %v13311_v18  ;;  %2147 = vmatpush.bf16.msrb.mxu1 %v13312_v61 }
 0x23d   :  { %2160 = vmatpush.bf16.msrb.mxu2 %v13313_v32  ;;  %2173 = vmatpush.bf16.msrb.mxu3 %v13314_v60 }
 0x240   :  { %2135 = vmatpush.bf16.msrb.mxu0 %v13315_v6  ;;  %2148 = vmatpush.bf16.msrb.mxu1 %v13316_v20  ;;  %v13346_v6 = vld [vmem:[#allocation85_spill] sm:$0xff] }
 0x241   :  { %2161 = vmatpush.bf16.msrb.mxu2 %v13317_v41  ;;  %2174 = vmatpush.bf16.msrb.mxu3 %v13318_v13  ;;  %v1866_v60 = vunpack.c.l.bf16 %v13346_v6 }
 0x244   :  { %2136 = vmatpush.bf16.msrb.mxu0 %v13319_v57  ;;  %2149 = vmatpush.bf16.msrb.mxu1 %v13320_v19 }
 0x245   :  { %2162 = vmatpush.bf16.msrb.mxu2 %v13321_v24  ;;  %2175 = vmatpush.bf16.msrb.mxu3 %v13322_v4 }
 0x248   :  { %2137 = vmatpush.bf16.msrb.mxu0 %v13323_v33  ;;  %2150 = vmatpush.bf16.msrb.mxu1 %v13324_v1 }
 0x249   :  { %2163 = vmatpush.bf16.msrb.mxu2 %v13325_v48  ;;  %2176 = vmatpush.bf16.msrb.mxu3 %v13326_v2 }
 0x24c   :  { %2138 = vmatpush.bf16.msrb.mxu0 %v13327_v12  ;;  %2151 = vmatpush.bf16.msrb.mxu1 %v13328_v31 }
 0x24d   :  { %2164 = vmatpush.bf16.msrb.mxu2 %v13329_v14  ;;  %2177 = vmatpush.bf16.msrb.mxu3 %v13330_v21  ;;  %v13341_v21 = vld [vmem:[#allocation57_spill] sm:$0xff] }
 0x250   :  { %2139 = vmatpush.bf16.msrb.mxu0 %v13331_v40  ;;  %2152 = vmatpush.bf16.msrb.mxu1 %v13332_v56  ;;  %v13342_v40 = vld [vmem:[#allocation58_spill] sm:$0xff] }
 0x251   :  { %2165 = vmatpush.bf16.msrb.mxu2 %v13333_v26  ;;  %2178 = vmatpush.bf16.msrb.mxu3 %v13334_v50  ;;  %v13343_v56 = vld [vmem:[#allocation62_spill] sm:$0xff] }
 0x252   :  { %v1799_v26 = vunpack.c.l.bf16 %v13343_v56  ;;  %v1800_v50 = vunpack.c.h.bf16 %v13343_v56 }
 0x254   :  { %2140 = vmatpush.bf16.msrb.mxu0 %v13335_v7  ;;  %2153 = vmatpush.bf16.msrb.mxu1 %v13336_v5 }
 0x255   :  { %2166 = vmatpush.bf16.msrb.mxu2 %v13337_v55  ;;  %2179 = vmatpush.bf16.msrb.mxu3 %v13338_v17  ;;  %v13344_v17 = vld [vmem:[#allocation63_spill] sm:$0xff] }
 0x258   :  { %2141 = vmatpush.bf16.msrb.mxu0 %v13339_v10  ;;  %2154 = vmatpush.bf16.msrb.mxu1 %v13340_v3  ;;  %v1801_v10 = vunpack.c.l.bf16 %v13344_v17 }
 0x259   :  { %2167 = vmatpush.bf16.msrb.mxu2 %v13341_v21  ;;  %2180 = vmatpush.bf16.msrb.mxu3 %v13342_v40 }
 0x297   :  { %v1812_v14 = vpop.f32.mrf.mxu0  ;;  %v1825_v7 = vpop.f32.mrf.mxu1 }
 0x298   :  { %v1855_v31 = vadd.f32 %v1812_v14, %v1799_v26  ;;  %v1856_v5 = vadd.f32 %v1825_v7, %v1800_v50 }
 0x29a   :  { %v8034_v12 = vmul.f32 -1.442695, %v1855_v31  ;;  %v8035_v55 = vmul.f32 -1.442695, %v1856_v5 }
 0x29c   :  { %9489 = vpow2.f32 %v8034_v12  ;;  %v1802_v12 = vunpack.c.h.bf16 %v13344_v17 }
 0x29d   :  { %9491 = vpow2.f32 %v8035_v55 }
 0x29e   :  { %v1838_v2 = vpop.f32.mrf.mxu2  ;;  %v1851_v3 = vpop.f32.mrf.mxu3 }
 0x29f   :  { %v1857_v48 = vadd.f32 %v1838_v2, %v1801_v10  ;;  %v1814_v21 = vpop.f32.mrf.mxu0  ;;  %v1827_v1 = vpop.f32.mrf.mxu1  ;;  %v1858_v7 = vadd.f32 %v1851_v3, %v1802_v12 }
 0x2a1   :  { %v8036_v40 = vmul.f32 -1.442695, %v1857_v48 }
 0x2a2   :  { %v9490_v33 = vpop.eup %9489 }
 0x2a3   :  { %v9492_v4 = vpop.eup %9491  ;;  %v1933_v24 = vadd.f32 1.0, %v9490_v33  ;;  %9493 = vpow2.f32 %v8036_v40  ;;  %v13345_v33 = vld [vmem:[#allocation84_spill] sm:$0xff] }
 0x2a4   :  { %v1934_v56 = vadd.f32 1.0, %v9492_v4  ;;  %v1864_v40 = vunpack.c.l.bf16 %v13345_v33  ;;  %v1865_v4 = vunpack.c.h.bf16 %v13345_v33 }
 0x2a5   :  { %9495 = vrcp.f32 %v1933_v24  ;;  %v1945_v19 = vand.u32 2147483647, %v1933_v24  ;;  %v1947_v3 = vand.u32 2147483648, %v1933_v24  ;;  %vm1941_vm3 = vweird.f32 %v1933_v24 }
 0x2a6   :  { %9497 = vrcp.f32 %v1934_v56  ;;  %v1840_v14 = vpop.f32.mrf.mxu2  ;;  %v1853_v31 = vpop.f32.mrf.mxu3  ;;  %v1960_v20 = vand.u32 2147483647, %v1934_v56  ;;  %vm1956_vm2 = vweird.f32 %v1934_v56 }
 0x2a7   :  { %vm1946_vm6 = vcmp.eq.f32.partialorder %v1945_v19, 8.507059e+37 }
 0x2a8   :  { %vm1961_vm7 = vcmp.eq.f32.partialorder %v1960_v20, 8.507059e+37 }
 0x2a9   :  { %v9494_v26 = vpop.eup %9493 }
 0x2aa   :  { %v10890_v50 = vadd.f32 1.0, %v9494_v26  ;;  %v1962_v26 = vand.u32 2147483648, %v1934_v56 }
 0x2ab   :  { %v9496_v5 = vpop.eup %9495  ;;  %v1877_v2 = vpop.f32.mrf.mxu0 }
 0x2ac   :  { %v1890_v21 = vpop.f32.mrf.mxu1  ;;  %v9498_v1 = vpop.eup %9497  ;;  %v1937_v48 = vmul.f32 %v9496_v5, %v1933_v24  ;;  %9499 = vrcp.f32 %v10890_v50  ;;  %v1920_v14 = vadd.f32 %v1877_v2, %v1864_v40  ;;  %vm1942_vm0 = vweird.f32 %v9496_v5 }
 0x2ad   :  { %v1952_v55 = vmul.f32 %v9498_v1, %v1934_v56  ;;  %9501 = vtanh.f32 %v1858_v7  ;;  %v1921_v17 = vadd.f32 %v1890_v21, %v1865_v4  ;;  %vm1957_vm1 = vweird.f32 %v9498_v1  ;;  %vm1943_vm4 = vmor %vm1941_vm3, %vm1942_vm0 }
 0x2ae   :  { %v1938_v10 = vsub.f32 1.0, %v1937_v48  ;;  %v8037_v57 = vmul.f32 -1.442695, %v1920_v14  ;;  %v1948_v48 = vor.u32 1.1754944e-38, %v1947_v3  ;;  %vm1958_vm5 = vmor %vm1956_vm2, %vm1957_vm1  ;;  %v1963_v14 = vor.u32 1.1754944e-38, %v1962_v26 }
 0x2af   :  { %v1953_v31 = vsub.f32 1.0, %v1952_v55  ;;  %v8038_v13 = vmul.f32 -1.442695, %v1921_v17  ;;  %v1977_v20 = vand.u32 2147483648, %v10890_v50  ;;  %vm1971_vm9 = vweird.f32 %v10890_v50 }
 0x2b0   :  { %v1939_v12 = vmul.f32 %v9496_v5, %v1938_v10  ;;  %9503 = vpow2.f32 %v8037_v57 }
 0x2b1   :  { %v1954_v41 = vmul.f32 %v9498_v1, %v1953_v31  ;;  %9505 = vpow2.f32 %v8038_v13 }
 0x2b2   :  { %v9500_v32 = vpop.eup %9499  ;;  %v1940_v33 = vadd.f32 %v9496_v5, %v1939_v12  ;;  %v1903_v7 = vpop.f32.mrf.mxu2 }
 0x2b3   :  { %v1916_v2 = vpop.f32.mrf.mxu3  ;;  %v1967_v21 = vmul.f32 %v9500_v32, %v10890_v50  ;;  %v1955_v40 = vadd.f32 %v9498_v1, %v1954_v41  ;;  %v1879_v4 = vpop.f32.mrf.mxu0  ;;  %v1922_v56 = vadd.f32 %v1903_v7, %v1866_v60  ;;  %vm1972_vm8 = vweird.f32 %v9500_v32 }
 0x2b4   :  { %v1892_v55 = vpop.f32.mrf.mxu1  ;;  %v9502_v10 = vpop.eup %9501  ;;  %v1944_v17 = vsel %vm1943_vm4, %v9496_v5, %v1940_v33  ;;  %vm1973_vm10 = vmor %vm1971_vm9, %vm1972_vm8  ;;  %v1867_v7 = vunpack.c.h.bf16 %v13346_v6 }
 0x2b5   :  { %v1968_v24 = vsub.f32 1.0, %v1967_v21  ;;  %v1949_v57 = vsel %vm1946_vm6, %v1948_v48, %v1944_v17  ;;  %v1959_v31 = vsel %vm1958_vm5, %v9498_v1, %v1955_v40  ;;  %v8039_v53 = vmul.f32 -1.442695, %v1922_v56 }
 0x2b6   :  { %v1964_v12 = vsel %vm1961_vm7, %v1963_v14, %v1959_v31  ;;  %v1983_v59 = vmul.f32 %v9502_v10, %v1949_v57  ;;  %v9504_v13 = vpop.eup %9503  ;;  %v1978_v1 = vor.u32 1.1754944e-38, %v1977_v20  ;;  %v1923_v40 = vadd.f32 %v1916_v2, %v1867_v7 }
 0x2b7   :  { %v1969_v61 = vmul.f32 %v9500_v32, %v1968_v24  ;;  %v1982_v41 = vmul.f32 %v1964_v12, %v10798_v28  ;;  %9507 = vpow2.f32 %v8039_v53  ;;  %v9506_v3 = vpop.eup %9505  ;;  %v1996_v55 = vadd.f32 1.0, %v9504_v13 }
 0x2b8   :  { %v10902_v5 = vadd.f32 1.0, %v9506_v3  ;;  %v1975_v28 = vand.u32 2147483647, %v10890_v50 }
 0x2b9   :  { %v10900_v4 = vadd.f32 %v1983_v59, %v1982_v41  ;;  %v1970_v26 = vadd.f32 %v9500_v32, %v1969_v61  ;;  %v2010_v57 = vand.u32 2147483648, %v1996_v55  ;;  %v2008_v41 = vand.u32 2147483647, %v1996_v55 }
 0x2ba   :  { %v1905_v60 = vpop.f32.mrf.mxu2  ;;  %vm1976_vm11 = vcmp.eq.f32.partialorder %v1975_v28, 8.507059e+37  ;;  %v2025_v31 = vand.u32 2147483648, %v10902_v5  ;;  %v2023_v3 = vand.u32 2147483647, %v10902_v5  ;;  %vm2004_vm14 = vweird.f32 %v1996_v55 }
 0x2bb   :  { %v1918_v19 = vpop.f32.mrf.mxu3  ;;  %9509 = vtanh.f32 %v10900_v4  ;;  %v1974_v59 = vsel %vm1973_vm10, %v9500_v32, %v1970_v26  ;;  %vm2019_vm15 = vweird.f32 %v10902_v5  ;;  %v2011_v26 = vor.u32 1.1754944e-38, %v2010_v57  ;;  %v13348_v57 = vld [vmem:[#allocation25_spill] sm:$0xff] }
 0x2bc   :  { %9511 = vrcp.f32 %v1996_v55  ;;  %v1979_v21 = vsel %vm1976_vm11, %v1978_v1, %v1974_v59  ;;  %v2026_v28 = vor.u32 1.1754944e-38, %v2025_v31  ;;  %vm2009_vm2 = vcmp.eq.f32.partialorder %v2008_v41, 8.507059e+37  ;;  %v13350_v31 = vld [vmem:[#allocation29_spill] sm:$0xff]  ;;  %v13352_v41 = vld [vmem:[#allocation31_spill] sm:$0xff] }
 0x2bd   :  { %9513 = vrcp.f32 %v10902_v5  ;;  %v9508_v53 = vpop.eup %9507  ;;  %vm2024_vm3 = vcmp.eq.f32.partialorder %v2023_v3, 8.507059e+37  ;;  %v13355_v3 = vld [vmem:[#allocation34_spill] sm:$0xff] }
 0x2be   :  { %v10909_v33 = vadd.f32 1.0, %v9508_v53 }
 0x2c0   :  { %9515 = vrcp.f32 %v10909_v33  ;;  %vm2034_vm5 = vweird.f32 %v10909_v33 }
 0x2c1   :  { %v9510_v61 = vpop.eup %9509  ;;  %9517 = vtanh.f32 %v1923_v40 }
 0x2c2   :  { %v9512_v48 = vpop.eup %9511  ;;  %v1986_v10 = vmul.f32 %v9510_v61, %v1979_v21 }
 0x2c3   :  { %v9514_v50 = vpop.eup %9513  ;;  %v2000_v14 = vmul.f32 %v9512_v48, %v1996_v55  ;;  %vm2005_vm12 = vweird.f32 %v9512_v48 }
 0x2c4   :  { %v2015_v17 = vmul.f32 %v9514_v50, %v10902_v5  ;;  %v2050_v56 = vpack.c.bf16 %v1986_v10, %v1986_v10  ;;  %vm2020_vm13 = vweird.f32 %v9514_v50  ;;  %vm2006_vm0 = vmor %vm2004_vm14, %vm2005_vm12  ;;  %v2040_v10 = vand.u32 2147483648, %v10909_v33 }
 0x2c5   :  { %v2001_v24 = vsub.f32 1.0, %v2000_v14  ;;  %vm2021_vm1 = vmor %vm2019_vm15, %vm2020_vm13 }
 0x2c6   :  { %v2016_v32 = vsub.f32 1.0, %v2015_v17  ;;  %2054 = vst [vmem:[#allocation2 + $0x10] sm:$0xf] %v2050_v56  ;;  %2077 = vmatmul.bf16.vlgmr.msra.gmra.mxu0 %v2050_v56  ;;  %2090 = vmatmul.bf16.vlgmr.msra.gmra.mxu1 %v2050_v56  ;;  %v9516_v6 = vpop.eup %9515  ;;  %v2041_v14 = vor.u32 1.1754944e-38, %v2040_v10  ;;  %v13370_v10 = vld [vmem:[#allocation49_spill] sm:$0xff] }
 0x2c7   :  { %v2002_v12 = vmul.f32 %v9512_v48, %v2001_v24  ;;  %2103 = vmatmul.bf16.vlgmr.msra.gmra.mxu2 %v2050_v56  ;;  %2116 = vmatmul.bf16.vlgmr.msra.gmra.mxu3 %v2050_v56  ;;  %v2030_v13 = vmul.f32 %v9516_v6, %v10909_v33  ;;  %v9518_v59 = vpop.eup %9517  ;;  %vm2035_vm4 = vweird.f32 %v9516_v6 }
 0x2c8   :  { %v2017_v2 = vmul.f32 %v9514_v50, %v2016_v32  ;;  %2332 = vmatpush.bf16.msra.mxu0 %v13277_v42  ;;  %2345 = vmatpush.bf16.msra.mxu1 %v10249_v11  ;;  %vm2036_vm6 = vmor %vm2034_vm5, %vm2035_vm4  ;;  %v13347_v32 = vld [vmem:[#allocation28_spill] sm:$0xff] }
 0x2c9   :  { %v2003_v60 = vadd.f32 %v9512_v48, %v2002_v12  ;;  %2358 = vmatpush.bf16.msra.mxu2 %v13278_v47  ;;  %2371 = vmatpush.bf16.msra.mxu3 %v10262_v25  ;;  %v2031_v19 = vsub.f32 1.0, %v2030_v13  ;;  %v13351_v12 = vld [vmem:[#allocation30_spill] sm:$0xff]  ;;  %v13354_v13 = vld [vmem:[#allocation33_spill] sm:$0xff] }
 0x2ca   :  { %v2018_v20 = vadd.f32 %v9514_v50, %v2017_v2  ;;  %v13353_v2 = vld [vmem:[#allocation32_spill] sm:$0xff] }
 0x2cb   :  { %v2007_v53 = vsel %vm2006_vm0, %v9512_v48, %v2003_v60  ;;  %v2032_v55 = vmul.f32 %v9516_v6, %v2031_v19  ;;  %v13356_v60 = vld [vmem:[#allocation35_spill] sm:$0xff]  ;;  %v13357_v19 = vld [vmem:[#allocation36_spill] sm:$0xff] }
 0x2cc   :  { %v2012_v1 = vsel %vm2009_vm2, %v2011_v26, %v2007_v53  ;;  %v2022_v7 = vsel %vm2021_vm1, %v9514_v50, %v2018_v20  ;;  %2333 = vmatpush.bf16.msra.mxu0 %v10254_v16  ;;  %2346 = vmatpush.bf16.msra.mxu1 %v13279_v27  ;;  %v13358_v26 = vld [vmem:[#allocation37_spill] sm:$0xff]  ;;  %v13359_v20 = vld [vmem:[#allocation38_spill] sm:$0xff]  ;;  %v13361_v53 = vld [vmem:[#allocation40_spill] sm:$0xff] }
 0x2cd   :  { %v2027_v61 = vsel %vm2024_vm3, %v2026_v28, %v2022_v7  ;;  %v2046_v5 = vmul.f32 %v9518_v59, %v2012_v1  ;;  %2359 = vmatpush.bf16.msra.mxu2 %v10260_v22  ;;  %2372 = vmatpush.bf16.msra.mxu3 %v13280_v43  ;;  %v2033_v48 = vadd.f32 %v9516_v6, %v2032_v55  ;;  %v13360_v28 = vld [vmem:[#allocation39_spill] sm:$0xff]  ;;  %v13362_v59 = vld [vmem:[#allocation41_spill] sm:$0xff]  ;;  %v13363_v1 = vld [vmem:[#allocation42_spill] sm:$0xff] }
 0x2ce   :  { %v2045_v21 = vmul.f32 %v2027_v61, %v10822_v0  ;;  %v2038_v0 = vand.u32 2147483647, %v10909_v33  ;;  %v13364_v7 = vld [vmem:[#allocation43_spill] sm:$0xff]  ;;  %v13365_v55 = vld [vmem:[#allocation44_spill] sm:$0xff]  ;;  %v13366_v61 = vld [vmem:[#allocation45_spill] sm:$0xff] }
 0x2cf   :  { %v2037_v50 = vsel %vm2036_vm6, %v9516_v6, %v2033_v48  ;;  %v13349_v6 = vld [vmem:[#allocation26_spill] sm:$0xff]  ;;  %v13369_v48 = vld [vmem:[#allocation48_spill] sm:$0xff] }
 0x2d0   :  { %v10928_v40 = vadd.f32 %v2046_v5, %v2045_v21  ;;  %2334 = vmatpush.bf16.msra.mxu0 %v10277_v30  ;;  %2347 = vmatpush.bf16.msra.mxu1 %v10279_v34  ;;  %vm2039_vm7 = vcmp.eq.f32.partialorder %v2038_v0, 8.507059e+37  ;;  %v13367_v5 = vld [vmem:[#allocation46_spill] sm:$0xff]  ;;  %v13368_v21 = vld [vmem:[#allocation47_spill] sm:$0xff] }
 0x2d1   :  { %2360 = vmatpush.bf16.msra.mxu2 %v10281_v36  ;;  %2373 = vmatpush.bf16.msra.mxu3 %v10293_v49  ;;  %v2042_v56 = vsel %vm2039_vm7, %v2041_v14, %v2037_v50  ;;  %v13371_v0 = vld [vmem:[#allocation50_spill] sm:$0xff]  ;;  %v13372_v50 = vld [vmem:[#allocation51_spill] sm:$0xff]  ;;  %v13373_v14 = vld [vmem:[#allocation52_spill] sm:$0xff] }
 0x2d2   :  { %9519 = vtanh.f32 %v10928_v40 }
 0x2d4   :  { %2335 = vmatpush.bf16.msra.mxu0 %v10288_v44  ;;  %2348 = vmatpush.bf16.msra.mxu1 %v10290_v45 }
 0x2d5   :  { %2361 = vmatpush.bf16.msra.mxu2 %v10295_v51  ;;  %2374 = vmatpush.bf16.msra.mxu3 %v10302_v54 }
 0x2d8   :  { %v9520_v17 = vpop.eup %9519  ;;  %2336 = vmatpush.bf16.msra.mxu0 %v10307_v58  ;;  %2349 = vmatpush.bf16.msra.mxu1 %v10310_v62 }
 0x2d9   :  { %v2049_v24 = vmul.f32 %v9520_v17, %v2042_v56  ;;  %2362 = vmatpush.bf16.msra.mxu2 %v10312_v63  ;;  %2375 = vmatpush.bf16.msra.mxu3 %v10315_v35  ;;  %v13374_v17 = vld [vmem:[#allocation53_spill] sm:$0xff]  ;;  %v13375_v56 = vld [vmem:[#allocation54_spill] sm:$0xff] }
 0x2db   :  { %v2055_v33 = vpack.c.bf16 %v2049_v24, %v2049_v24  ;;  %v13376_v24 = vld [vmem:[#allocation55_spill] sm:$0xff] }
 0x2dc   :  { %2337 = vmatpush.bf16.msra.mxu0 %v10319_v8  ;;  %2350 = vmatpush.bf16.msra.mxu1 %v10321_v9 }
 0x2dd   :  { %2059 = vst [vmem:[#allocation2 + $0x2c] sm:$0xf] %v2055_v33  ;;  %2142 = vmatmul.bf16.vlgmr.msrb.gmra.mxu0 %v2055_v33  ;;  %2155 = vmatmul.bf16.vlgmr.msrb.gmra.mxu1 %v2055_v33 }
 0x2de   :  { %2168 = vmatmul.bf16.vlgmr.msrb.gmra.mxu2 %v2055_v33  ;;  %2181 = vmatmul.bf16.vlgmr.msrb.gmra.mxu3 %v2055_v33  ;;  %v13377_v33 = vld [vmem:[#allocation56_spill] sm:$0xff] }
 0x2df   :  { %2363 = vmatpush.bf16.msra.mxu2 %v10324_v15  ;;  %2376 = vmatpush.bf16.msra.mxu3 %v10326_v23 }
 0x2e0   :  { %2338 = vmatpush.bf16.msra.mxu0 %v10329_v29  ;;  %2351 = vmatpush.bf16.msra.mxu1 %v10333_v37 }
 0x2e3   :  { %2364 = vmatpush.bf16.msra.mxu2 %v10335_v38  ;;  %2377 = vmatpush.bf16.msra.mxu3 %v10338_v39 }
 0x2e4   :  { %2339 = vmatpush.bf16.msra.mxu0 %v10345_v46  ;;  %2352 = vmatpush.bf16.msra.mxu1 %v10349_v52 }
 0x2e7   :  { %2365 = vmatpush.bf16.msra.mxu2 %v13348_v57  ;;  %2378 = vmatpush.bf16.msra.mxu3 %v13349_v6 }
 0x2e8   :  { %2394 = vmatpush.bf16.msrb.mxu0 %v13311_v18  ;;  %2407 = vmatpush.bf16.msrb.mxu1 %v13347_v32 }
 0x2eb   :  { %2420 = vmatpush.bf16.msrb.mxu2 %v13350_v31  ;;  %2433 = vmatpush.bf16.msrb.mxu3 %v13351_v12 }
 0x2ec   :  { %2395 = vmatpush.bf16.msrb.mxu0 %v13352_v41  ;;  %2408 = vmatpush.bf16.msrb.mxu1 %v13353_v2 }
 0x2ef   :  { %2421 = vmatpush.bf16.msrb.mxu2 %v13354_v13  ;;  %2434 = vmatpush.bf16.msrb.mxu3 %v13355_v3 }
 0x2f0   :  { %2396 = vmatpush.bf16.msrb.mxu0 %v13356_v60  ;;  %2409 = vmatpush.bf16.msrb.mxu1 %v13357_v19 }
 0x2f3   :  { %2422 = vmatpush.bf16.msrb.mxu2 %v13358_v26  ;;  %2435 = vmatpush.bf16.msrb.mxu3 %v13359_v20 }
 0x2f4   :  { %2397 = vmatpush.bf16.msrb.mxu0 %v13360_v28  ;;  %2410 = vmatpush.bf16.msrb.mxu1 %v13361_v53 }
 0x2f7   :  { %2423 = vmatpush.bf16.msrb.mxu2 %v13362_v59  ;;  %2436 = vmatpush.bf16.msrb.mxu3 %v13363_v1 }
 0x2f8   :  { %2398 = vmatpush.bf16.msrb.mxu0 %v13364_v7  ;;  %2411 = vmatpush.bf16.msrb.mxu1 %v13365_v55 }
 0x2fb   :  { %2424 = vmatpush.bf16.msrb.mxu2 %v13366_v61  ;;  %2437 = vmatpush.bf16.msrb.mxu3 %v13367_v5  ;;  %v13378_v5 = vld [vmem:[#allocation57_spill] sm:$0xff] }
 0x2fc   :  { %2399 = vmatpush.bf16.msrb.mxu0 %v13368_v21  ;;  %2412 = vmatpush.bf16.msrb.mxu1 %v13369_v48  ;;  %v13379_v21 = vld [vmem:[#allocation58_spill] sm:$0xff]  ;;  %v13380_v48 = vld [vmem:[#allocation64_spill] sm:$0xff] }
 0x2ff   :  { %2425 = vmatpush.bf16.msrb.mxu2 %v13370_v10  ;;  %2438 = vmatpush.bf16.msrb.mxu3 %v13371_v0  ;;  %v2065_v10 = vunpack.c.l.bf16 %v13380_v48  ;;  %v2066_v0 = vunpack.c.h.bf16 %v13380_v48 }
 0x300   :  { %2400 = vmatpush.bf16.msrb.mxu0 %v13372_v50  ;;  %2413 = vmatpush.bf16.msrb.mxu1 %v13373_v14 }
 0x303   :  { %2426 = vmatpush.bf16.msrb.mxu2 %v13374_v17  ;;  %2439 = vmatpush.bf16.msrb.mxu3 %v13375_v56  ;;  %v13381_v56 = vld [vmem:[#allocation65_spill] sm:$0xff] }
 0x304   :  { %2401 = vmatpush.bf16.msrb.mxu0 %v13376_v24  ;;  %2414 = vmatpush.bf16.msrb.mxu1 %v13377_v33  ;;  %v2067_v24 = vunpack.c.l.bf16 %v13381_v56 }
 0x307   :  { %2427 = vmatpush.bf16.msrb.mxu2 %v13378_v5  ;;  %2440 = vmatpush.bf16.msrb.mxu3 %v13379_v21 }
 0x343   :  { %v2078_v61 = vpop.f32.mrf.mxu0  ;;  %v2091_v50 = vpop.f32.mrf.mxu1 }
 0x344   :  { %v2121_v55 = vadd.f32 %v2078_v61, %v2065_v10  ;;  %v2122_v14 = vadd.f32 %v2091_v50, %v2066_v0 }
 0x346   :  { %v8040_v7 = vmul.f32 -1.442695, %v2121_v55  ;;  %v8041_v17 = vmul.f32 -1.442695, %v2122_v14 }
 0x348   :  { %9521 = vpow2.f32 %v8040_v7  ;;  %v2068_v7 = vunpack.c.h.bf16 %v13381_v56 }
 0x349   :  { %9523 = vpow2.f32 %v8041_v17 }
 0x34a   :  { %v2104_v1 = vpop.f32.mrf.mxu2  ;;  %v2117_v33 = vpop.f32.mrf.mxu3 }
 0x34b   :  { %v2123_v59 = vadd.f32 %v2104_v1, %v2067_v24  ;;  %v2080_v5 = vpop.f32.mrf.mxu0  ;;  %v2093_v53 = vpop.f32.mrf.mxu1  ;;  %v2124_v50 = vadd.f32 %v2117_v33, %v2068_v7 }
 0x34d   :  { %v8042_v21 = vmul.f32 -1.442695, %v2123_v59  ;;  %v13382_v59 = vld [vmem:[#allocation82_spill] sm:$0xff] }
 0x34e   :  { %v9522_v28 = vpop.eup %9521 }
 0x34f   :  { %v9524_v20 = vpop.eup %9523  ;;  %v2199_v26 = vadd.f32 1.0, %v9522_v28  ;;  %9525 = vpow2.f32 %v8042_v21  ;;  %v2130_v28 = vunpack.c.l.bf16 %v13382_v59 }
 0x350   :  { %v2200_v48 = vadd.f32 1.0, %v9524_v20  ;;  %v2131_v20 = vunpack.c.h.bf16 %v13382_v59 }
 0x351   :  { %9527 = vrcp.f32 %v2199_v26  ;;  %v2211_v17 = vand.u32 2147483647, %v2199_v26  ;;  %vm2207_vm11 = vweird.f32 %v2199_v26 }
 0x352   :  { %9529 = vrcp.f32 %v2200_v48  ;;  %v2106_v61 = vpop.f32.mrf.mxu2  ;;  %v2119_v55 = vpop.f32.mrf.mxu3  ;;  %v2228_v33 = vand.u32 2147483648, %v2200_v48  ;;  %v2226_v60 = vand.u32 2147483647, %v2200_v48  ;;  %vm2222_vm10 = vweird.f32 %v2200_v48 }
 0x353   :  { %v2213_v55 = vand.u32 2147483648, %v2199_v26  ;;  %vm2212_vm14 = vcmp.eq.f32.partialorder %v2211_v17, 8.507059e+37 }
 0x354   :  { %vm2227_vm15 = vcmp.eq.f32.partialorder %v2226_v60, 8.507059e+37 }
 0x355   :  { %v9526_v10 = vpop.eup %9525 }
 0x356   :  { %v10994_v0 = vadd.f32 1.0, %v9526_v10 }
 0x357   :  { %v9528_v14 = vpop.eup %9527 }
 0x358   :  { %v9530_v1 = vpop.eup %9529  ;;  %v2203_v5 = vmul.f32 %v9528_v14, %v2199_v26  ;;  %9531 = vrcp.f32 %v10994_v0  ;;  %vm2208_vm8 = vweird.f32 %v9528_v14  ;;  %v2243_v60 = vand.u32 2147483648, %v10994_v0 }
 0x359   :  { %v2218_v53 = vmul.f32 %v9530_v1, %v2200_v48  ;;  %9533 = vtanh.f32 %v2124_v50  ;;  %vm2223_vm9 = vweird.f32 %v9530_v1  ;;  %vm2209_vm12 = vmor %vm2207_vm11, %vm2208_vm8  ;;  %vm2237_vm1 = vweird.f32 %v10994_v0 }
 0x35a   :  { %v2204_v21 = vsub.f32 1.0, %v2203_v5  ;;  %v2143_v24 = vpop.f32.mrf.mxu0  ;;  %v2156_v61 = vpop.f32.mrf.mxu1  ;;  %v13383_v5 = vld [vmem:[#allocation83_spill] sm:$0xff]  ;;  %vm2224_vm13 = vmor %vm2222_vm10, %vm2223_vm9  ;;  %v2244_v17 = vor.u32 1.1754944e-38, %v2243_v60 }
 0x35b   :  { %v2219_v56 = vsub.f32 1.0, %v2218_v53  ;;  %v2186_v10 = vadd.f32 %v2143_v24, %v2130_v28  ;;  %v2187_v19 = vadd.f32 %v2156_v61, %v2131_v20  ;;  %v2132_v50 = vunpack.c.l.bf16 %v13383_v5 }
 0x35c   :  { %v2205_v7 = vmul.f32 %v9528_v14, %v2204_v21  ;;  %v2214_v53 = vor.u32 1.1754944e-38, %v2213_v55  ;;  %v2229_v21 = vor.u32 1.1754944e-38, %v2228_v33 }
 0x35d   :  { %v2220_v3 = vmul.f32 %v9530_v1, %v2219_v56  ;;  %v8043_v13 = vmul.f32 -1.442695, %v2186_v10  ;;  %v8044_v2 = vmul.f32 -1.442695, %v2187_v19 }
 0x35e   :  { %v9532_v41 = vpop.eup %9531  ;;  %v2206_v59 = vadd.f32 %v9528_v14, %v2205_v7 }
 0x35f   :  { %v2233_v12 = vmul.f32 %v9532_v41, %v10994_v0  ;;  %v2221_v28 = vadd.f32 %v9530_v1, %v2220_v3  ;;  %9535 = vpow2.f32 %v8043_v13  ;;  %v9534_v20 = vpop.eup %9533  ;;  %vm2238_vm0 = vweird.f32 %v9532_v41 }
 0x360   :  { %v2210_v24 = vsel %vm2209_vm12, %v9528_v14, %v2206_v59  ;;  %9537 = vpow2.f32 %v8044_v2  ;;  %vm2239_vm2 = vmor %vm2237_vm1, %vm2238_vm0 }
 0x361   :  { %v2234_v61 = vsub.f32 1.0, %v2233_v12  ;;  %v2215_v19 = vsel %vm2212_vm14, %v2214_v53, %v2210_v24  ;;  %v2225_v56 = vsel %vm2224_vm13, %v9530_v1, %v2221_v28  ;;  %v2169_v48 = vpop.f32.mrf.mxu2  ;;  %v2182_v26 = vpop.f32.mrf.mxu3 }
 0x362   :  { %v2230_v10 = vsel %vm2227_vm15, %v2229_v21, %v2225_v56  ;;  %v2249_v7 = vmul.f32 %v9534_v20, %v2215_v19  ;;  %v2188_v31 = vadd.f32 %v2169_v48, %v2132_v50  ;;  %v2145_v32 = vpop.f32.mrf.mxu0  ;;  %v2158_v18 = vpop.f32.mrf.mxu1 }
 0x363   :  { %v2235_v55 = vmul.f32 %v9532_v41, %v2234_v61  ;;  %v2248_v13 = vmul.f32 %v2230_v10, %v10900_v4  ;;  %v2241_v18 = vand.u32 2147483647, %v10994_v0 }
 0x364   :  { %v8045_v3 = vmul.f32 -1.442695, %v2188_v31 }
 0x365   :  { %v9536_v6 = vpop.eup %9535  ;;  %v11002_v33 = vadd.f32 %v2249_v7, %v2248_v13  ;;  %v2236_v2 = vadd.f32 %v9532_v41, %v2235_v55  ;;  %vm2242_vm3 = vcmp.eq.f32.partialorder %v2241_v18, 8.507059e+37 }
 0x366   :  { %v9538_v14 = vpop.eup %9537  ;;  %v2262_v12 = vadd.f32 1.0, %v9536_v6  ;;  %9539 = vpow2.f32 %v8045_v3  ;;  %v2133_v6 = vunpack.c.h.bf16 %v13383_v5 }
 0x367   :  { %9541 = vtanh.f32 %v11002_v33  ;;  %v2263_v1 = vadd.f32 1.0, %v9538_v14  ;;  %v2240_v31 = vsel %vm2239_vm2, %v9532_v41, %v2236_v2 }
 0x368   :  { %9543 = vrcp.f32 %v2262_v12  ;;  %v2245_v28 = vsel %vm2242_vm3, %v2244_v17, %v2240_v31  ;;  %v2189_v21 = vadd.f32 %v2182_v26, %v2133_v6  ;;  %v2276_v10 = vand.u32 2147483648, %v2262_v12 }
 0x369   :  { %9545 = vrcp.f32 %v2263_v1  ;;  %v2171_v4 = vpop.f32.mrf.mxu2  ;;  %v2184_v32 = vpop.f32.mrf.mxu3  ;;  %v2291_v7 = vand.u32 2147483648, %v2263_v1  ;;  %v2274_v55 = vand.u32 2147483647, %v2262_v12  ;;  %v2289_v26 = vand.u32 2147483647, %v2263_v1 }
 0x36a   :  { %vm2270_vm6 = vweird.f32 %v2262_v12  ;;  %vm2285_vm7 = vweird.f32 %v2263_v1  ;;  %v2277_v60 = vor.u32 1.1754944e-38, %v2276_v10  ;;  %v13385_v10 = vld [vmem:[#allocation27_spill] sm:$0xff] }
 0x36b   :  { %v2292_v4 = vor.u32 1.1754944e-38, %v2291_v7  ;;  %vm2275_vm10 = vcmp.eq.f32.partialorder %v2274_v55, 8.507059e+37  ;;  %vm2290_vm11 = vcmp.eq.f32.partialorder %v2289_v26, 8.507059e+37  ;;  %v13386_v7 = vld [vmem:[#allocation28_spill] sm:$0xff]  ;;  %v13388_v55 = vld [vmem:[#allocation30_spill] sm:$0xff] }
 0x36c   :  { %v9540_v59 = vpop.eup %9539  ;;  %v13390_v26 = vld [vmem:[#allocation32_spill] sm:$0xff] }
 0x36d   :  { %v9542_v50 = vpop.eup %9541  ;;  %v11009_v53 = vadd.f32 1.0, %v9540_v59 }
 0x36e   :  { %v9544_v20 = vpop.eup %9543  ;;  %v2252_v24 = vmul.f32 %v9542_v50, %v2245_v28 }
 0x36f   :  { %v9546_v61 = vpop.eup %9545  ;;  %v2266_v0 = vmul.f32 %v9544_v20, %v2262_v12  ;;  %9547 = vrcp.f32 %v11009_v53  ;;  %vm2271_vm4 = vweird.f32 %v9544_v20  ;;  %vm2300_vm13 = vweird.f32 %v11009_v53 }
 0x370   :  { %v2281_v19 = vmul.f32 %v9546_v61, %v2263_v1  ;;  %v2316_v48 = vpack.c.bf16 %v2252_v24, %v2252_v24  ;;  %9549 = vtanh.f32 %v2189_v21  ;;  %vm2286_vm5 = vweird.f32 %v9546_v61  ;;  %vm2272_vm8 = vmor %vm2270_vm6, %vm2271_vm4 }
 0x371   :  { %v2267_v56 = vsub.f32 1.0, %v2266_v0  ;;  %vm2287_vm9 = vmor %vm2285_vm7, %vm2286_vm5  ;;  %v2306_v24 = vand.u32 2147483648, %v11009_v53 }
 0x372   :  { %v2282_v41 = vsub.f32 1.0, %v2281_v19  ;;  %2320 = vst [vmem:[#allocation2 + $0x18] sm:$0xf] %v2316_v48  ;;  %2340 = vmatmul.bf16.vlgmr.msra.gmra.mxu0 %v2316_v48  ;;  %2353 = vmatmul.bf16.vlgmr.msra.gmra.mxu1 %v2316_v48 }
 0x373   :  { %v2268_v5 = vmul.f32 %v9544_v20, %v2267_v56  ;;  %2366 = vmatmul.bf16.vlgmr.msra.gmra.mxu2 %v2316_v48  ;;  %2379 = vmatmul.bf16.vlgmr.msra.gmra.mxu3 %v2316_v48  ;;  %v2307_v0 = vor.u32 1.1754944e-38, %v2306_v24  ;;  %v13407_v24 = vld [vmem:[#allocation49_spill] sm:$0xff] }
 0x374   :  { %v2283_v13 = vmul.f32 %v9546_v61, %v2282_v41  ;;  %2586 = vmatpush.bf16.msra.mxu0 %v13277_v42  ;;  %2599 = vmatpush.bf16.msra.mxu1 %v10249_v11  ;;  %v13384_v41 = vld [vmem:[#allocation26_spill] sm:$0xff] }
 0x375   :  { %v9548_v3 = vpop.eup %9547  ;;  %v2269_v14 = vadd.f32 %v9544_v20, %v2268_v5  ;;  %2612 = vmatpush.bf16.msra.mxu2 %v13278_v47  ;;  %2625 = vmatpush.bf16.msra.mxu3 %v10262_v25  ;;  %v13387_v5 = vld [vmem:[#allocation29_spill] sm:$0xff] }
 0x376   :  { %v2296_v2 = vmul.f32 %v9548_v3, %v11009_v53  ;;  %v2284_v18 = vadd.f32 %v9546_v61, %v2283_v13  ;;  %v9550_v12 = vpop.eup %9549  ;;  %vm2301_vm12 = vweird.f32 %v9548_v3  ;;  %v13389_v13 = vld [vmem:[#allocation31_spill] sm:$0xff] }
 0x377   :  { %v2273_v32 = vsel %vm2272_vm8, %v9544_v20, %v2269_v14  ;;  %vm2302_vm14 = vmor %vm2300_vm13, %vm2301_vm12  ;;  %v13392_v14 = vld [vmem:[#allocation34_spill] sm:$0xff] }
 0x378   :  { %v2297_v31 = vsub.f32 1.0, %v2296_v2  ;;  %v2278_v17 = vsel %vm2275_vm10, %v2277_v60, %v2273_v32  ;;  %v2288_v59 = vsel %vm2287_vm9, %v9546_v61, %v2284_v18  ;;  %2587 = vmatpush.bf16.msra.mxu0 %v10254_v16  ;;  %2600 = vmatpush.bf16.msra.mxu1 %v13279_v27  ;;  %v13393_v2 = vld [vmem:[#allocation35_spill] sm:$0xff]  ;;  %v13394_v60 = vld [vmem:[#allocation36_spill] sm:$0xff]  ;;  %v13395_v18 = vld [vmem:[#allocation37_spill] sm:$0xff] }
 0x379   :  { %v2293_v1 = vsel %vm2290_vm11, %v2292_v4, %v2288_v59  ;;  %v2312_v6 = vmul.f32 %v9550_v12, %v2278_v17  ;;  %2613 = vmatpush.bf16.msra.mxu2 %v10260_v22  ;;  %2626 = vmatpush.bf16.msra.mxu3 %v13280_v43  ;;  %v13396_v4 = vld [vmem:[#allocation38_spill] sm:$0xff]  ;;  %v13397_v32 = vld [vmem:[#allocation39_spill] sm:$0xff]  ;;  %v13398_v12 = vld [vmem:[#allocation40_spill] sm:$0xff] }
 0x37a   :  { %v2298_v50 = vmul.f32 %v9548_v3, %v2297_v31  ;;  %v2311_v28 = vmul.f32 %v2293_v1, %v10928_v40  ;;  %v2304_v40 = vand.u32 2147483647, %v11009_v53  ;;  %v13399_v31 = vld [vmem:[#allocation41_spill] sm:$0xff]  ;;  %v13400_v17 = vld [vmem:[#allocation42_spill] sm:$0xff]  ;;  %v13401_v59 = vld [vmem:[#allocation43_spill] sm:$0xff] }
 0x37b   :  { %v13402_v1 = vld [vmem:[#allocation44_spill] sm:$0xff] }
 0x37c   :  { %v11024_v20 = vadd.f32 %v2312_v6, %v2311_v28  ;;  %v2299_v21 = vadd.f32 %v9548_v3, %v2298_v50  ;;  %2588 = vmatpush.bf16.msra.mxu0 %v10277_v30  ;;  %2601 = vmatpush.bf16.msra.mxu1 %v10279_v34  ;;  %vm2305_vm15 = vcmp.eq.f32.partialorder %v2304_v40, 8.507059e+37  ;;  %v13403_v6 = vld [vmem:[#allocation45_spill] sm:$0xff]  ;;  %v13404_v50 = vld [vmem:[#allocation46_spill] sm:$0xff]  ;;  %v13405_v28 = vld [vmem:[#allocation47_spill] sm:$0xff] }
 0x37d   :  { %2614 = vmatpush.bf16.msra.mxu2 %v10281_v36  ;;  %2627 = vmatpush.bf16.msra.mxu3 %v10293_v49  ;;  %v13408_v40 = vld [vmem:[#allocation50_spill] sm:$0xff] }
 0x37e   :  { %9551 = vtanh.f32 %v11024_v20  ;;  %v2303_v61 = vsel %vm2302_vm14, %v9548_v3, %v2299_v21  ;;  %v13391_v3 = vld [vmem:[#allocation33_spill] sm:$0xff]  ;;  %v13406_v21 = vld [vmem:[#allocation48_spill] sm:$0xff] }
 0x37f   :  { %v2308_v56 = vsel %vm2305_vm15, %v2307_v0, %v2303_v61  ;;  %v13409_v61 = vld [vmem:[#allocation51_spill] sm:$0xff]  ;;  %v13410_v0 = vld [vmem:[#allocation52_spill] sm:$0xff] }
 0x380   :  { %2589 = vmatpush.bf16.msra.mxu0 %v10288_v44  ;;  %2602 = vmatpush.bf16.msra.mxu1 %v10290_v45 }
 0x381   :  { %2615 = vmatpush.bf16.msra.mxu2 %v10295_v51  ;;  %2628 = vmatpush.bf16.msra.mxu3 %v10302_v54 }
 0x384   :  { %v9552_v19 = vpop.eup %9551  ;;  %2590 = vmatpush.bf16.msra.mxu0 %v10307_v58  ;;  %2603 = vmatpush.bf16.msra.mxu1 %v10310_v62 }
 0x385   :  { %v2315_v48 = vmul.f32 %v9552_v19, %v2308_v56  ;;  %2616 = vmatpush.bf16.msra.mxu2 %v10312_v63  ;;  %2629 = vmatpush.bf16.msra.mxu3 %v10315_v35  ;;  %v13411_v19 = vld [vmem:[#allocation53_spill] sm:$0xff]  ;;  %v13412_v56 = vld [vmem:[#allocation54_spill] sm:$0xff] }
 0x387   :  { %v2321_v53 = vpack.c.bf16 %v2315_v48, %v2315_v48  ;;  %v13413_v48 = vld [vmem:[#allocation55_spill] sm:$0xff] }
 0x388   :  { %2591 = vmatpush.bf16.msra.mxu0 %v10319_v8  ;;  %2604 = vmatpush.bf16.msra.mxu1 %v10321_v9 }
 0x389   :  { %2325 = vst [vmem:[#allocation2 + $0x24] sm:$0xf] %v2321_v53  ;;  %2402 = vmatmul.bf16.vlgmr.msrb.gmra.mxu0 %v2321_v53  ;;  %2415 = vmatmul.bf16.vlgmr.msrb.gmra.mxu1 %v2321_v53 }
 0x38a   :  { %2428 = vmatmul.bf16.vlgmr.msrb.gmra.mxu2 %v2321_v53  ;;  %2441 = vmatmul.bf16.vlgmr.msrb.gmra.mxu3 %v2321_v53  ;;  %v13414_v53 = vld [vmem:[#allocation56_spill] sm:$0xff] }
 0x38b   :  { %2617 = vmatpush.bf16.msra.mxu2 %v10324_v15  ;;  %2630 = vmatpush.bf16.msra.mxu3 %v10326_v23 }
 0x38c   :  { %2592 = vmatpush.bf16.msra.mxu0 %v10329_v29  ;;  %2605 = vmatpush.bf16.msra.mxu1 %v10333_v37 }
 0x38f   :  { %2618 = vmatpush.bf16.msra.mxu2 %v10335_v38  ;;  %2631 = vmatpush.bf16.msra.mxu3 %v10338_v39 }
 0x390   :  { %2593 = vmatpush.bf16.msra.mxu0 %v10345_v46  ;;  %2606 = vmatpush.bf16.msra.mxu1 %v10349_v52 }
 0x393   :  { %2619 = vmatpush.bf16.msra.mxu2 %v13348_v57  ;;  %2632 = vmatpush.bf16.msra.mxu3 %v13384_v41 }
 0x394   :  { %2648 = vmatpush.bf16.msrb.mxu0 %v13385_v10  ;;  %2661 = vmatpush.bf16.msrb.mxu1 %v13386_v7 }
 0x397   :  { %2674 = vmatpush.bf16.msrb.mxu2 %v13387_v5  ;;  %2687 = vmatpush.bf16.msrb.mxu3 %v13388_v55 }
 0x398   :  { %2649 = vmatpush.bf16.msrb.mxu0 %v13389_v13  ;;  %2662 = vmatpush.bf16.msrb.mxu1 %v13390_v26  ;;  %v13420_v13 = vld [vmem:[#allocation81_spill] sm:$0xff] }
 0x39b   :  { %2675 = vmatpush.bf16.msrb.mxu2 %v13391_v3  ;;  %2688 = vmatpush.bf16.msrb.mxu3 %v13392_v14 }
 0x39c   :  { %2650 = vmatpush.bf16.msrb.mxu0 %v13393_v2  ;;  %2663 = vmatpush.bf16.msrb.mxu1 %v13394_v60 }
 0x39f   :  { %2676 = vmatpush.bf16.msrb.mxu2 %v13395_v18  ;;  %2689 = vmatpush.bf16.msrb.mxu3 %v13396_v4 }
 0x3a0   :  { %2651 = vmatpush.bf16.msrb.mxu0 %v13397_v32  ;;  %2664 = vmatpush.bf16.msrb.mxu1 %v13398_v12 }
 0x3a3   :  { %2677 = vmatpush.bf16.msrb.mxu2 %v13399_v31  ;;  %2690 = vmatpush.bf16.msrb.mxu3 %v13400_v17 }
 0x3a4   :  { %2652 = vmatpush.bf16.msrb.mxu0 %v13401_v59  ;;  %2665 = vmatpush.bf16.msrb.mxu1 %v13402_v1 }
 0x3a7   :  { %2678 = vmatpush.bf16.msrb.mxu2 %v13403_v6  ;;  %2691 = vmatpush.bf16.msrb.mxu3 %v13404_v50  ;;  %v13415_v50 = vld [vmem:[#allocation57_spill] sm:$0xff] }
 0x3a8   :  { %2653 = vmatpush.bf16.msrb.mxu0 %v13405_v28  ;;  %2666 = vmatpush.bf16.msrb.mxu1 %v13406_v21  ;;  %v13416_v28 = vld [vmem:[#allocation58_spill] sm:$0xff] }
 0x3a9   :  { %v13417_v21 = vld [vmem:[#allocation66_spill] sm:$0xff] }
 0x3ab   :  { %2679 = vmatpush.bf16.msrb.mxu2 %v13407_v24  ;;  %2692 = vmatpush.bf16.msrb.mxu3 %v13408_v40  ;;  %v2328_v24 = vunpack.c.l.bf16 %v13417_v21  ;;  %v2329_v40 = vunpack.c.h.bf16 %v13417_v21 }
 0x3ac   :  { %2654 = vmatpush.bf16.msrb.mxu0 %v13409_v61  ;;  %2667 = vmatpush.bf16.msrb.mxu1 %v13410_v0 }
 0x3af   :  { %2680 = vmatpush.bf16.msrb.mxu2 %v13411_v19  ;;  %2693 = vmatpush.bf16.msrb.mxu3 %v13412_v56  ;;  %v13418_v56 = vld [vmem:[#allocation67_spill] sm:$0xff] }
 0x3b0   :  { %2655 = vmatpush.bf16.msrb.mxu0 %v13413_v48  ;;  %2668 = vmatpush.bf16.msrb.mxu1 %v13414_v53  ;;  %v2330_v48 = vunpack.c.l.bf16 %v13418_v56 }
 0x3b3   :  { %2681 = vmatpush.bf16.msrb.mxu2 %v13415_v50  ;;  %2694 = vmatpush.bf16.msrb.mxu3 %v13416_v28 }
 0x3ef   :  { %v2341_v6 = vpop.f32.mrf.mxu0  ;;  %v2354_v61 = vpop.f32.mrf.mxu1 }
 0x3f0   :  { %v2384_v1 = vadd.f32 %v2341_v6, %v2328_v24  ;;  %v2385_v0 = vadd.f32 %v2354_v61, %v2329_v40 }
 0x3f2   :  { %v8046_v59 = vmul.f32 -1.442695, %v2384_v1  ;;  %v8047_v19 = vmul.f32 -1.442695, %v2385_v0 }
 0x3f4   :  { %9553 = vpow2.f32 %v8046_v59  ;;  %v2331_v59 = vunpack.c.h.bf16 %v13418_v56 }
 0x3f5   :  { %9555 = vpow2.f32 %v8047_v19 }
 0x3f6   :  { %v2367_v17 = vpop.f32.mrf.mxu2  ;;  %v2380_v53 = vpop.f32.mrf.mxu3 }
 0x3f7   :  { %v2386_v31 = vadd.f32 %v2367_v17, %v2330_v48  ;;  %v2343_v50 = vpop.f32.mrf.mxu0  ;;  %v2356_v12 = vpop.f32.mrf.mxu1  ;;  %v2387_v40 = vadd.f32 %v2380_v53, %v2331_v59 }
 0x3f8   :  { %v13419_v12 = vld [vmem:[#allocation80_spill] sm:$0xff] }
 0x3f9   :  { %v8048_v28 = vmul.f32 -1.442695, %v2386_v31  ;;  %v2390_v31 = vunpack.c.l.bf16 %v13419_v12 }
 0x3fa   :  { %v9554_v32 = vpop.eup %9553 }
 0x3fb   :  { %v9556_v4 = vpop.eup %9555  ;;  %v2459_v18 = vadd.f32 1.0, %v9554_v32  ;;  %9557 = vpow2.f32 %v8048_v28  ;;  %v2391_v32 = vunpack.c.h.bf16 %v13419_v12  ;;  %v2392_v12 = vunpack.c.l.bf16 %v13420_v13 }
 0x3fc   :  { %v2460_v21 = vadd.f32 1.0, %v9556_v4 }
 0x3fd   :  { %9559 = vrcp.f32 %v2459_v18  ;;  %vm2467_vm3 = vweird.f32 %v2459_v18 }
 0x3fe   :  { %9561 = vrcp.f32 %v2460_v21  ;;  %v2369_v6 = vpop.f32.mrf.mxu2  ;;  %v2382_v1 = vpop.f32.mrf.mxu3  ;;  %v2488_v59 = vand.u32 2147483648, %v2460_v21  ;;  %v2486_v60 = vand.u32 2147483647, %v2460_v21  ;;  %vm2482_vm2 = vweird.f32 %v2460_v21 }
 0x3ff   :  { %v2471_v6 = vand.u32 2147483647, %v2459_v18 }
 0x400   :  { %vm2487_vm7 = vcmp.eq.f32.partialorder %v2486_v60, 8.507059e+37 }
 0x401   :  { %v9558_v24 = vpop.eup %9557  ;;  %vm2472_vm6 = vcmp.eq.f32.partialorder %v2471_v6, 8.507059e+37 }
 0x402   :  { %v11090_v61 = vadd.f32 1.0, %v9558_v24  ;;  %v2473_v24 = vand.u32 2147483648, %v2459_v18 }
 0x403   :  { %v9560_v0 = vpop.eup %9559 }
 0x404   :  { %v9562_v17 = vpop.eup %9561  ;;  %v2463_v50 = vmul.f32 %v9560_v0, %v2459_v18  ;;  %9563 = vrcp.f32 %v11090_v61  ;;  %vm2468_vm0 = vweird.f32 %v9560_v0  ;;  %v2503_v6 = vand.u32 2147483648, %v11090_v61 }
 0x405   :  { %v2478_v4 = vmul.f32 %v9562_v17, %v2460_v21  ;;  %9565 = vtanh.f32 %v2387_v40  ;;  %vm2483_vm1 = vweird.f32 %v9562_v17  ;;  %vm2469_vm4 = vmor %vm2467_vm3, %vm2468_vm0  ;;  %vm2497_vm9 = vweird.f32 %v11090_v61 }
 0x406   :  { %v2403_v28 = vpop.f32.mrf.mxu0  ;;  %v2416_v19 = vpop.f32.mrf.mxu1  ;;  %v2464_v48 = vsub.f32 1.0, %v2463_v50  ;;  %vm2484_vm5 = vmor %vm2482_vm2, %vm2483_vm1 }
 0x407   :  { %v2446_v56 = vadd.f32 %v2403_v28, %v2390_v31  ;;  %v2447_v1 = vadd.f32 %v2416_v19, %v2391_v32  ;;  %v2479_v53 = vsub.f32 1.0, %v2478_v4  ;;  %v2474_v32 = vor.u32 1.1754944e-38, %v2473_v24 }
 0x408   :  { %v2465_v2 = vmul.f32 %v9560_v0, %v2464_v48  ;;  %v2489_v28 = vor.u32 1.1754944e-38, %v2488_v59 }
 0x409   :  { %v8049_v14 = vmul.f32 -1.442695, %v2446_v56  ;;  %v8050_v3 = vmul.f32 -1.442695, %v2447_v1  ;;  %v2480_v26 = vmul.f32 %v9562_v17, %v2479_v53 }
 0x40a   :  { %v9564_v55 = vpop.eup %9563  ;;  %v2466_v40 = vadd.f32 %v9560_v0, %v2465_v2 }
 0x40b   :  { %9567 = vpow2.f32 %v8049_v14  ;;  %v9566_v50 = vpop.eup %9565  ;;  %v2493_v31 = vmul.f32 %v9564_v55, %v11090_v61  ;;  %v2481_v4 = vadd.f32 %v9562_v17, %v2480_v26  ;;  %vm2498_vm8 = vweird.f32 %v9564_v55 }
 0x40c   :  { %9569 = vpow2.f32 %v8050_v3  ;;  %v2470_v19 = vsel %vm2469_vm4, %v9560_v0, %v2466_v40  ;;  %vm2499_vm10 = vmor %vm2497_vm9, %vm2498_vm8  ;;  %v2504_v40 = vor.u32 1.1754944e-38, %v2503_v6 }
 0x40d   :  { %v2429_v48 = vpop.f32.mrf.mxu2  ;;  %v2442_v56 = vpop.f32.mrf.mxu3  ;;  %v2494_v1 = vsub.f32 1.0, %v2493_v31  ;;  %v2475_v53 = vsel %vm2472_vm6, %v2474_v32, %v2470_v19  ;;  %v2485_v21 = vsel %vm2484_vm5, %v9562_v17, %v2481_v4 }
 0x40e   :  { %v2448_v2 = vadd.f32 %v2429_v48, %v2392_v12  ;;  %v2405_v18 = vpop.f32.mrf.mxu0  ;;  %v2418_v14 = vpop.f32.mrf.mxu1  ;;  %v2490_v5 = vsel %vm2487_vm7, %v2489_v28, %v2485_v21  ;;  %v2509_v7 = vmul.f32 %v9566_v50, %v2475_v53 }
 0x40f   :  { %v2495_v10 = vmul.f32 %v9564_v55, %v2494_v1  ;;  %v2508_v24 = vmul.f32 %v2490_v5, %v11002_v33 }
 0x410   :  { %v8051_v26 = vmul.f32 -1.442695, %v2448_v2 }
 0x411   :  { %v9568_v3 = vpop.eup %9567  ;;  %v11098_v59 = vadd.f32 %v2509_v7, %v2508_v24  ;;  %v2496_v17 = vadd.f32 %v9564_v55, %v2495_v10  ;;  %v2501_v7 = vand.u32 2147483647, %v11090_v61  ;;  %v2393_v10 = vunpack.c.h.bf16 %v13420_v13 }
 0x412   :  { %v9570_v41 = vpop.eup %9569  ;;  %v11100_v0 = vadd.f32 1.0, %v9568_v3  ;;  %9571 = vpow2.f32 %v8051_v26 }
 0x413   :  { %v11102_v60 = vadd.f32 1.0, %v9570_v41  ;;  %9573 = vtanh.f32 %v11098_v59  ;;  %v2500_v41 = vsel %vm2499_vm10, %v9564_v55, %v2496_v17  ;;  %vm2502_vm11 = vcmp.eq.f32.partialorder %v2501_v7, 8.507059e+37 }
 0x414   :  { %9575 = vrcp.f32 %v11100_v0  ;;  %v2449_v4 = vadd.f32 %v2442_v56, %v2393_v10  ;;  %v2505_v28 = vsel %vm2502_vm11, %v2504_v40, %v2500_v41  ;;  %v2536_v2 = vand.u32 2147483648, %v11100_v0 }
 0x415   :  { %v2431_v12 = vpop.f32.mrf.mxu2  ;;  %v2444_v33 = vpop.f32.mrf.mxu3  ;;  %9577 = vrcp.f32 %v11102_v60  ;;  %v2551_v13 = vand.u32 2147483648, %v11102_v60  ;;  %v2534_v14 = vand.u32 2147483647, %v11100_v0  ;;  %v2549_v26 = vand.u32 2147483647, %v11102_v60 }
 0x416   :  { %vm2530_vm14 = vweird.f32 %v11100_v0  ;;  %vm2545_vm15 = vweird.f32 %v11102_v60  ;;  %v2537_v6 = vor.u32 1.1754944e-38, %v2536_v2  ;;  %v13422_v2 = vld [vmem:[#allocation27_spill] sm:$0xff] }
 0x417   :  { %v2552_v33 = vor.u32 1.1754944e-38, %v2551_v13  ;;  %vm2535_vm2 = vcmp.eq.f32.partialorder %v2534_v14, 8.507059e+37  ;;  %vm2550_vm3 = vcmp.eq.f32.partialorder %v2549_v26, 8.507059e+37  ;;  %v13423_v13 = vld [vmem:[#allocation28_spill] sm:$0xff]  ;;  %v13425_v14 = vld [vmem:[#allocation30_spill] sm:$0xff]  ;;  %v13428_v26 = vld [vmem:[#allocation33_spill] sm:$0xff] }
 0x418   :  { %v9572_v5 = vpop.eup %9571 }
 0x419   :  { %v11110_v50 = vadd.f32 1.0, %v9572_v5  ;;  %v9574_v31 = vpop.eup %9573 }
 0x41a   :  { %v9576_v32 = vpop.eup %9575  ;;  %v2512_v48 = vmul.f32 %v9574_v31, %v2505_v28 }
 0x41b   :  { %9579 = vrcp.f32 %v11110_v50  ;;  %v9578_v19 = vpop.eup %9577  ;;  %v2526_v61 = vmul.f32 %v9576_v32, %v11100_v0  ;;  %vm2531_vm12 = vweird.f32 %v9576_v32  ;;  %vm2560_vm5 = vweird.f32 %v11110_v50 }
 0x41c   :  { %v2541_v1 = vmul.f32 %v9578_v19, %v11102_v60  ;;  %v2576_v55 = vpack.c.bf16 %v2512_v48, %v2512_v48  ;;  %9581 = vtanh.f32 %v2449_v4  ;;  %vm2546_vm13 = vweird.f32 %v9578_v19  ;;  %vm2532_vm0 = vmor %vm2530_vm14, %vm2531_vm12 }
 0x41d   :  { %v2527_v53 = vsub.f32 1.0, %v2526_v61  ;;  %vm2547_vm1 = vmor %vm2545_vm15, %vm2546_vm13 }
 0x41e   :  { %v2542_v21 = vsub.f32 1.0, %v2541_v1  ;;  %2577 = vst [vmem:[#allocation2 + $0x20] sm:$0xf] %v2576_v55  ;;  %2594 = vmatmul.bf16.vlgmr.msra.gmra.mxu0 %v2576_v55  ;;  %2607 = vmatmul.bf16.vlgmr.msra.gmra.mxu1 %v2576_v55 }
 0x41f   :  { %v2528_v18 = vmul.f32 %v9576_v32, %v2527_v53  ;;  %2620 = vmatmul.bf16.vlgmr.msra.gmra.mxu2 %v2576_v55  ;;  %2633 = vmatmul.bf16.vlgmr.msra.gmra.mxu3 %v2576_v55 }
 0x420   :  { %v2543_v24 = vmul.f32 %v9578_v19, %v2542_v21  ;;  %2840 = vmatpush.bf16.msra.mxu0 %v13277_v42  ;;  %2853 = vmatpush.bf16.msra.mxu1 %v10249_v11  ;;  %v13421_v21 = vld [vmem:[#allocation26_spill] sm:$0xff] }
 0x421   :  { %v9580_v56 = vpop.eup %9579  ;;  %v2529_v17 = vadd.f32 %v9576_v32, %v2528_v18  ;;  %2866 = vmatpush.bf16.msra.mxu2 %v13278_v47  ;;  %2879 = vmatpush.bf16.msra.mxu3 %v10262_v25  ;;  %v13424_v18 = vld [vmem:[#allocation29_spill] sm:$0xff] }
 0x422   :  { %v2556_v3 = vmul.f32 %v9580_v56, %v11110_v50  ;;  %v2544_v12 = vadd.f32 %v9578_v19, %v2543_v24  ;;  %v9582_v0 = vpop.eup %9581  ;;  %vm2561_vm4 = vweird.f32 %v9580_v56  ;;  %v13427_v24 = vld [vmem:[#allocation32_spill] sm:$0xff] }
 0x423   :  { %v2533_v5 = vsel %vm2532_vm0, %v9576_v32, %v2529_v17  ;;  %vm2562_vm6 = vmor %vm2560_vm5, %vm2561_vm4  ;;  %v13430_v17 = vld [vmem:[#allocation35_spill] sm:$0xff] }
 0x424   :  { %v2557_v7 = vsub.f32 1.0, %v2556_v3  ;;  %v2538_v41 = vsel %vm2535_vm2, %v2537_v6, %v2533_v5  ;;  %v2548_v40 = vsel %vm2547_vm1, %v9578_v19, %v2544_v12  ;;  %2841 = vmatpush.bf16.msra.mxu0 %v10254_v16  ;;  %2854 = vmatpush.bf16.msra.mxu1 %v13279_v27  ;;  %v2566_v19 = vand.u32 2147483648, %v11110_v50  ;;  %v13429_v3 = vld [vmem:[#allocation34_spill] sm:$0xff]  ;;  %v13431_v6 = vld [vmem:[#allocation36_spill] sm:$0xff]  ;;  %v13432_v12 = vld [vmem:[#allocation37_spill] sm:$0xff] }
 0x425   :  { %v2553_v60 = vsel %vm2550_vm3, %v2552_v33, %v2548_v40  ;;  %v2572_v31 = vmul.f32 %v9582_v0, %v2538_v41  ;;  %2867 = vmatpush.bf16.msra.mxu2 %v10260_v22  ;;  %2880 = vmatpush.bf16.msra.mxu3 %v13280_v43  ;;  %v13433_v33 = vld [vmem:[#allocation38_spill] sm:$0xff]  ;;  %v13435_v5 = vld [vmem:[#allocation40_spill] sm:$0xff]  ;;  %v13436_v0 = vld [vmem:[#allocation41_spill] sm:$0xff] }
 0x426   :  { %v2558_v10 = vmul.f32 %v9580_v56, %v2557_v7  ;;  %v2571_v4 = vmul.f32 %v2553_v60, %v11024_v20  ;;  %v2564_v20 = vand.u32 2147483647, %v11110_v50  ;;  %v2567_v48 = vor.u32 1.1754944e-38, %v2566_v19  ;;  %v13434_v7 = vld [vmem:[#allocation39_spill] sm:$0xff]  ;;  %v13437_v41 = vld [vmem:[#allocation42_spill] sm:$0xff]  ;;  %v13440_v60 = vld [vmem:[#allocation45_spill] sm:$0xff] }
 0x427   :  { %v13438_v40 = vld [vmem:[#allocation43_spill] sm:$0xff]  ;;  %v13444_v19 = vld [vmem:[#allocation49_spill] sm:$0xff] }
 0x428   :  { %v11134_v28 = vadd.f32 %v2572_v31, %v2571_v4  ;;  %v2559_v32 = vadd.f32 %v9580_v56, %v2558_v10  ;;  %2842 = vmatpush.bf16.msra.mxu0 %v10277_v30  ;;  %2855 = vmatpush.bf16.msra.mxu1 %v10279_v34  ;;  %vm2565_vm7 = vcmp.eq.f32.partialorder %v2564_v20, 8.507059e+37  ;;  %v13439_v10 = vld [vmem:[#allocation44_spill] sm:$0xff]  ;;  %v13441_v31 = vld [vmem:[#allocation46_spill] sm:$0xff]  ;;  %v13442_v4 = vld [vmem:[#allocation47_spill] sm:$0xff] }
 0x429   :  { %2868 = vmatpush.bf16.msra.mxu2 %v10281_v36  ;;  %2881 = vmatpush.bf16.msra.mxu3 %v10293_v49  ;;  %v13445_v20 = vld [vmem:[#allocation50_spill] sm:$0xff] }
 0x42a   :  { %9583 = vtanh.f32 %v11134_v28  ;;  %v2563_v61 = vsel %vm2562_vm6, %v9580_v56, %v2559_v32  ;;  %v13426_v56 = vld [vmem:[#allocation31_spill] sm:$0xff]  ;;  %v13443_v32 = vld [vmem:[#allocation48_spill] sm:$0xff] }
 0x42b   :  { %v2568_v53 = vsel %vm2565_vm7, %v2567_v48, %v2563_v61  ;;  %v13446_v61 = vld [vmem:[#allocation51_spill] sm:$0xff]  ;;  %v13447_v48 = vld [vmem:[#allocation52_spill] sm:$0xff] }
 0x42c   :  { %2843 = vmatpush.bf16.msra.mxu0 %v10288_v44  ;;  %2856 = vmatpush.bf16.msra.mxu1 %v10290_v45 }
 0x42d   :  { %2869 = vmatpush.bf16.msra.mxu2 %v10295_v51  ;;  %2882 = vmatpush.bf16.msra.mxu3 %v10302_v54 }
 0x430   :  { %v9584_v1 = vpop.eup %9583  ;;  %2844 = vmatpush.bf16.msra.mxu0 %v10307_v58  ;;  %2857 = vmatpush.bf16.msra.mxu1 %v10310_v62 }
 0x431   :  { %v2575_v55 = vmul.f32 %v9584_v1, %v2568_v53  ;;  %2870 = vmatpush.bf16.msra.mxu2 %v10312_v63  ;;  %2883 = vmatpush.bf16.msra.mxu3 %v10315_v35  ;;  %v13448_v1 = vld [vmem:[#allocation53_spill] sm:$0xff]  ;;  %v13449_v53 = vld [vmem:[#allocation54_spill] sm:$0xff] }
 0x433   :  { %v2578_v50 = vpack.c.bf16 %v2575_v55, %v2575_v55  ;;  %v13450_v55 = vld [vmem:[#allocation55_spill] sm:$0xff] }
 0x434   :  { %2845 = vmatpush.bf16.msra.mxu0 %v10319_v8  ;;  %2858 = vmatpush.bf16.msra.mxu1 %v10321_v9 }
 0x435   :  { %2579 = vst [vmem:[#allocation2 + $0x1c] sm:$0xf] %v2578_v50  ;;  %2656 = vmatmul.bf16.vlgmr.msrb.gmra.mxu0 %v2578_v50  ;;  %2669 = vmatmul.bf16.vlgmr.msrb.gmra.mxu1 %v2578_v50 }
 0x436   :  { %2682 = vmatmul.bf16.vlgmr.msrb.gmra.mxu2 %v2578_v50  ;;  %2695 = vmatmul.bf16.vlgmr.msrb.gmra.mxu3 %v2578_v50  ;;  %v13451_v50 = vld [vmem:[#allocation56_spill] sm:$0xff] }
 0x437   :  { %2871 = vmatpush.bf16.msra.mxu2 %v10324_v15  ;;  %2884 = vmatpush.bf16.msra.mxu3 %v10326_v23 }
 0x438   :  { %2846 = vmatpush.bf16.msra.mxu0 %v10329_v29  ;;  %2859 = vmatpush.bf16.msra.mxu1 %v10333_v37 }
 0x43b   :  { %2872 = vmatpush.bf16.msra.mxu2 %v10335_v38  ;;  %2885 = vmatpush.bf16.msra.mxu3 %v10338_v39 }
 0x43c   :  { %2847 = vmatpush.bf16.msra.mxu0 %v10345_v46  ;;  %2860 = vmatpush.bf16.msra.mxu1 %v10349_v52 }
 0x43f   :  { %2873 = vmatpush.bf16.msra.mxu2 %v13348_v57  ;;  %2886 = vmatpush.bf16.msra.mxu3 %v13421_v21 }
 0x440   :  { %2902 = vmatpush.bf16.msrb.mxu0 %v13422_v2  ;;  %2915 = vmatpush.bf16.msrb.mxu1 %v13423_v13 }
 0x443   :  { %2928 = vmatpush.bf16.msrb.mxu2 %v13424_v18  ;;  %2941 = vmatpush.bf16.msrb.mxu3 %v13425_v14 }
 0x444   :  { %2903 = vmatpush.bf16.msrb.mxu0 %v13426_v56  ;;  %2916 = vmatpush.bf16.msrb.mxu1 %v13427_v24  ;;  %v13457_v56 = vld [vmem:[#allocation79_spill] sm:$0xff] }
 0x447   :  { %2929 = vmatpush.bf16.msrb.mxu2 %v13428_v26  ;;  %2942 = vmatpush.bf16.msrb.mxu3 %v13429_v3 }
 0x448   :  { %2904 = vmatpush.bf16.msrb.mxu0 %v13430_v17  ;;  %2917 = vmatpush.bf16.msrb.mxu1 %v13431_v6 }
 0x44b   :  { %2930 = vmatpush.bf16.msrb.mxu2 %v13432_v12  ;;  %2943 = vmatpush.bf16.msrb.mxu3 %v13433_v33 }
 0x44c   :  { %2905 = vmatpush.bf16.msrb.mxu0 %v13434_v7  ;;  %2918 = vmatpush.bf16.msrb.mxu1 %v13435_v5 }
 0x44f   :  { %2931 = vmatpush.bf16.msrb.mxu2 %v13436_v0  ;;  %2944 = vmatpush.bf16.msrb.mxu3 %v13437_v41 }
 0x450   :  { %2906 = vmatpush.bf16.msrb.mxu0 %v13438_v40  ;;  %2919 = vmatpush.bf16.msrb.mxu1 %v13439_v10 }
 0x453   :  { %2932 = vmatpush.bf16.msrb.mxu2 %v13440_v60  ;;  %2945 = vmatpush.bf16.msrb.mxu3 %v13441_v31  ;;  %v13452_v31 = vld [vmem:[#allocation57_spill] sm:$0xff] }
 0x454   :  { %2907 = vmatpush.bf16.msrb.mxu0 %v13442_v4  ;;  %2920 = vmatpush.bf16.msrb.mxu1 %v13443_v32  ;;  %v13453_v4 = vld [vmem:[#allocation58_spill] sm:$0xff]  ;;  %v13454_v32 = vld [vmem:[#allocation68_spill] sm:$0xff] }
 0x457   :  { %2933 = vmatpush.bf16.msrb.mxu2 %v13444_v19  ;;  %2946 = vmatpush.bf16.msrb.mxu3 %v13445_v20  ;;  %v2582_v19 = vunpack.c.l.bf16 %v13454_v32  ;;  %v2583_v20 = vunpack.c.h.bf16 %v13454_v32 }
 0x458   :  { %2908 = vmatpush.bf16.msrb.mxu0 %v13446_v61  ;;  %2921 = vmatpush.bf16.msrb.mxu1 %v13447_v48 }
 0x45b   :  { %2934 = vmatpush.bf16.msrb.mxu2 %v13448_v1  ;;  %2947 = vmatpush.bf16.msrb.mxu3 %v13449_v53  ;;  %v13455_v53 = vld [vmem:[#allocation69_spill] sm:$0xff] }
 0x45c   :  { %2909 = vmatpush.bf16.msrb.mxu0 %v13450_v55  ;;  %2922 = vmatpush.bf16.msrb.mxu1 %v13451_v50  ;;  %v2584_v55 = vunpack.c.l.bf16 %v13455_v53 }
 0x45f   :  { %2935 = vmatpush.bf16.msrb.mxu2 %v13452_v31  ;;  %2948 = vmatpush.bf16.msrb.mxu3 %v13453_v4 }
 0x49b   :  { %v2595_v10 = vpop.f32.mrf.mxu0  ;;  %v2608_v61 = vpop.f32.mrf.mxu1 }
 0x49c   :  { %v2638_v60 = vadd.f32 %v2595_v10, %v2582_v19  ;;  %v2639_v48 = vadd.f32 %v2608_v61, %v2583_v20 }
 0x49e   :  { %v8052_v40 = vmul.f32 -1.442695, %v2638_v60  ;;  %v8053_v1 = vmul.f32 -1.442695, %v2639_v48 }
 0x4a0   :  { %9585 = vpow2.f32 %v8052_v40  ;;  %v2585_v40 = vunpack.c.h.bf16 %v13455_v53 }
 0x4a1   :  { %9587 = vpow2.f32 %v8053_v1 }
 0x4a2   :  { %v2621_v41 = vpop.f32.mrf.mxu2  ;;  %v2634_v50 = vpop.f32.mrf.mxu3 }
 0x4a3   :  { %v2640_v5 = vadd.f32 %v2621_v41, %v2584_v55  ;;  %v2597_v31 = vpop.f32.mrf.mxu0  ;;  %v2610_v0 = vpop.f32.mrf.mxu1  ;;  %v2641_v20 = vadd.f32 %v2634_v50, %v2585_v40 }
 0x4a5   :  { %v8054_v4 = vmul.f32 -1.442695, %v2640_v5  ;;  %v13456_v5 = vld [vmem:[#allocation78_spill] sm:$0xff] }
 0x4a6   :  { %v9586_v7 = vpop.eup %9585  ;;  %v2644_v0 = vunpack.c.l.bf16 %v13456_v5 }
 0x4a7   :  { %v9588_v33 = vpop.eup %9587  ;;  %v2713_v6 = vadd.f32 1.0, %v9586_v7  ;;  %9589 = vpow2.f32 %v8054_v4  ;;  %v2645_v7 = vunpack.c.h.bf16 %v13456_v5  ;;  %v2646_v5 = vunpack.c.l.bf16 %v13457_v56 }
 0x4a8   :  { %v2714_v32 = vadd.f32 1.0, %v9588_v33 }
 0x4a9   :  { %9591 = vrcp.f32 %v2713_v6  ;;  %vm2721_vm11 = vweird.f32 %v2713_v6 }
 0x4aa   :  { %9593 = vrcp.f32 %v2714_v32  ;;  %v2623_v10 = vpop.f32.mrf.mxu2  ;;  %v2636_v60 = vpop.f32.mrf.mxu3  ;;  %v2742_v40 = vand.u32 2147483648, %v2714_v32  ;;  %v2740_v12 = vand.u32 2147483647, %v2714_v32  ;;  %vm2736_vm10 = vweird.f32 %v2714_v32 }
 0x4ab   :  { %v2725_v10 = vand.u32 2147483647, %v2713_v6 }
 0x4ac   :  { %vm2741_vm15 = vcmp.eq.f32.partialorder %v2740_v12, 8.507059e+37 }
 0x4ad   :  { %v9590_v19 = vpop.eup %9589  ;;  %vm2726_vm14 = vcmp.eq.f32.partialorder %v2725_v10, 8.507059e+37 }
 0x4ae   :  { %v11200_v61 = vadd.f32 1.0, %v9590_v19  ;;  %v2727_v19 = vand.u32 2147483648, %v2713_v6 }
 0x4af   :  { %v9592_v48 = vpop.eup %9591 }
 0x4b0   :  { %v9594_v41 = vpop.eup %9593  ;;  %v2717_v31 = vmul.f32 %v9592_v48, %v2713_v6  ;;  %9595 = vrcp.f32 %v11200_v61  ;;  %vm2722_vm8 = vweird.f32 %v9592_v48  ;;  %v2757_v10 = vand.u32 2147483648, %v11200_v61 }
 0x4b1   :  { %v2732_v33 = vmul.f32 %v9594_v41, %v2714_v32  ;;  %9597 = vtanh.f32 %v2641_v20  ;;  %vm2737_vm9 = vweird.f32 %v9594_v41  ;;  %vm2723_vm12 = vmor %vm2721_vm11, %vm2722_vm8  ;;  %vm2751_vm1 = vweird.f32 %v11200_v61 }
 0x4b2   :  { %v2657_v4 = vpop.f32.mrf.mxu0  ;;  %v2670_v1 = vpop.f32.mrf.mxu1  ;;  %v2718_v55 = vsub.f32 1.0, %v2717_v31  ;;  %vm2738_vm13 = vmor %vm2736_vm10, %vm2737_vm9 }
 0x4b3   :  { %v2700_v53 = vadd.f32 %v2657_v4, %v2644_v0  ;;  %v2701_v60 = vadd.f32 %v2670_v1, %v2645_v7  ;;  %v2733_v50 = vsub.f32 1.0, %v2732_v33  ;;  %v2728_v7 = vor.u32 1.1754944e-38, %v2727_v19 }
 0x4b4   :  { %v2719_v17 = vmul.f32 %v9592_v48, %v2718_v55  ;;  %v2743_v4 = vor.u32 1.1754944e-38, %v2742_v40 }
 0x4b5   :  { %v8055_v3 = vmul.f32 -1.442695, %v2700_v53  ;;  %v8056_v24 = vmul.f32 -1.442695, %v2701_v60  ;;  %v2734_v26 = vmul.f32 %v9594_v41, %v2733_v50 }
 0x4b6   :  { %v9596_v14 = vpop.eup %9595  ;;  %v2720_v20 = vadd.f32 %v9592_v48, %v2719_v17 }
 0x4b7   :  { %9599 = vpow2.f32 %v8055_v3  ;;  %v9598_v31 = vpop.eup %9597  ;;  %v2747_v0 = vmul.f32 %v9596_v14, %v11200_v61  ;;  %v2735_v33 = vadd.f32 %v9594_v41, %v2734_v26  ;;  %vm2752_vm0 = vweird.f32 %v9596_v14 }
 0x4b8   :  { %9601 = vpow2.f32 %v8056_v24  ;;  %v2724_v1 = vsel %vm2723_vm12, %v9592_v48, %v2720_v20  ;;  %vm2753_vm2 = vmor %vm2751_vm1, %vm2752_vm0  ;;  %v2758_v20 = vor.u32 1.1754944e-38, %v2757_v10 }
 0x4b9   :  { %v2683_v55 = vpop.f32.mrf.mxu2  ;;  %v2696_v53 = vpop.f32.mrf.mxu3  ;;  %v2748_v60 = vsub.f32 1.0, %v2747_v0  ;;  %v2729_v50 = vsel %vm2726_vm14, %v2728_v7, %v2724_v1  ;;  %v2739_v32 = vsel %vm2738_vm13, %v9594_v41, %v2735_v33 }
 0x4ba   :  { %v2702_v17 = vadd.f32 %v2683_v55, %v2646_v5  ;;  %v2659_v6 = vpop.f32.mrf.mxu0  ;;  %v2672_v3 = vpop.f32.mrf.mxu1  ;;  %v2744_v13 = vsel %vm2741_vm15, %v2743_v4, %v2739_v32  ;;  %v2763_v21 = vmul.f32 %v9598_v31, %v2729_v50 }
 0x4bb   :  { %v2749_v52 = vmul.f32 %v9596_v14, %v2748_v60  ;;  %v2762_v19 = vmul.f32 %v2744_v13, %v11098_v59 }
 0x4bc   :  { %v8057_v26 = vmul.f32 -1.442695, %v2702_v17 }
 0x4bd   :  { %v9600_v24 = vpop.eup %9599  ;;  %v11208_v40 = vadd.f32 %v2763_v21, %v2762_v19  ;;  %v2750_v41 = vadd.f32 %v9596_v14, %v2749_v52  ;;  %v2755_v21 = vand.u32 2147483647, %v11200_v61  ;;  %v2647_v52 = vunpack.c.h.bf16 %v13457_v56 }
 0x4be   :  { %v9602_v18 = vpop.eup %9601  ;;  %v11210_v48 = vadd.f32 1.0, %v9600_v24  ;;  %9603 = vpow2.f32 %v8057_v26 }
 0x4bf   :  { %v11212_v12 = vadd.f32 1.0, %v9602_v18  ;;  %9605 = vtanh.f32 %v11208_v40  ;;  %v2754_v18 = vsel %vm2753_vm2, %v9596_v14, %v2750_v41  ;;  %vm2756_vm3 = vcmp.eq.f32.partialorder %v2755_v21, 8.507059e+37 }
 0x4c0   :  { %9607 = vrcp.f32 %v11210_v48  ;;  %v2703_v33 = vadd.f32 %v2696_v53, %v2647_v52  ;;  %v2759_v4 = vsel %vm2756_vm3, %v2758_v20, %v2754_v18  ;;  %v2790_v17 = vand.u32 2147483648, %v11210_v48 }
 0x4c1   :  { %v2685_v5 = vpop.f32.mrf.mxu2  ;;  %v2698_v59 = vpop.f32.mrf.mxu3  ;;  %9609 = vrcp.f32 %v11212_v12  ;;  %v2805_v56 = vand.u32 2147483648, %v11212_v12  ;;  %v2788_v3 = vand.u32 2147483647, %v11210_v48  ;;  %v2803_v26 = vand.u32 2147483647, %v11212_v12 }
 0x4c2   :  { %vm2784_vm6 = vweird.f32 %v11210_v48  ;;  %vm2799_vm7 = vweird.f32 %v11212_v12  ;;  %v2791_v10 = vor.u32 1.1754944e-38, %v2790_v17  ;;  %v13490_v17 = vld [vmem:[#allocation58_spill] sm:$0xff] }
 0x4c3   :  { %v2806_v59 = vor.u32 1.1754944e-38, %v2805_v56  ;;  %vm2789_vm10 = vcmp.eq.f32.partialorder %v2788_v3, 8.507059e+37  ;;  %vm2804_vm11 = vcmp.eq.f32.partialorder %v2803_v26, 8.507059e+37  ;;  %v13491_v56 = vld [vmem:[#allocation70_spill] sm:$0xff] }
 0x4c4   :  { %v9604_v13 = vpop.eup %9603  ;;  %v2837_v3 = vunpack.c.h.bf16 %v13491_v56 }
 0x4c5   :  { %v11220_v31 = vadd.f32 1.0, %v9604_v13  ;;  %v9606_v0 = vpop.eup %9605 }
 0x4c6   :  { %v9608_v7 = vpop.eup %9607  ;;  %v2766_v55 = vmul.f32 %v9606_v0, %v2759_v4  ;;  %v13482_v4 = vld [vmem:[#allocation50_spill] sm:$0xff] }
 0x4c7   :  { %9611 = vrcp.f32 %v11220_v31  ;;  %v9610_v1 = vpop.eup %9609  ;;  %v2780_v61 = vmul.f32 %v9608_v7, %v11210_v48  ;;  %vm2785_vm4 = vweird.f32 %v9608_v7  ;;  %v2820_v0 = vand.u32 2147483648, %v11220_v31 }
 0x4c8   :  { %v2795_v60 = vmul.f32 %v9610_v1, %v11212_v12  ;;  %v2830_v14 = vpack.c.bf16 %v2766_v55, %v2766_v55  ;;  %9613 = vtanh.f32 %v2703_v33  ;;  %vm2800_vm5 = vweird.f32 %v9610_v1  ;;  %vm2786_vm8 = vmor %vm2784_vm6, %vm2785_vm4  ;;  %v13481_v33 = vld [vmem:[#allocation48_spill] sm:$0xff] }
 0x4c9   :  { %v2781_v50 = vsub.f32 1.0, %v2780_v61  ;;  %vm2801_vm9 = vmor %vm2799_vm7, %vm2800_vm5  ;;  %vm2814_vm13 = vweird.f32 %v11220_v31  ;;  %v13484_v61 = vld [vmem:[#allocation53_spill] sm:$0xff]  ;;  %v13485_v55 = vld [vmem:[#allocation52_spill] sm:$0xff] }
 0x4ca   :  { %v2796_v32 = vsub.f32 1.0, %v2795_v60  ;;  %2831 = vst [vmem:[#allocation2 + $0x28] sm:$0xf] %v2830_v14  ;;  %2848 = vmatmul.bf16.vlgmr.msra.gmra.mxu0 %v2830_v14  ;;  %2861 = vmatmul.bf16.vlgmr.msra.gmra.mxu1 %v2830_v14  ;;  %v13486_v60 = vld [vmem:[#allocation54_spill] sm:$0xff] }
 0x4cb   :  { %v2782_v6 = vmul.f32 %v9608_v7, %v2781_v50  ;;  %2874 = vmatmul.bf16.vlgmr.msra.gmra.mxu2 %v2830_v14  ;;  %2887 = vmatmul.bf16.vlgmr.msra.gmra.mxu3 %v2830_v14  ;;  %v13487_v50 = vld [vmem:[#allocation55_spill] sm:$0xff]  ;;  %v13488_v14 = vld [vmem:[#allocation57_spill] sm:$0xff] }
 0x4cc   :  { %v2797_v19 = vmul.f32 %v9610_v1, %v2796_v32  ;;  %3094 = vmatpush.bf16.msra.mxu0 %v13277_v42  ;;  %3120 = vmatpush.bf16.msra.mxu2 %v13278_v47  ;;  %v13489_v32 = vld [vmem:[#allocation56_spill] sm:$0xff] }
 0x4cd   :  { %v9612_v53 = vpop.eup %9611  ;;  %v2783_v41 = vadd.f32 %v9608_v7, %v2782_v6  ;;  %3107 = vmatpush.bf16.msra.mxu1 %v10249_v11  ;;  %3133 = vmatpush.bf16.msra.mxu3 %v10262_v25  ;;  %v2836_v6 = vunpack.c.l.bf16 %v13491_v56 }
 0x4ce   :  { %v2810_v24 = vmul.f32 %v9612_v53, %v11220_v31  ;;  %v2798_v5 = vadd.f32 %v9610_v1, %v2797_v19  ;;  %v9614_v48 = vpop.eup %9613  ;;  %vm2815_vm12 = vweird.f32 %v9612_v53 }
 0x4cf   :  { %v2787_v13 = vsel %vm2786_vm8, %v9608_v7, %v2783_v41  ;;  %vm2816_vm14 = vmor %vm2814_vm13, %vm2815_vm12  ;;  %v13480_v7 = vld [vmem:[#allocation49_spill] sm:$0xff] }
 0x4d0   :  { %v2811_v21 = vsub.f32 1.0, %v2810_v24  ;;  %v2792_v42 = vsel %vm2789_vm10, %v2791_v10, %v2787_v13  ;;  %v2802_v18 = vsel %vm2801_vm9, %v9610_v1, %v2798_v5  ;;  %3095 = vmatpush.bf16.msra.mxu0 %v10254_v16  ;;  %3121 = vmatpush.bf16.msra.mxu2 %v10260_v22  ;;  %v2818_v16 = vand.u32 2147483647, %v11220_v31  ;;  %v13479_v31 = vld [vmem:[#allocation47_spill] sm:$0xff] }
 0x4d1   :  { %v2807_v12 = vsel %vm2804_vm11, %v2806_v59, %v2802_v18  ;;  %v2826_v20 = vmul.f32 %v9614_v48, %v2792_v42  ;;  %3108 = vmatpush.bf16.msra.mxu1 %v13279_v27  ;;  %3134 = vmatpush.bf16.msra.mxu3 %v13280_v43  ;;  %v13475_v43 = vld [vmem:[#allocation43_spill] sm:$0xff] }
 0x4d2   :  { %v2812_v47 = vmul.f32 %v9612_v53, %v2811_v21  ;;  %v2825_v11 = vmul.f32 %v2807_v12, %v11134_v28  ;;  %vm2819_vm15 = vcmp.eq.f32.partialorder %v2818_v16, 8.507059e+37  ;;  %v13477_v28 = vld [vmem:[#allocation44_spill] sm:$0xff]  ;;  %v13483_v1 = vld [vmem:[#allocation51_spill] sm:$0xff] }
 0x4d3   :  { %v13492_v5 = vld [vmem:[#allocation71_spill] sm:$0xff] }
 0x4d4   :  { %v11244_v25 = vadd.f32 %v2826_v20, %v2825_v11  ;;  %v2813_v52 = vadd.f32 %v9612_v53, %v2812_v47  ;;  %3096 = vmatpush.bf16.msra.mxu0 %v10277_v30  ;;  %3122 = vmatpush.bf16.msra.mxu2 %v10281_v36  ;;  %v2821_v30 = vor.u32 1.1754944e-38, %v2820_v0  ;;  %v2838_v59 = vunpack.c.l.bf16 %v13492_v5 }
 0x4d5   :  { %3109 = vmatpush.bf16.msra.mxu1 %v10279_v34  ;;  %3135 = vmatpush.bf16.msra.mxu3 %v10293_v49  ;;  %v13459_v49 = vld [vmem:[#allocation24_spill] sm:$0xff] }
 0x4d6   :  { %9615 = vtanh.f32 %v11244_v25  ;;  %v2817_v22 = vsel %vm2816_vm14, %v9612_v53, %v2813_v52 }
 0x4d7   :  { %v2822_v34 = vsel %vm2819_vm15, %v2821_v30, %v2817_v22  ;;  %v2839_v22 = vunpack.c.h.bf16 %v13492_v5 }
 0x4d8   :  { %3097 = vmatpush.bf16.msra.mxu0 %v10288_v44  ;;  %3123 = vmatpush.bf16.msra.mxu2 %v10295_v51  ;;  %v13460_v51 = vld [vmem:[#allocation26_spill] sm:$0xff] }
 0x4d9   :  { %3110 = vmatpush.bf16.msra.mxu1 %v10290_v45  ;;  %3136 = vmatpush.bf16.msra.mxu3 %v10302_v54  ;;  %v13458_v45 = vld [vmem:[#allocation29_spill] sm:$0xff]  ;;  %v13461_v54 = vld [vmem:[#allocation28_spill] sm:$0xff] }
 0x4dc   :  { %v9616_v36 = vpop.eup %9615  ;;  %3098 = vmatpush.bf16.msra.mxu0 %v10307_v58  ;;  %3124 = vmatpush.bf16.msra.mxu2 %v10312_v63  ;;  %v13462_v58 = vld [vmem:[#allocation30_spill] sm:$0xff]  ;;  %v13464_v63 = vld [vmem:[#allocation33_spill] sm:$0xff] }
 0x4dd   :  { %v2829_v27 = vmul.f32 %v9616_v36, %v2822_v34  ;;  %3111 = vmatpush.bf16.msra.mxu1 %v10310_v62  ;;  %3137 = vmatpush.bf16.msra.mxu3 %v10315_v35  ;;  %v13463_v62 = vld [vmem:[#allocation31_spill] sm:$0xff]  ;;  %v13465_v35 = vld [vmem:[#allocation32_spill] sm:$0xff] }
 0x4df   :  { %v2832_v44 = vpack.c.bf16 %v2829_v27, %v2829_v27 }
 0x4e0   :  { %3099 = vmatpush.bf16.msra.mxu0 %v10319_v8  ;;  %3125 = vmatpush.bf16.msra.mxu2 %v10324_v15  ;;  %v13466_v8 = vld [vmem:[#allocation34_spill] sm:$0xff]  ;;  %v13468_v15 = vld [vmem:[#allocation37_spill] sm:$0xff] }
 0x4e1   :  { %2833 = vst [vmem:[#allocation2 + $0x14] sm:$0xf] %v2832_v44  ;;  %2910 = vmatmul.bf16.vlgmr.msrb.gmra.mxu0 %v2832_v44  ;;  %2923 = vmatmul.bf16.vlgmr.msrb.gmra.mxu1 %v2832_v44 }
 0x4e2   :  { %2936 = vmatmul.bf16.vlgmr.msrb.gmra.mxu2 %v2832_v44  ;;  %2949 = vmatmul.bf16.vlgmr.msrb.gmra.mxu3 %v2832_v44 }
 0x4e3   :  { %3112 = vmatpush.bf16.msra.mxu1 %v10321_v9  ;;  %3138 = vmatpush.bf16.msra.mxu3 %v10326_v23  ;;  %v13467_v9 = vld [vmem:[#allocation35_spill] sm:$0xff]  ;;  %v13469_v23 = vld [vmem:[#allocation36_spill] sm:$0xff] }
 0x4e4   :  { %3100 = vmatpush.bf16.msra.mxu0 %v10329_v29  ;;  %3126 = vmatpush.bf16.msra.mxu2 %v10335_v38  ;;  %v13470_v29 = vld [vmem:[#allocation38_spill] sm:$0xff]  ;;  %v13472_v38 = vld [vmem:[#allocation41_spill] sm:$0xff] }
 0x4e7   :  { %3113 = vmatpush.bf16.msra.mxu1 %v10333_v37  ;;  %3139 = vmatpush.bf16.msra.mxu3 %v10338_v39  ;;  %v13471_v37 = vld [vmem:[#allocation39_spill] sm:$0xff]  ;;  %v13473_v39 = vld [vmem:[#allocation40_spill] sm:$0xff] }
 0x4e8   :  { %3101 = vmatpush.bf16.msra.mxu0 %v10345_v46  ;;  %3127 = vmatpush.bf16.msra.mxu2 %v13348_v57  ;;  %v13474_v46 = vld [vmem:[#allocation42_spill] sm:$0xff]  ;;  %v13476_v57 = vld [vmem:[#allocation45_spill] sm:$0xff] }
 0x4eb   :  { %3114 = vmatpush.bf16.msra.mxu1 %v13459_v49  ;;  %3140 = vmatpush.bf16.msra.mxu3 %v13460_v51  ;;  %v13493_v49 = vld [vmem:[#allocation76_spill] sm:$0xff] }
 0x4ec   :  { %3156 = vmatpush.bf16.msrb.mxu0 %v13422_v2  ;;  %3182 = vmatpush.bf16.msrb.mxu2 %v13458_v45  ;;  %v13478_v2 = vld [vmem:[#allocation46_spill] sm:$0xff]  ;;  %v2898_v51 = vunpack.c.l.bf16 %v13493_v49 }
 0x4ef   :  { %3169 = vmatpush.bf16.msrb.mxu1 %v13461_v54  ;;  %3195 = vmatpush.bf16.msrb.mxu3 %v13462_v58  ;;  %v2899_v54 = vunpack.c.h.bf16 %v13493_v49  ;;  %v8330_v49 = vld [vmem:[#allocation10 + $0x1e0] sm:$0xf0] }
 0x4f0   :  { %3157 = vmatpush.bf16.msrb.mxu0 %v13463_v62  ;;  %3183 = vmatpush.bf16.msrb.mxu2 %v13464_v63 }
 0x4f3   :  { %3170 = vmatpush.bf16.msrb.mxu1 %v13465_v35  ;;  %3196 = vmatpush.bf16.msrb.mxu3 %v13466_v8 }
 0x4f4   :  { %3158 = vmatpush.bf16.msrb.mxu0 %v13467_v9  ;;  %3184 = vmatpush.bf16.msrb.mxu2 %v13468_v15 }
 0x4f7   :  { %3171 = vmatpush.bf16.msrb.mxu1 %v13469_v23  ;;  %3197 = vmatpush.bf16.msrb.mxu3 %v13470_v29 }
 0x4f8   :  { %3159 = vmatpush.bf16.msrb.mxu0 %v13471_v37  ;;  %3185 = vmatpush.bf16.msrb.mxu2 %v13472_v38 }
 0x4fb   :  { %3172 = vmatpush.bf16.msrb.mxu1 %v13473_v39  ;;  %3198 = vmatpush.bf16.msrb.mxu3 %v13474_v46 }
 0x4fc   :  { %3160 = vmatpush.bf16.msrb.mxu0 %v13475_v43  ;;  %3186 = vmatpush.bf16.msrb.mxu2 %v13476_v57 }
 0x4ff   :  { %3173 = vmatpush.bf16.msrb.mxu1 %v13477_v28  ;;  %3199 = vmatpush.bf16.msrb.mxu3 %v13478_v2  ;;  %v13494_v28 = vld [vmem:[#allocation77_spill] sm:$0xff] }
 0x500   :  { %3161 = vmatpush.bf16.msrb.mxu0 %v13479_v31  ;;  %3187 = vmatpush.bf16.msrb.mxu2 %v13480_v7  ;;  %v2900_v2 = vunpack.c.l.bf16 %v13494_v28 }
 0x503   :  { %3174 = vmatpush.bf16.msrb.mxu1 %v13481_v33  ;;  %3200 = vmatpush.bf16.msrb.mxu3 %v13482_v4 }
 0x504   :  { %3162 = vmatpush.bf16.msrb.mxu0 %v13483_v1  ;;  %3188 = vmatpush.bf16.msrb.mxu2 %v13484_v61 }
 0x507   :  { %3175 = vmatpush.bf16.msrb.mxu1 %v13485_v55  ;;  %3201 = vmatpush.bf16.msrb.mxu3 %v13486_v60 }
 0x508   :  { %3163 = vmatpush.bf16.msrb.mxu0 %v13487_v50  ;;  %3189 = vmatpush.bf16.msrb.mxu2 %v13488_v14 }
 0x50b   :  { %3176 = vmatpush.bf16.msrb.mxu1 %v13489_v32  ;;  %3202 = vmatpush.bf16.msrb.mxu3 %v13490_v17 }
 0x547   :  { %v2849_v53 = vpop.f32.mrf.mxu0  ;;  %v2862_v19 = vpop.f32.mrf.mxu1 }
 0x548   :  { %v2892_v26 = vadd.f32 %v2849_v53, %v2836_v6  ;;  %v2893_v24 = vadd.f32 %v2862_v19, %v2837_v3 }
 0x54a   :  { %v8058_v41 = vmul.f32 -1.442695, %v2892_v26  ;;  %v8059_v10 = vmul.f32 -1.442695, %v2893_v24 }
 0x54c   :  { %9617 = vpow2.f32 %v8058_v41 }
 0x54d   :  { %9619 = vpow2.f32 %v8059_v10 }
 0x54e   :  { %v2875_v21 = vpop.f32.mrf.mxu2  ;;  %v2888_v13 = vpop.f32.mrf.mxu3 }
 0x54f   :  { %v2894_v48 = vadd.f32 %v2875_v21, %v2838_v59  ;;  %v2851_v42 = vpop.f32.mrf.mxu0  ;;  %v2864_v18 = vpop.f32.mrf.mxu1  ;;  %v2895_v36 = vadd.f32 %v2888_v13, %v2839_v22 }
 0x551   :  { %v8060_v47 = vmul.f32 -1.442695, %v2894_v48 }
 0x552   :  { %v9618_v12 = vpop.eup %9617 }
 0x553   :  { %v9620_v20 = vpop.eup %9619  ;;  %v2967_v11 = vadd.f32 1.0, %v9618_v12  ;;  %9621 = vpow2.f32 %v8060_v47 }
 0x554   :  { %v2968_v52 = vadd.f32 1.0, %v9620_v20 }
 0x555   :  { %9623 = vrcp.f32 %v2967_v11  ;;  %v2979_v8 = vand.u32 2147483647, %v2967_v11  ;;  %v2981_v37 = vand.u32 2147483648, %v2967_v11  ;;  %vm2975_vm3 = vweird.f32 %v2967_v11 }
 0x556   :  { %9625 = vrcp.f32 %v2968_v52  ;;  %v2877_v0 = vpop.f32.mrf.mxu2  ;;  %v2890_v16 = vpop.f32.mrf.mxu3  ;;  %v2996_v29 = vand.u32 2147483648, %v2968_v52  ;;  %v2994_v38 = vand.u32 2147483647, %v2968_v52  ;;  %vm2990_vm2 = vweird.f32 %v2968_v52 }
 0x557   :  { %v2982_v1 = vor.u32 1.1754944e-38, %v2981_v37  ;;  %vm2980_vm6 = vcmp.eq.f32.partialorder %v2979_v8, 8.507059e+37  ;;  %v2901_v16 = vunpack.c.h.bf16 %v13494_v28  ;;  %v8298_v37 = vld [vmem:[#allocation10 + $0x1a0] sm:$0xf0] }
 0x558   :  { %v2997_v55 = vor.u32 1.1754944e-38, %v2996_v29  ;;  %vm2995_vm7 = vcmp.eq.f32.partialorder %v2994_v38, 8.507059e+37  ;;  %v9234_v29 = vld [vmem:[#allocation10 + $0x184] sm:$0xf] }
 0x559   :  { %v9622_v30 = vpop.eup %9621 }
 0x55a   :  { %v11310_v34 = vadd.f32 1.0, %v9622_v30  ;;  %v8328_v30 = vld [vmem:[#allocation10 + $0x1c0] sm:$0xf] }
 0x55b   :  { %v9624_v27 = vpop.eup %9623 }
 0x55c   :  { %v9626_v44 = vpop.eup %9625  ;;  %v2971_v45 = vmul.f32 %v9624_v27, %v2967_v11  ;;  %9627 = vrcp.f32 %v11310_v34  ;;  %vm2976_vm0 = vweird.f32 %v9624_v27  ;;  %v3011_v18 = vand.u32 2147483648, %v11310_v34 }
 0x55d   :  { %v2986_v58 = vmul.f32 %v9626_v44, %v2968_v52  ;;  %9629 = vtanh.f32 %v2895_v36  ;;  %vm2991_vm1 = vweird.f32 %v9626_v44  ;;  %vm2977_vm4 = vmor %vm2975_vm3, %vm2976_vm0  ;;  %vm3005_vm9 = vweird.f32 %v11310_v34 }
 0x55e   :  { %v2911_v62 = vpop.f32.mrf.mxu0  ;;  %v2924_v63 = vpop.f32.mrf.mxu1  ;;  %v2972_v35 = vsub.f32 1.0, %v2971_v45  ;;  %vm2992_vm5 = vmor %vm2990_vm2, %vm2991_vm1  ;;  %v3009_v12 = vand.u32 2147483647, %v11310_v34  ;;  %v3012_v52 = vor.u32 1.1754944e-38, %v3011_v18  ;;  %v9246_v45 = vld [vmem:[#allocation10 + $0x1dc] sm:$0xf0] }
 0x55f   :  { %v2954_v9 = vadd.f32 %v2911_v62, %v2898_v51  ;;  %v2955_v15 = vadd.f32 %v2924_v63, %v2899_v54  ;;  %v2987_v23 = vsub.f32 1.0, %v2986_v58  ;;  %v8296_v63 = vld [vmem:[#allocation10 + $0x180] sm:$0xf]  ;;  %v8234_v18 = vld [vmem:[#allocation10 + $0x120] sm:$0xf0] }
 0x560   :  { %v2973_v39 = vmul.f32 %v9624_v27, %v2972_v35  ;;  %vm3010_vm11 = vcmp.eq.f32.partialorder %v3009_v12, 8.507059e+37  ;;  %v9238_v35 = vld [vmem:[#allocation10 + $0x19c] sm:$0xf0] }
 0x561   :  { %v8061_v46 = vmul.f32 -1.442695, %v2954_v9  ;;  %v8062_v43 = vmul.f32 -1.442695, %v2955_v15  ;;  %v2988_v57 = vmul.f32 %v9626_v44, %v2987_v23  ;;  %v8329_v15 = vor.u32 %v9246_v45, %v8328_v30 }
 0x562   :  { %v9628_v31 = vpop.eup %9627  ;;  %v2974_v7 = vadd.f32 %v9624_v27, %v2973_v39 }
 0x563   :  { %9631 = vpow2.f32 %v8061_v46  ;;  %v9630_v33 = vpop.eup %9629  ;;  %v3001_v4 = vmul.f32 %v9628_v31, %v11310_v34  ;;  %v2989_v61 = vadd.f32 %v9626_v44, %v2988_v57  ;;  %vm3006_vm8 = vweird.f32 %v9628_v31  ;;  %v9242_v34 = vld [vmem:[#allocation10 + $0x1c4] sm:$0xf]  ;;  %v8264_v46 = vld [vmem:[#allocation10 + $0x140] sm:$0xf] }
 0x564   :  { %9633 = vpow2.f32 %v8062_v43  ;;  %v2978_v60 = vsel %vm2977_vm4, %v9624_v27, %v2974_v7  ;;  %vm3007_vm10 = vmor %vm3005_vm9, %vm3006_vm8  ;;  %v8333_v23 = vor.u32 %v9242_v34, %v8330_v49  ;;  %v9230_v43 = vld [vmem:[#allocation10 + $0x15c] sm:$0xf0] }
 0x565   :  { %v2937_v50 = vpop.f32.mrf.mxu2  ;;  %v2950_v14 = vpop.f32.mrf.mxu3  ;;  %v3002_v32 = vsub.f32 1.0, %v3001_v4  ;;  %v2983_v17 = vsel %vm2980_vm6, %v2982_v1, %v2978_v60  ;;  %v2993_v56 = vsel %vm2992_vm5, %v9626_v44, %v2989_v61  ;;  %v8297_v4 = vor.u32 %v9238_v35, %v8296_v63  ;;  %v9226_v60 = vld [vmem:[#allocation10 + $0x144] sm:$0xf]  ;;  %v8168_v34 = vld [vmem:[#allocation10 + $0x80] sm:$0xf] }
 0x566   :  { %v2956_v6 = vadd.f32 %v2937_v50, %v2900_v2  ;;  %v2913_v3 = vpop.f32.mrf.mxu0  ;;  %v2926_v53 = vpop.f32.mrf.mxu1  ;;  %v2998_v19 = vsel %vm2995_vm7, %v2997_v55, %v2993_v56  ;;  %v3017_v26 = vmul.f32 %v9630_v33, %v2983_v17  ;;  %v2957_v27 = vadd.f32 %v2950_v14, %v2901_v16  ;;  %v8266_v50 = vld [vmem:[#allocation10 + $0x160] sm:$0xf0] }
 0x567   :  { %v3003_v24 = vmul.f32 %v9628_v31, %v3002_v32  ;;  %v3016_v41 = vmul.f32 %v2998_v19, %v11208_v40  ;;  %v8301_v55 = vor.u32 %v9234_v29, %v8298_v37  ;;  %v8265_v17 = vor.u32 %v9230_v43, %v8264_v46  ;;  %v8138_v29 = vld [vmem:[#allocation10 + $0x60] sm:$0xf0]  ;;  %v9190_v46 = vld [vmem:[#allocation10 + $0x1c] sm:$0xf0] }
 0x568   :  { %v8063_v10 = vmul.f32 -1.442695, %v2956_v6  ;;  %v9186_v43 = vld [vmem:[#allocation10 + $0x4] sm:$0xf] }
 0x569   :  { %v9632_v5 = vpop.eup %9631  ;;  %v11318_v21 = vadd.f32 %v3017_v26, %v3016_v41  ;;  %v3004_v42 = vadd.f32 %v9628_v31, %v3003_v24  ;;  %v8269_v24 = vor.u32 %v9226_v60, %v8266_v50  ;;  %v8088_v60 = vld [vmem:[#allocation2 + $0x20] sm:$0xf] }
 0x56a   :  { %v9634_v59 = vpop.eup %9633  ;;  %v11320_v13 = vadd.f32 1.0, %v9632_v5  ;;  %9635 = vpow2.f32 %v8063_v10 }
 0x56b   :  { %v11322_v48 = vadd.f32 1.0, %v9634_v59  ;;  %9637 = vtanh.f32 %v11318_v21  ;;  %v3008_v11 = vsel %vm3007_vm10, %v9628_v31, %v3004_v42  ;;  %v8232_v59 = vld [vmem:[#allocation10 + $0x100] sm:$0xf]  ;;  %v9218_v42 = vld [vmem:[#allocation10 + $0x104] sm:$0xf] }
 0x56c   :  { %9639 = vrcp.f32 %v11320_v13  ;;  %v3013_v44 = vsel %vm3010_vm11, %v3012_v52, %v3008_v11  ;;  %v3044_v39 = vand.u32 2147483648, %v11320_v13  ;;  %v3042_v2 = vand.u32 2147483647, %v11320_v13  ;;  %v8200_v11 = vld [vmem:[#allocation10 + $0xc0] sm:$0xf] }
 0x56d   :  { %v2939_v47 = vpop.f32.mrf.mxu2  ;;  %v2952_v40 = vpop.f32.mrf.mxu3  ;;  %9641 = vrcp.f32 %v11322_v48  ;;  %v3059_v57 = vand.u32 2147483648, %v11322_v48  ;;  %v3057_v33 = vand.u32 2147483647, %v11322_v48  ;;  %vm3038_vm14 = vweird.f32 %v11320_v13  ;;  %v9214_v52 = vld [vmem:[#allocation10 + $0xdc] sm:$0xf0] }
 0x56e   :  { %vm3053_vm15 = vweird.f32 %v11322_v48  ;;  %v3045_v14 = vor.u32 1.1754944e-38, %v3044_v39  ;;  %vm3043_vm2 = vcmp.eq.f32.partialorder %v3042_v2, 8.507059e+37  ;;  %v8237_v12 = vor.u32 %v9218_v42, %v8234_v18  ;;  %v8104_v39 = vld [vmem:[#allocation10] sm:$0xf] }
 0x56f   :  { %v3060_v56 = vor.u32 1.1754944e-38, %v3059_v57  ;;  %vm3058_vm3 = vcmp.eq.f32.partialorder %v3057_v33, 8.507059e+37  ;;  %v8106_v57 = vld [vmem:[#allocation10 + $0x20] sm:$0xf0] }
 0x570   :  { %v9636_v20 = vpop.eup %9635  ;;  %v8109_v2 = vor.u32 %v9186_v43, %v8106_v57  ;;  %v9298_v57 = vld [vmem:[#allocation10 + $0x384] sm:$0xf] }
 0x571   :  { %v11330_v0 = vadd.f32 1.0, %v9636_v20  ;;  %v9638_v22 = vpop.eup %9637 }
 0x572   :  { %v9640_v36 = vpop.eup %9639  ;;  %v3020_v58 = vmul.f32 %v9638_v22, %v3013_v44  ;;  %v8202_v22 = vld [vmem:[#allocation10 + $0xe0] sm:$0xf0] }
 0x573   :  { %9643 = vrcp.f32 %v11330_v0  ;;  %v9642_v51 = vpop.eup %9641  ;;  %v3034_v54 = vmul.f32 %v9640_v36, %v11320_v13  ;;  %vm3039_vm12 = vweird.f32 %v9640_v36  ;;  %v3074_v16 = vand.u32 2147483648, %v11330_v0 }
 0x574   :  { %v3049_v62 = vmul.f32 %v9642_v51, %v11322_v48  ;;  %v3084_v9 = vpack.c.bf16 %v3020_v58, %v3020_v58  ;;  %9645 = vtanh.f32 %v2957_v27  ;;  %vm3054_vm13 = vweird.f32 %v9642_v51  ;;  %vm3040_vm0 = vmor %vm3038_vm14, %vm3039_vm12  ;;  %v9222_v48 = vld [vmem:[#allocation10 + $0x11c] sm:$0xf0]  ;;  %v9202_v58 = vld [vmem:[#allocation10 + $0x84] sm:$0xf] }
 0x575   :  { %v3035_v8 = vsub.f32 1.0, %v3034_v54  ;;  %vm3055_vm1 = vmor %vm3053_vm15, %vm3054_vm13  ;;  %v8233_v40 = vor.u32 %v9222_v48, %v8232_v59  ;;  %vm3068_vm5 = vweird.f32 %v11330_v0  ;;  %v3072_v30 = vand.u32 2147483647, %v11330_v0  ;;  %v9206_v54 = vld [vmem:[#allocation10 + $0x9c] sm:$0xf0] }
 0x576   :  { %v3050_v38 = vsub.f32 1.0, %v3049_v62  ;;  %3085 = vst [vmem:[#allocation2 + $0x30] sm:$0xf] %v3084_v9  ;;  %3102 = vmatmul.bf16.vlgmr.msra.gmra.mxu0 %v3084_v9  ;;  %3115 = vmatmul.bf16.vlgmr.msra.gmra.mxu1 %v3084_v9  ;;  %v8201_v27 = vor.u32 %v9214_v52, %v8200_v11  ;;  %v3075_v45 = vor.u32 1.1754944e-38, %v3074_v16  ;;  %v8170_v62 = vld [vmem:[#allocation10 + $0xa0] sm:$0xf0] }
 0x577   :  { %v3036_v28 = vmul.f32 %v9640_v36, %v3035_v8  ;;  %3128 = vmatmul.bf16.vlgmr.msra.gmra.mxu2 %v3084_v9  ;;  %3141 = vmatmul.bf16.vlgmr.msra.gmra.mxu3 %v3084_v9  ;;  %vm3073_vm7 = vcmp.eq.f32.partialorder %v3072_v30, 8.507059e+37  ;;  %v8173_v8 = vor.u32 %v9202_v58, %v8170_v62  ;;  %v8136_v9 = vld [vmem:[#allocation10 + $0x40] sm:$0xf] }
 0x578   :  { %v3051_v7 = vmul.f32 %v9642_v51, %v3050_v38  ;;  %4176 = vmatpush.bf16.msra.mxu0 %v8329_v15  ;;  %4234 = vmatpush.bf16.msra.mxu2 %v8333_v23  ;;  %v9198_v15 = vld [vmem:[#allocation10 + $0x5c] sm:$0xf0]  ;;  %v9194_v23 = vld [vmem:[#allocation10 + $0x44] sm:$0xf] }
 0x579   :  { %v11339_v31 = vpop.eup %9643  ;;  %v3037_v61 = vadd.f32 %v9640_v36, %v3036_v28  ;;  %v8137_v37 = vor.u32 %v9198_v15, %v8136_v9  ;;  %v8141_v38 = vor.u32 %v9194_v23, %v8138_v29  ;;  %v8105_v28 = vor.u32 %v9190_v46, %v8104_v39  ;;  %v8584_v11 = vld [vmem:[#allocation10 + $0x3c0] sm:$0xf]  ;;  %v13497_v39 = vld [vmem:[#allocation74_spill] sm:$0xff] }
 0x57a   :  { %v3064_v1 = vmul.f32 %v11339_v31, %v11330_v0  ;;  %v3052_v32 = vadd.f32 %v9642_v51, %v3051_v7  ;;  %v9646_v53 = vpop.eup %9645  ;;  %vm3069_vm4 = vweird.f32 %v11339_v31  ;;  %v8169_v0 = vor.u32 %v9206_v54, %v8168_v34  ;;  %v8072_v7 = vld [vmem:[#allocation2] sm:$0xf] }
 0x57b   :  { %v3041_v3 = vsel %vm3040_vm0, %v9640_v36, %v3037_v61  ;;  %vm3070_vm6 = vmor %vm3068_vm5, %vm3069_vm4  ;;  %v9302_v29 = vld [vmem:[#allocation10 + $0x39c] sm:$0xf0]  ;;  %v3152_v46 = vunpack.c.l.bf16 %v13497_v39 }
 0x57c   :  { %v3065_v6 = vsub.f32 1.0, %v3064_v1  ;;  %v3046_v19 = vsel %vm3043_vm2, %v3045_v14, %v3041_v3  ;;  %v3056_v26 = vsel %vm3055_vm1, %v9642_v51, %v3052_v32  ;;  %4177 = vmatpush.bf16.msra.mxu0 %v8297_v4  ;;  %4235 = vmatpush.bf16.msra.mxu2 %v8301_v55  ;;  %v9181_v4 = vld [vmem:[#allocation2 + $0x14] sm:$0xf0]  ;;  %v8080_v1 = vld [vmem:[#allocation2 + $0x10] sm:$0xf]  ;;  %v13495_v14 = vld [vmem:[#allocation72_spill] sm:$0xff] }
 0x57d   :  { %v3061_v10 = vsel %vm3058_vm3, %v3060_v56, %v3056_v26  ;;  %v3080_v5 = vmul.f32 %v9646_v53, %v3046_v19  ;;  %v11363_v61 = vor.u32 %v9181_v4, %v8080_v1  ;;  %v9183_v55 = vld [vmem:[#allocation2 + $0x24] sm:$0xf0]  ;;  %v3090_v32 = vunpack.c.l.bf16 %v13495_v14  ;;  %v13500_v1 = vld [vmem:[#allocation75_spill] sm:$0xff] }
 0x57e   :  { %v3066_v41 = vmul.f32 %v11339_v31, %v3065_v6  ;;  %v3079_v13 = vmul.f32 %v3061_v10, %v11244_v25  ;;  %v9210_v25 = vld [vmem:[#allocation10 + $0xc4] sm:$0xf]  ;;  %v11367_v50 = vor.u32 %v9183_v55, %v8088_v60  ;;  %v3153_v4 = vunpack.c.h.bf16 %v13497_v39  ;;  %v8304_v60 = vld [vmem:[#allocation10 + $0x188] sm:$0xf]  ;;  %v9219_v39 = vld [vmem:[#allocation10 + $0x10c] sm:$0xf] }
 0x57f   :  { %v8205_v44 = vor.u32 %v9210_v25, %v8202_v22  ;;  %v9310_v25 = vld [vmem:[#allocation10 + $0x3dc] sm:$0xf0]  ;;  %v3154_v55 = vunpack.c.l.bf16 %v13500_v1 }
 0x580   :  { %v11350_v47 = vadd.f32 %v3080_v5, %v3079_v13  ;;  %4178 = vmatpush.bf16.msra.mxu0 %v8265_v17  ;;  %4236 = vmatpush.bf16.msra.mxu2 %v8269_v24  ;;  %v3067_v20 = vadd.f32 %v11339_v31, %v3066_v41  ;;  %v3091_v17 = vunpack.c.h.bf16 %v13495_v14  ;;  %v13496_v24 = vld [vmem:[#allocation73_spill] sm:$0xff] }
 0x581   :  { %v3092_v41 = vunpack.c.l.bf16 %v13496_v24  ;;  %v3093_v22 = vunpack.c.h.bf16 %v13496_v24  ;;  %v9239_v14 = vld [vmem:[#allocation10 + $0x1a4] sm:$0xf0] }
 0x582   :  { %9647 = vtanh.f32 %v11350_v47  ;;  %v3071_v36 = vsel %vm3070_vm6, %v11339_v31, %v3067_v20  ;;  %v9179_v31 = vld [vmem:[#allocation2 + $0x4] sm:$0xf0] }
 0x583   :  { %v3076_v51 = vsel %vm3073_vm7, %v3075_v45, %v3071_v36  ;;  %v11359_v33 = vor.u32 %v9179_v31, %v8072_v7  ;;  %v8585_v36 = vor.u32 %v9310_v25, %v8584_v11  ;;  %v9231_v11 = vld [vmem:[#allocation10 + $0x164] sm:$0xf0] }
 0x584   :  { %4179 = vmatpush.bf16.msra.mxu0 %v8233_v40  ;;  %4237 = vmatpush.bf16.msra.mxu2 %v8237_v12 }
 0x585   :  { %4205 = vmatpush.bf16.msra.mxu1 %v8585_v36  ;;  %v9227_v36 = vld [vmem:[#allocation10 + $0x14c] sm:$0xf] }
 0x588   :  { %v9648_v49 = vpop.eup %9647  ;;  %4180 = vmatpush.bf16.msra.mxu0 %v8201_v27  ;;  %4238 = vmatpush.bf16.msra.mxu2 %v8205_v44  ;;  %v9306_v27 = vld [vmem:[#allocation10 + $0x3c4] sm:$0xf] }
 0x589   :  { %v3083_v63 = vmul.f32 %v9648_v49, %v3076_v51  ;;  %v8586_v44 = vld [vmem:[#allocation10 + $0x3e0] sm:$0xf0]  ;;  %v8336_v49 = vld [vmem:[#allocation10 + $0x1c8] sm:$0xf] }
 0x58a   :  { %v8589_v34 = vor.u32 %v9306_v27, %v8586_v44  ;;  %v9247_v51 = vld [vmem:[#allocation10 + $0x1e4] sm:$0xf0] }
 0x58b   :  { %v3086_v35 = vpack.c.bf16 %v3083_v63, %v3083_v63  ;;  %v8337_v62 = vor.u32 %v9247_v51, %v8336_v49  ;;  %v9243_v63 = vld [vmem:[#allocation10 + $0x1cc] sm:$0xf]  ;;  %v8488_v49 = vld [vmem:[#allocation10 + $0x300] sm:$0xf] }
 0x58c   :  { %4181 = vmatpush.bf16.msra.mxu0 %v8169_v0  ;;  %4239 = vmatpush.bf16.msra.mxu2 %v8173_v8  ;;  %v8552_v0 = vld [vmem:[#allocation10 + $0x380] sm:$0xf] }
 0x58d   :  { %3087 = vst [vmem:[#allocation2 + $0xc] sm:$0xf] %v3086_v35  ;;  %3164 = vmatmul.bf16.vlgmr.msrb.gmra.mxu0 %v3086_v35  ;;  %3177 = vmatmul.bf16.vlgmr.msrb.gmra.mxu1 %v3086_v35  ;;  %v8553_v43 = vor.u32 %v9302_v29, %v8552_v0  ;;  %v9286_v51 = vld [vmem:[#allocation10 + $0x31c] sm:$0xf0]  ;;  %v8240_v0 = vld [vmem:[#allocation10 + $0x108] sm:$0xf] }
 0x58e   :  { %3190 = vmatmul.bf16.vlgmr.msrb.gmra.mxu2 %v3086_v35  ;;  %3203 = vmatmul.bf16.vlgmr.msrb.gmra.mxu3 %v3086_v35  ;;  %v8338_v35 = vld [vmem:[#allocation10 + $0x1e8] sm:$0xf0]  ;;  %v9223_v29 = vld [vmem:[#allocation10 + $0x124] sm:$0xf0] }
 0x58f   :  { %4263 = vmatpush.bf16.msra.mxu3 %v8589_v34  ;;  %v8341_v23 = vor.u32 %v9243_v63, %v8338_v35  ;;  %4206 = vmatpush.bf16.msra.mxu1 %v8553_v43  ;;  %v8274_v34 = vld [vmem:[#allocation10 + $0x168] sm:$0xf0]  ;;  %v9282_v63 = vld [vmem:[#allocation10 + $0x304] sm:$0xf] }
 0x590   :  { %4182 = vmatpush.bf16.msra.mxu0 %v8137_v37  ;;  %4240 = vmatpush.bf16.msra.mxu2 %v8141_v38  ;;  %v8490_v35 = vld [vmem:[#allocation10 + $0x320] sm:$0xf0] }
 0x594   :  { %4183 = vmatpush.bf16.msra.mxu0 %v8105_v28  ;;  %4241 = vmatpush.bf16.msra.mxu2 %v8109_v2  ;;  %v8554_v28 = vld [vmem:[#allocation10 + $0x3a0] sm:$0xf0] }
 0x598   :  { %4292 = vmatpush.bf16.msrb.mxu0 %v8337_v62  ;;  %4350 = vmatpush.bf16.msrb.mxu2 %v8341_v23  ;;  %v8277_v62 = vor.u32 %v9227_v36, %v8274_v34  ;;  %v8426_v34 = vld [vmem:[#allocation10 + $0x2a0] sm:$0xf0] }
 0x59d   :  { %4184 = vmatmul.bf16.vlgmr.msra.gmra.mxu0 %v11359_v33 }
 0x59e   :  { %4242 = vmatmul.bf16.vlgmr.msra.gmra.mxu2 %v11359_v33 }
 0x5ad   :  { %4189 = vmatmul.bf16.gmra.mxu0 %v11363_v61 }
 0x5ae   :  { %4247 = vmatmul.bf16.gmra.mxu2 %v11363_v61 }
 0x5bd   :  { %4194 = vmatmul.bf16.gmra.mxu0 %v11367_v50 }
 0x5be   :  { %4252 = vmatmul.bf16.gmra.mxu2 %v11367_v50 }
 0x5f3   :  { %v3103_v56 = vpop.f32.mrf.mxu0  ;;  %v3116_v6 = vpop.f32.mrf.mxu1 }
 0x5f4   :  { %v3146_v3 = vadd.f32 %v3103_v56, %v3090_v32  ;;  %v3147_v53 = vadd.f32 %v3116_v6, %v3091_v17  ;;  %v9235_v32 = vld [vmem:[#allocation10 + $0x18c] sm:$0xf] }
 0x5f6   :  { %v8064_v19 = vmul.f32 -1.442695, %v3146_v3  ;;  %v8065_v26 = vmul.f32 -1.442695, %v3147_v53  ;;  %v8306_v3 = vld [vmem:[#allocation10 + $0x1a8] sm:$0xf0] }
 0x5f7   :  { %v8520_v53 = vld [vmem:[#allocation10 + $0x340] sm:$0xf] }
 0x5f8   :  { %9649 = vpow2.f32 %v8064_v19  ;;  %v9294_v19 = vld [vmem:[#allocation10 + $0x35c] sm:$0xf0] }
 0x5f9   :  { %9651 = vpow2.f32 %v8065_v26  ;;  %v8521_v44 = vor.u32 %v9294_v19, %v8520_v53  ;;  %v9278_v53 = vld [vmem:[#allocation10 + $0x2dc] sm:$0xf0] }
 0x5fa   :  { %v3129_v10 = vpop.f32.mrf.mxu2  ;;  %v3142_v5 = vpop.f32.mrf.mxu3 }
 0x5fb   :  { %v3148_v59 = vadd.f32 %v3129_v10, %v3092_v41  ;;  %v3105_v13 = vpop.f32.mrf.mxu0  ;;  %v3118_v48 = vpop.f32.mrf.mxu1  ;;  %v3149_v58 = vadd.f32 %v3142_v5, %v3093_v22  ;;  %v9290_v5 = vld [vmem:[#allocation10 + $0x344] sm:$0xf]  ;;  %4207 = vmatpush.bf16.msra.mxu1 %v8521_v44 }
 0x5fc   :  { %v9266_v44 = vld [vmem:[#allocation10 + $0x284] sm:$0xf] }
 0x5fd   :  { %v8066_v42 = vmul.f32 -1.442695, %v3148_v59  ;;  %v8522_v59 = vld [vmem:[#allocation10 + $0x360] sm:$0xf0] }
 0x5fe   :  { %v9650_v18 = vpop.eup %9649 }
 0x5ff   :  { %v9652_v40 = vpop.eup %9651  ;;  %v11374_v12 = vadd.f32 1.0, %v9650_v18  ;;  %9653 = vpow2.f32 %v8066_v42  ;;  %v8557_v42 = vor.u32 %v9298_v57, %v8554_v28  ;;  %v8305_v18 = vor.u32 %v9239_v14, %v8304_v60 }
 0x600   :  { %v11376_v20 = vadd.f32 1.0, %v9652_v40  ;;  %v8272_v40 = vld [vmem:[#allocation10 + $0x148] sm:$0xf]  ;;  %v8241_v60 = vor.u32 %v9223_v29, %v8240_v0 }
 0x601   :  { %9655 = vrcp.f32 %v11374_v12  ;;  %v3235_v30 = vand.u32 2147483648, %v11374_v12  ;;  %v3233_v45 = vand.u32 2147483647, %v11374_v12  ;;  %vm3229_vm9 = vweird.f32 %v11374_v12  ;;  %4264 = vmatpush.bf16.msra.mxu3 %v8557_v42  ;;  %4293 = vmatpush.bf16.msrb.mxu0 %v8305_v18  ;;  %v9211_v42 = vld [vmem:[#allocation10 + $0xcc] sm:$0xf] }
 0x602   :  { %9657 = vrcp.f32 %v11376_v20  ;;  %v3131_v52 = vpop.f32.mrf.mxu2  ;;  %v3144_v16 = vpop.f32.mrf.mxu3  ;;  %v3250_v8 = vand.u32 2147483648, %v11376_v20  ;;  %v3248_v15 = vand.u32 2147483647, %v11376_v20  ;;  %vm3244_vm14 = vweird.f32 %v11376_v20 }
 0x603   :  { %v11389_v38 = vor.u32 1.1754944e-38, %v3235_v30  ;;  %vm11397_vm8 = vcmp.eq.f32.partialorder %v3233_v45, 8.507059e+37  ;;  %v8309_v30 = vor.u32 %v9235_v32, %v8306_v3  ;;  %v8525_v45 = vor.u32 %v9290_v5, %v8522_v59  ;;  %v8456_v3 = vld [vmem:[#allocation10 + $0x2c0] sm:$0xf] }
 0x604   :  { %v3251_v24 = vor.u32 1.1754944e-38, %v3250_v8  ;;  %vm11407_vm11 = vcmp.eq.f32.partialorder %v3248_v15, 8.507059e+37  ;;  %v8457_v59 = vor.u32 %v9278_v53, %v8456_v3  ;;  %v8146_v3 = vld [vmem:[#allocation10 + $0x68] sm:$0xf0] }
 0x605   :  { %v9654_v54 = vpop.eup %9653  ;;  %4351 = vmatpush.bf16.msrb.mxu2 %v8309_v30  ;;  %4265 = vmatpush.bf16.msra.mxu3 %v8525_v45 }
 0x606   :  { %v11384_v9 = vadd.f32 1.0, %v9654_v54 }
 0x607   :  { %v11387_v37 = vpop.eup %9655 }
 0x608   :  { %v11392_v2 = vpop.eup %9657  ;;  %v3225_v31 = vmul.f32 %v11387_v37, %v11374_v12  ;;  %9659 = vrcp.f32 %v11384_v9  ;;  %vm3230_vm10 = vweird.f32 %v11387_v37  ;;  %vm3259_vm1 = vweird.f32 %v11384_v9 }
 0x609   :  { %v3240_v17 = vmul.f32 %v11392_v2, %v11376_v20  ;;  %9661 = vtanh.f32 %v3149_v58  ;;  %vm11416_vm12 = vmor %vm3229_vm9, %vm3230_vm10  ;;  %vm3245_vm13 = vweird.f32 %v11392_v2  ;;  %v8273_v58 = vor.u32 %v9231_v11, %v8272_v40  ;;  %4352 = vmatpush.bf16.msrb.mxu2 %v8277_v62 }
 0x60a   :  { %v3165_v56 = vpop.f32.mrf.mxu0  ;;  %v3178_v6 = vpop.f32.mrf.mxu1  ;;  %v3226_v26 = vsub.f32 1.0, %v3225_v31  ;;  %vm11431_vm15 = vmor %vm3244_vm14, %vm3245_vm13  ;;  %v8489_v31 = vor.u32 %v9286_v51, %v8488_v49  ;;  %v3265_v40 = vand.u32 2147483648, %v11384_v9  ;;  %v8176_v49 = vld [vmem:[#allocation10 + $0x88] sm:$0xf] }
 0x60b   :  { %v3208_v41 = vadd.f32 %v3165_v56, %v3152_v46  ;;  %v3209_v10 = vadd.f32 %v3178_v6, %v3153_v4  ;;  %v3241_v13 = vsub.f32 1.0, %v3240_v17  ;;  %v8242_v46 = vld [vmem:[#allocation10 + $0x128] sm:$0xf0]  ;;  %v8493_v4 = vor.u32 %v9282_v63, %v8490_v35  ;;  %4294 = vmatpush.bf16.msrb.mxu0 %v8273_v58  ;;  %v9207_v51 = vld [vmem:[#allocation10 + $0xa4] sm:$0xf0] }
 0x60c   :  { %v3227_v52 = vmul.f32 %v11387_v37, %v3226_v26  ;;  %v8245_v7 = vor.u32 %v9219_v39, %v8242_v46  ;;  %4208 = vmatpush.bf16.msra.mxu1 %v8489_v31  ;;  %v9203_v63 = vld [vmem:[#allocation10 + $0x8c] sm:$0xf]  ;;  %v8177_v29 = vor.u32 %v9207_v51, %v8176_v49  ;;  %v9262_v39 = vld [vmem:[#allocation10 + $0x25c] sm:$0xf0]  ;;  %v9258_v46 = vld [vmem:[#allocation10 + $0x244] sm:$0xf] }
 0x60d   :  { %v8067_v25 = vmul.f32 -1.442695, %v3208_v41  ;;  %v8068_v22 = vmul.f32 -1.442695, %v3209_v10  ;;  %v3242_v27 = vmul.f32 %v11392_v2, %v3241_v13  ;;  %v8458_v41 = vld [vmem:[#allocation10 + $0x2e0] sm:$0xf0]  ;;  %4266 = vmatpush.bf16.msra.mxu3 %v8493_v4 }
 0x60e   :  { %v11422_v12 = vpop.eup %9659  ;;  %v3228_v54 = vadd.f32 %v11387_v37, %v3227_v52  ;;  %v8208_v10 = vld [vmem:[#allocation10 + $0xc8] sm:$0xf]  ;;  %4353 = vmatpush.bf16.msrb.mxu2 %v8245_v7  ;;  %v8178_v35 = vld [vmem:[#allocation10 + $0xa8] sm:$0xf0]  ;;  %v8394_v4 = vld [vmem:[#allocation10 + $0x260] sm:$0xf0] }
 0x60f   :  { %9663 = vpow2.f32 %v8067_v25  ;;  %v9662_v8 = vpop.eup %9661  ;;  %v3255_v15 = vmul.f32 %v11422_v12, %v11384_v9  ;;  %v3243_v23 = vadd.f32 %v11392_v2, %v3242_v27  ;;  %v9215_v13 = vld [vmem:[#allocation10 + $0xe4] sm:$0xf0]  ;;  %4295 = vmatpush.bf16.msrb.mxu0 %v8241_v60  ;;  %vm3260_vm0 = vweird.f32 %v11422_v12  ;;  %v9254_v7 = vld [vmem:[#allocation10 + $0x21c] sm:$0xf0] }
 0x610   :  { %9665 = vpow2.f32 %v8068_v22  ;;  %v3232_v20 = vsel %vm11416_vm12, %v11387_v37, %v3228_v54  ;;  %v8209_v25 = vor.u32 %v9215_v13, %v8208_v10  ;;  %v8424_v22 = vld [vmem:[#allocation10 + $0x280] sm:$0xf]  ;;  %4209 = vmatpush.bf16.msra.mxu1 %v8457_v59  ;;  %v3263_v54 = vand.u32 2147483647, %v11384_v9  ;;  %vm11464_vm2 = vmor %vm3259_vm1, %vm3260_vm0  ;;  %v8144_v60 = vld [vmem:[#allocation10 + $0x48] sm:$0xf] }
 0x611   :  { %v3191_v57 = vpop.f32.mrf.mxu2  ;;  %v11438_v28 = vpop.f32.mrf.mxu3  ;;  %v3256_v14 = vsub.f32 1.0, %v3255_v15  ;;  %v3237_v32 = vsel %vm11397_vm8, %v11389_v38, %v3232_v20  ;;  %v3247_v17 = vsel %vm11431_vm15, %v11392_v2, %v3243_v23  ;;  %v9274_v38 = vld [vmem:[#allocation10 + $0x2c4] sm:$0xf]  ;;  %v3155_v15 = vunpack.c.h.bf16 %v13500_v1 }
 0x612   :  { %v3210_v56 = vadd.f32 %v3191_v57, %v3154_v55  ;;  %v3167_v6 = vpop.f32.mrf.mxu0  ;;  %v3180_v37 = vpop.f32.mrf.mxu1  ;;  %v3252_v19 = vsel %vm11407_vm11, %v3251_v24, %v3247_v17  ;;  %v3271_v26 = vmul.f32 %v9662_v8, %v3237_v32  ;;  %v8461_v48 = vor.u32 %v9274_v38, %v8458_v41  ;;  %v8210_v24 = vld [vmem:[#allocation10 + $0xe8] sm:$0xf0]  ;;  %v8392_v8 = vld [vmem:[#allocation10 + $0x240] sm:$0xf]  ;;  %v9250_v38 = vld [vmem:[#allocation10 + $0x204] sm:$0xf] }
 0x613   :  { %v3257_v2 = vmul.f32 %v11422_v12, %v3256_v14  ;;  %v3270_v5 = vmul.f32 %v3252_v19, %v11318_v21  ;;  %v9270_v21 = vld [vmem:[#allocation10 + $0x29c] sm:$0xf0]  ;;  %v8213_v27 = vor.u32 %v9211_v42, %v8210_v24  ;;  %4296 = vmatpush.bf16.msrb.mxu0 %v8209_v25  ;;  %v8429_v23 = vor.u32 %v9266_v44, %v8426_v34  ;;  %v9195_v17 = vld [vmem:[#allocation10 + $0x4c] sm:$0xf]  ;;  %v8592_v44 = vld [vmem:[#allocation10 + $0x3c8] sm:$0xf] }
 0x614   :  { %v8069_v55 = vmul.f32 -1.442695, %v3210_v56  ;;  %v8425_v45 = vor.u32 %v9270_v21, %v8424_v22  ;;  %4267 = vmatpush.bf16.msra.mxu3 %v8461_v48  ;;  %v3266_v20 = vor.u32 1.1754944e-38, %v3265_v40  ;;  %v8181_v57 = vor.u32 %v9203_v63, %v8178_v35  ;;  %v9187_v42 = vld [vmem:[#allocation10 + $0xc] sm:$0xf] }
 0x615   :  { %v9664_v18 = vpop.eup %9663  ;;  %v3272_v52 = vadd.f32 %v3271_v26, %v3270_v5  ;;  %v3258_v30 = vadd.f32 %v11422_v12, %v3257_v2  ;;  %4354 = vmatpush.bf16.msrb.mxu2 %v8213_v27  ;;  %v8393_v31 = vor.u32 %v9262_v39, %v8392_v8  ;;  %vm3264_vm3 = vcmp.eq.f32.partialorder %v3263_v54, 8.507059e+37  ;;  %v8360_v26 = vld [vmem:[#allocation10 + $0x200] sm:$0xf]  ;;  %v8362_v2 = vld [vmem:[#allocation10 + $0x220] sm:$0xf0] }
 0x616   :  { %v9666_v11 = vpop.eup %9665  ;;  %v11453_v16 = vadd.f32 1.0, %v9664_v18  ;;  %9667 = vpow2.f32 %v8069_v55  ;;  %4210 = vmatpush.bf16.msra.mxu1 %v8425_v45  ;;  %v3211_v32 = vadd.f32 %v11438_v28, %v3155_v15  ;;  %v8397_v6 = vor.u32 %v9258_v46, %v8394_v4  ;;  %v8112_v5 = vld [vmem:[#allocation10 + $0x8] sm:$0xf]  ;;  %v8114_v18 = vld [vmem:[#allocation10 + $0x28] sm:$0xf0] }
 0x617   :  { %v11457_v36 = vadd.f32 1.0, %v9666_v11  ;;  %9669 = vtanh.f32 %v3272_v52  ;;  %v3262_v9 = vsel %vm11464_vm2, %v11422_v12, %v3258_v30  ;;  %v9199_v12 = vld [vmem:[#allocation10 + $0x64] sm:$0xf0]  ;;  %4297 = vmatpush.bf16.msrb.mxu0 %v8177_v29  ;;  %v8149_v10 = vor.u32 %v9195_v17, %v8146_v3 }
 0x618   :  { %9671 = vrcp.f32 %v11453_v16  ;;  %v3267_v56 = vsel %vm3264_vm3, %v3266_v20, %v3262_v9  ;;  %4268 = vmatpush.bf16.msra.mxu3 %v8429_v23  ;;  %v8145_v37 = vor.u32 %v9199_v12, %v8144_v60  ;;  %v9191_v55 = vld [vmem:[#allocation10 + $0x24] sm:$0xf0]  ;;  %v3296_v48 = vand.u32 2147483647, %v11453_v16  ;;  %v8594_v12 = vld [vmem:[#allocation10 + $0x3e8] sm:$0xf0] }
 0x619   :  { %v3193_v58 = vpop.f32.mrf.mxu2  ;;  %v3206_v62 = vpop.f32.mrf.mxu3  ;;  %9673 = vrcp.f32 %v11457_v36  ;;  %4355 = vmatpush.bf16.msrb.mxu2 %v8181_v57  ;;  %v8361_v24 = vor.u32 %v9254_v7, %v8360_v26  ;;  %v3298_v52 = vand.u32 2147483648, %v11453_v16  ;;  %v8365_v25 = vor.u32 %v9250_v38, %v8362_v2  ;;  %v9311_v45 = vld [vmem:[#allocation10 + $0x3e4] sm:$0xf0]  ;;  %v9299_v26 = vld [vmem:[#allocation10 + $0x38c] sm:$0xf] }
 0x61a   :  { %4211 = vmatpush.bf16.msra.mxu1 %v8393_v31  ;;  %v8113_v22 = vor.u32 %v9191_v55, %v8112_v5  ;;  %v3313_v21 = vand.u32 2147483648, %v11457_v36  ;;  %v8117_v27 = vor.u32 %v9187_v42, %v8114_v18  ;;  %v3311_v51 = vand.u32 2147483647, %v11457_v36  ;;  %v8560_v20 = vld [vmem:[#allocation10 + $0x388] sm:$0xf] }
 0x61b   :  { %4298 = vmatpush.bf16.msrb.mxu0 %v8145_v37  ;;  %v8593_v54 = vor.u32 %v9311_v45, %v8592_v44  ;;  %vm3292_vm6 = vweird.f32 %v11453_v16  ;;  %vm3307_vm7 = vweird.f32 %v11457_v36  ;;  %v3299_v63 = vor.u32 1.1754944e-38, %v3298_v52  ;;  %v9303_v57 = vld [vmem:[#allocation10 + $0x3a4] sm:$0xf0]  ;;  %v9248_v52 = vld [vmem:[#allocation10 + $0x1ec] sm:$0xf0] }
 0x61c   :  { %v9668_v43 = vpop.eup %9667  ;;  %4269 = vmatpush.bf16.msra.mxu3 %v8397_v6  ;;  %v3314_v8 = vor.u32 1.1754944e-38, %v3313_v21  ;;  %vm3297_vm10 = vcmp.eq.f32.partialorder %v3296_v48, 8.507059e+37  ;;  %vm3312_vm11 = vcmp.eq.f32.partialorder %v3311_v51, 8.507059e+37  ;;  %v8561_v60 = vor.u32 %v9303_v57, %v8560_v20  ;;  %v9287_v2 = vld [vmem:[#allocation10 + $0x324] sm:$0xf0] }
 0x61d   :  { %v11473_v14 = vadd.f32 1.0, %v9668_v43  ;;  %v9670_v1 = vpop.eup %9669  ;;  %4356 = vmatpush.bf16.msrb.mxu2 %v8149_v10  ;;  %v8496_v10 = vld [vmem:[#allocation10 + $0x308] sm:$0xf]  ;;  %v8074_v48 = vld [vmem:[#allocation2 + $0x8] sm:$0xf0] }
 0x61e   :  { %v9672_v53 = vpop.eup %9671  ;;  %v3274_v19 = vmul.f32 %v9670_v1, %v3267_v56  ;;  %4212 = vmatpush.bf16.msra.mxu1 %v8361_v24  ;;  %v8497_v42 = vor.u32 %v9287_v2, %v8496_v10  ;;  %v8346_v21 = vld [vmem:[#allocation10 + $0x1f0] sm:$0xf0]  ;;  %v8312_v45 = vld [vmem:[#allocation10 + $0x190] sm:$0xf]  ;;  %v9275_v20 = vld [vmem:[#allocation10 + $0x2cc] sm:$0xf] }
 0x61f   :  { %9675 = vrcp.f32 %v11473_v14  ;;  %v9674_v41 = vpop.eup %9673  ;;  %v3288_v28 = vmul.f32 %v9672_v53, %v11453_v16  ;;  %vm3293_vm4 = vweird.f32 %v9672_v53  ;;  %4299 = vmatpush.bf16.msrb.mxu0 %v8113_v22  ;;  %v8096_v16 = vld [vmem:[#allocation2 + $0x30] sm:$0xf]  ;;  %v3326_v6 = vand.u32 2147483647, %v11473_v14  ;;  %v9236_v51 = vld [vmem:[#allocation10 + $0x194] sm:$0xf] }
 0x620   :  { %v3338_v59 = vpack.c.bf16 %v3274_v19, %v3274_v19  ;;  %v3303_v13 = vmul.f32 %v9674_v41, %v11457_v36  ;;  %9677 = vtanh.f32 %v3211_v32  ;;  %vm3308_vm5 = vweird.f32 %v9674_v41  ;;  %4270 = vmatpush.bf16.msra.mxu3 %v8365_v25  ;;  %vm3294_vm8 = vmor %vm3292_vm6, %vm3293_vm4  ;;  %v9307_v32 = vld [vmem:[#allocation10 + $0x3cc] sm:$0xf]  ;;  %v9295_v19 = vld [vmem:[#allocation10 + $0x364] sm:$0xf0] }
 0x621   :  { %v3289_v40 = vsub.f32 1.0, %v3288_v28  ;;  %4357 = vmatpush.bf16.msrb.mxu2 %v8117_v27  ;;  %vm3309_vm9 = vmor %vm3307_vm7, %vm3308_vm5  ;;  %v8597_v17 = vor.u32 %v9307_v32, %v8594_v12  ;;  %v3328_v37 = vand.u32 2147483648, %v11473_v14  ;;  %vm3322_vm13 = vweird.f32 %v11473_v14  ;;  %v8562_v28 = vld [vmem:[#allocation10 + $0x3a8] sm:$0xf0]  ;;  %v9244_v25 = vld [vmem:[#allocation10 + $0x1d4] sm:$0xf] }
 0x622   :  { %3339 = vst [vmem:[#allocation2 + $0x38] sm:$0xf] %v3338_v59  ;;  %v3304_v11 = vsub.f32 1.0, %v3303_v13  ;;  %4321 = vmatpush.bf16.msrb.mxu1 %v8593_v54  ;;  %vm3327_vm15 = vcmp.eq.f32.partialorder %v3326_v6, 8.507059e+37  ;;  %v8565_v55 = vor.u32 %v9299_v26, %v8562_v28  ;;  %v9291_v59 = vld [vmem:[#allocation10 + $0x34c] sm:$0xf]  ;;  %v8349_v44 = vor.u32 %v9244_v25, %v8346_v21 }
 0x623   :  { %v3290_v30 = vmul.f32 %v9672_v53, %v3289_v40  ;;  %v3329_v3 = vor.u32 1.1754944e-38, %v3328_v37  ;;  %v8530_v13 = vld [vmem:[#allocation10 + $0x368] sm:$0xf0]  ;;  %v9279_v27 = vld [vmem:[#allocation10 + $0x2e4] sm:$0xf0] }
 0x624   :  { %v3305_v49 = vmul.f32 %v9674_v41, %v3304_v11  ;;  %4379 = vmatpush.bf16.msrb.mxu3 %v8597_v17  ;;  %v8533_v18 = vor.u32 %v9291_v59, %v8530_v13  ;;  %v8344_v11 = vld [vmem:[#allocation10 + $0x1d0] sm:$0xf]  ;;  %v8314_v54 = vld [vmem:[#allocation10 + $0x1b0] sm:$0xf0]  ;;  %v8466_v57 = vld [vmem:[#allocation10 + $0x2e8] sm:$0xf0] }
 0x625   :  { %v9676_v34 = vpop.eup %9675  ;;  %v3291_v62 = vadd.f32 %v9672_v53, %v3290_v30  ;;  %v8345_v22 = vor.u32 %v9248_v52, %v8344_v11  ;;  %v8464_v30 = vld [vmem:[#allocation10 + $0x2c8] sm:$0xf]  ;;  %4466 = vmatpush.bf16.msra.mxu2 %v8349_v44  ;;  %v8250_v32 = vld [vmem:[#allocation10 + $0x130] sm:$0xf0]  ;;  %v8469_v12 = vor.u32 %v9275_v20, %v8466_v57  ;;  %v8082_v6 = vld [vmem:[#allocation2 + $0x18] sm:$0xf0] }
 0x626   :  { %v3318_v58 = vmul.f32 %v9676_v34, %v11473_v14  ;;  %v3306_v35 = vadd.f32 %v9674_v41, %v3305_v49  ;;  %v9678_v0 = vpop.eup %9677  ;;  %vm3323_vm12 = vweird.f32 %v9676_v34  ;;  %4322 = vmatpush.bf16.msrb.mxu1 %v8561_v60  ;;  %v9240_v49 = vld [vmem:[#allocation10 + $0x1ac] sm:$0xf0]  ;;  %v9220_v60 = vld [vmem:[#allocation10 + $0x114] sm:$0xf]  ;;  %v9267_v28 = vld [vmem:[#allocation10 + $0x28c] sm:$0xf] }
 0x627   :  { %v3295_v15 = vsel %vm3294_vm8, %v9672_v53, %v3291_v62  ;;  %vm3324_vm14 = vmor %vm3322_vm13, %vm3323_vm12  ;;  %v8528_v53 = vld [vmem:[#allocation10 + $0x348] sm:$0xf]  ;;  %4408 = vmatpush.bf16.msra.mxu0 %v8345_v22  ;;  %v8317_v62 = vor.u32 %v9236_v51, %v8314_v54  ;;  %v8218_v26 = vld [vmem:[#allocation10 + $0xf0] sm:$0xf0] }
 0x628   :  { %v3319_v9 = vsub.f32 1.0, %v3318_v58  ;;  %v3300_v23 = vsel %vm3297_vm10, %v3299_v63, %v3295_v15  ;;  %v3310_v29 = vsel %vm3309_vm9, %v9674_v41, %v3306_v35  ;;  %v8529_v41 = vor.u32 %v9295_v19, %v8528_v53  ;;  %4380 = vmatpush.bf16.msrb.mxu3 %v8565_v55  ;;  %v9283_v63 = vld [vmem:[#allocation10 + $0x30c] sm:$0xf]  ;;  %v8280_v15 = vld [vmem:[#allocation10 + $0x150] sm:$0xf] }
 0x629   :  { %v3315_v46 = vsel %vm3312_vm11, %v3314_v8, %v3310_v29  ;;  %v3334_v36 = vmul.f32 %v9678_v0, %v3300_v23  ;;  %v9185_v43 = vld [vmem:[#allocation2 + $0x34] sm:$0xf0]  ;;  %v8313_v58 = vor.u32 %v9240_v49, %v8312_v45  ;;  %v8498_v35 = vld [vmem:[#allocation10 + $0x328] sm:$0xf0]  ;;  %v8432_v0 = vld [vmem:[#allocation10 + $0x288] sm:$0xf]  ;;  %4467 = vmatpush.bf16.msra.mxu2 %v8317_v62 }
 0x62a   :  { %v3320_v39 = vmul.f32 %v9676_v34, %v3319_v9  ;;  %v3333_v31 = vmul.f32 %v3315_v46, %v11350_v47  ;;  %v11489_v4 = vor.u32 %v9185_v43, %v8096_v16  ;;  %4323 = vmatpush.bf16.msrb.mxu1 %v8529_v41  ;;  %v8501_v8 = vor.u32 %v9283_v63, %v8498_v35  ;;  %v9271_v9 = vld [vmem:[#allocation10 + $0x2a4] sm:$0xf0]  ;;  %v9232_v23 = vld [vmem:[#allocation10 + $0x16c] sm:$0xf0]  ;;  %v9228_v16 = vld [vmem:[#allocation10 + $0x154] sm:$0xf] }
 0x62b   :  { %v8433_v29 = vor.u32 %v9271_v9, %v8432_v0  ;;  %4409 = vmatpush.bf16.msra.mxu0 %v8313_v58  ;;  %v8281_v46 = vor.u32 %v9232_v23, %v8280_v15  ;;  %v8248_v43 = vld [vmem:[#allocation10 + $0x110] sm:$0xf]  ;;  %v9212_v53 = vld [vmem:[#allocation10 + $0xd4] sm:$0xf]  ;;  %v8434_v2 = vld [vmem:[#allocation10 + $0x2a8] sm:$0xf0] }
 0x62c   :  { %v3335_v1 = vadd.f32 %v3334_v36, %v3333_v31  ;;  %4199 = vmatmul.bf16.gmra.mxu0 %v11489_v4  ;;  %4257 = vmatmul.bf16.gmra.mxu2 %v11489_v4  ;;  %v3321_v56 = vadd.f32 %v9676_v34, %v3320_v39  ;;  %v8282_v39 = vld [vmem:[#allocation10 + $0x170] sm:$0xf0]  ;;  %v9224_v31 = vld [vmem:[#allocation10 + $0x12c] sm:$0xf0]  ;;  %v8221_v41 = vor.u32 %v9212_v53, %v8218_v26  ;;  %v9259_v11 = vld [vmem:[#allocation10 + $0x24c] sm:$0xf]  ;;  %v11522_v26 = vpop.f32.mrf.mxu2 }
 0x62d   :  { %4381 = vmatpush.bf16.msrb.mxu3 %v8533_v18  ;;  %v8285_v36 = vor.u32 %v9228_v16, %v8282_v39  ;;  %v8249_v17 = vor.u32 %v9224_v31, %v8248_v43  ;;  %v9208_v55 = vld [vmem:[#allocation10 + $0xac] sm:$0xf0]  ;;  %v8437_v59 = vor.u32 %v9267_v28, %v8434_v2  ;;  %v8368_v18 = vld [vmem:[#allocation10 + $0x208] sm:$0xf]  ;;  %v8402_v52 = vld [vmem:[#allocation10 + $0x268] sm:$0xf0] }
 0x62e   :  { %9679 = vtanh.f32 %v3335_v1  ;;  %v3325_v47 = vsel %vm3324_vm14, %v9676_v34, %v3321_v56  ;;  %4324 = vmatpush.bf16.msrb.mxu1 %v8497_v42  ;;  %v8465_v34 = vor.u32 %v9279_v27, %v8464_v30  ;;  %v8253_v1 = vor.u32 %v9220_v60, %v8250_v32  ;;  %v9180_v56 = vld [vmem:[#allocation2 + $0x14] sm:$0xf]  ;;  %v8152_v21 = vld [vmem:[#allocation10 + $0x50] sm:$0xf]  ;;  %v9251_v45 = vld [vmem:[#allocation10 + $0x20c] sm:$0xf]  ;;  %v11516_v32 = vpop.f32.mrf.mxu0 }
 0x62f   :  { %v3330_v38 = vsel %vm3327_vm15, %v3329_v3, %v3325_v47  ;;  %4410 = vmatpush.bf16.msra.mxu0 %v8281_v46  ;;  %4468 = vmatpush.bf16.msra.mxu2 %v8285_v36  ;;  %v11504_v37 = vor.u32 %v9180_v56, %v8082_v6  ;;  %v8216_v47 = vld [vmem:[#allocation10 + $0xd0] sm:$0xf]  ;;  %v9204_v42 = vld [vmem:[#allocation10 + $0x94] sm:$0xf]  ;;  %v8405_v22 = vor.u32 %v9259_v11, %v8402_v52  ;;  %v9182_v9 = vld [vmem:[#allocation2 + $0x24] sm:$0xf] }
 0x630   :  { %v9216_v3 = vld [vmem:[#allocation10 + $0xec] sm:$0xf0]  ;;  %v9196_v27 = vld [vmem:[#allocation10 + $0x54] sm:$0xf]  ;;  %v8090_v15 = vld [vmem:[#allocation2 + $0x28] sm:$0xf0] }
 0x631   :  { %4382 = vmatpush.bf16.msrb.mxu3 %v8501_v8  ;;  %v8217_v19 = vor.u32 %v9216_v3, %v8216_v47  ;;  %v9200_v30 = vld [vmem:[#allocation10 + $0x6c] sm:$0xf0]  ;;  %v8154_v44 = vld [vmem:[#allocation10 + $0x70] sm:$0xf0]  ;;  %v11510_v23 = vor.u32 %v9182_v9, %v8090_v15  ;;  %v8320_v52 = vld [vmem:[#allocation10 + $0x198] sm:$0xf] }
 0x632   :  { %4325 = vmatpush.bf16.msrb.mxu1 %v8465_v34  ;;  %v8370_v34 = vld [vmem:[#allocation10 + $0x228] sm:$0xf0]  ;;  %v8153_v49 = vor.u32 %v9200_v30, %v8152_v21  ;;  %v8157_v51 = vor.u32 %v9196_v27, %v8154_v44  ;;  %v8120_v54 = vld [vmem:[#allocation10 + $0x10] sm:$0xf]  ;;  %v9188_v62 = vld [vmem:[#allocation10 + $0x14] sm:$0xf] }
 0x633   :  { %4411 = vmatpush.bf16.msra.mxu0 %v8249_v17  ;;  %4469 = vmatpush.bf16.msra.mxu2 %v8253_v1  ;;  %v9192_v58 = vld [vmem:[#allocation10 + $0x2c] sm:$0xf0]  ;;  %v8122_v63 = vld [vmem:[#allocation10 + $0x30] sm:$0xf0]  ;;  %v8373_v35 = vor.u32 %v9251_v45, %v8370_v34  ;;  %v9237_v21 = vld [vmem:[#allocation10 + $0x19c] sm:$0xf] }
 0x634   :  { %v9680_v7 = vpop.eup %9679  ;;  %v8121_v0 = vor.u32 %v9192_v58, %v8120_v54  ;;  %v8125_v8 = vor.u32 %v9188_v62, %v8122_v63  ;;  %v9312_v16 = vld [vmem:[#allocation10 + $0x3ec] sm:$0xf0]  ;;  %v9308_v43 = vld [vmem:[#allocation10 + $0x3d4] sm:$0xf]  ;;  %v8322_v30 = vld [vmem:[#allocation10 + $0x1b8] sm:$0xf0] }
 0x635   :  { %v3337_v5 = vmul.f32 %v9680_v7, %v3330_v38  ;;  %4383 = vmatpush.bf16.msrb.mxu3 %v8469_v12  ;;  %v8400_v7 = vld [vmem:[#allocation10 + $0x248] sm:$0xf]  ;;  %v8568_v39 = vld [vmem:[#allocation10 + $0x390] sm:$0xf]  ;;  %v8602_v20 = vld [vmem:[#allocation10 + $0x3f0] sm:$0xf0]  ;;  %v8325_v44 = vor.u32 %v9237_v21, %v8322_v30 }
 0x636   :  { %4326 = vmatpush.bf16.msrb.mxu1 %v8433_v29  ;;  %v9263_v38 = vld [vmem:[#allocation10 + $0x264] sm:$0xf0]  ;;  %v8600_v29 = vld [vmem:[#allocation10 + $0x3d0] sm:$0xf]  ;;  %v8605_v57 = vor.u32 %v9308_v43, %v8602_v20  ;;  %v9184_v60 = vld [vmem:[#allocation2 + $0x34] sm:$0xf]  ;;  %v11524_v2 = vpop.f32.mrf.mxu0 }
 0x637   :  { %v3340_v14 = vpack.c.bf16 %v3337_v5, %v3337_v5  ;;  %v8401_v10 = vor.u32 %v9263_v38, %v8400_v7  ;;  %v8184_v5 = vld [vmem:[#allocation10 + $0x90] sm:$0xf]  ;;  %4412 = vmatpush.bf16.msra.mxu0 %v8217_v19  ;;  %4470 = vmatpush.bf16.msra.mxu2 %v8221_v41  ;;  %v8601_v46 = vor.u32 %v9312_v16, %v8600_v29  ;;  %v8098_v12 = vld [vmem:[#allocation2 + $0x38] sm:$0xf0]  ;;  %v9300_v6 = vld [vmem:[#allocation10 + $0x394] sm:$0xf] }
 0x638   :  { %v8185_v13 = vor.u32 %v9208_v55, %v8184_v5  ;;  %v9304_v36 = vld [vmem:[#allocation10 + $0x3ac] sm:$0xf0]  ;;  %v11518_v17 = vor.u32 %v9184_v60, %v8098_v12  ;;  %v8570_v3 = vld [vmem:[#allocation10 + $0x3b0] sm:$0xf0]  ;;  %v11528_v5 = vpop.f32.mrf.mxu2  ;;  %v8352_v55 = vld [vmem:[#allocation10 + $0x1d8] sm:$0xf] }
 0x639   :  { %3341 = vst [vmem:[#allocation2 + $0x4] sm:$0xf] %v3340_v14  ;;  %v8186_v14 = vld [vmem:[#allocation10 + $0xb0] sm:$0xf0]  ;;  %4384 = vmatpush.bf16.msrb.mxu3 %v8437_v59  ;;  %v8569_v31 = vor.u32 %v9304_v36, %v8568_v39  ;;  %v8536_v1 = vld [vmem:[#allocation10 + $0x350] sm:$0xf]  ;;  %v8573_v7 = vor.u32 %v9300_v6, %v8570_v3 }
 0x63a   :  { %4327 = vmatpush.bf16.msrb.mxu1 %v8401_v10  ;;  %v9296_v56 = vld [vmem:[#allocation10 + $0x36c] sm:$0xf0]  ;;  %v9292_v38 = vld [vmem:[#allocation10 + $0x354] sm:$0xf]  ;;  %v9249_v59 = vld [vmem:[#allocation10 + $0x1f4] sm:$0xf0] }
 0x63b   :  { %4413 = vmatpush.bf16.msra.mxu0 %v8185_v13  ;;  %v8537_v47 = vor.u32 %v9296_v56, %v8536_v1  ;;  %v8504_v53 = vld [vmem:[#allocation10 + $0x310] sm:$0xf]  ;;  %v8538_v41 = vld [vmem:[#allocation10 + $0x370] sm:$0xf0]  ;;  %v9245_v13 = vld [vmem:[#allocation10 + $0x1dc] sm:$0xf] }
 0x63c   :  { %4300 = vmatmul.bf16.vlgmr.msrb.gmra.mxu0 %v11359_v33  ;;  %4358 = vmatmul.bf16.vlgmr.msrb.gmra.mxu2 %v11359_v33  ;;  %v9288_v19 = vld [vmem:[#allocation10 + $0x32c] sm:$0xf0]  ;;  %v8541_v10 = vor.u32 %v9292_v38, %v8538_v41  ;;  %v9284_v45 = vld [vmem:[#allocation10 + $0x314] sm:$0xf]  ;;  %v8288_v58 = vld [vmem:[#allocation10 + $0x158] sm:$0xf] }
 0x63d   :  { %4385 = vmatpush.bf16.msrb.mxu3 %v8405_v22  ;;  %v8505_v28 = vor.u32 %v9288_v19, %v8504_v53  ;;  %v9241_v22 = vld [vmem:[#allocation10 + $0x1b4] sm:$0xf0]  ;;  %v8506_v34 = vld [vmem:[#allocation10 + $0x330] sm:$0xf0]  ;;  %v9272_v54 = vld [vmem:[#allocation10 + $0x2ac] sm:$0xf0] }
 0x63e   :  { %v8321_v27 = vor.u32 %v9241_v22, %v8320_v52  ;;  %v9233_v62 = vld [vmem:[#allocation10 + $0x174] sm:$0xf0]  ;;  %v9221_v39 = vld [vmem:[#allocation10 + $0x11c] sm:$0xf]  ;;  %v9276_v36 = vld [vmem:[#allocation10 + $0x2d4] sm:$0xf] }
 0x63f   :  { %4414 = vmatpush.bf16.msra.mxu0 %v8153_v49  ;;  %v8440_v49 = vld [vmem:[#allocation10 + $0x290] sm:$0xf]  ;;  %v8289_v9 = vor.u32 %v9233_v62, %v8288_v58  ;;  %v8256_v29 = vld [vmem:[#allocation10 + $0x118] sm:$0xf]  ;;  %v8474_v43 = vld [vmem:[#allocation10 + $0x2f0] sm:$0xf0] }
 0x640   :  { %v9178_v40 = vld [vmem:[#allocation2 + $0x4] sm:$0xf]  ;;  %v8441_v63 = vor.u32 %v9272_v54, %v8440_v49  ;;  %v9225_v16 = vld [vmem:[#allocation10 + $0x134] sm:$0xf0]  ;;  %v8477_v20 = vor.u32 %v9276_v36, %v8474_v43  ;;  %v9213_v56 = vld [vmem:[#allocation10 + $0xdc] sm:$0xf] }
 0x641   :  { %v11498_v24 = vor.u32 %v9178_v40, %v8074_v48  ;;  %v8189_v40 = vor.u32 %v9204_v42, %v8186_v14  ;;  %v9255_v48 = vld [vmem:[#allocation10 + $0x224] sm:$0xf0]  ;;  %4386 = vmatpush.bf16.msrb.mxu3 %v8373_v35  ;;  %v8353_v42 = vor.u32 %v9249_v59, %v8352_v55  ;;  %v8354_v14 = vld [vmem:[#allocation10 + $0x1f8] sm:$0xf0]  ;;  %v8224_v12 = vld [vmem:[#allocation10 + $0xd8] sm:$0xf] }
 0x642   :  { %v8369_v25 = vor.u32 %v9255_v48, %v8368_v18  ;;  %v11530_v18 = vpop.f32.mrf.mxu0  ;;  %v9280_v48 = vld [vmem:[#allocation10 + $0x2ec] sm:$0xf0]  ;;  %v8357_v11 = vor.u32 %v9245_v13, %v8354_v14  ;;  %v9229_v35 = vld [vmem:[#allocation10 + $0x15c] sm:$0xf]  ;;  %v9217_v1 = vld [vmem:[#allocation10 + $0xf4] sm:$0xf0] }
 0x643   :  { %4213 = vmatmul.bf16.vlgmr.msra.gmra.mxu1 %v11498_v24  ;;  %4271 = vmatmul.bf16.vlgmr.msra.gmra.mxu3 %v11498_v24  ;;  %v8225_v6 = vor.u32 %v9217_v1, %v8224_v12  ;;  %v8408_v53 = vld [vmem:[#allocation10 + $0x250] sm:$0xf]  ;;  %v9268_v38 = vld [vmem:[#allocation10 + $0x294] sm:$0xf]  ;;  %v9209_v55 = vld [vmem:[#allocation10 + $0xb4] sm:$0xf0] }
 0x644   :  { %4471 = vmatpush.bf16.msra.mxu2 %v8189_v40  ;;  %4328 = vmatpush.bf16.msrb.mxu1 %v8369_v25  ;;  %v8472_v40 = vld [vmem:[#allocation10 + $0x2d0] sm:$0xf]  ;;  %v8194_v14 = vld [vmem:[#allocation10 + $0xb8] sm:$0xf0]  ;;  %v9260_v52 = vld [vmem:[#allocation10 + $0x254] sm:$0xf] }
 0x645   :  { %4415 = vmatpush.bf16.msra.mxu0 %v8121_v0  ;;  %4495 = vmatpush.bf16.msra.mxu3 %v8605_v57  ;;  %v8473_v25 = vor.u32 %v9280_v48, %v8472_v40  ;;  %v8290_v0 = vld [vmem:[#allocation10 + $0x178] sm:$0xf0]  ;;  %v9264_v19 = vld [vmem:[#allocation10 + $0x26c] sm:$0xf0]  ;;  %v9252_v58 = vld [vmem:[#allocation10 + $0x214] sm:$0xf] }
 0x646   :  { %v8293_v15 = vor.u32 %v9229_v35, %v8290_v0  ;;  %v8409_v41 = vor.u32 %v9264_v19, %v8408_v53  ;;  %v8376_v40 = vld [vmem:[#allocation10 + $0x210] sm:$0xf]  ;;  %v8378_v62 = vld [vmem:[#allocation10 + $0x230] sm:$0xf0]  ;;  %v9193_v0 = vld [vmem:[#allocation10 + $0x34] sm:$0xf0] }
 0x647   :  { %v8381_v35 = vor.u32 %v9252_v58, %v8378_v62  ;;  %v9313_v36 = vld [vmem:[#allocation10 + $0x3f4] sm:$0xf0]  ;;  %v8610_v53 = vld [vmem:[#allocation10 + $0x3f8] sm:$0xf0] }
 0x648   :  { %4472 = vmatpush.bf16.msra.mxu2 %v8157_v51  ;;  %4437 = vmatpush.bf16.msra.mxu1 %v8601_v46  ;;  %v8509_v51 = vor.u32 %v9284_v45, %v8506_v34  ;;  %v8258_v46 = vld [vmem:[#allocation10 + $0x138] sm:$0xf0]  ;;  %v9305_v12 = vld [vmem:[#allocation10 + $0x3b4] sm:$0xf0] }
 0x649   :  { %4496 = vmatpush.bf16.msra.mxu3 %v8573_v7  ;;  %4524 = vmatpush.bf16.msrb.mxu0 %v8353_v42  ;;  %v8261_v60 = vor.u32 %v9221_v39, %v8258_v46  ;;  %v9205_v42 = vld [vmem:[#allocation10 + $0x9c] sm:$0xf]  ;;  %v8608_v46 = vld [vmem:[#allocation10 + $0x3d8] sm:$0xf] }
 0x64a   :  { %v11538_v57 = vpop.f32.mrf.mxu0  ;;  %v8197_v48 = vor.u32 %v9205_v42, %v8194_v14  ;;  %v9197_v45 = vld [vmem:[#allocation10 + $0x5c] sm:$0xf]  ;;  %v8609_v43 = vor.u32 %v9313_v36, %v8608_v46  ;;  %v8712_v42 = vld [vmem:[#allocation12 + $0xc0] sm:$0xf]  ;;  %v9340_v14 = vld [vmem:[#allocation12 + $0xcc] sm:$0xf0] }
 0x64b   :  { %v8162_v34 = vld [vmem:[#allocation10 + $0x78] sm:$0xf0] }
 0x64c   :  { %4305 = vmatmul.bf16.gmra.mxu0 %v11363_v61  ;;  %4363 = vmatmul.bf16.gmra.mxu2 %v11363_v61 }
 0x64d   :  { %4473 = vmatpush.bf16.msra.mxu2 %v8125_v8  ;;  %4438 = vmatpush.bf16.msra.mxu1 %v8569_v31  ;;  %v11534_v8 = vpop.f32.mrf.mxu2  ;;  %v8257_v31 = vor.u32 %v9225_v16, %v8256_v29 }
 0x64e   :  { %4497 = vmatpush.bf16.msra.mxu3 %v8541_v10  ;;  %4525 = vmatpush.bf16.msrb.mxu0 %v8321_v27  ;;  %v8192_v10 = vld [vmem:[#allocation10 + $0x98] sm:$0xf] }
 0x64f   :  { %v8193_v13 = vor.u32 %v9209_v55, %v8192_v10  ;;  %v8160_v27 = vld [vmem:[#allocation10 + $0x58] sm:$0xf]  ;;  %v9344_v10 = vld [vmem:[#allocation12 + $0xec] sm:$0xf0] }
 0x651   :  { %4439 = vmatpush.bf16.msra.mxu1 %v8537_v47  ;;  %4582 = vmatpush.bf16.msrb.mxu2 %v8357_v11  ;;  %v8226_v47 = vld [vmem:[#allocation10 + $0xf8] sm:$0xf0]  ;;  %v9256_v11 = vld [vmem:[#allocation10 + $0x22c] sm:$0xf0] }
 0x652   :  { %4498 = vmatpush.bf16.msra.mxu3 %v8509_v51  ;;  %4526 = vmatpush.bf16.msrb.mxu0 %v8289_v9  ;;  %v8229_v7 = vor.u32 %v9213_v56, %v8226_v47  ;;  %v11544_v22 = vpop.f32.mrf.mxu0  ;;  %v8377_v21 = vor.u32 %v9256_v11, %v8376_v40  ;;  %v8165_v51 = vor.u32 %v9197_v45, %v8162_v34  ;;  %v9189_v9 = vld [vmem:[#allocation10 + $0x1c] sm:$0xf]  ;;  %v8696_v45 = vld [vmem:[#allocation12 + $0xa0] sm:$0xf]  ;;  %v9336_v34 = vld [vmem:[#allocation12 + $0xac] sm:$0xf0] }
 0x653   :  { %4218 = vmatmul.bf16.gmra.mxu1 %v11504_v37  ;;  %4276 = vmatmul.bf16.gmra.mxu3 %v11504_v37  ;;  %v9309_v47 = vld [vmem:[#allocation10 + $0x3dc] sm:$0xf] }
 0x654   :  { %v8613_v19 = vor.u32 %v9309_v47, %v8610_v53  ;;  %v8578_v11 = vld [vmem:[#allocation10 + $0x3b8] sm:$0xf0] }
 0x655   :  { %4440 = vmatpush.bf16.msra.mxu1 %v8505_v28  ;;  %4583 = vmatpush.bf16.msrb.mxu2 %v8325_v44  ;;  %v11540_v3 = vpop.f32.mrf.mxu2  ;;  %v8442_v28 = vld [vmem:[#allocation10 + $0x2b0] sm:$0xf0]  ;;  %v9201_v44 = vld [vmem:[#allocation10 + $0x74] sm:$0xf0] }
 0x656   :  { %4499 = vmatpush.bf16.msra.mxu3 %v8477_v20  ;;  %4527 = vmatpush.bf16.msrb.mxu0 %v8257_v31  ;;  %v8445_v59 = vor.u32 %v9268_v38, %v8442_v28  ;;  %v8161_v49 = vor.u32 %v9201_v44, %v8160_v27  ;;  %v9297_v38 = vld [vmem:[#allocation10 + $0x374] sm:$0xf0]  ;;  %v8728_v28 = vld [vmem:[#allocation12 + $0xe0] sm:$0xf] }
 0x657   :  { %v11566_v55 = vor.u32 %v9344_v10, %v8728_v28  ;;  %v8720_v28 = vld [vmem:[#allocation12 + $0xc8] sm:$0xf]  ;;  %v9341_v10 = vld [vmem:[#allocation12 + $0xd4] sm:$0xf0] }
 0x659   :  { %4441 = vmatpush.bf16.msra.mxu1 %v8473_v25  ;;  %4584 = vmatpush.bf16.msrb.mxu2 %v8293_v15  ;;  %v8410_v25 = vld [vmem:[#allocation10 + $0x270] sm:$0xf0]  ;;  %v8130_v15 = vld [vmem:[#allocation10 + $0x38] sm:$0xf0]  ;;  %13509 = vst [vmem:[#allocation59_spill] sm:$0xff] %v11566_v55 }
 0x65a   :  { %4528 = vmatpush.bf16.msrb.mxu0 %v8225_v6  ;;  %4500 = vmatpush.bf16.msra.mxu3 %v8445_v59  ;;  %v8413_v30 = vor.u32 %v9260_v52, %v8410_v25  ;;  %v8133_v16 = vor.u32 %v9189_v9, %v8130_v15  ;;  %v11550_v39 = vpop.f32.mrf.mxu0  ;;  %v8512_v52 = vld [vmem:[#allocation10 + $0x318] sm:$0xf]  ;;  %v11578_v25 = vor.u32 %v9340_v14, %v8712_v42 }
 0x65c   :  { %4310 = vmatmul.bf16.gmra.mxu0 %v11367_v50  ;;  %4368 = vmatmul.bf16.gmra.mxu2 %v11367_v50  ;;  %13510 = vst [vmem:[#allocation20_spill] sm:$0xff] %v11578_v25 }
 0x65d   :  { %4442 = vmatpush.bf16.msra.mxu1 %v8441_v63  ;;  %4585 = vmatpush.bf16.msrb.mxu2 %v8261_v60  ;;  %v11548_v54 = vpop.f32.mrf.mxu2  ;;  %v8128_v63 = vld [vmem:[#allocation10 + $0x18] sm:$0xf] }
 0x65e   :  { %4529 = vmatpush.bf16.msrb.mxu0 %v8193_v13  ;;  %4501 = vmatpush.bf16.msra.mxu3 %v8413_v30  ;;  %v8129_v29 = vor.u32 %v9193_v0, %v8128_v63  ;;  %v8576_v60 = vld [vmem:[#allocation10 + $0x398] sm:$0xf]  ;;  %v11574_v13 = vld [vmem:[%s12924_s8] sm:$0xff]  ;;  %v9332_v0 = vld [vmem:[#allocation12 + $0x8c] sm:$0xf0] }
 0x65f   :  { %v8577_v1 = vor.u32 %v9305_v12, %v8576_v60  ;;  %v9289_v30 = vld [vmem:[#allocation10 + $0x334] sm:$0xf0]  ;;  %v11581_v27 = vperm.slane %v11574_v13, 0  ;;  %v11594_v62 = vperm.slane %v11574_v13, 1  ;;  %v11615_v14 = vperm.slane %v11574_v13, 3 }
 0x660   :  { %v8513_v44 = vor.u32 %v9289_v30, %v8512_v52  ;;  %v9345_v60 = vld [vmem:[#allocation12 + $0xf4] sm:$0xf0] }
 0x661   :  { %4586 = vmatpush.bf16.msrb.mxu2 %v8229_v7  ;;  %4443 = vmatpush.bf16.msra.mxu1 %v8409_v41  ;;  %v8544_v7 = vld [vmem:[#allocation10 + $0x358] sm:$0xf] }
 0x662   :  { %4530 = vmatpush.bf16.msrb.mxu0 %v8161_v49  ;;  %4502 = vmatpush.bf16.msra.mxu3 %v8381_v35  ;;  %v8545_v41 = vor.u32 %v9297_v38, %v8544_v7  ;;  %v11586_v49 = vor.u32 %v9336_v34, %v8696_v45  ;;  %v11597_v35 = vperm.slane %v11574_v13, 2  ;;  %v8480_v12 = vld [vmem:[#allocation10 + $0x2d8] sm:$0xf]  ;;  %v9328_v7 = vld [vmem:[#allocation12 + $0x6c] sm:$0xf0]  ;;  %v4244_v38 = vadd.f32 %v11522_v26, %v11594_v62 }
 0x663   :  { %4223 = vmatmul.bf16.gmra.mxu1 %v11510_v23  ;;  %4281 = vmatmul.bf16.gmra.mxu3 %v11510_v23  ;;  %v8648_v26 = vld [vmem:[#allocation12 + $0x40] sm:$0xf] }
 0x664   :  { %13511 = vst [vmem:[#allocation21_spill] sm:$0xff] %v11586_v49 }
 0x665   :  { %4587 = vmatpush.bf16.msrb.mxu2 %v8197_v48  ;;  %4444 = vmatpush.bf16.msra.mxu1 %v8377_v21  ;;  %v11554_v20 = vpop.f32.mrf.mxu2  ;;  %v9301_v48 = vld [vmem:[#allocation10 + $0x39c] sm:$0xf] }
 0x666   :  { %4531 = vmatpush.bf16.msrb.mxu0 %v8129_v29  ;;  %v8581_v21 = vor.u32 %v9301_v48, %v8578_v11  ;;  %v9293_v29 = vld [vmem:[#allocation10 + $0x35c] sm:$0xf]  ;;  %v11617_v48 = vor.u32 %v9341_v10, %v8720_v28 }
 0x668   :  { %13515 = vst [vmem:[#allocation61_spill] sm:$0xff] %v11617_v48 }
 0x669   :  { %4588 = vmatpush.bf16.msrb.mxu2 %v8165_v51  ;;  %v4186_v51 = vadd.f32 %v11516_v32, %v11581_v27  ;;  %v8736_v32 = vld [vmem:[#allocation12 + $0xe8] sm:$0xf] }
 0x66a   :  { %v11606_v47 = vor.u32 %v9345_v60, %v8736_v32  ;;  %v8704_v32 = vld [vmem:[#allocation12 + $0xa8] sm:$0xf] }
 0x66c   :  { %4315 = vmatmul.bf16.gmra.mxu0 %v11489_v4  ;;  %4373 = vmatmul.bf16.gmra.mxu2 %v11489_v4  ;;  %13513 = vst [vmem:[#allocation23_spill] sm:$0xff] %v11606_v47 }
 0x66d   :  { %4589 = vmatpush.bf16.msrb.mxu2 %v8133_v16  ;;  %v8546_v16 = vld [vmem:[#allocation10 + $0x378] sm:$0xf0] }
 0x673   :  { %4228 = vmatmul.bf16.gmra.mxu1 %v11518_v17  ;;  %4286 = vmatmul.bf16.gmra.mxu3 %v11518_v17 }
 0x67c   :  { %4416 = vmatmul.bf16.vlgmr.msra.gmra.mxu0 %v11359_v33  ;;  %4474 = vmatmul.bf16.vlgmr.msra.gmra.mxu2 %v11359_v33 }
 0x67d   :  { %4934 = vmatpush.bf16.msra.mxu0 %v11566_v55  ;;  %4960 = vmatpush.bf16.msra.mxu2 %v11606_v47 }
 0x681   :  { %4935 = vmatpush.bf16.msra.mxu0 %v11578_v25  ;;  %4961 = vmatpush.bf16.msra.mxu2 %v11617_v48 }
 0x683   :  { %4329 = vmatmul.bf16.vlgmr.msrb.gmra.mxu1 %v11498_v24  ;;  %4387 = vmatmul.bf16.vlgmr.msrb.gmra.mxu3 %v11498_v24 }
 0x684   :  { %4553 = vmatpush.bf16.msrb.mxu1 %v8609_v43  ;;  %4611 = vmatpush.bf16.msrb.mxu3 %v8613_v19  ;;  %v8549_v43 = vor.u32 %v9293_v29, %v8546_v16  ;;  %v8664_v19 = vld [vmem:[#allocation12 + $0x60] sm:$0xf]  ;;  %v9273_v29 = vld [vmem:[#allocation10 + $0x2b4] sm:$0xf0] }
 0x685   :  { %4936 = vmatpush.bf16.msra.mxu0 %v11586_v49 }
 0x688   :  { %4554 = vmatpush.bf16.msrb.mxu1 %v8577_v1  ;;  %4612 = vmatpush.bf16.msrb.mxu3 %v8581_v21  ;;  %v9281_v1 = vld [vmem:[#allocation10 + $0x2f4] sm:$0xf0] }
 0x689   :  { %v8481_v53 = vor.u32 %v9281_v1, %v8480_v12  ;;  %v9320_v1 = vld [vmem:[#allocation12 + $0x2c] sm:$0xf0] }
 0x68c   :  { %4421 = vmatmul.bf16.gmra.mxu0 %v11363_v61  ;;  %4479 = vmatmul.bf16.gmra.mxu2 %v11363_v61 }
 0x68d   :  { %4555 = vmatpush.bf16.msrb.mxu1 %v8545_v41  ;;  %4613 = vmatpush.bf16.msrb.mxu3 %v8549_v43  ;;  %v11612_v41 = vor.u32 %v9328_v7, %v8664_v19  ;;  %v9337_v43 = vld [vmem:[#allocation12 + $0xb4] sm:$0xf0]  ;;  %v4246_v19 = vadd.f32 %v11528_v5, %v11594_v62  ;;  %v8688_v7 = vld [vmem:[#allocation12 + $0x88] sm:$0xf] }
 0x68e   :  { %v11631_v12 = vor.u32 %v9337_v43, %v8704_v32  ;;  %v8672_v32 = vld [vmem:[#allocation12 + $0x68] sm:$0xf] }
 0x68f   :  { %13514 = vst [vmem:[#allocation60_spill] sm:$0xff] %v11612_v41 }
 0x690   :  { %13518 = vst [vmem:[#allocation62_spill] sm:$0xff] %v11631_v12  ;;  %4962 = vmatpush.bf16.msra.mxu2 %v11631_v12 }
 0x691   :  { %4556 = vmatpush.bf16.msrb.mxu1 %v8513_v44  ;;  %v9324_v44 = vld [vmem:[#allocation12 + $0x4c] sm:$0xf0] }
 0x692   :  { %v11629_v16 = vor.u32 %v9324_v44, %v8648_v26  ;;  %v8616_v44 = vld [vmem:[#allocation12] sm:$0xf] }
 0x693   :  { %4334 = vmatmul.bf16.gmra.mxu1 %v11504_v37  ;;  %4392 = vmatmul.bf16.gmra.mxu3 %v11504_v37 }
 0x694   :  { %13517 = vst [vmem:[#allocation87_spill] sm:$0xff] %v11629_v16 }
 0x695   :  { %4557 = vmatpush.bf16.msrb.mxu1 %v8481_v53  ;;  %v4188_v53 = vadd.f32 %v11524_v2, %v11581_v27 }
 0x69c   :  { %4426 = vmatmul.bf16.gmra.mxu0 %v11367_v50  ;;  %4484 = vmatmul.bf16.gmra.mxu2 %v11367_v50 }
 0x6a3   :  { %4339 = vmatmul.bf16.gmra.mxu1 %v11510_v23  ;;  %4397 = vmatmul.bf16.gmra.mxu3 %v11510_v23 }
 0x6a9   :  { %v11556_v31 = vpop.f32.mrf.mxu0 }
 0x6ac   :  { %4431 = vmatmul.bf16.gmra.mxu0 %v11489_v4  ;;  %4489 = vmatmul.bf16.gmra.mxu2 %v11489_v4 }
 0x6af   :  { %v11560_v56 = vpop.f32.mrf.mxu2 }
 0x6b1   :  { %v11562_v6 = vpop.f32.mrf.mxu0 }
 0x6b3   :  { %4344 = vmatmul.bf16.gmra.mxu1 %v11518_v17  ;;  %4402 = vmatmul.bf16.gmra.mxu3 %v11518_v17 }
 0x6b7   :  { %v11568_v59 = vpop.f32.mrf.mxu2 }
 0x6b9   :  { %v11576_v40 = vpop.f32.mrf.mxu0 }
 0x6bc   :  { %4532 = vmatmul.bf16.vlgmr.msrb.gmra.mxu0 %v11359_v33  ;;  %4590 = vmatmul.bf16.vlgmr.msrb.gmra.mxu2 %v11359_v33  ;;  %v8680_v33 = vld [vmem:[#allocation12 + $0x80] sm:$0xf] }
 0x6bd   :  { %v11599_v46 = vor.u32 %v9332_v0, %v8680_v33  ;;  %v8448_v33 = vld [vmem:[#allocation10 + $0x298] sm:$0xf] }
 0x6be   :  { %v8449_v60 = vor.u32 %v9273_v29, %v8448_v33  ;;  %v8482_v29 = vld [vmem:[#allocation10 + $0x2f8] sm:$0xf0] }
 0x6bf   :  { %v11590_v58 = vpop.f32.mrf.mxu2  ;;  %13512 = vst [vmem:[#allocation22_spill] sm:$0xff] %v11599_v46  ;;  %4937 = vmatpush.bf16.msra.mxu0 %v11599_v46 }
 0x6c0   :  { %v4214_v63 = vpop.f32.mrf.mxu1  ;;  %4558 = vmatpush.bf16.msrb.mxu1 %v8449_v60  ;;  %v9329_v60 = vld [vmem:[#allocation12 + $0x74] sm:$0xf0] }
 0x6c1   :  { %v4215_v9 = vadd.f32 %v4214_v63, %v4186_v51  ;;  %v4303_v15 = vpop.f32.mrf.mxu0  ;;  %v9285_v51 = vld [vmem:[#allocation10 + $0x31c] sm:$0xf] }
 0x6c2   :  { %v11602_v36 = vadd.f32 %v4303_v15, %v11597_v35  ;;  %v8514_v63 = vld [vmem:[#allocation10 + $0x338] sm:$0xf0] }
 0x6c3   :  { %4445 = vmatmul.bf16.vlgmr.msra.gmra.mxu1 %v11498_v24  ;;  %4503 = vmatmul.bf16.vlgmr.msra.gmra.mxu3 %v11498_v24  ;;  %v8517_v15 = vor.u32 %v9285_v51, %v8514_v63 }
 0x6c4   :  { %4938 = vmatpush.bf16.msra.mxu0 %v11612_v41 }
 0x6c5   :  { %4614 = vmatpush.bf16.msrb.mxu3 %v8517_v15  ;;  %v9277_v15 = vld [vmem:[#allocation10 + $0x2dc] sm:$0xf] }
 0x6c6   :  { %v4272_v42 = vpop.f32.mrf.mxu3 }
 0x6c7   :  { %v4273_v11 = vadd.f32 %v4272_v42, %v4244_v38  ;;  %v4361_v52 = vpop.f32.mrf.mxu2  ;;  %v9333_v38 = vld [vmem:[#allocation12 + $0x94] sm:$0xf0]  ;;  %v4191_v42 = vadd.f32 %v11530_v18, %v11581_v27  ;;  %v8485_v18 = vor.u32 %v9277_v15, %v8482_v29  ;;  %v9372_v15 = vld [vmem:[#allocation13 + $0xcc] sm:$0xf0] }
 0x6c8   :  { %v4216_v21 = vpop.f32.mrf.mxu1  ;;  %v11620_v30 = vadd.f32 %v4361_v52, %v11615_v14  ;;  %4939 = vmatpush.bf16.msra.mxu0 %v11629_v16 }
 0x6c9   :  { %v11623_v45 = vpack.c.bf16 %v4273_v11, %v4215_v9  ;;  %v4306_v34 = vpop.f32.mrf.mxu0  ;;  %v8632_v9 = vld [vmem:[#allocation12 + $0x20] sm:$0xf]  ;;  %v4217_v2 = vadd.f32 %v4216_v21, %v4188_v53  ;;  %v8416_v53 = vld [vmem:[#allocation10 + $0x258] sm:$0xf]  ;;  %4615 = vmatpush.bf16.msrb.mxu3 %v8485_v18 }
 0x6ca   :  { %v11627_v0 = vadd.f32 %v4306_v34, %v11597_v35  ;;  %v11641_v10 = vor.u32 %v9320_v1, %v8632_v9  ;;  %v9316_v34 = vld [vmem:[#allocation12 + $0xc] sm:$0xf0]  ;;  %v8856_v9 = vld [vmem:[#allocation13 + $0xe0] sm:$0xf] }
 0x6cb   :  { %13516 = vst [vmem:[#allocation86_spill] sm:$0xff] %v11623_v45  ;;  %v11657_v21 = vor.u32 %v9316_v34, %v8616_v44  ;;  %v9376_v1 = vld [vmem:[#allocation13 + $0xec] sm:$0xf0]  ;;  %v9325_v34 = vld [vmem:[#allocation12 + $0x54] sm:$0xf0] }
 0x6cc   :  { %4537 = vmatmul.bf16.gmra.mxu0 %v11363_v61  ;;  %4595 = vmatmul.bf16.gmra.mxu2 %v11363_v61  ;;  %13519 = vst [vmem:[#allocation63_spill] sm:$0xff] %v11641_v10  ;;  %v11643_v61 = vor.u32 %v9333_v38, %v8688_v7  ;;  %v11661_v7 = vor.u32 %v9329_v60, %v8672_v32 }
 0x6cd   :  { %4940 = vmatpush.bf16.msra.mxu0 %v11641_v10  ;;  %13522 = vst [vmem:[#allocation25_spill] sm:$0xff] %v11657_v21  ;;  %v11663_v38 = vor.u32 %v9376_v1, %v8856_v9 }
 0x6ce   :  { %v4274_v28 = vpop.f32.mrf.mxu3  ;;  %13520 = vst [vmem:[#allocation84_spill] sm:$0xff] %v11643_v61  ;;  %4963 = vmatpush.bf16.msra.mxu2 %v11643_v61 }
 0x6cf   :  { %v4275_v11 = vadd.f32 %v4274_v28, %v4246_v19  ;;  %v4364_v52 = vpop.f32.mrf.mxu2  ;;  %v9265_v19 = vld [vmem:[#allocation10 + $0x274] sm:$0xf0]  ;;  %13523 = vst [vmem:[#allocation64_spill] sm:$0xff] %v11661_v7 }
 0x6d0   :  { %v4219_v5 = vpop.f32.mrf.mxu1  ;;  %v11648_v26 = vadd.f32 %v4364_v52, %v11615_v14  ;;  %13524 = vst [vmem:[#allocation65_spill] sm:$0xff] %v11663_v38  ;;  %v8417_v28 = vor.u32 %v9265_v19, %v8416_v53  ;;  %v8656_v52 = vld [vmem:[#allocation12 + $0x48] sm:$0xf]  ;;  %v8384_v53 = vld [vmem:[#allocation10 + $0x218] sm:$0xf] }
 0x6d1   :  { %v11650_v51 = vpack.c.bf16 %v4275_v11, %v4217_v2  ;;  %v4220_v63 = vadd.f32 %v4219_v5, %v4191_v42  ;;  %v4308_v33 = vpop.f32.mrf.mxu0  ;;  %v4249_v42 = vadd.f32 %v11534_v8, %v11594_v62  ;;  %v9269_v2 = vld [vmem:[#allocation10 + $0x29c] sm:$0xf]  ;;  %4941 = vmatpush.bf16.msra.mxu0 %v11657_v21  ;;  %v11672_v18 = vor.u32 %v9325_v34, %v8656_v52  ;;  %v9257_v19 = vld [vmem:[#allocation10 + $0x234] sm:$0xf0] }
 0x6d2   :  { %v11653_v43 = vadd.f32 %v4308_v33, %v11597_v35  ;;  %v8450_v11 = vld [vmem:[#allocation10 + $0x2b8] sm:$0xf0]  ;;  %4559 = vmatpush.bf16.msrb.mxu1 %v8417_v28  ;;  %v8840_v33 = vld [vmem:[#allocation13 + $0xc0] sm:$0xf]  ;;  %4964 = vmatpush.bf16.msra.mxu2 %v11661_v7 }
 0x6d3   :  { %13521 = vst [vmem:[#allocation85_spill] sm:$0xff] %v11650_v51  ;;  %4450 = vmatmul.bf16.gmra.mxu1 %v11504_v37  ;;  %4508 = vmatmul.bf16.gmra.mxu3 %v11504_v37  ;;  %v8453_v44 = vor.u32 %v9269_v2, %v8450_v11  ;;  %v11674_v8 = vor.u32 %v9372_v15, %v8840_v33  ;;  %v9261_v28 = vld [vmem:[#allocation10 + $0x25c] sm:$0xf]  ;;  %v9321_v51 = vld [vmem:[#allocation12 + $0x34] sm:$0xf0] }
 0x6d4   :  { %13525 = vst [vmem:[#allocation82_spill] sm:$0xff] %v11672_v18  ;;  %v8385_v2 = vor.u32 %v9257_v19, %v8384_v53  ;;  %v8418_v11 = vld [vmem:[#allocation10 + $0x278] sm:$0xf0]  ;;  %v4193_v15 = vadd.f32 %v11538_v57, %v11581_v27 }
 0x6d5   :  { %5156 = vmatpush.bf16.msrb.mxu0 %v11663_v38  ;;  %13526 = vst [vmem:[#allocation83_spill] sm:$0xff] %v11674_v8  ;;  %4616 = vmatpush.bf16.msrb.mxu3 %v8453_v44  ;;  %v8421_v52 = vor.u32 %v9261_v28, %v8418_v11  ;;  %v9368_v44 = vld [vmem:[#allocation13 + $0xac] sm:$0xf0]  ;;  %v8386_v53 = vld [vmem:[#allocation10 + $0x238] sm:$0xf0] }
 0x6d6   :  { %v4277_v5 = vpop.f32.mrf.mxu3  ;;  %4965 = vmatpush.bf16.msra.mxu2 %v11672_v18  ;;  %4560 = vmatpush.bf16.msrb.mxu1 %v8385_v2  ;;  %v9317_v11 = vld [vmem:[#allocation12 + $0x14] sm:$0xf0] }
 0x6d7   :  { %v4278_v29 = vadd.f32 %v4277_v5, %v4249_v42  ;;  %v11668_v32 = vpop.f32.mrf.mxu2  ;;  %v8640_v5 = vld [vmem:[#allocation12 + $0x28] sm:$0xf] }
 0x6d8   :  { %v4221_v60 = vpop.f32.mrf.mxu1  ;;  %v11683_v34 = vor.u32 %v9321_v51, %v8640_v5  ;;  %v8624_v51 = vld [vmem:[#allocation12 + $0x8] sm:$0xf]  ;;  %v8808_v5 = vld [vmem:[#allocation13 + $0x80] sm:$0xf] }
 0x6d9   :  { %v11676_v9 = vpack.c.bf16 %v4278_v29, %v4220_v63  ;;  %v4311_v1 = vpop.f32.mrf.mxu0  ;;  %5157 = vmatpush.bf16.msrb.mxu0 %v11674_v8  ;;  %v8824_v63 = vld [vmem:[#allocation13 + $0xa0] sm:$0xf]  ;;  %v4251_v29 = vadd.f32 %v11540_v3, %v11594_v62  ;;  %4617 = vmatpush.bf16.msrb.mxu3 %v8421_v52  ;;  %v11700_v2 = vor.u32 %v9317_v11, %v8624_v51  ;;  %v9356_v11 = vld [vmem:[#allocation13 + $0x4c] sm:$0xf0] }
 0x6da   :  { %v11679_v42 = vadd.f32 %v4311_v1, %v11597_v35  ;;  %13528 = vst [vmem:[#allocation67_spill] sm:$0xff] %v11683_v34  ;;  %v11687_v33 = vor.u32 %v9368_v44, %v8824_v63  ;;  %v9253_v1 = vld [vmem:[#allocation10 + $0x21c] sm:$0xf]  ;;  %v4222_v63 = vadd.f32 %v4221_v60, %v4193_v15  ;;  %4966 = vmatpush.bf16.msra.mxu2 %v11683_v34  ;;  %v9360_v60 = vld [vmem:[#allocation13 + $0x6c] sm:$0xf0] }
 0x6db   :  { %13527 = vst [vmem:[#allocation66_spill] sm:$0xff] %v11676_v9  ;;  %v8389_v28 = vor.u32 %v9253_v1, %v8386_v53  ;;  %v9364_v9 = vld [vmem:[#allocation13 + $0x8c] sm:$0xf0]  ;;  %v9342_v15 = vld [vmem:[#allocation12 + $0xe4] sm:$0xf]  ;;  %v4254_v51 = vadd.f32 %v11548_v54, %v11594_v62 }
 0x6dc   :  { %4542 = vmatmul.bf16.gmra.mxu0 %v11367_v50  ;;  %4600 = vmatmul.bf16.gmra.mxu2 %v11367_v50  ;;  %13529 = vst [vmem:[#allocation80_spill] sm:$0xff] %v11687_v33  ;;  %v4196_v50 = vadd.f32 %v11544_v22, %v11581_v27  ;;  %v11702_v52 = vor.u32 %v9364_v9, %v8808_v5  ;;  %v8792_v22 = vld [vmem:[#allocation13 + $0x60] sm:$0xf] }
 0x6dd   :  { %5158 = vmatpush.bf16.msrb.mxu0 %v11687_v33  ;;  %13530 = vst [vmem:[#allocation81_spill] sm:$0xff] %v11700_v2  ;;  %4618 = vmatpush.bf16.msrb.mxu3 %v8389_v28  ;;  %v11714_v9 = vor.u32 %v9360_v60, %v8792_v22  ;;  %v8776_v28 = vld [vmem:[#allocation13 + $0x40] sm:$0xf]  ;;  %v9338_v22 = vld [vmem:[#allocation12 + $0xc4] sm:$0xf] }
 0x6de   :  { %v4279_v19 = vpop.f32.mrf.mxu3  ;;  %13531 = vst [vmem:[#allocation27_spill] sm:$0xff] %v11702_v52  ;;  %4967 = vmatpush.bf16.msra.mxu2 %v11700_v2  ;;  %v8714_v60 = vld [vmem:[#allocation12 + $0xd0] sm:$0xf0] }
 0x6df   :  { %v4280_v44 = vadd.f32 %v4279_v19, %v4251_v29  ;;  %v4369_v45 = vpop.f32.mrf.mxu2  ;;  %v8730_v29 = vld [vmem:[#allocation12 + $0xf0] sm:$0xf0]  ;;  %13534 = vst [vmem:[#allocation78_spill] sm:$0xff] %v11714_v9 }
 0x6e0   :  { %v4224_v57 = vpop.f32.mrf.mxu1  ;;  %v11698_v3 = vadd.f32 %v4369_v45, %v11615_v14  ;;  %v11712_v45 = vor.u32 %v9342_v15, %v8730_v29  ;;  %v11724_v15 = vor.u32 %v9356_v11, %v8776_v28  ;;  %v11729_v29 = vor.u32 %v9338_v22, %v8714_v60  ;;  %v8744_v11 = vld [vmem:[#allocation13] sm:$0xf] }
 0x6e1   :  { %v11704_v1 = vpack.c.bf16 %v4280_v44, %v4222_v63  ;;  %v4225_v53 = vadd.f32 %v4224_v57, %v4196_v50  ;;  %v11706_v18 = vpop.f32.mrf.mxu0  ;;  %5159 = vmatpush.bf16.msrb.mxu0 %v11702_v52 }
 0x6e2   :  { %13533 = vst [vmem:[#allocation69_spill] sm:$0xff] %v11712_v45  ;;  %4947 = vmatpush.bf16.msra.mxu1 %v11712_v45  ;;  %v9352_v45 = vld [vmem:[#allocation13 + $0x2c] sm:$0xf0] }
 0x6e3   :  { %13532 = vst [vmem:[#allocation68_spill] sm:$0xff] %v11704_v1  ;;  %4455 = vmatmul.bf16.gmra.mxu1 %v11510_v23  ;;  %4513 = vmatmul.bf16.gmra.mxu3 %v11510_v23  ;;  %v8760_v1 = vld [vmem:[#allocation13 + $0x20] sm:$0xf] }
 0x6e4   :  { %13536 = vst [vmem:[#allocation29_spill] sm:$0xff] %v11724_v15 }
 0x6e5   :  { %5160 = vmatpush.bf16.msrb.mxu0 %v11714_v9  ;;  %13537 = vst [vmem:[#allocation24_spill] sm:$0xff] %v11729_v29 }
 0x6e6   :  { %v4282_v19 = vpop.f32.mrf.mxu3  ;;  %4948 = vmatpush.bf16.msra.mxu1 %v11729_v29  ;;  %v8738_v29 = vld [vmem:[#allocation12 + $0xf8] sm:$0xf0] }
 0x6e7   :  { %v4283_v5 = vadd.f32 %v4282_v19, %v4254_v51  ;;  %v11719_v50 = vpop.f32.mrf.mxu2  ;;  %v4256_v51 = vadd.f32 %v11554_v20, %v11594_v62  ;;  %v11739_v19 = vor.u32 %v9352_v45, %v8760_v1  ;;  %v9343_v45 = vld [vmem:[#allocation12 + $0xec] sm:$0xf] }
 0x6e8   :  { %v4226_v63 = vpop.f32.mrf.mxu1  ;;  %v11753_v7 = vor.u32 %v9343_v45, %v8738_v29  ;;  %v4203_v29 = vadd.f32 %v11562_v6, %v11581_v27  ;;  %v13545_v6 = vmov 0  }
 0x6e9   :  { %v11722_v44 = vpack.c.bf16 %v4283_v5, %v4225_v53  ;;  %v4316_v57 = vpop.f32.mrf.mxu0  ;;  %v4198_v53 = vadd.f32 %v11550_v39, %v11581_v27  ;;  %5161 = vmatpush.bf16.msrb.mxu0 %v11724_v15  ;;  %13538 = vst [vmem:[#allocation26_spill] sm:$0xff] %v11739_v19  ;;  %v9348_v5 = vld [vmem:[#allocation13 + $0xc] sm:$0xf0] }
 0x6ea   :  { %v11727_v54 = vadd.f32 %v4316_v57, %v11597_v35  ;;  %v4201_v57 = vadd.f32 %v11556_v31, %v11581_v27  ;;  %v11751_v1 = vor.u32 %v9348_v5, %v8744_v11  ;;  %13541 = vst [vmem:[#allocation31_spill] sm:$0xff] %v11753_v7  ;;  %v9334_v31 = vld [vmem:[#allocation12 + $0xa4] sm:$0xf]  ;;  %4973 = vmatpush.bf16.msra.mxu3 %v11753_v7  ;;  %v11784_v27 = vperm.slane %v11574_v13, 5 }
 0x6eb   :  { %13535 = vst [vmem:[#allocation79_spill] sm:$0xff] %v11722_v44  ;;  %v4227_v22 = vadd.f32 %v4226_v63, %v4198_v53  ;;  %v8698_v63 = vld [vmem:[#allocation12 + $0xb0] sm:$0xf0] }
 0x6ec   :  { %4547 = vmatmul.bf16.gmra.mxu0 %v11489_v4  ;;  %4605 = vmatmul.bf16.gmra.mxu2 %v11489_v4  ;;  %13540 = vst [vmem:[#allocation30_spill] sm:$0xff] %v11751_v1  ;;  %v11758_v53 = vor.u32 %v9334_v31, %v8698_v63  ;;  %v9330_v63 = vld [vmem:[#allocation12 + $0x84] sm:$0xf] }
 0x6ed   :  { %5162 = vmatpush.bf16.msrb.mxu0 %v11739_v19 }
 0x6ee   :  { %v4284_v28 = vpop.f32.mrf.mxu3  ;;  %13542 = vst [vmem:[#allocation33_spill] sm:$0xff] %v11758_v53  ;;  %4949 = vmatpush.bf16.msra.mxu1 %v11758_v53 }
 0x6ef   :  { %v4285_v4 = vadd.f32 %v4284_v28, %v4256_v51  ;;  %v4374_v60 = vpop.f32.mrf.mxu2  ;;  %v11764_v28 = vperm.slane %v11574_v13, 4 }
 0x6f0   :  { %v4229_v44 = vpop.f32.mrf.mxu1  ;;  %v11744_v39 = vadd.f32 %v4374_v60, %v11615_v14 }
 0x6f1   :  { %v11746_v20 = vpack.c.bf16 %v4285_v4, %v4227_v22  ;;  %v4230_v2 = vadd.f32 %v4229_v44, %v4201_v57  ;;  %v11748_v34 = vpop.f32.mrf.mxu0  ;;  %v4259_v44 = vadd.f32 %v11560_v56, %v11594_v62  ;;  %5163 = vmatpush.bf16.msrb.mxu0 %v11751_v1  ;;  %v9339_v22 = vld [vmem:[#allocation12 + $0xcc] sm:$0xf]  ;;  %v8722_v4 = vld [vmem:[#allocation12 + $0xd8] sm:$0xf0] }
 0x6f2   :  { %v11773_v31 = vor.u32 %v9339_v22, %v8722_v4  ;;  %v8864_v4 = vld [vmem:[#allocation13 + $0xe8] sm:$0xf] }
 0x6f3   :  { %13539 = vst [vmem:[#allocation28_spill] sm:$0xff] %v11746_v20  ;;  %4460 = vmatmul.bf16.gmra.mxu1 %v11518_v17  ;;  %4518 = vmatmul.bf16.gmra.mxu3 %v11518_v17  ;;  %v8682_v20 = vld [vmem:[#allocation12 + $0x90] sm:$0xf0] }
 0x6f4   :  { %v11778_v53 = vor.u32 %v9330_v63, %v8682_v20  ;;  %4974 = vmatpush.bf16.msra.mxu3 %v11773_v31 }
 0x6f6   :  { %v4287_v51 = vpop.f32.mrf.mxu3  ;;  %13544 = vst [vmem:[#allocation34_spill] sm:$0xff] %v11778_v53  ;;  %4950 = vmatpush.bf16.msra.mxu1 %v11778_v53 }
 0x6f7   :  { %v4288_v11 = vadd.f32 %v4287_v51, %v4259_v44  ;;  %v11769_v5 = vpop.f32.mrf.mxu2  ;;  %v8706_v44 = vld [vmem:[#allocation12 + $0xb8] sm:$0xf0]  ;;  %v4261_v51 = vadd.f32 %v11568_v59, %v11594_v62  ;;  %v9331_v62 = vld [vmem:[#allocation12 + $0x8c] sm:$0xf] }
 0x6f8   :  { %v4231_v57 = vpop.f32.mrf.mxu1 }
 0x6f9   :  { %v11771_v60 = vpack.c.bf16 %v4288_v11, %v4230_v2  ;;  %v4232_v56 = vadd.f32 %v4231_v57, %v4203_v29  ;;  %v4417_v45 = vpop.f32.mrf.mxu0  ;;  %v9335_v2 = vld [vmem:[#allocation12 + $0xac] sm:$0xf]  ;;  %v4302_v11 = vadd.f32 %v11576_v40, %v11597_v35 }
 0x6fa   :  { %v11776_v7 = vadd.f32 %v4417_v45, %v11764_v28  ;;  %v11789_v29 = vor.u32 %v9335_v2, %v8706_v44  ;;  %v9377_v45 = vld [vmem:[#allocation13 + $0xf4] sm:$0xf0]  ;;  %v8690_v2 = vld [vmem:[#allocation12 + $0x98] sm:$0xf0] }
 0x6fb   :  { %13543 = vst [vmem:[#allocation32_spill] sm:$0xff] %v11771_v60  ;;  %v11798_v59 = vor.u32 %v9377_v45, %v8864_v4  ;;  %v11804_v40 = vor.u32 %v9331_v62, %v8690_v2  ;;  %v4360_v45 = vadd.f32 %v11590_v58, %v11615_v14 }
 0x6fc   :  { %4942 = vmatmul.bf16.vlgmr.msra.gmra.mxu0 %v13545_v6  ;;  %4968 = vmatmul.bf16.vlgmr.msra.gmra.mxu2 %v13545_v6 }
 0x6fd   :  { %5352 = vmatpush.bf16.msra.mxu0 %v11566_v55  ;;  %4975 = vmatpush.bf16.msra.mxu3 %v11789_v29  ;;  %13546 = vst [vmem:[#allocation35_spill] sm:$0xff] %v11798_v59 }
 0x6fe   :  { %v4289_v20 = vpop.f32.mrf.mxu3  ;;  %13548 = vst [vmem:[#allocation36_spill] sm:$0xff] %v11804_v40  ;;  %5182 = vmatpush.bf16.msrb.mxu2 %v11798_v59 }
 0x6ff   :  { %v4290_v57 = vadd.f32 %v4289_v20, %v4261_v51  ;;  %v4475_v22 = vpop.f32.mrf.mxu2  ;;  %v9326_v51 = vld [vmem:[#allocation12 + $0x64] sm:$0xf]  ;;  %v8666_v20 = vld [vmem:[#allocation12 + $0x70] sm:$0xf0] }
 0x700   :  { %v4330_v63 = vpop.f32.mrf.mxu1  ;;  %v11796_v60 = vadd.f32 %v4475_v22, %v11784_v27  ;;  %v8848_v22 = vld [vmem:[#allocation13 + $0xc8] sm:$0xf]  ;;  %v11810_v4 = vor.u32 %v9326_v51, %v8666_v20 }
 0x701   :  { %v11800_v44 = vpack.c.bf16 %v4290_v57, %v4232_v56  ;;  %v4331_v55 = vadd.f32 %v4330_v63, %v4302_v11  ;;  %v11802_v53 = vpop.f32.mrf.mxu0  ;;  %5353 = vmatpush.bf16.msra.mxu0 %v11578_v25  ;;  %4976 = vmatpush.bf16.msra.mxu3 %v11804_v40  ;;  %v9373_v56 = vld [vmem:[#allocation13 + $0xd4] sm:$0xf0]  ;;  %v9327_v11 = vld [vmem:[#allocation12 + $0x6c] sm:$0xf]  ;;  %v8674_v57 = vld [vmem:[#allocation12 + $0x78] sm:$0xf0] }
 0x702   :  { %13549 = vst [vmem:[#allocation38_spill] sm:$0xff] %v11810_v4  ;;  %v11815_v63 = vor.u32 %v9373_v56, %v8848_v22  ;;  %v11817_v62 = vor.u32 %v9327_v11, %v8674_v57  ;;  %4951 = vmatpush.bf16.msra.mxu1 %v11810_v4  ;;  %v8832_v20 = vld [vmem:[#allocation13 + $0xa8] sm:$0xf]  ;;  %v9322_v22 = vld [vmem:[#allocation12 + $0x44] sm:$0xf] }
 0x703   :  { %13547 = vst [vmem:[#allocation37_spill] sm:$0xff] %v11800_v44  ;;  %4561 = vmatmul.bf16.vlgmr.msrb.gmra.mxu1 %v11498_v24  ;;  %4619 = vmatmul.bf16.vlgmr.msrb.gmra.mxu3 %v11498_v24  ;;  %v9369_v44 = vld [vmem:[#allocation13 + $0xb4] sm:$0xf0]  ;;  %v8650_v56 = vld [vmem:[#allocation12 + $0x50] sm:$0xf0] }
 0x704   :  { %13550 = vst [vmem:[#allocation39_spill] sm:$0xff] %v11815_v63  ;;  %5183 = vmatpush.bf16.msrb.mxu2 %v11815_v63  ;;  %v11825_v58 = vor.u32 %v9369_v44, %v8832_v20  ;;  %v9323_v11 = vld [vmem:[#allocation12 + $0x4c] sm:$0xf]  ;;  %v8816_v44 = vld [vmem:[#allocation13 + $0x88] sm:$0xf] }
 0x705   :  { %13551 = vst [vmem:[#allocation41_spill] sm:$0xff] %v11817_v62  ;;  %5354 = vmatpush.bf16.msra.mxu0 %v11586_v49  ;;  %4977 = vmatpush.bf16.msra.mxu3 %v11817_v62  ;;  %v9319_v20 = vld [vmem:[#allocation12 + $0x2c] sm:$0xf]  ;;  %v9374_v62 = vld [vmem:[#allocation13 + $0xe4] sm:$0xf] }
 0x706   :  { %v4388_v24 = vpop.f32.mrf.mxu3  ;;  %13553 = vst [vmem:[#allocation42_spill] sm:$0xff] %v11825_v58 }
 0x707   :  { %v4389_v2 = vadd.f32 %v4388_v24, %v4360_v45  ;;  %v11821_v51 = vpop.f32.mrf.mxu2  ;;  %v11830_v45 = vor.u32 %v9322_v22, %v8650_v56  ;;  %v8658_v24 = vld [vmem:[#allocation12 + $0x58] sm:$0xf0] }
 0x708   :  { %13552 = vst [vmem:[#allocation40_spill] sm:$0xff] %v11821_v51  ;;  %v4332_v25 = vpop.f32.mrf.mxu1  ;;  %v11836_v51 = vor.u32 %v9323_v11, %v8658_v24  ;;  %5184 = vmatpush.bf16.msrb.mxu2 %v11825_v58 }
 0x709   :  { %v11827_v57 = vpack.c.bf16 %v4389_v2, %v4331_v55  ;;  %v4333_v49 = vadd.f32 %v4332_v25, %v11602_v36  ;;  %v4422_v4 = vpop.f32.mrf.mxu0  ;;  %13555 = vst [vmem:[#allocation45_spill] sm:$0xff] %v11830_v45  ;;  %5355 = vmatpush.bf16.msra.mxu0 %v11599_v46  ;;  %4952 = vmatpush.bf16.msra.mxu1 %v11830_v45  ;;  %v9365_v55 = vld [vmem:[#allocation13 + $0x94] sm:$0xf0]  ;;  %v9318_v36 = vld [vmem:[#allocation12 + $0x24] sm:$0xf] }
 0x70a   :  { %v11834_v40 = vadd.f32 %v4422_v4, %v11764_v28  ;;  %13557 = vst [vmem:[#allocation46_spill] sm:$0xff] %v11836_v51  ;;  %4978 = vmatpush.bf16.msra.mxu3 %v11836_v51  ;;  %v11842_v25 = vor.u32 %v9365_v55, %v8816_v44  ;;  %v8634_v2 = vld [vmem:[#allocation12 + $0x30] sm:$0xf0]  ;;  %v8642_v4 = vld [vmem:[#allocation12 + $0x38] sm:$0xf0] }
 0x70b   :  { %13554 = vst [vmem:[#allocation43_spill] sm:$0xff] %v11827_v57  ;;  %v11844_v22 = vor.u32 %v9318_v36, %v8634_v2  ;;  %v11847_v11 = vor.u32 %v9319_v20, %v8642_v4  ;;  %v8800_v44 = vld [vmem:[#allocation13 + $0x68] sm:$0xf]  ;;  %v9361_v55 = vld [vmem:[#allocation13 + $0x74] sm:$0xf0] }
 0x70c   :  { %13556 = vst [vmem:[#allocation44_spill] sm:$0xff] %v11834_v40  ;;  %5164 = vmatmul.bf16.vlgmr.msrb.gmra.mxu0 %v13545_v6  ;;  %5185 = vmatpush.bf16.msrb.mxu2 %v11842_v25  ;;  %v11856_v36 = vor.u32 %v9361_v55, %v8800_v44  ;;  %v9314_v2 = vld [vmem:[#allocation12 + $0x4] sm:$0xf]  ;;  %v8618_v20 = vld [vmem:[#allocation12 + $0x10] sm:$0xf0] }
 0x70d   :  { %13558 = vst [vmem:[#allocation47_spill] sm:$0xff] %v11842_v25  ;;  %5356 = vmatpush.bf16.msra.mxu0 %v11612_v41  ;;  %4953 = vmatpush.bf16.msra.mxu1 %v11844_v22  ;;  %v9315_v4 = vld [vmem:[#allocation12 + $0xc] sm:$0xf]  ;;  %v8626_v45 = vld [vmem:[#allocation12 + $0x18] sm:$0xf0] }
 0x70e   :  { %13559 = vst [vmem:[#allocation49_spill] sm:$0xff] %v11844_v22  ;;  %v4390_v56 = vpop.f32.mrf.mxu3  ;;  %4979 = vmatpush.bf16.msra.mxu3 %v11847_v11  ;;  %v11863_v22 = vor.u32 %v9314_v2, %v8618_v20  ;;  %v8858_v40 = vld [vmem:[#allocation13 + $0xf0] sm:$0xf0]  ;;  %v9375_v55 = vld [vmem:[#allocation13 + $0xec] sm:$0xf] }
 0x70f   :  { %13560 = vst [vmem:[#allocation48_spill] sm:$0xff] %v11847_v11  ;;  %v4391_v24 = vadd.f32 %v4390_v56, %v11620_v30  ;;  %v4480_v46 = vpop.f32.mrf.mxu2  ;;  %v11868_v44 = vor.u32 %v9374_v62, %v8858_v40  ;;  %v8866_v11 = vld [vmem:[#allocation13 + $0xf8] sm:$0xf0]  ;;  %v9370_v40 = vld [vmem:[#allocation13 + $0xc4] sm:$0xf] }
 0x710   :  { %v4335_v57 = vpop.f32.mrf.mxu1  ;;  %v11853_v51 = vadd.f32 %v4480_v46, %v11784_v27  ;;  %13561 = vst [vmem:[#allocation50_spill] sm:$0xff] %v11856_v36  ;;  %v11866_v46 = vor.u32 %v9315_v4, %v8626_v45  ;;  %5186 = vmatpush.bf16.msrb.mxu2 %v11856_v36  ;;  %v8842_v62 = vld [vmem:[#allocation13 + $0xd0] sm:$0xf0]  ;;  %v9371_v45 = vld [vmem:[#allocation13 + $0xcc] sm:$0xf] }
 0x711   :  { %v11858_v41 = vpack.c.bf16 %v4391_v24, %v4333_v49  ;;  %v4336_v30 = vadd.f32 %v4335_v57, %v11627_v0  ;;  %v11861_v56 = vpop.f32.mrf.mxu0  ;;  %5357 = vmatpush.bf16.msra.mxu0 %v11629_v16  ;;  %13564 = vst [vmem:[#allocation52_spill] sm:$0xff] %v11868_v44  ;;  %v11872_v49 = vor.u32 %v9375_v55, %v8866_v11  ;;  %v8784_v0 = vld [vmem:[#allocation13 + $0x48] sm:$0xf]  ;;  %v9357_v57 = vld [vmem:[#allocation13 + $0x54] sm:$0xf0] }
 0x712   :  { %13563 = vst [vmem:[#allocation53_spill] sm:$0xff] %v11866_v46  ;;  %4954 = vmatpush.bf16.msra.mxu1 %v11863_v22  ;;  %v11876_v24 = vor.u32 %v9357_v57, %v8784_v0  ;;  %4980 = vmatpush.bf16.msra.mxu3 %v11866_v46  ;;  %v8850_v11 = vld [vmem:[#allocation13 + $0xd8] sm:$0xf0]  ;;  %v8768_v0 = vld [vmem:[#allocation13 + $0x28] sm:$0xf] }
 0x713   :  { %13562 = vst [vmem:[#allocation51_spill] sm:$0xff] %v11858_v41  ;;  %4566 = vmatmul.bf16.gmra.mxu1 %v11504_v37  ;;  %4624 = vmatmul.bf16.gmra.mxu3 %v11504_v37  ;;  %v11881_v37 = vor.u32 %v9370_v40, %v8842_v62  ;;  %v11887_v55 = vor.u32 %v9371_v45, %v8850_v11  ;;  %v9353_v57 = vld [vmem:[#allocation13 + $0x34] sm:$0xf0] }
 0x714   :  { %13565 = vst [vmem:[#allocation54_spill] sm:$0xff] %v11872_v49  ;;  %5187 = vmatpush.bf16.msrb.mxu2 %v11876_v24  ;;  %v11890_v16 = vor.u32 %v9353_v57, %v8768_v0  ;;  %v4367_v0 = vadd.f32 %v11668_v32, %v11615_v14  ;;  %v8810_v57 = vld [vmem:[#allocation13 + $0x90] sm:$0xf0] }
 0x715   :  { %13566 = vst [vmem:[#allocation55_spill] sm:$0xff] %v11876_v24  ;;  %5358 = vmatpush.bf16.msra.mxu0 %v11641_v10  ;;  %v9366_v10 = vld [vmem:[#allocation13 + $0xa4] sm:$0xf] }
 0x716   :  { %5169 = vmatpush.bf16.msrb.mxu1 %v11868_v44  ;;  %v4393_v2 = vpop.f32.mrf.mxu3  ;;  %5195 = vmatpush.bf16.msrb.mxu3 %v11872_v49  ;;  %13567 = vst [vmem:[#allocation57_spill] sm:$0xff] %v11881_v37  ;;  %v8834_v49 = vld [vmem:[#allocation13 + $0xb8] sm:$0xf0] }
 0x717   :  { %v4394_v20 = vadd.f32 %v4393_v2, %v11648_v26  ;;  %v11885_v4 = vpop.f32.mrf.mxu2  ;;  %13568 = vst [vmem:[#allocation56_spill] sm:$0xff] %v11887_v55  ;;  %v8826_v26 = vld [vmem:[#allocation13 + $0xb0] sm:$0xf0]  ;;  %v9367_v2 = vld [vmem:[#allocation13 + $0xac] sm:$0xf] }
 0x718   :  { %v4337_v41 = vpop.f32.mrf.mxu1  ;;  %13569 = vst [vmem:[#allocation58_spill] sm:$0xff] %v11890_v16  ;;  %v11900_v11 = vor.u32 %v9366_v10, %v8826_v26  ;;  %5188 = vmatpush.bf16.msrb.mxu2 %v11890_v16  ;;  %v9362_v10 = vld [vmem:[#allocation13 + $0x84] sm:$0xf] }
 0x719   :  { %v11892_v44 = vpack.c.bf16 %v4394_v20, %v4336_v30  ;;  %v4338_v40 = vadd.f32 %v4337_v41, %v11653_v43  ;;  %v4427_v62 = vpop.f32.mrf.mxu0  ;;  %5359 = vmatpush.bf16.msra.mxu0 %v11657_v21  ;;  %v11903_v30 = vor.u32 %v9367_v2, %v8834_v49  ;;  %v8752_v20 = vld [vmem:[#allocation13 + $0x8] sm:$0xf]  ;;  %v9349_v41 = vld [vmem:[#allocation13 + $0x14] sm:$0xf0]  ;;  %v11913_v49 = vor.u32 %v9362_v10, %v8810_v57  ;;  %v8818_v2 = vld [vmem:[#allocation13 + $0x98] sm:$0xf0] }
 0x71a   :  { %5170 = vmatpush.bf16.msrb.mxu1 %v11881_v37  ;;  %v11897_v45 = vadd.f32 %v4427_v62, %v11764_v28  ;;  %5196 = vmatpush.bf16.msrb.mxu3 %v11887_v55  ;;  %13571 = vst [vmem:[#allocation71_spill] sm:$0xff] %v11900_v11  ;;  %v11907_v43 = vor.u32 %v9349_v41, %v8752_v20  ;;  %v9363_v62 = vld [vmem:[#allocation13 + $0x8c] sm:$0xf]  ;;  %v8794_v10 = vld [vmem:[#allocation13 + $0x70] sm:$0xf0] }
 0x71b   :  { %13570 = vst [vmem:[#allocation70_spill] sm:$0xff] %v11892_v44  ;;  %v11915_v21 = vor.u32 %v9363_v62, %v8818_v2  ;;  %v9359_v57 = vld [vmem:[#allocation13 + $0x6c] sm:$0xf] }
 0x71c   :  { %13572 = vst [vmem:[#allocation76_spill] sm:$0xff] %v11903_v30  ;;  %5189 = vmatpush.bf16.msrb.mxu2 %v11907_v43 }
 0x71d   :  { %5414 = vmatpush.bf16.msrb.mxu0 %v11663_v38  ;;  %13573 = vst [vmem:[#allocation77_spill] sm:$0xff] %v11907_v43 }
 0x71e   :  { %5171 = vmatpush.bf16.msrb.mxu1 %v11900_v11  ;;  %v4395_v26 = vpop.f32.mrf.mxu3  ;;  %5197 = vmatpush.bf16.msrb.mxu3 %v11903_v30  ;;  %13574 = vst [vmem:[#allocation72_spill] sm:$0xff] %v11913_v49 }
 0x71f   :  { %v4396_v44 = vadd.f32 %v4395_v26, %v4367_v0  ;;  %v4485_v38 = vpop.f32.mrf.mxu2  ;;  %13575 = vst [vmem:[#allocation73_spill] sm:$0xff] %v11915_v21  ;;  %v9358_v0 = vld [vmem:[#allocation13 + $0x64] sm:$0xf]  ;;  %5190 = vmatmul.bf16.vlgmr.msrb.gmra.mxu2 %v13545_v6 }
 0x720   :  { %v4340_v20 = vpop.f32.mrf.mxu1  ;;  %v11919_v32 = vadd.f32 %v4485_v38, %v11784_v27  ;;  %5378 = vmatpush.bf16.msra.mxu2 %v11606_v47  ;;  %v11930_v62 = vor.u32 %v9358_v0, %v8794_v10  ;;  %v8802_v38 = vld [vmem:[#allocation13 + $0x78] sm:$0xf0] }
 0x721   :  { %5415 = vmatpush.bf16.msrb.mxu0 %v11674_v8  ;;  %v11922_v41 = vpack.c.bf16 %v4396_v44, %v4338_v40  ;;  %v4341_v11 = vadd.f32 %v4340_v20, %v11679_v42  ;;  %v11925_v30 = vpop.f32.mrf.mxu0  ;;  %v11934_v44 = vor.u32 %v9359_v57, %v8802_v38  ;;  %v9354_v42 = vld [vmem:[#allocation13 + $0x44] sm:$0xf]  ;;  %v8778_v40 = vld [vmem:[#allocation13 + $0x50] sm:$0xf0]  ;;  %v9355_v20 = vld [vmem:[#allocation13 + $0x4c] sm:$0xf] }
 0x722   :  { %5172 = vmatpush.bf16.msrb.mxu1 %v11913_v49  ;;  %5198 = vmatpush.bf16.msrb.mxu3 %v11915_v21  ;;  %13577 = vst [vmem:[#allocation75_spill] sm:$0xff] %v11930_v62  ;;  %v11941_v2 = vor.u32 %v9354_v42, %v8778_v40  ;;  %v8786_v0 = vld [vmem:[#allocation13 + $0x58] sm:$0xf0]  ;;  %v9350_v8 = vld [vmem:[#allocation13 + $0x24] sm:$0xf] }
 0x723   :  { %13576 = vst [vmem:[#allocation74_spill] sm:$0xff] %v11922_v41  ;;  %4571 = vmatmul.bf16.gmra.mxu1 %v11510_v23  ;;  %4629 = vmatmul.bf16.gmra.mxu3 %v11510_v23  ;;  %v11946_v57 = vor.u32 %v9355_v20, %v8786_v0  ;;  %v9351_v42 = vld [vmem:[#allocation13 + $0x2c] sm:$0xf]  ;;  %v4372_v0 = vadd.f32 %v11719_v50, %v11615_v14 }
 0x724   :  { %13578 = vst [vmem:[#allocation88_spill] sm:$0xff] %v11934_v44  ;;  %5379 = vmatpush.bf16.msra.mxu2 %v11617_v48  ;;  %v8762_v48 = vld [vmem:[#allocation13 + $0x30] sm:$0xf0] }
 0x725   :  { %5416 = vmatpush.bf16.msrb.mxu0 %v11687_v33  ;;  %13579 = vst [vmem:[#allocation89_spill] sm:$0xff] %v11941_v2 }
 0x726   :  { %5173 = vmatpush.bf16.msrb.mxu1 %v11930_v62  ;;  %v4398_v26 = vpop.f32.mrf.mxu3  ;;  %5199 = vmatpush.bf16.msrb.mxu3 %v11934_v44  ;;  %13580 = vst [vmem:[#allocation90_spill] sm:$0xff] %v11946_v57 }
 0x727   :  { %v4399_v23 = vadd.f32 %v4398_v26, %v11698_v3  ;;  %v11944_v10 = vpop.f32.mrf.mxu2  ;;  %v11957_v3 = vor.u32 %v9350_v8, %v8762_v48  ;;  %v8770_v26 = vld [vmem:[#allocation13 + $0x38] sm:$0xf0] }
 0x728   :  { %v4342_v38 = vpop.f32.mrf.mxu1  ;;  %5380 = vmatpush.bf16.msra.mxu2 %v11631_v12  ;;  %v11959_v20 = vor.u32 %v9351_v42, %v8770_v26  ;;  %v8754_v42 = vld [vmem:[#allocation13 + $0x18] sm:$0xf0] }
 0x729   :  { %5417 = vmatpush.bf16.msrb.mxu0 %v11702_v52  ;;  %v11949_v41 = vpack.c.bf16 %v4399_v23, %v4341_v11  ;;  %v4432_v33 = vpop.f32.mrf.mxu0  ;;  %13582 = vst [vmem:[#allocation92_spill] sm:$0xff] %v11957_v3  ;;  %v4314_v11 = vadd.f32 %v11706_v18, %v11597_v35  ;;  %v9346_v23 = vld [vmem:[#allocation13 + $0x4] sm:$0xf] }
 0x72a   :  { %5174 = vmatpush.bf16.msrb.mxu1 %v11941_v2  ;;  %v11954_v40 = vadd.f32 %v4432_v33, %v11764_v28  ;;  %5200 = vmatpush.bf16.msrb.mxu3 %v11946_v57  ;;  %13583 = vst [vmem:[#allocation93_spill] sm:$0xff] %v11959_v20  ;;  %v8746_v33 = vld [vmem:[#allocation13 + $0x10] sm:$0xf0] }
 0x72b   :  { %13581 = vst [vmem:[#allocation91_spill] sm:$0xff] %v11949_v41  ;;  %v9347_v41 = vld [vmem:[#allocation13 + $0xc] sm:$0xf]  ;;  %v11969_v8 = vor.u32 %v9346_v23, %v8746_v33  ;;  %v4343_v26 = vadd.f32 %v4342_v38, %v4314_v11  ;;  %v13587_v23 = vld [vmem:[#allocation64_spill] sm:$0xff]  ;;  %v13590_v33 = vld [vmem:[#allocation67_spill] sm:$0xff] }
 0x72c   :  { %5381 = vmatpush.bf16.msra.mxu2 %v11643_v61  ;;  %v11971_v18 = vor.u32 %v9347_v41, %v8754_v42  ;;  %v11990_v41 = vperm.slane %v11574_v13, 6  ;;  %v4319_v42 = vadd.f32 %v11748_v34, %v11597_v35  ;;  %v13594_v34 = vld [vmem:[#allocation31_spill] sm:$0xff] }
 0x72d   :  { %5418 = vmatpush.bf16.msrb.mxu0 %v11714_v9  ;;  %13584 = vst [vmem:[#allocation94_spill] sm:$0xff] %v11969_v8 }
 0x72e   :  { %5175 = vmatpush.bf16.msrb.mxu1 %v11957_v3  ;;  %v4400_v48 = vpop.f32.mrf.mxu3  ;;  %5201 = vmatpush.bf16.msrb.mxu3 %v11959_v20  ;;  %13585 = vst [vmem:[#allocation95_spill] sm:$0xff] %v11971_v18 }
 0x72f   :  { %v4401_v9 = vadd.f32 %v4400_v48, %v4372_v0  ;;  %v4490_v52 = vpop.f32.mrf.mxu2  ;;  %v12003_v48 = vperm.slane %v11574_v13, 7 }
 0x730   :  { %v4345_v12 = vpop.f32.mrf.mxu1  ;;  %v11974_v50 = vadd.f32 %v4490_v52, %v11784_v27  ;;  %5382 = vmatpush.bf16.msra.mxu2 %v13587_v23  ;;  %v13588_v52 = vld [vmem:[#allocation82_spill] sm:$0xff] }
 0x731   :  { %5419 = vmatpush.bf16.msrb.mxu0 %v11724_v15  ;;  %v11977_v47 = vpack.c.bf16 %v4401_v9, %v4343_v26  ;;  %v4346_v61 = vadd.f32 %v4345_v12, %v11727_v54  ;;  %v11980_v3 = vpop.f32.mrf.mxu0  ;;  %v13591_v26 = vld [vmem:[#allocation81_spill] sm:$0xff]  ;;  %v13599_v15 = vld [vmem:[#allocation34_spill] sm:$0xff] }
 0x732   :  { %5176 = vmatpush.bf16.msrb.mxu1 %v11969_v8  ;;  %5202 = vmatpush.bf16.msrb.mxu3 %v11971_v18 }
 0x733   :  { %13586 = vst [vmem:[#allocation96_spill] sm:$0xff] %v11977_v47  ;;  %4576 = vmatmul.bf16.gmra.mxu1 %v11518_v17  ;;  %4634 = vmatmul.bf16.gmra.mxu3 %v11518_v17 }
 0x734   :  { %5383 = vmatpush.bf16.msra.mxu2 %v13588_v52 }
 0x735   :  { %5420 = vmatpush.bf16.msrb.mxu0 %v11739_v19 }
 0x736   :  { %v4403_v9 = vpop.f32.mrf.mxu3 }
 0x737   :  { %v4404_v12 = vadd.f32 %v4403_v9, %v11744_v39  ;;  %v11993_v54 = vpop.f32.mrf.mxu2  ;;  %v4377_v39 = vadd.f32 %v11769_v5, %v11615_v14  ;;  %v13593_v14 = vld [vmem:[#allocation69_spill] sm:$0xff] }
 0x738   :  { %v4347_v38 = vpop.f32.mrf.mxu1  ;;  %5384 = vmatpush.bf16.msra.mxu2 %v13590_v33 }
 0x739   :  { %5421 = vmatpush.bf16.msrb.mxu0 %v11751_v1  ;;  %v11996_v11 = vpack.c.bf16 %v4404_v12, %v4346_v61  ;;  %v4533_v0 = vpop.f32.mrf.mxu0  ;;  %v4348_v61 = vadd.f32 %v4347_v38, %v4319_v42 }
 0x73a   :  { %v12000_v17 = vadd.f32 %v4533_v0, %v11990_v41 }
 0x73b   :  { %13589 = vst [vmem:[#allocation64_spill] sm:$0xff] %v11996_v11 }
 0x73c   :  { %5385 = vmatpush.bf16.msra.mxu2 %v13591_v26 }
 0x73e   :  { %v4405_v9 = vpop.f32.mrf.mxu3 }
 0x73f   :  { %v4406_v12 = vadd.f32 %v4405_v9, %v4377_v39  ;;  %v4591_v11 = vpop.f32.mrf.mxu2 }
 0x740   :  { %5440 = vmatpush.bf16.msrb.mxu2 %v11798_v59  ;;  %v4446_v47 = vpop.f32.mrf.mxu1  ;;  %v12012_v0 = vadd.f32 %v4591_v11, %v12003_v48 }
 0x741   :  { %v12014_v13 = vpack.c.bf16 %v4406_v12, %v4348_v61  ;;  %v4447_v1 = vadd.f32 %v4446_v47, %v11776_v7  ;;  %v12017_v35 = vpop.f32.mrf.mxu0  ;;  %v13595_v7 = vld [vmem:[#allocation24_spill] sm:$0xff]  ;;  %v13597_v61 = vld [vmem:[#allocation33_spill] sm:$0xff] }
 0x742   :  { %v13598_v12 = vld [vmem:[#allocation40_spill] sm:$0xff] }
 0x743   :  { %13592 = vst [vmem:[#allocation82_spill] sm:$0xff] %v12014_v13  ;;  %4955 = vmatmul.bf16.vlgmr.msra.gmra.mxu1 %v13545_v6  ;;  %4981 = vmatmul.bf16.vlgmr.msra.gmra.mxu3 %v13545_v6 }
 0x744   :  { %5441 = vmatpush.bf16.msrb.mxu2 %v11815_v63  ;;  %5365 = vmatpush.bf16.msra.mxu1 %v13593_v14 }
 0x745   :  { %5391 = vmatpush.bf16.msra.mxu3 %v13594_v34 }
 0x746   :  { %v4504_v5 = vpop.f32.mrf.mxu3 }
 0x747   :  { %v4505_v38 = vadd.f32 %v4504_v5, %v11796_v60  ;;  %v12026_v11 = vpop.f32.mrf.mxu2  ;;  %v4420_v60 = vadd.f32 %v11802_v53, %v11764_v28  ;;  %v4478_v5 = vadd.f32 %v13598_v12, %v11784_v27  ;;  %v13602_v53 = vld [vmem:[#allocation44_spill] sm:$0xff] }
 0x748   :  { %5442 = vmatpush.bf16.msrb.mxu2 %v11825_v58  ;;  %v4448_v47 = vpop.f32.mrf.mxu1  ;;  %5366 = vmatpush.bf16.msra.mxu1 %v13595_v7 }
 0x749   :  { %5392 = vmatpush.bf16.msra.mxu3 %v11773_v31  ;;  %v12030_v42 = vpack.c.bf16 %v4505_v38, %v4447_v1  ;;  %v4538_v39 = vpop.f32.mrf.mxu0  ;;  %v4449_v1 = vadd.f32 %v4448_v47, %v4420_v60  ;;  %v13604_v47 = vld [vmem:[#allocation41_spill] sm:$0xff] }
 0x74a   :  { %v12033_v9 = vadd.f32 %v4538_v39, %v11990_v41 }
 0x74b   :  { %13596 = vst [vmem:[#allocation67_spill] sm:$0xff] %v12030_v42 }
 0x74c   :  { %5443 = vmatpush.bf16.msrb.mxu2 %v11842_v25  ;;  %5367 = vmatpush.bf16.msra.mxu1 %v13597_v61  ;;  %v13600_v25 = vld [vmem:[#allocation36_spill] sm:$0xff] }
 0x74d   :  { %5393 = vmatpush.bf16.msra.mxu3 %v11789_v29 }
 0x74e   :  { %v4506_v13 = vpop.f32.mrf.mxu3 }
 0x74f   :  { %v4507_v38 = vadd.f32 %v4506_v13, %v4478_v5  ;;  %v4596_v42 = vpop.f32.mrf.mxu2  ;;  %v13603_v13 = vld [vmem:[#allocation38_spill] sm:$0xff] }
 0x750   :  { %5444 = vmatpush.bf16.msrb.mxu2 %v11856_v36  ;;  %v4451_v39 = vpop.f32.mrf.mxu1  ;;  %v12044_v19 = vadd.f32 %v4596_v42, %v12003_v48  ;;  %5368 = vmatpush.bf16.msra.mxu1 %v13599_v15 }
 0x751   :  { %5394 = vmatpush.bf16.msra.mxu3 %v13600_v25  ;;  %v12048_v58 = vpack.c.bf16 %v4507_v38, %v4449_v1  ;;  %v4452_v63 = vadd.f32 %v4451_v39, %v13602_v53  ;;  %v12051_v59 = vpop.f32.mrf.mxu0  ;;  %v13605_v1 = vld [vmem:[#allocation45_spill] sm:$0xff]  ;;  %v13606_v38 = vld [vmem:[#allocation46_spill] sm:$0xff] }
 0x753   :  { %13601 = vst [vmem:[#allocation69_spill] sm:$0xff] %v12048_v58  ;;  %5177 = vmatmul.bf16.vlgmr.msrb.gmra.mxu1 %v13545_v6  ;;  %5203 = vmatmul.bf16.vlgmr.msrb.gmra.mxu3 %v13545_v6  ;;  %v13608_v58 = vld [vmem:[#allocation49_spill] sm:$0xff] }
 0x754   :  { %5445 = vmatpush.bf16.msrb.mxu2 %v11876_v24  ;;  %5369 = vmatpush.bf16.msra.mxu1 %v13603_v13 }
 0x755   :  { %5395 = vmatpush.bf16.msra.mxu3 %v13604_v47 }
 0x756   :  { %v4509_v42 = vpop.f32.mrf.mxu3 }
 0x757   :  { %v4510_v60 = vadd.f32 %v4509_v42, %v11853_v51  ;;  %v12060_v12 = vpop.f32.mrf.mxu2  ;;  %v4425_v51 = vadd.f32 %v11861_v56, %v11764_v28  ;;  %v4483_v42 = vadd.f32 %v11885_v4, %v11784_v27  ;;  %v13612_v4 = vld [vmem:[#allocation54_spill] sm:$0xff] }
 0x758   :  { %5446 = vmatpush.bf16.msrb.mxu2 %v11890_v16  ;;  %v4453_v5 = vpop.f32.mrf.mxu1  ;;  %5370 = vmatpush.bf16.msra.mxu1 %v13605_v1  ;;  %v13609_v16 = vld [vmem:[#allocation48_spill] sm:$0xff] }
 0x759   :  { %5396 = vmatpush.bf16.msra.mxu3 %v13606_v38  ;;  %v12064_v39 = vpack.c.bf16 %v4510_v60, %v4452_v63  ;;  %v4543_v53 = vpop.f32.mrf.mxu0  ;;  %v4454_v36 = vadd.f32 %v4453_v5, %v4425_v51 }
 0x75a   :  { %v12067_v6 = vadd.f32 %v4543_v53, %v11990_v41 }
 0x75b   :  { %13607 = vst [vmem:[#allocation31_spill] sm:$0xff] %v12064_v39 }
 0x75c   :  { %5447 = vmatpush.bf16.msrb.mxu2 %v11907_v43  ;;  %5371 = vmatpush.bf16.msra.mxu1 %v13608_v58 }
 0x75d   :  { %5397 = vmatpush.bf16.msra.mxu3 %v13609_v16  ;;  %v13611_v16 = vld [vmem:[#allocation52_spill] sm:$0xff] }
 0x75e   :  { %v4511_v24 = vpop.f32.mrf.mxu3 }
 0x75f   :  { %v4512_v63 = vadd.f32 %v4511_v24, %v4483_v42  ;;  %v4601_v60 = vpop.f32.mrf.mxu2 }
 0x760   :  { %v4456_v39 = vpop.f32.mrf.mxu1  ;;  %v12077_v53 = vadd.f32 %v4601_v60, %v12003_v48  ;;  %5372 = vmatpush.bf16.msra.mxu1 %v11863_v22 }
 0x761   :  { %5398 = vmatpush.bf16.msra.mxu3 %v11866_v46  ;;  %v12081_v43 = vpack.c.bf16 %v4512_v63, %v4454_v36  ;;  %v4457_v26 = vadd.f32 %v4456_v39, %v11897_v45  ;;  %v12084_v56 = vpop.f32.mrf.mxu0  ;;  %v13614_v45 = vld [vmem:[#allocation71_spill] sm:$0xff]  ;;  %v13615_v39 = vld [vmem:[#allocation76_spill] sm:$0xff] }
 0x763   :  { %13610 = vst [vmem:[#allocation24_spill] sm:$0xff] %v12081_v43  ;;  %v4430_v43 = vadd.f32 %v11925_v30, %v11764_v28 }
 0x764   :  { %5427 = vmatpush.bf16.msrb.mxu1 %v13611_v16 }
 0x765   :  { %5453 = vmatpush.bf16.msrb.mxu3 %v13612_v4 }
 0x766   :  { %v4514_v24 = vpop.f32.mrf.mxu3 }
 0x767   :  { %v4515_v5 = vadd.f32 %v4514_v24, %v11919_v32  ;;  %v12091_v51 = vpop.f32.mrf.mxu2 }
 0x768   :  { %5428 = vmatpush.bf16.msrb.mxu1 %v11881_v37  ;;  %v4458_v42 = vpop.f32.mrf.mxu1 }
 0x769   :  { %5454 = vmatpush.bf16.msrb.mxu3 %v11887_v55  ;;  %v12093_v36 = vpack.c.bf16 %v4515_v5, %v4457_v26  ;;  %v4548_v63 = vpop.f32.mrf.mxu0  ;;  %v4488_v55 = vadd.f32 %v11944_v10, %v11784_v27  ;;  %v4459_v26 = vadd.f32 %v4458_v42, %v4430_v43 }
 0x76a   :  { %v12098_v60 = vadd.f32 %v4548_v63, %v11990_v41 }
 0x76b   :  { %13613 = vst [vmem:[#allocation33_spill] sm:$0xff] %v12093_v36 }
 0x76c   :  { %5429 = vmatpush.bf16.msrb.mxu1 %v13614_v45 }
 0x76d   :  { %5455 = vmatpush.bf16.msrb.mxu3 %v13615_v39 }
 0x76e   :  { %v4516_v32 = vpop.f32.mrf.mxu3 }
 0x76f   :  { %v4517_v24 = vadd.f32 %v4516_v32, %v4488_v55  ;;  %v4606_v5 = vpop.f32.mrf.mxu2  ;;  %v13617_v32 = vld [vmem:[#allocation86_spill] sm:$0xff] }
 0x770   :  { %5430 = vmatpush.bf16.msrb.mxu1 %v11913_v49  ;;  %v4461_v36 = vpop.f32.mrf.mxu1  ;;  %v12107_v39 = vadd.f32 %v4606_v5, %v12003_v48 }
 0x771   :  { %5456 = vmatpush.bf16.msrb.mxu3 %v11915_v21  ;;  %v12109_v63 = vpack.c.bf16 %v4517_v24, %v4459_v26  ;;  %v4462_v45 = vadd.f32 %v4461_v36, %v11954_v40  ;;  %v12112_v30 = vpop.f32.mrf.mxu0  ;;  %v4770_v26 = vunpack.c.l.bf16 %v13617_v32  ;;  %v13619_v24 = vld [vmem:[#allocation92_spill] sm:$0xff] }
 0x773   :  { %13616 = vst [vmem:[#allocation40_spill] sm:$0xff] %v12109_v63 }
 0x774   :  { %5431 = vmatpush.bf16.msrb.mxu1 %v11930_v62 }
 0x775   :  { %5457 = vmatpush.bf16.msrb.mxu3 %v11934_v44 }
 0x776   :  { %v4519_v55 = vpop.f32.mrf.mxu3 }
 0x777   :  { %v4520_v43 = vadd.f32 %v4519_v55, %v11974_v50  ;;  %v12119_v10 = vpop.f32.mrf.mxu2  ;;  %v13620_v50 = vld [vmem:[#allocation43_spill] sm:$0xff] }
 0x778   :  { %5432 = vmatpush.bf16.msrb.mxu1 %v11941_v2  ;;  %v12121_v42 = vpop.f32.mrf.mxu1  ;;  %v4772_v55 = vunpack.c.l.bf16 %v13620_v50 }
 0x779   :  { %5458 = vmatpush.bf16.msrb.mxu3 %v11946_v57  ;;  %v12124_v40 = vpack.c.bf16 %v4520_v43, %v4462_v45  ;;  %v4943_v36 = vpop.f32.mrf.mxu0 }
 0x77a   :  { %v4986_v5 = vadd.f32 %v4943_v36, %v4770_v26  ;;  %v4536_v36 = vadd.f32 %v12017_v35, %v11990_v41  ;;  %v4541_v35 = vadd.f32 %v12051_v59, %v11990_v41 }
 0x77b   :  { %13618 = vst [vmem:[#allocation34_spill] sm:$0xff] %v12124_v40 }
 0x77c   :  { %5433 = vmatpush.bf16.msrb.mxu1 %v13619_v24 }
 0x77d   :  { %5459 = vmatpush.bf16.msrb.mxu3 %v11959_v20 }
 0x77e   :  { %v4521_v63 = vpop.f32.mrf.mxu3 }
 0x77f   :  { %v4969_v57 = vpop.f32.mrf.mxu2 }
 0x780   :  { %5434 = vmatpush.bf16.msrb.mxu1 %v11969_v8  ;;  %v4562_v2 = vpop.f32.mrf.mxu1  ;;  %v4988_v44 = vadd.f32 %v4969_v57, %v4772_v55 }
 0x781   :  { %5460 = vmatpush.bf16.msrb.mxu3 %v11971_v18  ;;  %v4563_v62 = vadd.f32 %v4562_v2, %v12000_v17  ;;  %v4945_v45 = vpop.f32.mrf.mxu0  ;;  %v4594_v18 = vadd.f32 %v12026_v11, %v12003_v48  ;;  %v4599_v11 = vadd.f32 %v12060_v12, %v12003_v48  ;;  %v4546_v12 = vadd.f32 %v12084_v56, %v11990_v41 }
 0x786   :  { %v4620_v43 = vpop.f32.mrf.mxu3 }
 0x787   :  { %v4621_v40 = vadd.f32 %v4620_v43, %v12012_v0  ;;  %v4971_v24 = vpop.f32.mrf.mxu2 }
 0x788   :  { %v4564_v21 = vpop.f32.mrf.mxu1 }
 0x789   :  { %v12133_v20 = vpack.c.bf16 %v4621_v40, %v4563_v62  ;;  %v5165_v26 = vpop.f32.mrf.mxu0  ;;  %v4565_v49 = vadd.f32 %v4564_v21, %v4536_v36  ;;  %v8870_v36 = vmul.f32 -1.442695, %v4986_v5  ;;  %v4493_v5 = vadd.f32 %v11993_v54, %v11784_v27 }
 0x78b   :  { %13621 = vst [vmem:[#allocation36_spill] sm:$0xff] %v12133_v20  ;;  %9681 = vpow2.f32 %v8870_v36  ;;  %v4522_v56 = vadd.f32 %v4521_v63, %v4493_v5  ;;  %v13663_v20 = vld [vmem:[#allocation90_spill] sm:$0xff] }
 0x78e   :  { %v4622_v8 = vpop.f32.mrf.mxu3 }
 0x78f   :  { %v4623_v57 = vadd.f32 %v4622_v8, %v4594_v18 }
 0x790   :  { %v4567_v55 = vpop.f32.mrf.mxu1 }
 0x791   :  { %v12139_v2 = vpack.c.bf16 %v4623_v57, %v4565_v49  ;;  %v4568_v17 = vadd.f32 %v4567_v55, %v12033_v9  ;;  %v5167_v0 = vpop.f32.mrf.mxu0  ;;  %v9682_v59 = vpop.eup %9681 }
 0x793   :  { %13622 = vst [vmem:[#allocation44_spill] sm:$0xff] %v12139_v2  ;;  %v13664_v2 = vld [vmem:[#allocation26_spill] sm:$0xff] }
 0x796   :  { %v4625_v24 = vpop.f32.mrf.mxu3 }
 0x797   :  { %v4626_v62 = vadd.f32 %v4625_v24, %v12044_v19  ;;  %v4604_v24 = vadd.f32 %v12091_v51, %v12003_v48 }
 0x798   :  { %v4569_v40 = vpop.f32.mrf.mxu1 }
 0x799   :  { %v12143_v45 = vpack.c.bf16 %v4626_v62, %v4568_v17  ;;  %v4570_v8 = vadd.f32 %v4569_v40, %v4541_v35 }
 0x79b   :  { %13623 = vst [vmem:[#allocation38_spill] sm:$0xff] %v12143_v45  ;;  %v13665_v45 = vld [vmem:[#allocation92_spill] sm:$0xff] }
 0x79e   :  { %v4627_v21 = vpop.f32.mrf.mxu3 }
 0x79f   :  { %v4628_v18 = vadd.f32 %v4627_v21, %v4599_v11  ;;  %v5221_v11 = vadd.f32 1.0, %v9682_v59 }
 0x7a0   :  { %v4572_v49 = vpop.f32.mrf.mxu1 }
 0x7a1   :  { %v12149_v43 = vpack.c.bf16 %v4628_v18, %v4570_v8  ;;  %v4573_v9 = vadd.f32 %v4572_v49, %v12067_v6  ;;  %v4435_v18 = vadd.f32 %v11980_v3, %v11764_v28  ;;  %9683 = vrcp.f32 %v5221_v11 }
 0x7a2   :  { %v5191_v55 = vpop.f32.mrf.mxu2  ;;  %v4609_v28 = vadd.f32 %v12119_v10, %v12003_v48  ;;  %v4773_v48 = vunpack.c.h.bf16 %v13620_v50  ;;  %vm5229_vm1 = vweird.f32 %v5221_v11 }
 0x7a3   :  { %13624 = vst [vmem:[#allocation41_spill] sm:$0xff] %v12149_v43  ;;  %v4464_v49 = vadd.f32 %v12121_v42, %v4435_v18  ;;  %v13666_v43 = vld [vmem:[#allocation58_spill] sm:$0xff] }
 0x7a5   :  { %v4670_v51 = vpack.c.bf16 %v4522_v56, %v4464_v49  ;;  %v5235_v49 = vand.u32 2147483648, %v5221_v11 }
 0x7a6   :  { %v4630_v57 = vpop.f32.mrf.mxu3 }
 0x7a7   :  { %v4631_v19 = vadd.f32 %v4630_v57, %v12077_v53  ;;  %v9684_v27 = vpop.eup %9683  ;;  %v4992_v54 = vunpack.c.l.bf16 %v4670_v51 }
 0x7a8   :  { %v4574_v17 = vpop.f32.mrf.mxu1  ;;  %v5225_v3 = vmul.f32 %v9684_v27, %v5221_v11  ;;  %vm5230_vm0 = vweird.f32 %v9684_v27 }
 0x7a9   :  { %v12153_v0 = vpack.c.bf16 %v4631_v19, %v4573_v9  ;;  %v4575_v40 = vadd.f32 %v4574_v17, %v4546_v12  ;;  %v8872_v17 = vmul.f32 -1.442695, %v4988_v44  ;;  %v5208_v59 = vadd.f32 %v5165_v26, %v4992_v54  ;;  %vm5231_vm2 = vmor %vm5229_vm1, %vm5230_vm0 }
 0x7aa   :  { %v5193_v6 = vpop.f32.mrf.mxu2 }
 0x7ab   :  { %13625 = vst [vmem:[#allocation45_spill] sm:$0xff] %v12153_v0  ;;  %9685 = vpow2.f32 %v8872_v17  ;;  %v13667_v0 = vld [vmem:[#allocation93_spill] sm:$0xff] }
 0x7ae   :  { %v4632_v62 = vpop.f32.mrf.mxu3 }
 0x7af   :  { %v4633_v35 = vadd.f32 %v4632_v62, %v4604_v24  ;;  %v4771_v24 = vunpack.c.h.bf16 %v13617_v32 }
 0x7b0   :  { %v4577_v53 = vpop.f32.mrf.mxu1 }
 0x7b1   :  { %v12161_v21 = vpack.c.bf16 %v4633_v35, %v4575_v40  ;;  %v4578_v8 = vadd.f32 %v4577_v53, %v12098_v60  ;;  %v4551_v60 = vadd.f32 %v12112_v30, %v11990_v41  ;;  %v5226_v40 = vsub.f32 1.0, %v5225_v3  ;;  %v9686_v10 = vpop.eup %9685 }
 0x7b3   :  { %13626 = vst [vmem:[#allocation46_spill] sm:$0xff] %v12161_v21  ;;  %v5227_v30 = vmul.f32 %v9684_v27, %v5226_v40  ;;  %v13668_v21 = vld [vmem:[#allocation30_spill] sm:$0xff] }
 0x7b5   :  { %v5228_v18 = vadd.f32 %v9684_v27, %v5227_v30 }
 0x7b6   :  { %v4635_v9 = vpop.f32.mrf.mxu3 }
 0x7b7   :  { %v4636_v36 = vadd.f32 %v4635_v9, %v12107_v39  ;;  %v8873_v39 = vmul.f32 -1.442695, %v5208_v59  ;;  %v5232_v50 = vsel %vm5231_vm2, %v9684_v27, %v5228_v18 }
 0x7b8   :  { %v4579_v57 = vpop.f32.mrf.mxu1 }
 0x7b9   :  { %v12168_v19 = vpack.c.bf16 %v4636_v36, %v4578_v8  ;;  %v4580_v42 = vadd.f32 %v4579_v57, %v4551_v60  ;;  %9687 = vpow2.f32 %v8873_v39  ;;  %v12179_v8 = vadd.f32 1.0, %v9686_v10 }
 0x7ba   :  { %v5233_v36 = vand.u32 2147483647, %v5221_v11  ;;  %v4993_v60 = vunpack.c.h.bf16 %v4670_v51 }
 0x7bb   :  { %vm5259_vm9 = vweird.f32 %v12179_v8 }
 0x7bc   :  { %vm5234_vm3 = vcmp.eq.f32.partialorder %v5233_v36, 8.507059e+37 }
 0x7be   :  { %v4637_v63 = vpop.f32.mrf.mxu3 }
 0x7bf   :  { %v4638_v12 = vadd.f32 %v4637_v63, %v4609_v28  ;;  %v9688_v56 = vpop.eup %9687 }
 0x7c0   :  { %v4956_v62 = vpop.f32.mrf.mxu1  ;;  %v12182_v17 = vadd.f32 1.0, %v9688_v56 }
 0x7c1   :  { %v12175_v35 = vpack.c.bf16 %v4638_v12, %v4580_v42  ;;  %v4987_v44 = vadd.f32 %v4956_v62, %v4771_v24 }
 0x7c2   :  { %vm5292_vm13 = vweird.f32 %v12182_v17 }
 0x7c3   :  { %v8871_v26 = vmul.f32 -1.442695, %v4987_v44  ;;  %v4994_v41 = vunpack.c.l.bf16 %v12175_v35 }
 0x7c5   :  { %9689 = vpow2.f32 %v8871_v26  ;;  %v5210_v53 = vadd.f32 %v5191_v55, %v4994_v41  ;;  %v5236_v55 = vor.u32 1.1754944e-38, %v5235_v49 }
 0x7c6   :  { %v4982_v6 = vpop.f32.mrf.mxu3 }
 0x7c7   :  { %v4989_v5 = vadd.f32 %v4982_v6, %v4773_v48  ;;  %v8875_v54 = vmul.f32 -1.442695, %v5210_v53  ;;  %v5237_v3 = vsel %vm5234_vm3, %v5236_v55, %v5232_v50 }
 0x7c8   :  { %v4958_v32 = vpop.f32.mrf.mxu1 }
 0x7c9   :  { %9691 = vtanh.f32 %v4989_v5 }
 0x7ca   :  { %9693 = vrcp.f32 %v12179_v8 }
 0x7cb   :  { %v9690_v9 = vpop.eup %9689 }
 0x7cc   :  { %v5222_v57 = vadd.f32 1.0, %v9690_v9 }
 0x7ce   :  { %9695 = vrcp.f32 %v5222_v57  ;;  %v4984_v59 = vpop.f32.mrf.mxu3  ;;  %v5250_v41 = vand.u32 2147483648, %v5222_v57  ;;  %v5248_v6 = vand.u32 2147483647, %v5222_v57  ;;  %vm5244_vm5 = vweird.f32 %v5222_v57 }
 0x7cf   :  { %v9692_v28 = vpop.eup %9691  ;;  %9697 = vpow2.f32 %v8875_v54 }
 0x7d0   :  { %v5178_v63 = vpop.f32.mrf.mxu1  ;;  %v5271_v42 = vmul.f32 %v9692_v28, %v5237_v3  ;;  %9699 = vrcp.f32 %v12182_v17  ;;  %v12185_v11 = vpop.eup %9693  ;;  %v5251_v56 = vor.u32 1.1754944e-38, %v5250_v41  ;;  %vm5249_vm7 = vcmp.eq.f32.partialorder %v5248_v6, 8.507059e+37 }
 0x7d1   :  { %v5209_v12 = vadd.f32 %v5178_v63, %v4993_v60  ;;  %v5255_v40 = vmul.f32 %v12185_v11, %v12179_v8  ;;  %v4995_v60 = vunpack.c.h.bf16 %v12175_v35  ;;  %vm5260_vm8 = vweird.f32 %v12185_v11 }
 0x7d2   :  { %vm12209_vm10 = vmor %vm5259_vm9, %vm5260_vm8 }
 0x7d3   :  { %v8874_v24 = vmul.f32 -1.442695, %v5209_v12  ;;  %v5256_v5 = vsub.f32 1.0, %v5255_v40 }
 0x7d4   :  { %v9696_v39 = vpop.eup %9695 }
 0x7d5   :  { %v5240_v27 = vmul.f32 %v9696_v39, %v5222_v57  ;;  %9701 = vpow2.f32 %v8874_v24  ;;  %v9698_v62 = vpop.eup %9697  ;;  %vm5245_vm4 = vweird.f32 %v9696_v39  ;;  %v5257_v36 = vmul.f32 %v12185_v11, %v5256_v5 }
 0x7d6   :  { %v5204_v44 = vpop.f32.mrf.mxu3  ;;  %v12189_v26 = vpop.eup %9699  ;;  %v12191_v10 = vadd.f32 1.0, %v9698_v62  ;;  %vm5246_vm6 = vmor %vm5244_vm5, %vm5245_vm4  ;;  %v5265_v57 = vand.u32 2147483648, %v12179_v8  ;;  %v5263_v24 = vand.u32 2147483647, %v12179_v8 }
 0x7d7   :  { %v5241_v51 = vsub.f32 1.0, %v5240_v27  ;;  %v5288_v32 = vmul.f32 %v12189_v26, %v12182_v17  ;;  %v5211_v3 = vadd.f32 %v5204_v44, %v4995_v60  ;;  %v5258_v63 = vadd.f32 %v12185_v11, %v5257_v36 }
 0x7d8   :  { %v5180_v48 = vpop.f32.mrf.mxu1  ;;  %9703 = vrcp.f32 %v12191_v10  ;;  %v5266_v62 = vor.u32 1.1754944e-38, %v5265_v57  ;;  %vm5293_vm11 = vweird.f32 %v12189_v26  ;;  %vm5264_vm12 = vcmp.eq.f32.partialorder %v5263_v24, 8.507059e+37  ;;  %v13630_v24 = vld [vmem:[#allocation23_spill] sm:$0xff] }
 0x7d9   :  { %v5242_v30 = vmul.f32 %v9696_v39, %v5241_v51  ;;  %v5289_v55 = vsub.f32 1.0, %v5288_v32  ;;  %v5262_v44 = vsel %vm12209_vm10, %v12185_v11, %v5258_v63  ;;  %v5296_v48 = vand.u32 2147483647, %v12182_v17  ;;  %vm5294_vm15 = vmor %vm5292_vm13, %vm5293_vm11 }
 0x7da   :  { %v5267_v32 = vsel %vm5264_vm12, %v5266_v62, %v5262_v44  ;;  %vm5322_vm5 = vweird.f32 %v12191_v10  ;;  %v5326_v35 = vand.u32 2147483647, %v12191_v10  ;;  %v13632_v62 = vld [vmem:[#allocation61_spill] sm:$0xff] }
 0x7db   :  { %v9702_v53 = vpop.eup %9701  ;;  %v5243_v18 = vadd.f32 %v9696_v39, %v5242_v30  ;;  %v5298_v30 = vand.u32 2147483648, %v12182_v17  ;;  %vm5297_vm2 = vcmp.eq.f32.partialorder %v5296_v48, 8.507059e+37 }
 0x7dc   :  { %v5285_v49 = vadd.f32 1.0, %v9702_v53 }
 0x7dd   :  { %v5247_v9 = vsel %vm5246_vm6, %v9696_v39, %v5243_v18  ;;  %v5290_v39 = vmul.f32 %v12189_v26, %v5289_v55 }
 0x7de   :  { %v5252_v54 = vsel %vm5249_vm7, %v5251_v56, %v5247_v9  ;;  %9705 = vrcp.f32 %v5285_v49  ;;  %v5206_v50 = vpop.f32.mrf.mxu3  ;;  %v12203_v12 = vpop.eup %9703  ;;  %v5313_v8 = vand.u32 2147483648, %v5285_v49  ;;  %v5311_v53 = vand.u32 2147483647, %v5285_v49 }
 0x7df   :  { %v5270_v59 = vmul.f32 0.0, %v5252_v54  ;;  %v5318_v40 = vmul.f32 %v12203_v12, %v12191_v10  ;;  %v5291_v41 = vadd.f32 %v12189_v26, %v5290_v39  ;;  %vm5307_vm0 = vweird.f32 %v5285_v49 }
 0x7e0   :  { %v5314_v54 = vor.u32 1.1754944e-38, %v5313_v8  ;;  %v5299_v50 = vor.u32 1.1754944e-38, %v5298_v30  ;;  %vm5312_vm3 = vcmp.eq.f32.partialorder %v5311_v53, 8.507059e+37  ;;  %vm5323_vm4 = vweird.f32 %v12203_v12  ;;  %v13638_v53 = vld [vmem:[#allocation87_spill] sm:$0xff] }
 0x7e1   :  { %v12198_v28 = vadd.f32 %v5271_v42, %v5270_v59  ;;  %v5319_v18 = vsub.f32 1.0, %v5318_v40  ;;  %v5295_v56 = vsel %vm5294_vm15, %v12189_v26, %v5291_v41  ;;  %v13629_v26 = vld [vmem:[#allocation59_spill] sm:$0xff]  ;;  %vm5324_vm6 = vmor %vm5322_vm5, %vm5323_vm4  ;;  %vm5327_vm7 = vcmp.eq.f32.partialorder %v5326_v35, 8.507059e+37  ;;  %v13656_v35 = vld [vmem:[#allocation78_spill] sm:$0xff] }
 0x7e2   :  { %v5300_v60 = vsel %vm5297_vm2, %v5299_v50, %v5295_v56  ;;  %v13642_v56 = vld [vmem:[#allocation81_spill] sm:$0xff]  ;;  %v13646_v50 = vld [vmem:[#allocation39_spill] sm:$0xff] }
 0x7e3   :  { %9707 = vtanh.f32 %v12198_v28  ;;  %v5320_v17 = vmul.f32 %v12203_v12, %v5319_v18  ;;  %v13640_v18 = vld [vmem:[#allocation48_spill] sm:$0xff] }
 0x7e4   :  { %v9706_v27 = vpop.eup %9705  ;;  %9709 = vtanh.f32 %v5211_v3 }
 0x7e5   :  { %v5303_v42 = vmul.f32 %v9706_v27, %v5285_v49  ;;  %vm5308_vm14 = vweird.f32 %v9706_v27  ;;  %v5321_v39 = vadd.f32 %v12203_v12, %v5320_v17  ;;  %v13649_v17 = vld [vmem:[#allocation71_spill] sm:$0xff] }
 0x7e6   :  { %vm5309_vm1 = vmor %vm5307_vm0, %vm5308_vm14 }
 0x7e7   :  { %v5304_v51 = vsub.f32 1.0, %v5303_v42  ;;  %v13631_v42 = vld [vmem:[#allocation20_spill] sm:$0xff]  ;;  %v5325_v40 = vsel %vm5324_vm6, %v12203_v12, %v5321_v39  ;;  %v13654_v39 = vld [vmem:[#allocation47_spill] sm:$0xff] }
 0x7e8   :  { %v13637_v12 = vld [vmem:[#allocation60_spill] sm:$0xff] }
 0x7e9   :  { %v9708_v6 = vpop.eup %9707  ;;  %v5305_v5 = vmul.f32 %v9706_v27, %v5304_v51  ;;  %v13633_v51 = vld [vmem:[#allocation21_spill] sm:$0xff] }
 0x7ea   :  { %v5274_v11 = vmul.f32 %v9708_v6, %v5267_v32  ;;  %v9710_v36 = vpop.eup %9709  ;;  %v13635_v6 = vld [vmem:[#allocation22_spill] sm:$0xff]  ;;  %v13639_v32 = vld [vmem:[#allocation63_spill] sm:$0xff] }
 0x7eb   :  { %v5306_v9 = vadd.f32 %v9706_v27, %v5305_v5  ;;  %v5334_v49 = vmul.f32 %v9710_v36, %v5300_v60  ;;  %v13636_v5 = vld [vmem:[#allocation84_spill] sm:$0xff]  ;;  %v13644_v36 = vld [vmem:[#allocation35_spill] sm:$0xff]  ;;  %v13650_v60 = vld [vmem:[#allocation42_spill] sm:$0xff] }
 0x7ec   :  { %v5338_v55 = vpack.c.bf16 %v5274_v11, %v5274_v11  ;;  %v13641_v11 = vld [vmem:[#allocation25_spill] sm:$0xff] }
 0x7ed   :  { %v5310_v59 = vsel %vm5309_vm1, %v9706_v27, %v5306_v9  ;;  %v5328_v27 = vand.u32 2147483648, %v12191_v10  ;;  %v13634_v10 = vld [vmem:[#allocation62_spill] sm:$0xff]  ;;  %v13643_v9 = vld [vmem:[#allocation65_spill] sm:$0xff] }
 0x7ee   :  { %v5315_v57 = vsel %vm5312_vm3, %v5314_v54, %v5310_v59  ;;  %5341 = vst [vmem:[#allocation3] sm:$0xf] %v5338_v55  ;;  %5360 = vmatmul.bf16.vlgmr.msra.gmra.mxu0 %v5338_v55  ;;  %5373 = vmatmul.bf16.vlgmr.msra.gmra.mxu1 %v5338_v55  ;;  %v13645_v54 = vld [vmem:[#allocation83_spill] sm:$0xff]  ;;  %v13648_v59 = vld [vmem:[#allocation80_spill] sm:$0xff] }
 0x7ef   :  { %v5333_v3 = vmul.f32 0.0, %v5315_v57  ;;  %5386 = vmatmul.bf16.vlgmr.msra.gmra.mxu2 %v5338_v55  ;;  %5399 = vmatmul.bf16.vlgmr.msra.gmra.mxu3 %v5338_v55  ;;  %v5329_v44 = vor.u32 1.1754944e-38, %v5328_v27  ;;  %v13647_v55 = vld [vmem:[#allocation56_spill] sm:$0xff]  ;;  %v13655_v27 = vld [vmem:[#allocation73_spill] sm:$0xff] }
 0x7f0   :  { %5610 = vmatpush.bf16.msra.mxu0 %v13629_v26  ;;  %5623 = vmatpush.bf16.msra.mxu1 %v13593_v14  ;;  %v13651_v57 = vld [vmem:[#allocation76_spill] sm:$0xff] }
 0x7f1   :  { %v12227_v63 = vadd.f32 %v5334_v49, %v5333_v3  ;;  %5636 = vmatpush.bf16.msra.mxu2 %v13630_v24  ;;  %5649 = vmatpush.bf16.msra.mxu3 %v13594_v34  ;;  %v5330_v8 = vsel %vm5327_vm7, %v5329_v44, %v5325_v40  ;;  %v13652_v3 = vld [vmem:[#allocation27_spill] sm:$0xff]  ;;  %v13653_v49 = vld [vmem:[#allocation72_spill] sm:$0xff]  ;;  %v13658_v44 = vld [vmem:[#allocation50_spill] sm:$0xff] }
 0x7f2   :  { %v13657_v40 = vld [vmem:[#allocation75_spill] sm:$0xff] }
 0x7f3   :  { %9711 = vtanh.f32 %v12227_v63 }
 0x7f4   :  { %5611 = vmatpush.bf16.msra.mxu0 %v13631_v42  ;;  %5624 = vmatpush.bf16.msra.mxu1 %v13595_v7 }
 0x7f5   :  { %5637 = vmatpush.bf16.msra.mxu2 %v13632_v62  ;;  %5650 = vmatpush.bf16.msra.mxu3 %v11773_v31 }
 0x7f8   :  { %5612 = vmatpush.bf16.msra.mxu0 %v13633_v51  ;;  %5625 = vmatpush.bf16.msra.mxu1 %v13597_v61 }
 0x7f9   :  { %v9712_v41 = vpop.eup %9711  ;;  %5638 = vmatpush.bf16.msra.mxu2 %v13634_v10  ;;  %5651 = vmatpush.bf16.msra.mxu3 %v11789_v29 }
 0x7fa   :  { %v5337_v48 = vmul.f32 %v9712_v41, %v5330_v8  ;;  %v13659_v41 = vld [vmem:[#allocation88_spill] sm:$0xff]  ;;  %v13660_v8 = vld [vmem:[#allocation29_spill] sm:$0xff] }
 0x7fc   :  { %v5342_v30 = vpack.c.bf16 %v5337_v48, %v5337_v48  ;;  %5613 = vmatpush.bf16.msra.mxu0 %v13635_v6  ;;  %5626 = vmatpush.bf16.msra.mxu1 %v13599_v15  ;;  %v13661_v48 = vld [vmem:[#allocation89_spill] sm:$0xff] }
 0x7fd   :  { %5639 = vmatpush.bf16.msra.mxu2 %v13636_v5  ;;  %5652 = vmatpush.bf16.msra.mxu3 %v13600_v25 }
 0x7fe   :  { %5345 = vst [vmem:[#allocation3 + $0x3c] sm:$0xf] %v5342_v30  ;;  %5422 = vmatmul.bf16.vlgmr.msrb.gmra.mxu0 %v5342_v30  ;;  %5435 = vmatmul.bf16.vlgmr.msrb.gmra.mxu1 %v5342_v30 }
 0x7ff   :  { %5448 = vmatmul.bf16.vlgmr.msrb.gmra.mxu2 %v5342_v30  ;;  %5461 = vmatmul.bf16.vlgmr.msrb.gmra.mxu3 %v5342_v30  ;;  %v13662_v30 = vld [vmem:[#allocation55_spill] sm:$0xff] }
 0x800   :  { %5614 = vmatpush.bf16.msra.mxu0 %v13637_v12  ;;  %5627 = vmatpush.bf16.msra.mxu1 %v13603_v13 }
 0x801   :  { %5640 = vmatpush.bf16.msra.mxu2 %v13587_v23  ;;  %5653 = vmatpush.bf16.msra.mxu3 %v13604_v47 }
 0x804   :  { %5615 = vmatpush.bf16.msra.mxu0 %v13638_v53  ;;  %5628 = vmatpush.bf16.msra.mxu1 %v13605_v1 }
 0x805   :  { %5641 = vmatpush.bf16.msra.mxu2 %v13588_v52  ;;  %5654 = vmatpush.bf16.msra.mxu3 %v13606_v38 }
 0x808   :  { %5616 = vmatpush.bf16.msra.mxu0 %v13639_v32  ;;  %5629 = vmatpush.bf16.msra.mxu1 %v13608_v58 }
 0x809   :  { %5642 = vmatpush.bf16.msra.mxu2 %v13590_v33  ;;  %5655 = vmatpush.bf16.msra.mxu3 %v13640_v18 }
 0x80c   :  { %5617 = vmatpush.bf16.msra.mxu0 %v13641_v11  ;;  %5630 = vmatpush.bf16.msra.mxu1 %v11863_v22 }
 0x80d   :  { %5643 = vmatpush.bf16.msra.mxu2 %v13642_v56  ;;  %5656 = vmatpush.bf16.msra.mxu3 %v11866_v46 }
 0x810   :  { %5672 = vmatpush.bf16.msrb.mxu0 %v13643_v9  ;;  %5685 = vmatpush.bf16.msrb.mxu1 %v13611_v16 }
 0x811   :  { %5698 = vmatpush.bf16.msrb.mxu2 %v13644_v36  ;;  %5711 = vmatpush.bf16.msrb.mxu3 %v13612_v4 }
 0x814   :  { %5673 = vmatpush.bf16.msrb.mxu0 %v13645_v54  ;;  %5686 = vmatpush.bf16.msrb.mxu1 %v11881_v37 }
 0x815   :  { %5699 = vmatpush.bf16.msrb.mxu2 %v13646_v50  ;;  %5712 = vmatpush.bf16.msrb.mxu3 %v13647_v55 }
 0x818   :  { %5674 = vmatpush.bf16.msrb.mxu0 %v13648_v59  ;;  %5687 = vmatpush.bf16.msrb.mxu1 %v13649_v17 }
 0x819   :  { %5700 = vmatpush.bf16.msrb.mxu2 %v13650_v60  ;;  %5713 = vmatpush.bf16.msrb.mxu3 %v13651_v57 }
 0x81c   :  { %5675 = vmatpush.bf16.msrb.mxu0 %v13652_v3  ;;  %5688 = vmatpush.bf16.msrb.mxu1 %v13653_v49 }
 0x81d   :  { %5701 = vmatpush.bf16.msrb.mxu2 %v13654_v39  ;;  %5714 = vmatpush.bf16.msrb.mxu3 %v13655_v27 }
 0x820   :  { %5676 = vmatpush.bf16.msrb.mxu0 %v13656_v35  ;;  %5689 = vmatpush.bf16.msrb.mxu1 %v13657_v40 }
 0x821   :  { %5702 = vmatpush.bf16.msrb.mxu2 %v13658_v44  ;;  %5715 = vmatpush.bf16.msrb.mxu3 %v13659_v41  ;;  %v13669_v44 = vld [vmem:[#allocation94_spill] sm:$0xff]  ;;  %v13670_v41 = vld [vmem:[#allocation77_spill] sm:$0xff] }
 0x824   :  { %5677 = vmatpush.bf16.msrb.mxu0 %v13660_v8  ;;  %5690 = vmatpush.bf16.msrb.mxu1 %v13661_v48  ;;  %v13671_v8 = vld [vmem:[#allocation95_spill] sm:$0xff]  ;;  %v13672_v48 = vld [vmem:[#allocation85_spill] sm:$0xff] }
 0x825   :  { %5703 = vmatpush.bf16.msrb.mxu2 %v13662_v30  ;;  %5716 = vmatpush.bf16.msrb.mxu3 %v13663_v20  ;;  %v5348_v30 = vunpack.c.l.bf16 %v13672_v48  ;;  %v5349_v20 = vunpack.c.h.bf16 %v13672_v48 }
 0x828   :  { %5678 = vmatpush.bf16.msrb.mxu0 %v13664_v2  ;;  %5691 = vmatpush.bf16.msrb.mxu1 %v13665_v45 }
 0x829   :  { %5704 = vmatpush.bf16.msrb.mxu2 %v13666_v43  ;;  %5717 = vmatpush.bf16.msrb.mxu3 %v13667_v0  ;;  %v13673_v0 = vld [vmem:[#allocation51_spill] sm:$0xff] }
 0x82c   :  { %5679 = vmatpush.bf16.msrb.mxu0 %v13668_v21  ;;  %5692 = vmatpush.bf16.msrb.mxu1 %v13669_v44  ;;  %v5350_v21 = vunpack.c.l.bf16 %v13673_v0 }
 0x82d   :  { %5705 = vmatpush.bf16.msrb.mxu2 %v13670_v41  ;;  %5718 = vmatpush.bf16.msrb.mxu3 %v13671_v8 }
 0x86b   :  { %v5361_v40 = vpop.f32.mrf.mxu0  ;;  %v5374_v2 = vpop.f32.mrf.mxu1 }
 0x86c   :  { %v5404_v35 = vadd.f32 %v5361_v40, %v5348_v30  ;;  %v5405_v45 = vadd.f32 %v5374_v2, %v5349_v20 }
 0x86e   :  { %v8876_v27 = vmul.f32 -1.442695, %v5404_v35  ;;  %v8877_v43 = vmul.f32 -1.442695, %v5405_v45  ;;  %v13674_v45 = vld [vmem:[#allocation34_spill] sm:$0xff]  ;;  %v5351_v35 = vunpack.c.h.bf16 %v13673_v0 }
 0x870   :  { %9713 = vpow2.f32 %v8876_v27  ;;  %v5410_v27 = vunpack.c.l.bf16 %v13674_v45 }
 0x871   :  { %9715 = vpow2.f32 %v8877_v43  ;;  %v5411_v43 = vunpack.c.h.bf16 %v13674_v45  ;;  %v5412_v45 = vunpack.c.l.bf16 %v12168_v19 }
 0x872   :  { %v5387_v39 = vpop.f32.mrf.mxu2  ;;  %v5400_v44 = vpop.f32.mrf.mxu3 }
 0x873   :  { %v5406_v49 = vadd.f32 %v5387_v39, %v5350_v21  ;;  %v5363_v41 = vpop.f32.mrf.mxu0  ;;  %v5376_v3 = vpop.f32.mrf.mxu1 }
 0x874   :  { %v5407_v41 = vadd.f32 %v5400_v44, %v5351_v35 }
 0x875   :  { %v8878_v8 = vmul.f32 -1.442695, %v5406_v49 }
 0x876   :  { %v9714_v57 = vpop.eup %9713 }
 0x877   :  { %v9716_v60 = vpop.eup %9715  ;;  %v5479_v17 = vadd.f32 1.0, %v9714_v57  ;;  %9717 = vpow2.f32 %v8878_v8 }
 0x878   :  { %v5480_v48 = vadd.f32 1.0, %v9716_v60 }
 0x879   :  { %9719 = vrcp.f32 %v5479_v17  ;;  %v5491_v55 = vand.u32 2147483647, %v5479_v17  ;;  %v5493_v44 = vand.u32 2147483648, %v5479_v17  ;;  %vm5487_vm11 = vweird.f32 %v5479_v17 }
 0x87a   :  { %9721 = vrcp.f32 %v5480_v48  ;;  %v5389_v20 = vpop.f32.mrf.mxu2  ;;  %v5402_v2 = vpop.f32.mrf.mxu3  ;;  %v5506_v50 = vand.u32 2147483647, %v5480_v48  ;;  %vm5502_vm10 = vweird.f32 %v5480_v48 }
 0x87b   :  { %v5423_v40 = vpop.f32.mrf.mxu0  ;;  %v5436_v21 = vpop.f32.mrf.mxu1  ;;  %vm5492_vm14 = vcmp.eq.f32.partialorder %v5491_v55, 8.507059e+37 }
 0x87c   :  { %v5466_v39 = vadd.f32 %v5423_v40, %v5410_v27  ;;  %v5467_v3 = vadd.f32 %v5436_v21, %v5411_v43  ;;  %vm5507_vm15 = vcmp.eq.f32.partialorder %v5506_v50, 8.507059e+37 }
 0x87d   :  { %v9718_v49 = vpop.eup %9717 }
 0x87e   :  { %v12304_v30 = vadd.f32 1.0, %v9718_v49  ;;  %v8879_v57 = vmul.f32 -1.442695, %v5466_v39  ;;  %v8880_v8 = vmul.f32 -1.442695, %v5467_v3  ;;  %v5508_v3 = vand.u32 2147483648, %v5480_v48 }
 0x87f   :  { %v9720_v60 = vpop.eup %9719 }
 0x880   :  { %v9722_v59 = vpop.eup %9721  ;;  %v5483_v20 = vmul.f32 %v9720_v60, %v5479_v17  ;;  %9723 = vrcp.f32 %v12304_v30  ;;  %vm5488_vm8 = vweird.f32 %v9720_v60  ;;  %vm5517_vm1 = vweird.f32 %v12304_v30 }
 0x881   :  { %v5498_v2 = vmul.f32 %v9722_v59, %v5480_v48  ;;  %9725 = vtanh.f32 %v5407_v41  ;;  %vm5503_vm9 = vweird.f32 %v9722_v59  ;;  %vm5489_vm12 = vmor %vm5487_vm11, %vm5488_vm8 }
 0x882   :  { %v5484_v0 = vsub.f32 1.0, %v5483_v20  ;;  %9727 = vpow2.f32 %v8879_v57  ;;  %v5449_v27 = vpop.f32.mrf.mxu2  ;;  %v5462_v43 = vpop.f32.mrf.mxu3  ;;  %vm5504_vm13 = vmor %vm5502_vm10, %vm5503_vm9 }
 0x883   :  { %v5499_v40 = vsub.f32 1.0, %v5498_v2  ;;  %9729 = vpow2.f32 %v8880_v8  ;;  %v5468_v35 = vadd.f32 %v5449_v27, %v5412_v45  ;;  %v5425_v21 = vpop.f32.mrf.mxu0  ;;  %v5438_v39 = vpop.f32.mrf.mxu1  ;;  %v5494_v2 = vor.u32 1.1754944e-38, %v5493_v44 }
 0x884   :  { %v5485_v49 = vmul.f32 %v9720_v60, %v5484_v0  ;;  %v5509_v27 = vor.u32 1.1754944e-38, %v5508_v3 }
 0x885   :  { %v5500_v37 = vmul.f32 %v9722_v59, %v5499_v40  ;;  %v8881_v41 = vmul.f32 -1.442695, %v5468_v35 }
 0x886   :  { %v9724_v54 = vpop.eup %9723  ;;  %v5486_v20 = vadd.f32 %v9720_v60, %v5485_v49 }
 0x887   :  { %v9726_v57 = vpop.eup %9725  ;;  %v5513_v4 = vmul.f32 %v9724_v54, %v12304_v30  ;;  %v5501_v8 = vadd.f32 %v9722_v59, %v5500_v37  ;;  %9731 = vpow2.f32 %v8881_v41  ;;  %vm5518_vm0 = vweird.f32 %v9724_v54 }
 0x888   :  { %v9728_v45 = vpop.eup %9727  ;;  %v5490_v0 = vsel %vm5489_vm12, %v9720_v60, %v5486_v20  ;;  %vm5519_vm2 = vmor %vm5517_vm1, %vm5518_vm0 }
 0x889   :  { %v9730_v40 = vpop.eup %9729  ;;  %v5514_v21 = vsub.f32 1.0, %v5513_v4  ;;  %v5495_v35 = vsel %vm5492_vm14, %v5494_v2, %v5490_v0  ;;  %v5505_v39 = vsel %vm5504_vm13, %v9722_v59, %v5501_v8  ;;  %v5542_v48 = vadd.f32 1.0, %v9728_v45 }
 0x88a   :  { %v5510_v49 = vsel %vm5507_vm15, %v5509_v27, %v5505_v39  ;;  %v5529_v17 = vmul.f32 %v9726_v57, %v5495_v35  ;;  %v5543_v36 = vadd.f32 1.0, %v9730_v40  ;;  %v5451_v16 = vpop.f32.mrf.mxu2  ;;  %v5464_v9 = vpop.f32.mrf.mxu3  ;;  %v5413_v4 = vunpack.c.h.bf16 %v12168_v19 }
 0x88b   :  { %v5515_v46 = vmul.f32 %v9724_v54, %v5514_v21  ;;  %v5528_v37 = vmul.f32 %v5510_v49, %v12198_v28  ;;  %9733 = vrcp.f32 %v5542_v48  ;;  %v5523_v59 = vand.u32 2147483648, %v12304_v30 }
 0x88c   :  { %9735 = vrcp.f32 %v5543_v36  ;;  %v5521_v16 = vand.u32 2147483647, %v12304_v30  ;;  %v5469_v28 = vadd.f32 %v5462_v43, %v5413_v4  ;;  %v5571_v45 = vand.u32 2147483648, %v5543_v36 }
 0x88d   :  { %v9732_v44 = vpop.eup %9731  ;;  %v12310_v3 = vadd.f32 %v5529_v17, %v5528_v37  ;;  %v5516_v55 = vadd.f32 %v9724_v54, %v5515_v46  ;;  %v5524_v57 = vor.u32 1.1754944e-38, %v5523_v59  ;;  %v5556_v27 = vand.u32 2147483648, %v5542_v48 }
 0x88e   :  { %v12312_v50 = vadd.f32 1.0, %v9732_v44  ;;  %vm5522_vm3 = vcmp.eq.f32.partialorder %v5521_v16, 8.507059e+37  ;;  %v5554_v21 = vand.u32 2147483647, %v5542_v48  ;;  %vm5550_vm6 = vweird.f32 %v5542_v48 }
 0x88f   :  { %9737 = vtanh.f32 %v12310_v3  ;;  %v5520_v20 = vsel %vm5519_vm2, %v9724_v54, %v5516_v55  ;;  %v5569_v54 = vand.u32 2147483647, %v5543_v36  ;;  %vm5565_vm7 = vweird.f32 %v5543_v36 }
 0x890   :  { %9739 = vrcp.f32 %v12312_v50  ;;  %v5525_v0 = vsel %vm5522_vm3, %v5524_v57, %v5520_v20  ;;  %v5557_v44 = vor.u32 1.1754944e-38, %v5556_v27  ;;  %v5572_v59 = vor.u32 1.1754944e-38, %v5571_v45 }
 0x891   :  { %v9734_v9 = vpop.eup %9733  ;;  %9741 = vtanh.f32 %v5469_v28  ;;  %vm5555_vm10 = vcmp.eq.f32.partialorder %v5554_v21, 8.507059e+37  ;;  %vm5570_vm11 = vcmp.eq.f32.partialorder %v5569_v54, 8.507059e+37  ;;  %vm5580_vm13 = vweird.f32 %v12312_v50  ;;  %v13678_v21 = vld [vmem:[#allocation35_spill] sm:$0xff] }
 0x892   :  { %v9736_v60 = vpop.eup %9735  ;;  %v5546_v41 = vmul.f32 %v9734_v9, %v5542_v48  ;;  %vm5551_vm4 = vweird.f32 %v9734_v9  ;;  %v13682_v54 = vld [vmem:[#allocation39_spill] sm:$0xff] }
 0x893   :  { %v5561_v2 = vmul.f32 %v9736_v60, %v5543_v36  ;;  %vm5566_vm5 = vweird.f32 %v9736_v60  ;;  %vm5552_vm8 = vmor %vm5550_vm6, %vm5551_vm4 }
 0x894   :  { %v5547_v19 = vsub.f32 1.0, %v5546_v41  ;;  %vm5567_vm9 = vmor %vm5565_vm7, %vm5566_vm5 }
 0x895   :  { %v9738_v46 = vpop.eup %9737  ;;  %v5562_v8 = vsub.f32 1.0, %v5561_v2  ;;  %v5586_v2 = vand.u32 2147483648, %v12312_v50 }
 0x896   :  { %v9740_v40 = vpop.eup %9739  ;;  %v5548_v30 = vmul.f32 %v9734_v9, %v5547_v19  ;;  %v5532_v43 = vmul.f32 %v9738_v46, %v5525_v0  ;;  %v13675_v0 = vld [vmem:[#allocation53_spill] sm:$0xff] }
 0x897   :  { %v5563_v35 = vmul.f32 %v9736_v60, %v5562_v8  ;;  %v5576_v39 = vmul.f32 %v9740_v40, %v12312_v50  ;;  %v9742_v55 = vpop.eup %9741  ;;  %vm5581_vm12 = vweird.f32 %v9740_v40  ;;  %v5587_v46 = vor.u32 1.1754944e-38, %v5586_v2  ;;  %v13698_v2 = vld [vmem:[#allocation55_spill] sm:$0xff] }
 0x898   :  { %v5549_v49 = vadd.f32 %v9734_v9, %v5548_v30  ;;  %v5596_v17 = vpack.c.bf16 %v5532_v43, %v5532_v43  ;;  %vm5582_vm14 = vmor %vm5580_vm13, %vm5581_vm12  ;;  %v13677_v30 = vld [vmem:[#allocation52_spill] sm:$0xff]  ;;  %v13679_v43 = vld [vmem:[#allocation54_spill] sm:$0xff] }
 0x899   :  { %v5577_v37 = vsub.f32 1.0, %v5576_v39  ;;  %v5564_v4 = vadd.f32 %v9736_v60, %v5563_v35  ;;  %v13680_v35 = vld [vmem:[#allocation83_spill] sm:$0xff]  ;;  %v13681_v39 = vld [vmem:[#allocation57_spill] sm:$0xff] }
 0x89a   :  { %v5553_v16 = vsel %vm5552_vm8, %v9734_v9, %v5549_v49  ;;  %5618 = vmatmul.bf16.vlgmr.msra.gmra.mxu0 %v5596_v17  ;;  %5631 = vmatmul.bf16.vlgmr.msra.gmra.mxu1 %v5596_v17  ;;  %v13683_v49 = vld [vmem:[#allocation56_spill] sm:$0xff] }
 0x89b   :  { %v5558_v28 = vsel %vm5555_vm10, %v5557_v44, %v5553_v16  ;;  %v5568_v41 = vsel %vm5567_vm9, %v9736_v60, %v5564_v4  ;;  %5644 = vmatmul.bf16.vlgmr.msra.gmra.mxu2 %v5596_v17  ;;  %5657 = vmatmul.bf16.vlgmr.msra.gmra.mxu3 %v5596_v17  ;;  %v5578_v20 = vmul.f32 %v9740_v40, %v5577_v37  ;;  %v13684_v17 = vld [vmem:[#allocation80_spill] sm:$0xff]  ;;  %v13685_v37 = vld [vmem:[#allocation71_spill] sm:$0xff]  ;;  %v13686_v44 = vld [vmem:[#allocation42_spill] sm:$0xff] }
 0x89c   :  { %v5573_v48 = vsel %vm5570_vm11, %v5572_v59, %v5568_v41  ;;  %v5592_v57 = vmul.f32 %v9742_v55, %v5558_v28  ;;  %5868 = vmatpush.bf16.msra.mxu0 %v13629_v26  ;;  %5881 = vmatpush.bf16.msra.mxu1 %v13593_v14  ;;  %v13687_v4 = vld [vmem:[#allocation76_spill] sm:$0xff]  ;;  %v13688_v55 = vld [vmem:[#allocation27_spill] sm:$0xff]  ;;  %v13691_v28 = vld [vmem:[#allocation73_spill] sm:$0xff] }
 0x89d   :  { %v5591_v36 = vmul.f32 %v5573_v48, %v12227_v63  ;;  %5894 = vmatpush.bf16.msra.mxu2 %v13630_v24  ;;  %5907 = vmatpush.bf16.msra.mxu3 %v13594_v34  ;;  %v5579_v60 = vadd.f32 %v9740_v40, %v5578_v20  ;;  %v5584_v63 = vand.u32 2147483647, %v12312_v50  ;;  %v13689_v59 = vld [vmem:[#allocation72_spill] sm:$0xff]  ;;  %v13690_v16 = vld [vmem:[#allocation47_spill] sm:$0xff]  ;;  %v13692_v41 = vld [vmem:[#allocation78_spill] sm:$0xff] }
 0x89e   :  { %v13693_v20 = vld [vmem:[#allocation75_spill] sm:$0xff]  ;;  %v13694_v48 = vld [vmem:[#allocation50_spill] sm:$0xff] }
 0x89f   :  { %v12326_v9 = vadd.f32 %v5592_v57, %v5591_v36  ;;  %v5583_v19 = vsel %vm5582_vm14, %v9740_v40, %v5579_v60  ;;  %vm5585_vm15 = vcmp.eq.f32.partialorder %v5584_v63, 8.507059e+37  ;;  %v13676_v40 = vld [vmem:[#allocation65_spill] sm:$0xff]  ;;  %v13695_v57 = vld [vmem:[#allocation88_spill] sm:$0xff]  ;;  %v13699_v63 = vld [vmem:[#allocation90_spill] sm:$0xff] }
 0x8a0   :  { %5869 = vmatpush.bf16.msra.mxu0 %v13631_v42  ;;  %5882 = vmatpush.bf16.msra.mxu1 %v13595_v7  ;;  %v5588_v45 = vsel %vm5585_vm15, %v5587_v46, %v5583_v19  ;;  %v13696_v36 = vld [vmem:[#allocation29_spill] sm:$0xff]  ;;  %v13700_v19 = vld [vmem:[#allocation26_spill] sm:$0xff]  ;;  %v13701_v46 = vld [vmem:[#allocation92_spill] sm:$0xff] }
 0x8a1   :  { %9743 = vtanh.f32 %v12326_v9  ;;  %5895 = vmatpush.bf16.msra.mxu2 %v13632_v62  ;;  %5908 = vmatpush.bf16.msra.mxu3 %v11773_v31  ;;  %v13697_v60 = vld [vmem:[#allocation89_spill] sm:$0xff] }
 0x8a4   :  { %5870 = vmatpush.bf16.msra.mxu0 %v13633_v51  ;;  %5883 = vmatpush.bf16.msra.mxu1 %v13597_v61 }
 0x8a5   :  { %5896 = vmatpush.bf16.msra.mxu2 %v13634_v10  ;;  %5909 = vmatpush.bf16.msra.mxu3 %v11789_v29 }
 0x8a7   :  { %v9744_v8 = vpop.eup %9743 }
 0x8a8   :  { %v5595_v27 = vmul.f32 %v9744_v8, %v5588_v45  ;;  %5871 = vmatpush.bf16.msra.mxu0 %v13635_v6  ;;  %5884 = vmatpush.bf16.msra.mxu1 %v13599_v15  ;;  %v13702_v8 = vld [vmem:[#allocation58_spill] sm:$0xff]  ;;  %v13703_v45 = vld [vmem:[#allocation93_spill] sm:$0xff] }
 0x8a9   :  { %5897 = vmatpush.bf16.msra.mxu2 %v13636_v5  ;;  %5910 = vmatpush.bf16.msra.mxu3 %v13600_v25 }
 0x8aa   :  { %v5600_v50 = vpack.c.bf16 %v5595_v27, %v5595_v27  ;;  %v13704_v27 = vld [vmem:[#allocation30_spill] sm:$0xff] }
 0x8ac   :  { %5680 = vmatmul.bf16.vlgmr.msrb.gmra.mxu0 %v5600_v50  ;;  %5693 = vmatmul.bf16.vlgmr.msrb.gmra.mxu1 %v5600_v50 }
 0x8ad   :  { %5706 = vmatmul.bf16.vlgmr.msrb.gmra.mxu2 %v5600_v50  ;;  %5719 = vmatmul.bf16.vlgmr.msrb.gmra.mxu3 %v5600_v50  ;;  %v13705_v50 = vld [vmem:[#allocation94_spill] sm:$0xff] }
 0x8ae   :  { %5872 = vmatpush.bf16.msra.mxu0 %v13637_v12  ;;  %5885 = vmatpush.bf16.msra.mxu1 %v13603_v13 }
 0x8af   :  { %5898 = vmatpush.bf16.msra.mxu2 %v13587_v23  ;;  %5911 = vmatpush.bf16.msra.mxu3 %v13604_v47 }
 0x8b2   :  { %5873 = vmatpush.bf16.msra.mxu0 %v13638_v53  ;;  %5886 = vmatpush.bf16.msra.mxu1 %v13605_v1 }
 0x8b3   :  { %5899 = vmatpush.bf16.msra.mxu2 %v13588_v52  ;;  %5912 = vmatpush.bf16.msra.mxu3 %v13606_v38 }
 0x8b6   :  { %5874 = vmatpush.bf16.msra.mxu0 %v13639_v32  ;;  %5887 = vmatpush.bf16.msra.mxu1 %v13608_v58 }
 0x8b7   :  { %5900 = vmatpush.bf16.msra.mxu2 %v13590_v33  ;;  %5913 = vmatpush.bf16.msra.mxu3 %v13640_v18 }
 0x8ba   :  { %5875 = vmatpush.bf16.msra.mxu0 %v13641_v11  ;;  %5888 = vmatpush.bf16.msra.mxu1 %v11863_v22 }
 0x8bb   :  { %5901 = vmatpush.bf16.msra.mxu2 %v13642_v56  ;;  %5914 = vmatpush.bf16.msra.mxu3 %v13675_v0 }
 0x8be   :  { %5930 = vmatpush.bf16.msrb.mxu0 %v13676_v40  ;;  %5943 = vmatpush.bf16.msrb.mxu1 %v13677_v30 }
 0x8bf   :  { %5956 = vmatpush.bf16.msrb.mxu2 %v13678_v21  ;;  %5969 = vmatpush.bf16.msrb.mxu3 %v13679_v43 }
 0x8c2   :  { %5931 = vmatpush.bf16.msrb.mxu0 %v13680_v35  ;;  %5944 = vmatpush.bf16.msrb.mxu1 %v13681_v39 }
 0x8c3   :  { %5957 = vmatpush.bf16.msrb.mxu2 %v13682_v54  ;;  %5970 = vmatpush.bf16.msrb.mxu3 %v13683_v49 }
 0x8c6   :  { %5932 = vmatpush.bf16.msrb.mxu0 %v13684_v17  ;;  %5945 = vmatpush.bf16.msrb.mxu1 %v13685_v37 }
 0x8c7   :  { %5958 = vmatpush.bf16.msrb.mxu2 %v13686_v44  ;;  %5971 = vmatpush.bf16.msrb.mxu3 %v13687_v4 }
 0x8ca   :  { %5933 = vmatpush.bf16.msrb.mxu0 %v13688_v55  ;;  %5946 = vmatpush.bf16.msrb.mxu1 %v13689_v59 }
 0x8cb   :  { %5959 = vmatpush.bf16.msrb.mxu2 %v13690_v16  ;;  %5972 = vmatpush.bf16.msrb.mxu3 %v13691_v28 }
 0x8ce   :  { %5934 = vmatpush.bf16.msrb.mxu0 %v13692_v41  ;;  %5947 = vmatpush.bf16.msrb.mxu1 %v13693_v20 }
 0x8cf   :  { %5960 = vmatpush.bf16.msrb.mxu2 %v13694_v48  ;;  %5973 = vmatpush.bf16.msrb.mxu3 %v13695_v57  ;;  %v13706_v57 = vld [vmem:[#allocation77_spill] sm:$0xff] }
 0x8d2   :  { %5935 = vmatpush.bf16.msrb.mxu0 %v13696_v36  ;;  %5948 = vmatpush.bf16.msrb.mxu1 %v13697_v60  ;;  %v13707_v36 = vld [vmem:[#allocation95_spill] sm:$0xff]  ;;  %v13708_v60 = vld [vmem:[#allocation66_spill] sm:$0xff] }
 0x8d3   :  { %5961 = vmatpush.bf16.msrb.mxu2 %v13698_v2  ;;  %5974 = vmatpush.bf16.msrb.mxu3 %v13699_v63  ;;  %v5606_v2 = vunpack.c.l.bf16 %v13708_v60  ;;  %v5607_v63 = vunpack.c.h.bf16 %v13708_v60 }
 0x8d6   :  { %5936 = vmatpush.bf16.msrb.mxu0 %v13700_v19  ;;  %5949 = vmatpush.bf16.msrb.mxu1 %v13701_v46 }
 0x8d7   :  { %5962 = vmatpush.bf16.msrb.mxu2 %v13702_v8  ;;  %5975 = vmatpush.bf16.msrb.mxu3 %v13703_v45  ;;  %v13709_v45 = vld [vmem:[#allocation70_spill] sm:$0xff] }
 0x8da   :  { %5937 = vmatpush.bf16.msrb.mxu0 %v13704_v27  ;;  %5950 = vmatpush.bf16.msrb.mxu1 %v13705_v50  ;;  %v5608_v27 = vunpack.c.l.bf16 %v13709_v45 }
 0x8db   :  { %5963 = vmatpush.bf16.msrb.mxu2 %v13706_v57  ;;  %5976 = vmatpush.bf16.msrb.mxu3 %v13707_v36 }
 0x917   :  { %v5619_v48 = vpop.f32.mrf.mxu0  ;;  %v5632_v19 = vpop.f32.mrf.mxu1 }
 0x918   :  { %v5662_v20 = vadd.f32 %v5619_v48, %v5606_v2  ;;  %v5663_v46 = vadd.f32 %v5632_v19, %v5607_v63  ;;  %v13710_v2 = vld [vmem:[#allocation40_spill] sm:$0xff] }
 0x919   :  { %v5668_v63 = vunpack.c.l.bf16 %v13710_v2  ;;  %v5669_v19 = vunpack.c.h.bf16 %v13710_v2 }
 0x91a   :  { %v8882_v41 = vmul.f32 -1.442695, %v5662_v20  ;;  %v8883_v8 = vmul.f32 -1.442695, %v5663_v46 }
 0x91c   :  { %9745 = vpow2.f32 %v8882_v41  ;;  %v5609_v41 = vunpack.c.h.bf16 %v13709_v45 }
 0x91d   :  { %9747 = vpow2.f32 %v8883_v8 }
 0x91e   :  { %v5645_v28 = vpop.f32.mrf.mxu2  ;;  %v5658_v50 = vpop.f32.mrf.mxu3 }
 0x91f   :  { %v5664_v16 = vadd.f32 %v5645_v28, %v5608_v27  ;;  %v5621_v57 = vpop.f32.mrf.mxu0  ;;  %v5634_v59 = vpop.f32.mrf.mxu1 }
 0x921   :  { %v8884_v36 = vmul.f32 -1.442695, %v5664_v16  ;;  %v5665_v16 = vadd.f32 %v5658_v50, %v5609_v41 }
 0x922   :  { %v9746_v55 = vpop.eup %9745 }
 0x923   :  { %v9748_v4 = vpop.eup %9747  ;;  %v5737_v44 = vadd.f32 1.0, %v9746_v55  ;;  %9749 = vpow2.f32 %v8884_v36 }
 0x924   :  { %v5738_v60 = vadd.f32 1.0, %v9748_v4 }
 0x925   :  { %9751 = vrcp.f32 %v5737_v44  ;;  %v5749_v39 = vand.u32 2147483647, %v5737_v44  ;;  %vm5745_vm3 = vweird.f32 %v5737_v44 }
 0x926   :  { %9753 = vrcp.f32 %v5738_v60  ;;  %v5647_v48 = vpop.f32.mrf.mxu2  ;;  %v5660_v20 = vpop.f32.mrf.mxu3  ;;  %v5766_v54 = vand.u32 2147483648, %v5738_v60  ;;  %v5764_v50 = vand.u32 2147483647, %v5738_v60  ;;  %vm5760_vm2 = vweird.f32 %v5738_v60 }
 0x927   :  { %v13711_v20 = vld [vmem:[#allocation46_spill] sm:$0xff]  ;;  %vm5750_vm6 = vcmp.eq.f32.partialorder %v5749_v39, 8.507059e+37 }
 0x928   :  { %v5670_v45 = vunpack.c.l.bf16 %v13711_v20  ;;  %vm5765_vm7 = vcmp.eq.f32.partialorder %v5764_v50, 8.507059e+37 }
 0x929   :  { %v9750_v46 = vpop.eup %9749  ;;  %v5681_v28 = vpop.f32.mrf.mxu0 }
 0x92a   :  { %v5694_v57 = vpop.f32.mrf.mxu1  ;;  %v12398_v59 = vadd.f32 1.0, %v9750_v46  ;;  %v5724_v8 = vadd.f32 %v5681_v28, %v5668_v63  ;;  %v5751_v46 = vand.u32 2147483648, %v5737_v44 }
 0x92b   :  { %v5725_v55 = vadd.f32 %v5694_v57, %v5669_v19  ;;  %v9752_v36 = vpop.eup %9751 }
 0x92c   :  { %v9754_v4 = vpop.eup %9753  ;;  %v5741_v27 = vmul.f32 %v9752_v36, %v5737_v44  ;;  %9755 = vrcp.f32 %v12398_v59  ;;  %v8885_v17 = vmul.f32 -1.442695, %v5724_v8  ;;  %vm5746_vm0 = vweird.f32 %v9752_v36 }
 0x92d   :  { %v5756_v48 = vmul.f32 %v9754_v4, %v5738_v60  ;;  %9757 = vtanh.f32 %v5665_v16  ;;  %v8886_v2 = vmul.f32 -1.442695, %v5725_v55  ;;  %vm5761_vm1 = vweird.f32 %v9754_v4  ;;  %vm5747_vm4 = vmor %vm5745_vm3, %vm5746_vm0 }
 0x92e   :  { %v5742_v37 = vsub.f32 1.0, %v5741_v27  ;;  %9759 = vpow2.f32 %v8885_v17  ;;  %vm5762_vm5 = vmor %vm5760_vm2, %vm5761_vm1  ;;  %v5781_v39 = vand.u32 2147483648, %v12398_v59  ;;  %vm5775_vm9 = vweird.f32 %v12398_v59 }
 0x92f   :  { %v5757_v49 = vsub.f32 1.0, %v5756_v48  ;;  %9761 = vpow2.f32 %v8886_v2 }
 0x930   :  { %v5743_v35 = vmul.f32 %v9752_v36, %v5742_v37  ;;  %v5707_v41 = vpop.f32.mrf.mxu2  ;;  %v5720_v63 = vpop.f32.mrf.mxu3  ;;  %v5752_v37 = vor.u32 1.1754944e-38, %v5751_v46 }
 0x931   :  { %v5758_v19 = vmul.f32 %v9754_v4, %v5757_v49  ;;  %v5726_v28 = vadd.f32 %v5707_v41, %v5670_v45  ;;  %v5683_v57 = vpop.f32.mrf.mxu0  ;;  %v5767_v49 = vor.u32 1.1754944e-38, %v5766_v54 }
 0x932   :  { %v5696_v43 = vpop.f32.mrf.mxu1  ;;  %v9756_v27 = vpop.eup %9755  ;;  %v5744_v16 = vadd.f32 %v9752_v36, %v5743_v35 }
 0x933   :  { %v5771_v8 = vmul.f32 %v9756_v27, %v12398_v59  ;;  %v5759_v55 = vadd.f32 %v9754_v4, %v5758_v19  ;;  %v8887_v48 = vmul.f32 -1.442695, %v5726_v28  ;;  %v9758_v17 = vpop.eup %9757  ;;  %vm5776_vm8 = vweird.f32 %v9756_v27 }
 0x934   :  { %v5748_v21 = vsel %vm5747_vm4, %v9752_v36, %v5744_v16  ;;  %v9760_v35 = vpop.eup %9759  ;;  %vm5777_vm10 = vmor %vm5775_vm9, %vm5776_vm8  ;;  %v5782_v16 = vor.u32 1.1754944e-38, %v5781_v39 }
 0x935   :  { %v5772_v45 = vsub.f32 1.0, %v5771_v8  ;;  %v5753_v43 = vsel %vm5750_vm6, %v5752_v37, %v5748_v21  ;;  %v5763_v2 = vsel %vm5762_vm5, %v9754_v4, %v5759_v55  ;;  %9763 = vpow2.f32 %v8887_v48  ;;  %v9762_v41 = vpop.eup %9761 }
 0x936   :  { %v5768_v44 = vsel %vm5765_vm7, %v5767_v49, %v5763_v2  ;;  %v5787_v60 = vmul.f32 %v9758_v17, %v5753_v43  ;;  %v5800_v19 = vadd.f32 1.0, %v9760_v35  ;;  %v12406_v28 = vadd.f32 1.0, %v9762_v41 }
 0x937   :  { %v5773_v57 = vmul.f32 %v9756_v27, %v5772_v45  ;;  %v5786_v46 = vmul.f32 %v5768_v44, %v12310_v3  ;;  %v5779_v3 = vand.u32 2147483647, %v12398_v59 }
 0x938   :  { %v5709_v30 = vpop.f32.mrf.mxu2  ;;  %v5722_v40 = vpop.f32.mrf.mxu3  ;;  %9765 = vrcp.f32 %v5800_v19  ;;  %v5812_v2 = vand.u32 2147483647, %v5800_v19  ;;  %v5814_v35 = vand.u32 2147483648, %v5800_v19  ;;  %v5829_v44 = vand.u32 2147483648, %v12406_v28 }
 0x939   :  { %v12408_v54 = vadd.f32 %v5787_v60, %v5786_v46  ;;  %9767 = vrcp.f32 %v12406_v28  ;;  %v5774_v36 = vadd.f32 %v9756_v27, %v5773_v57  ;;  %v5671_v40 = vunpack.c.h.bf16 %v13711_v20 }
 0x93a   :  { %vm5780_vm11 = vcmp.eq.f32.partialorder %v5779_v3, 8.507059e+37  ;;  %v5827_v57 = vand.u32 2147483647, %v12406_v28  ;;  %vm5808_vm14 = vweird.f32 %v5800_v19  ;;  %vm5823_vm15 = vweird.f32 %v12406_v28 }
 0x93b   :  { %v9764_v21 = vpop.eup %9763  ;;  %9769 = vtanh.f32 %v12408_v54  ;;  %v5778_v30 = vsel %vm5777_vm10, %v9756_v27, %v5774_v36  ;;  %v5727_v8 = vadd.f32 %v5720_v63, %v5671_v40  ;;  %v5815_v39 = vor.u32 1.1754944e-38, %v5814_v35  ;;  %v13712_v35 = vld [vmem:[#allocation65_spill] sm:$0xff] }
 0x93c   :  { %v12415_v4 = vadd.f32 1.0, %v9764_v21  ;;  %v5783_v49 = vsel %vm5780_vm11, %v5782_v16, %v5778_v30  ;;  %v5830_v3 = vor.u32 1.1754944e-38, %v5829_v44  ;;  %vm5813_vm2 = vcmp.eq.f32.partialorder %v5812_v2, 8.507059e+37  ;;  %v13714_v44 = vld [vmem:[#allocation35_spill] sm:$0xff] }
 0x93d   :  { %vm5828_vm3 = vcmp.eq.f32.partialorder %v5827_v57, 8.507059e+37  ;;  %v13719_v57 = vld [vmem:[#allocation56_spill] sm:$0xff] }
 0x93e   :  { %9771 = vrcp.f32 %v12415_v4  ;;  %v9766_v50 = vpop.eup %9765  ;;  %vm5838_vm5 = vweird.f32 %v12415_v4 }
 0x93f   :  { %v9768_v37 = vpop.eup %9767  ;;  %v5804_v55 = vmul.f32 %v9766_v50, %v5800_v19  ;;  %9773 = vtanh.f32 %v5727_v8  ;;  %vm5809_vm12 = vweird.f32 %v9766_v50 }
 0x940   :  { %v5819_v17 = vmul.f32 %v9768_v37, %v12406_v28  ;;  %vm5824_vm13 = vweird.f32 %v9768_v37  ;;  %vm5810_vm0 = vmor %vm5808_vm14, %vm5809_vm12 }
 0x941   :  { %v9770_v48 = vpop.eup %9769  ;;  %v5805_v45 = vsub.f32 1.0, %v5804_v55  ;;  %vm5825_vm1 = vmor %vm5823_vm15, %vm5824_vm13 }
 0x942   :  { %v5790_v59 = vmul.f32 %v9770_v48, %v5783_v49  ;;  %v5820_v43 = vsub.f32 1.0, %v5819_v17  ;;  %v5844_v17 = vand.u32 2147483648, %v12415_v4 }
 0x943   :  { %v5806_v27 = vmul.f32 %v9766_v50, %v5805_v45 }
 0x944   :  { %v9772_v20 = vpop.eup %9771  ;;  %v5854_v60 = vpack.c.bf16 %v5790_v59, %v5790_v59  ;;  %v5821_v63 = vmul.f32 %v9768_v37, %v5820_v43  ;;  %v5845_v45 = vor.u32 1.1754944e-38, %v5844_v17  ;;  %v13734_v17 = vld [vmem:[#allocation55_spill] sm:$0xff] }
 0x945   :  { %v5834_v41 = vmul.f32 %v9772_v20, %v12415_v4  ;;  %v5807_v46 = vadd.f32 %v9766_v50, %v5806_v27  ;;  %v9774_v30 = vpop.eup %9773  ;;  %vm5839_vm4 = vweird.f32 %v9772_v20  ;;  %v13715_v27 = vld [vmem:[#allocation54_spill] sm:$0xff] }
 0x946   :  { %5876 = vmatmul.bf16.vlgmr.msra.gmra.mxu0 %v5854_v60  ;;  %5889 = vmatmul.bf16.vlgmr.msra.gmra.mxu1 %v5854_v60  ;;  %v5822_v36 = vadd.f32 %v9768_v37, %v5821_v63  ;;  %vm5840_vm6 = vmor %vm5838_vm5, %vm5839_vm4  ;;  %v13717_v63 = vld [vmem:[#allocation57_spill] sm:$0xff] }
 0x947   :  { %v5835_v21 = vsub.f32 1.0, %v5834_v41  ;;  %5902 = vmatmul.bf16.vlgmr.msra.gmra.mxu2 %v5854_v60  ;;  %5915 = vmatmul.bf16.vlgmr.msra.gmra.mxu3 %v5854_v60  ;;  %v5811_v40 = vsel %vm5810_vm0, %v9766_v50, %v5807_v46  ;;  %v13716_v60 = vld [vmem:[#allocation83_spill] sm:$0xff]  ;;  %v13720_v46 = vld [vmem:[#allocation80_spill] sm:$0xff] }
 0x948   :  { %6126 = vmatpush.bf16.msra.mxu0 %v13629_v26  ;;  %6139 = vmatpush.bf16.msra.mxu1 %v13593_v14  ;;  %v5816_v19 = vsel %vm5813_vm2, %v5815_v39, %v5811_v40  ;;  %v5826_v16 = vsel %vm5825_vm1, %v9768_v37, %v5822_v36  ;;  %v13718_v41 = vld [vmem:[#allocation39_spill] sm:$0xff]  ;;  %v13722_v39 = vld [vmem:[#allocation42_spill] sm:$0xff]  ;;  %v13723_v36 = vld [vmem:[#allocation76_spill] sm:$0xff] }
 0x949   :  { %6152 = vmatpush.bf16.msra.mxu2 %v13630_v24  ;;  %6165 = vmatpush.bf16.msra.mxu3 %v13594_v34  ;;  %v5836_v28 = vmul.f32 %v9772_v20, %v5835_v21  ;;  %v5831_v8 = vsel %vm5828_vm3, %v5830_v3, %v5826_v16  ;;  %v5850_v55 = vmul.f32 %v9774_v30, %v5816_v19  ;;  %v13721_v21 = vld [vmem:[#allocation71_spill] sm:$0xff]  ;;  %v13725_v40 = vld [vmem:[#allocation72_spill] sm:$0xff]  ;;  %v13727_v19 = vld [vmem:[#allocation73_spill] sm:$0xff] }
 0x94a   :  { %v5849_v48 = vmul.f32 %v5831_v8, %v12326_v9  ;;  %v5842_v9 = vand.u32 2147483647, %v12415_v4  ;;  %v13724_v3 = vld [vmem:[#allocation27_spill] sm:$0xff]  ;;  %v13728_v16 = vld [vmem:[#allocation78_spill] sm:$0xff] }
 0x94b   :  { %v5837_v37 = vadd.f32 %v9772_v20, %v5836_v28  ;;  %v13726_v30 = vld [vmem:[#allocation47_spill] sm:$0xff]  ;;  %v13730_v8 = vld [vmem:[#allocation50_spill] sm:$0xff] }
 0x94c   :  { %6127 = vmatpush.bf16.msra.mxu0 %v13631_v42  ;;  %6140 = vmatpush.bf16.msra.mxu1 %v13595_v7  ;;  %v12431_v50 = vadd.f32 %v5850_v55, %v5849_v48  ;;  %vm5843_vm7 = vcmp.eq.f32.partialorder %v5842_v9, 8.507059e+37  ;;  %v13729_v28 = vld [vmem:[#allocation75_spill] sm:$0xff]  ;;  %v13731_v55 = vld [vmem:[#allocation88_spill] sm:$0xff]  ;;  %v13732_v48 = vld [vmem:[#allocation29_spill] sm:$0xff] }
 0x94d   :  { %6153 = vmatpush.bf16.msra.mxu2 %v13632_v62  ;;  %6166 = vmatpush.bf16.msra.mxu3 %v11773_v31  ;;  %v5841_v49 = vsel %vm5840_vm6, %v9772_v20, %v5837_v37  ;;  %v13713_v20 = vld [vmem:[#allocation52_spill] sm:$0xff]  ;;  %v13733_v37 = vld [vmem:[#allocation89_spill] sm:$0xff]  ;;  %v13735_v9 = vld [vmem:[#allocation90_spill] sm:$0xff] }
 0x94e   :  { %9775 = vtanh.f32 %v12431_v50  ;;  %v5846_v43 = vsel %vm5843_vm7, %v5845_v45, %v5841_v49  ;;  %v13736_v49 = vld [vmem:[#allocation26_spill] sm:$0xff]  ;;  %v13737_v45 = vld [vmem:[#allocation92_spill] sm:$0xff] }
 0x950   :  { %6128 = vmatpush.bf16.msra.mxu0 %v13633_v51  ;;  %6141 = vmatpush.bf16.msra.mxu1 %v13597_v61 }
 0x951   :  { %6154 = vmatpush.bf16.msra.mxu2 %v13634_v10  ;;  %6167 = vmatpush.bf16.msra.mxu3 %v11789_v29 }
 0x954   :  { %6129 = vmatpush.bf16.msra.mxu0 %v13635_v6  ;;  %6142 = vmatpush.bf16.msra.mxu1 %v13599_v15  ;;  %v9776_v59 = vpop.eup %9775 }
 0x955   :  { %6155 = vmatpush.bf16.msra.mxu2 %v13636_v5  ;;  %6168 = vmatpush.bf16.msra.mxu3 %v13600_v25  ;;  %v5853_v4 = vmul.f32 %v9776_v59, %v5846_v43  ;;  %v13738_v59 = vld [vmem:[#allocation58_spill] sm:$0xff]  ;;  %v13739_v43 = vld [vmem:[#allocation93_spill] sm:$0xff] }
 0x957   :  { %v5858_v2 = vpack.c.bf16 %v5853_v4, %v5853_v4  ;;  %v13740_v4 = vld [vmem:[#allocation30_spill] sm:$0xff] }
 0x958   :  { %6130 = vmatpush.bf16.msra.mxu0 %v13637_v12  ;;  %6143 = vmatpush.bf16.msra.mxu1 %v13603_v13 }
 0x959   :  { %6156 = vmatpush.bf16.msra.mxu2 %v13587_v23  ;;  %6169 = vmatpush.bf16.msra.mxu3 %v13604_v47 }
 0x95a   :  { %5938 = vmatmul.bf16.vlgmr.msrb.gmra.mxu0 %v5858_v2  ;;  %5951 = vmatmul.bf16.vlgmr.msrb.gmra.mxu1 %v5858_v2 }
 0x95b   :  { %5964 = vmatmul.bf16.vlgmr.msrb.gmra.mxu2 %v5858_v2  ;;  %5977 = vmatmul.bf16.vlgmr.msrb.gmra.mxu3 %v5858_v2  ;;  %v13741_v2 = vld [vmem:[#allocation94_spill] sm:$0xff] }
 0x95c   :  { %6131 = vmatpush.bf16.msra.mxu0 %v13638_v53  ;;  %6144 = vmatpush.bf16.msra.mxu1 %v13605_v1 }
 0x95d   :  { %6157 = vmatpush.bf16.msra.mxu2 %v13588_v52  ;;  %6170 = vmatpush.bf16.msra.mxu3 %v13606_v38 }
 0x960   :  { %6132 = vmatpush.bf16.msra.mxu0 %v13639_v32  ;;  %6145 = vmatpush.bf16.msra.mxu1 %v13608_v58 }
 0x961   :  { %6158 = vmatpush.bf16.msra.mxu2 %v13590_v33  ;;  %6171 = vmatpush.bf16.msra.mxu3 %v13640_v18 }
 0x964   :  { %6133 = vmatpush.bf16.msra.mxu0 %v13641_v11  ;;  %6146 = vmatpush.bf16.msra.mxu1 %v11863_v22 }
 0x965   :  { %6159 = vmatpush.bf16.msra.mxu2 %v13642_v56  ;;  %6172 = vmatpush.bf16.msra.mxu3 %v13675_v0 }
 0x968   :  { %6188 = vmatpush.bf16.msrb.mxu0 %v13712_v35  ;;  %6201 = vmatpush.bf16.msrb.mxu1 %v13713_v20 }
 0x969   :  { %6214 = vmatpush.bf16.msrb.mxu2 %v13714_v44  ;;  %6227 = vmatpush.bf16.msrb.mxu3 %v13715_v27 }
 0x96c   :  { %6189 = vmatpush.bf16.msrb.mxu0 %v13716_v60  ;;  %6202 = vmatpush.bf16.msrb.mxu1 %v13717_v63  ;;  %v13747_v60 = vld [vmem:[#allocation45_spill] sm:$0xff] }
 0x96d   :  { %6215 = vmatpush.bf16.msrb.mxu2 %v13718_v41  ;;  %6228 = vmatpush.bf16.msrb.mxu3 %v13719_v57  ;;  %v5928_v27 = vunpack.c.l.bf16 %v13747_v60 }
 0x970   :  { %6190 = vmatpush.bf16.msrb.mxu0 %v13720_v46  ;;  %6203 = vmatpush.bf16.msrb.mxu1 %v13721_v21 }
 0x971   :  { %6216 = vmatpush.bf16.msrb.mxu2 %v13722_v39  ;;  %6229 = vmatpush.bf16.msrb.mxu3 %v13723_v36 }
 0x974   :  { %6191 = vmatpush.bf16.msrb.mxu0 %v13724_v3  ;;  %6204 = vmatpush.bf16.msrb.mxu1 %v13725_v40 }
 0x975   :  { %6217 = vmatpush.bf16.msrb.mxu2 %v13726_v30  ;;  %6230 = vmatpush.bf16.msrb.mxu3 %v13727_v19 }
 0x978   :  { %6192 = vmatpush.bf16.msrb.mxu0 %v13728_v16  ;;  %6205 = vmatpush.bf16.msrb.mxu1 %v13729_v28 }
 0x979   :  { %6218 = vmatpush.bf16.msrb.mxu2 %v13730_v8  ;;  %6231 = vmatpush.bf16.msrb.mxu3 %v13731_v55  ;;  %v13742_v55 = vld [vmem:[#allocation77_spill] sm:$0xff] }
 0x97c   :  { %6193 = vmatpush.bf16.msrb.mxu0 %v13732_v48  ;;  %6206 = vmatpush.bf16.msrb.mxu1 %v13733_v37  ;;  %v13743_v48 = vld [vmem:[#allocation95_spill] sm:$0xff]  ;;  %v13744_v37 = vld [vmem:[#allocation68_spill] sm:$0xff] }
 0x97d   :  { %6219 = vmatpush.bf16.msrb.mxu2 %v13734_v17  ;;  %6232 = vmatpush.bf16.msrb.mxu3 %v13735_v9  ;;  %v5864_v17 = vunpack.c.l.bf16 %v13744_v37  ;;  %v5865_v9 = vunpack.c.h.bf16 %v13744_v37 }
 0x980   :  { %6194 = vmatpush.bf16.msrb.mxu0 %v13736_v49  ;;  %6207 = vmatpush.bf16.msrb.mxu1 %v13737_v45 }
 0x981   :  { %6220 = vmatpush.bf16.msrb.mxu2 %v13738_v59  ;;  %6233 = vmatpush.bf16.msrb.mxu3 %v13739_v43  ;;  %v13745_v43 = vld [vmem:[#allocation74_spill] sm:$0xff] }
 0x984   :  { %6195 = vmatpush.bf16.msrb.mxu0 %v13740_v4  ;;  %6208 = vmatpush.bf16.msrb.mxu1 %v13741_v2  ;;  %v5866_v4 = vunpack.c.l.bf16 %v13745_v43 }
 0x985   :  { %6221 = vmatpush.bf16.msrb.mxu2 %v13742_v55  ;;  %6234 = vmatpush.bf16.msrb.mxu3 %v13743_v48 }
 0x9c3   :  { %v5877_v8 = vpop.f32.mrf.mxu0  ;;  %v5890_v49 = vpop.f32.mrf.mxu1 }
 0x9c4   :  { %v5920_v28 = vadd.f32 %v5877_v8, %v5864_v17  ;;  %v5921_v45 = vadd.f32 %v5890_v49, %v5865_v9 }
 0x9c6   :  { %v8888_v16 = vmul.f32 -1.442695, %v5920_v28  ;;  %v8889_v59 = vmul.f32 -1.442695, %v5921_v45 }
 0x9c8   :  { %9777 = vpow2.f32 %v8888_v16  ;;  %v5867_v16 = vunpack.c.h.bf16 %v13745_v43 }
 0x9c9   :  { %9779 = vpow2.f32 %v8889_v59 }
 0x9ca   :  { %v5903_v19 = vpop.f32.mrf.mxu2  ;;  %v5916_v2 = vpop.f32.mrf.mxu3 }
 0x9cb   :  { %v5922_v30 = vadd.f32 %v5903_v19, %v5866_v4  ;;  %v5879_v55 = vpop.f32.mrf.mxu0  ;;  %v5892_v40 = vpop.f32.mrf.mxu1  ;;  %v5923_v49 = vadd.f32 %v5916_v2, %v5867_v16 }
 0x9cd   :  { %v8890_v48 = vmul.f32 -1.442695, %v5922_v30 }
 0x9ce   :  { %v9778_v3 = vpop.eup %9777 }
 0x9cf   :  { %v9780_v36 = vpop.eup %9779  ;;  %v5995_v39 = vadd.f32 1.0, %v9778_v3  ;;  %9781 = vpow2.f32 %v8890_v48  ;;  %v13746_v3 = vld [vmem:[#allocation33_spill] sm:$0xff] }
 0x9d0   :  { %v5996_v37 = vadd.f32 1.0, %v9780_v36  ;;  %v5926_v48 = vunpack.c.l.bf16 %v13746_v3  ;;  %v5927_v36 = vunpack.c.h.bf16 %v13746_v3 }
 0x9d1   :  { %9783 = vrcp.f32 %v5995_v39  ;;  %v6007_v21 = vand.u32 2147483647, %v5995_v39  ;;  %v6009_v2 = vand.u32 2147483648, %v5995_v39  ;;  %vm6003_vm11 = vweird.f32 %v5995_v39 }
 0x9d2   :  { %9785 = vrcp.f32 %v5996_v37  ;;  %v5905_v8 = vpop.f32.mrf.mxu2  ;;  %v5918_v28 = vpop.f32.mrf.mxu3  ;;  %v6022_v63 = vand.u32 2147483647, %v5996_v37  ;;  %vm6018_vm10 = vweird.f32 %v5996_v37 }
 0x9d3   :  { %vm6008_vm14 = vcmp.eq.f32.partialorder %v6007_v21, 8.507059e+37 }
 0x9d4   :  { %vm6023_vm15 = vcmp.eq.f32.partialorder %v6022_v63, 8.507059e+37 }
 0x9d5   :  { %v9782_v17 = vpop.eup %9781 }
 0x9d6   :  { %v12499_v9 = vadd.f32 1.0, %v9782_v17  ;;  %v6024_v17 = vand.u32 2147483648, %v5996_v37 }
 0x9d7   :  { %v9784_v45 = vpop.eup %9783  ;;  %v5939_v19 = vpop.f32.mrf.mxu0 }
 0x9d8   :  { %v5952_v55 = vpop.f32.mrf.mxu1  ;;  %v9786_v40 = vpop.eup %9785  ;;  %v5999_v30 = vmul.f32 %v9784_v45, %v5995_v39  ;;  %9787 = vrcp.f32 %v12499_v9  ;;  %v5982_v8 = vadd.f32 %v5939_v19, %v5926_v48  ;;  %vm6004_vm8 = vweird.f32 %v9784_v45 }
 0x9d9   :  { %v6014_v59 = vmul.f32 %v9786_v40, %v5996_v37  ;;  %9789 = vtanh.f32 %v5923_v49  ;;  %v5983_v43 = vadd.f32 %v5952_v55, %v5927_v36  ;;  %vm6019_vm9 = vweird.f32 %v9786_v40  ;;  %vm6005_vm12 = vmor %vm6003_vm11, %vm6004_vm8 }
 0x9da   :  { %v6000_v4 = vsub.f32 1.0, %v5999_v30  ;;  %v8891_v46 = vmul.f32 -1.442695, %v5982_v8  ;;  %v6010_v30 = vor.u32 1.1754944e-38, %v6009_v2  ;;  %vm6020_vm13 = vmor %vm6018_vm10, %vm6019_vm9  ;;  %v6025_v8 = vor.u32 1.1754944e-38, %v6024_v17 }
 0x9db   :  { %v6015_v28 = vsub.f32 1.0, %v6014_v59  ;;  %v8892_v57 = vmul.f32 -1.442695, %v5983_v43  ;;  %v6039_v63 = vand.u32 2147483648, %v12499_v9  ;;  %vm6033_vm1 = vweird.f32 %v12499_v9 }
 0x9dc   :  { %v6001_v16 = vmul.f32 %v9784_v45, %v6000_v4  ;;  %9791 = vpow2.f32 %v8891_v46 }
 0x9dd   :  { %v6016_v41 = vmul.f32 %v9786_v40, %v6015_v28  ;;  %9793 = vpow2.f32 %v8892_v57 }
 0x9de   :  { %v9788_v44 = vpop.eup %9787  ;;  %v6002_v3 = vadd.f32 %v9784_v45, %v6001_v16  ;;  %v5965_v49 = vpop.f32.mrf.mxu2 }
 0x9df   :  { %v5978_v19 = vpop.f32.mrf.mxu3  ;;  %v6029_v55 = vmul.f32 %v9788_v44, %v12499_v9  ;;  %v6017_v48 = vadd.f32 %v9786_v40, %v6016_v41  ;;  %v5941_v36 = vpop.f32.mrf.mxu0  ;;  %v5984_v37 = vadd.f32 %v5965_v49, %v5928_v27  ;;  %vm6034_vm0 = vweird.f32 %v9788_v44 }
 0x9e0   :  { %v5954_v59 = vpop.f32.mrf.mxu1  ;;  %v9790_v4 = vpop.eup %9789  ;;  %v6006_v43 = vsel %vm6005_vm12, %v9784_v45, %v6002_v3  ;;  %vm6035_vm2 = vmor %vm6033_vm1, %vm6034_vm0  ;;  %v5929_v49 = vunpack.c.h.bf16 %v13747_v60 }
 0x9e1   :  { %v6030_v39 = vsub.f32 1.0, %v6029_v55  ;;  %v6011_v46 = vsel %vm6008_vm14, %v6010_v30, %v6006_v43  ;;  %v6021_v28 = vsel %vm6020_vm13, %v9786_v40, %v6017_v48  ;;  %v8893_v56 = vmul.f32 -1.442695, %v5984_v37 }
 0x9e2   :  { %v6026_v16 = vsel %vm6023_vm15, %v6025_v8, %v6021_v28  ;;  %v6045_v0 = vmul.f32 %v9790_v4, %v6011_v46  ;;  %v9792_v57 = vpop.eup %9791  ;;  %v6040_v40 = vor.u32 1.1754944e-38, %v6039_v63  ;;  %v5985_v48 = vadd.f32 %v5978_v19, %v5929_v49 }
 0x9e3   :  { %v6031_v20 = vmul.f32 %v9788_v44, %v6030_v39  ;;  %v6044_v41 = vmul.f32 %v6026_v16, %v12408_v54  ;;  %9795 = vpow2.f32 %v8893_v56  ;;  %v9794_v2 = vpop.eup %9793  ;;  %v6058_v59 = vadd.f32 1.0, %v9792_v57 }
 0x9e4   :  { %v12511_v45 = vadd.f32 1.0, %v9794_v2  ;;  %v6037_v54 = vand.u32 2147483647, %v12499_v9 }
 0x9e5   :  { %v12509_v36 = vadd.f32 %v6045_v0, %v6044_v41  ;;  %v6032_v17 = vadd.f32 %v9788_v44, %v6031_v20  ;;  %v6072_v46 = vand.u32 2147483648, %v6058_v59  ;;  %v6070_v41 = vand.u32 2147483647, %v6058_v59 }
 0x9e6   :  { %v5967_v27 = vpop.f32.mrf.mxu2  ;;  %vm6038_vm3 = vcmp.eq.f32.partialorder %v6037_v54, 8.507059e+37  ;;  %v6087_v28 = vand.u32 2147483648, %v12511_v45  ;;  %v6085_v2 = vand.u32 2147483647, %v12511_v45  ;;  %vm6066_vm6 = vweird.f32 %v6058_v59 }
 0x9e7   :  { %v5980_v21 = vpop.f32.mrf.mxu3  ;;  %9797 = vtanh.f32 %v12509_v36  ;;  %v6036_v0 = vsel %vm6035_vm2, %v9788_v44, %v6032_v17  ;;  %vm6081_vm7 = vweird.f32 %v12511_v45  ;;  %v6073_v17 = vor.u32 1.1754944e-38, %v6072_v46  ;;  %v13749_v46 = vld [vmem:[#allocation81_spill] sm:$0xff] }
 0x9e8   :  { %9799 = vrcp.f32 %v6058_v59  ;;  %v6041_v55 = vsel %vm6038_vm3, %v6040_v40, %v6036_v0  ;;  %v6088_v54 = vor.u32 1.1754944e-38, %v6087_v28  ;;  %vm6071_vm10 = vcmp.eq.f32.partialorder %v6070_v41, 8.507059e+37  ;;  %v13751_v28 = vld [vmem:[#allocation35_spill] sm:$0xff] }
 0x9e9   :  { %9801 = vrcp.f32 %v12511_v45  ;;  %v9796_v56 = vpop.eup %9795  ;;  %vm6086_vm11 = vcmp.eq.f32.partialorder %v6085_v2, 8.507059e+37  ;;  %v13753_v41 = vld [vmem:[#allocation83_spill] sm:$0xff]  ;;  %v13756_v2 = vld [vmem:[#allocation56_spill] sm:$0xff] }
 0x9ea   :  { %v12518_v3 = vadd.f32 1.0, %v9796_v56 }
 0x9ec   :  { %9803 = vrcp.f32 %v12518_v3  ;;  %vm6096_vm13 = vweird.f32 %v12518_v3 }
 0x9ed   :  { %v9798_v20 = vpop.eup %9797  ;;  %9805 = vtanh.f32 %v5985_v48 }
 0x9ee   :  { %v9800_v30 = vpop.eup %9799  ;;  %v6048_v4 = vmul.f32 %v9798_v20, %v6041_v55 }
 0x9ef   :  { %v9802_v9 = vpop.eup %9801  ;;  %v6062_v8 = vmul.f32 %v9800_v30, %v6058_v59  ;;  %vm6067_vm4 = vweird.f32 %v9800_v30 }
 0x9f0   :  { %v6077_v43 = vmul.f32 %v9802_v9, %v12511_v45  ;;  %v6112_v37 = vpack.c.bf16 %v6048_v4, %v6048_v4  ;;  %vm6082_vm5 = vweird.f32 %v9802_v9  ;;  %vm6068_vm8 = vmor %vm6066_vm6, %vm6067_vm4  ;;  %v6102_v4 = vand.u32 2147483648, %v12518_v3 }
 0x9f1   :  { %v6063_v39 = vsub.f32 1.0, %v6062_v8  ;;  %vm6083_vm9 = vmor %vm6081_vm7, %vm6082_vm5 }
 0x9f2   :  { %v6078_v44 = vsub.f32 1.0, %v6077_v43  ;;  %6134 = vmatmul.bf16.vlgmr.msra.gmra.mxu0 %v6112_v37  ;;  %6147 = vmatmul.bf16.vlgmr.msra.gmra.mxu1 %v6112_v37  ;;  %v9804_v60 = vpop.eup %9803  ;;  %v6103_v8 = vor.u32 1.1754944e-38, %v6102_v4  ;;  %v13771_v4 = vld [vmem:[#allocation55_spill] sm:$0xff] }
 0x9f3   :  { %v6064_v16 = vmul.f32 %v9800_v30, %v6063_v39  ;;  %6160 = vmatmul.bf16.vlgmr.msra.gmra.mxu2 %v6112_v37  ;;  %6173 = vmatmul.bf16.vlgmr.msra.gmra.mxu3 %v6112_v37  ;;  %v6092_v57 = vmul.f32 %v9804_v60, %v12518_v3  ;;  %v9806_v0 = vpop.eup %9805  ;;  %vm6097_vm12 = vweird.f32 %v9804_v60 }
 0x9f4   :  { %v6079_v19 = vmul.f32 %v9802_v9, %v6078_v44  ;;  %6380 = vmatpush.bf16.msra.mxu0 %v13629_v26  ;;  %6393 = vmatpush.bf16.msra.mxu1 %v13593_v14  ;;  %vm6098_vm14 = vmor %vm6096_vm13, %vm6097_vm12  ;;  %v13748_v44 = vld [vmem:[#allocation52_spill] sm:$0xff] }
 0x9f5   :  { %v6065_v27 = vadd.f32 %v9800_v30, %v6064_v16  ;;  %6406 = vmatpush.bf16.msra.mxu2 %v13630_v24  ;;  %6419 = vmatpush.bf16.msra.mxu3 %v13594_v34  ;;  %v6093_v21 = vsub.f32 1.0, %v6092_v57  ;;  %v13752_v16 = vld [vmem:[#allocation54_spill] sm:$0xff]  ;;  %v13755_v57 = vld [vmem:[#allocation39_spill] sm:$0xff] }
 0x9f6   :  { %v6080_v63 = vadd.f32 %v9802_v9, %v6079_v19  ;;  %v13754_v19 = vld [vmem:[#allocation57_spill] sm:$0xff] }
 0x9f7   :  { %v6069_v56 = vsel %vm6068_vm8, %v9800_v30, %v6065_v27  ;;  %v6094_v59 = vmul.f32 %v9804_v60, %v6093_v21  ;;  %v13757_v27 = vld [vmem:[#allocation80_spill] sm:$0xff]  ;;  %v13758_v21 = vld [vmem:[#allocation71_spill] sm:$0xff] }
 0x9f8   :  { %v6074_v40 = vsel %vm6071_vm10, %v6073_v17, %v6069_v56  ;;  %v6084_v49 = vsel %vm6083_vm9, %v9802_v9, %v6080_v63  ;;  %6381 = vmatpush.bf16.msra.mxu0 %v13631_v42  ;;  %6394 = vmatpush.bf16.msra.mxu1 %v13595_v7  ;;  %v13759_v17 = vld [vmem:[#allocation42_spill] sm:$0xff]  ;;  %v13760_v63 = vld [vmem:[#allocation76_spill] sm:$0xff] }
 0x9f9   :  { %v6089_v20 = vsel %vm6086_vm11, %v6088_v54, %v6084_v49  ;;  %v6108_v45 = vmul.f32 %v9806_v0, %v6074_v40  ;;  %6407 = vmatpush.bf16.msra.mxu2 %v13632_v62  ;;  %6420 = vmatpush.bf16.msra.mxu3 %v11773_v31  ;;  %v6095_v30 = vadd.f32 %v9804_v60, %v6094_v59  ;;  %v13761_v54 = vld [vmem:[#allocation27_spill] sm:$0xff]  ;;  %v13762_v56 = vld [vmem:[#allocation72_spill] sm:$0xff]  ;;  %v13764_v40 = vld [vmem:[#allocation73_spill] sm:$0xff] }
 0x9fa   :  { %v6107_v55 = vmul.f32 %v6089_v20, %v12431_v50  ;;  %v6100_v50 = vand.u32 2147483647, %v12518_v3  ;;  %v13763_v0 = vld [vmem:[#allocation47_spill] sm:$0xff]  ;;  %v13765_v49 = vld [vmem:[#allocation78_spill] sm:$0xff] }
 0x9fb   :  { %v6099_v9 = vsel %vm6098_vm14, %v9804_v60, %v6095_v30  ;;  %v13750_v60 = vld [vmem:[#allocation53_spill] sm:$0xff]  ;;  %v13766_v59 = vld [vmem:[#allocation75_spill] sm:$0xff]  ;;  %v13767_v20 = vld [vmem:[#allocation50_spill] sm:$0xff] }
 0x9fc   :  { %v12537_v48 = vadd.f32 %v6108_v45, %v6107_v55  ;;  %6382 = vmatpush.bf16.msra.mxu0 %v13633_v51  ;;  %6395 = vmatpush.bf16.msra.mxu1 %v13597_v61  ;;  %vm6101_vm15 = vcmp.eq.f32.partialorder %v6100_v50, 8.507059e+37  ;;  %v13768_v45 = vld [vmem:[#allocation88_spill] sm:$0xff]  ;;  %v13769_v55 = vld [vmem:[#allocation29_spill] sm:$0xff]  ;;  %v13772_v50 = vld [vmem:[#allocation90_spill] sm:$0xff] }
 0x9fd   :  { %6408 = vmatpush.bf16.msra.mxu2 %v13634_v10  ;;  %6421 = vmatpush.bf16.msra.mxu3 %v11789_v29  ;;  %v6104_v37 = vsel %vm6101_vm15, %v6103_v8, %v6099_v9  ;;  %v13770_v30 = vld [vmem:[#allocation89_spill] sm:$0xff]  ;;  %v13773_v9 = vld [vmem:[#allocation26_spill] sm:$0xff]  ;;  %v13774_v8 = vld [vmem:[#allocation92_spill] sm:$0xff] }
 0x9fe   :  { %9807 = vtanh.f32 %v12537_v48 }
 0xa00   :  { %6383 = vmatpush.bf16.msra.mxu0 %v13635_v6  ;;  %6396 = vmatpush.bf16.msra.mxu1 %v13599_v15 }
 0xa01   :  { %6409 = vmatpush.bf16.msra.mxu2 %v13636_v5  ;;  %6422 = vmatpush.bf16.msra.mxu3 %v13600_v25 }
 0xa04   :  { %v9808_v43 = vpop.eup %9807  ;;  %6384 = vmatpush.bf16.msra.mxu0 %v13637_v12  ;;  %6397 = vmatpush.bf16.msra.mxu1 %v13603_v13 }
 0xa05   :  { %v6111_v39 = vmul.f32 %v9808_v43, %v6104_v37  ;;  %6410 = vmatpush.bf16.msra.mxu2 %v13587_v23  ;;  %6423 = vmatpush.bf16.msra.mxu3 %v13604_v47  ;;  %v13775_v43 = vld [vmem:[#allocation58_spill] sm:$0xff]  ;;  %v13776_v37 = vld [vmem:[#allocation93_spill] sm:$0xff] }
 0xa07   :  { %v6116_v3 = vpack.c.bf16 %v6111_v39, %v6111_v39  ;;  %v13777_v39 = vld [vmem:[#allocation30_spill] sm:$0xff] }
 0xa08   :  { %6385 = vmatpush.bf16.msra.mxu0 %v13638_v53  ;;  %6398 = vmatpush.bf16.msra.mxu1 %v13605_v1 }
 0xa09   :  { %6196 = vmatmul.bf16.vlgmr.msrb.gmra.mxu0 %v6116_v3  ;;  %6209 = vmatmul.bf16.vlgmr.msrb.gmra.mxu1 %v6116_v3 }
 0xa0a   :  { %6222 = vmatmul.bf16.vlgmr.msrb.gmra.mxu2 %v6116_v3  ;;  %6235 = vmatmul.bf16.vlgmr.msrb.gmra.mxu3 %v6116_v3  ;;  %v13778_v3 = vld [vmem:[#allocation94_spill] sm:$0xff] }
 0xa0b   :  { %6411 = vmatpush.bf16.msra.mxu2 %v13588_v52  ;;  %6424 = vmatpush.bf16.msra.mxu3 %v13606_v38 }
 0xa0c   :  { %6386 = vmatpush.bf16.msra.mxu0 %v13639_v32  ;;  %6399 = vmatpush.bf16.msra.mxu1 %v13608_v58 }
 0xa0f   :  { %6412 = vmatpush.bf16.msra.mxu2 %v13590_v33  ;;  %6425 = vmatpush.bf16.msra.mxu3 %v13640_v18 }
 0xa10   :  { %6387 = vmatpush.bf16.msra.mxu0 %v13641_v11  ;;  %6400 = vmatpush.bf16.msra.mxu1 %v11863_v22 }
 0xa13   :  { %6413 = vmatpush.bf16.msra.mxu2 %v13749_v46  ;;  %6426 = vmatpush.bf16.msra.mxu3 %v13750_v60 }
 0xa14   :  { %6442 = vmatpush.bf16.msrb.mxu0 %v13712_v35  ;;  %6455 = vmatpush.bf16.msrb.mxu1 %v13748_v44 }
 0xa17   :  { %6468 = vmatpush.bf16.msrb.mxu2 %v13751_v28  ;;  %6481 = vmatpush.bf16.msrb.mxu3 %v13752_v16 }
 0xa18   :  { %6443 = vmatpush.bf16.msrb.mxu0 %v13753_v41  ;;  %6456 = vmatpush.bf16.msrb.mxu1 %v13754_v19 }
 0xa1b   :  { %6469 = vmatpush.bf16.msrb.mxu2 %v13755_v57  ;;  %6482 = vmatpush.bf16.msrb.mxu3 %v13756_v2 }
 0xa1c   :  { %6444 = vmatpush.bf16.msrb.mxu0 %v13757_v27  ;;  %6457 = vmatpush.bf16.msrb.mxu1 %v13758_v21 }
 0xa1f   :  { %6470 = vmatpush.bf16.msrb.mxu2 %v13759_v17  ;;  %6483 = vmatpush.bf16.msrb.mxu3 %v13760_v63 }
 0xa20   :  { %6445 = vmatpush.bf16.msrb.mxu0 %v13761_v54  ;;  %6458 = vmatpush.bf16.msrb.mxu1 %v13762_v56 }
 0xa23   :  { %6471 = vmatpush.bf16.msrb.mxu2 %v13763_v0  ;;  %6484 = vmatpush.bf16.msrb.mxu3 %v13764_v40 }
 0xa24   :  { %6446 = vmatpush.bf16.msrb.mxu0 %v13765_v49  ;;  %6459 = vmatpush.bf16.msrb.mxu1 %v13766_v59 }
 0xa27   :  { %6472 = vmatpush.bf16.msrb.mxu2 %v13767_v20  ;;  %6485 = vmatpush.bf16.msrb.mxu3 %v13768_v45  ;;  %v13779_v45 = vld [vmem:[#allocation77_spill] sm:$0xff] }
 0xa28   :  { %6447 = vmatpush.bf16.msrb.mxu0 %v13769_v55  ;;  %6460 = vmatpush.bf16.msrb.mxu1 %v13770_v30  ;;  %v13780_v55 = vld [vmem:[#allocation95_spill] sm:$0xff] }
 0xa29   :  { %v13781_v30 = vld [vmem:[#allocation79_spill] sm:$0xff] }
 0xa2b   :  { %6473 = vmatpush.bf16.msrb.mxu2 %v13771_v4  ;;  %6486 = vmatpush.bf16.msrb.mxu3 %v13772_v50  ;;  %v6122_v4 = vunpack.c.l.bf16 %v13781_v30  ;;  %v6123_v50 = vunpack.c.h.bf16 %v13781_v30 }
 0xa2c   :  { %6448 = vmatpush.bf16.msrb.mxu0 %v13773_v9  ;;  %6461 = vmatpush.bf16.msrb.mxu1 %v13774_v8 }
 0xa2f   :  { %6474 = vmatpush.bf16.msrb.mxu2 %v13775_v43  ;;  %6487 = vmatpush.bf16.msrb.mxu3 %v13776_v37  ;;  %v13782_v37 = vld [vmem:[#allocation91_spill] sm:$0xff] }
 0xa30   :  { %6449 = vmatpush.bf16.msrb.mxu0 %v13777_v39  ;;  %6462 = vmatpush.bf16.msrb.mxu1 %v13778_v3  ;;  %v6124_v39 = vunpack.c.l.bf16 %v13782_v37 }
 0xa33   :  { %6475 = vmatpush.bf16.msrb.mxu2 %v13779_v45  ;;  %6488 = vmatpush.bf16.msrb.mxu3 %v13780_v55 }
 0xa6f   :  { %v6135_v20 = vpop.f32.mrf.mxu0  ;;  %v6148_v9 = vpop.f32.mrf.mxu1 }
 0xa70   :  { %v6178_v59 = vadd.f32 %v6135_v20, %v6122_v4  ;;  %v6179_v8 = vadd.f32 %v6148_v9, %v6123_v50 }
 0xa72   :  { %v8894_v49 = vmul.f32 -1.442695, %v6178_v59  ;;  %v8895_v43 = vmul.f32 -1.442695, %v6179_v8 }
 0xa74   :  { %9809 = vpow2.f32 %v8894_v49  ;;  %v6125_v49 = vunpack.c.h.bf16 %v13782_v37 }
 0xa75   :  { %9811 = vpow2.f32 %v8895_v43 }
 0xa76   :  { %v6161_v40 = vpop.f32.mrf.mxu2  ;;  %v6174_v3 = vpop.f32.mrf.mxu3 }
 0xa77   :  { %v6180_v0 = vadd.f32 %v6161_v40, %v6124_v39  ;;  %v6137_v45 = vpop.f32.mrf.mxu0  ;;  %v6150_v56 = vpop.f32.mrf.mxu1  ;;  %v6181_v9 = vadd.f32 %v6174_v3, %v6125_v49 }
 0xa79   :  { %v8896_v55 = vmul.f32 -1.442695, %v6180_v0  ;;  %v13783_v0 = vld [vmem:[#allocation24_spill] sm:$0xff] }
 0xa7a   :  { %v9810_v54 = vpop.eup %9809 }
 0xa7b   :  { %v9812_v63 = vpop.eup %9811  ;;  %v6253_v17 = vadd.f32 1.0, %v9810_v54  ;;  %9813 = vpow2.f32 %v8896_v55  ;;  %v6184_v54 = vunpack.c.l.bf16 %v13783_v0 }
 0xa7c   :  { %v6254_v30 = vadd.f32 1.0, %v9812_v63  ;;  %v6185_v63 = vunpack.c.h.bf16 %v13783_v0 }
 0xa7d   :  { %9815 = vrcp.f32 %v6253_v17  ;;  %v6265_v43 = vand.u32 2147483647, %v6253_v17  ;;  %vm6261_vm3 = vweird.f32 %v6253_v17 }
 0xa7e   :  { %9817 = vrcp.f32 %v6254_v30  ;;  %v6163_v20 = vpop.f32.mrf.mxu2  ;;  %v6176_v59 = vpop.f32.mrf.mxu3  ;;  %v6282_v3 = vand.u32 2147483648, %v6254_v30  ;;  %v6280_v27 = vand.u32 2147483647, %v6254_v30  ;;  %vm6276_vm2 = vweird.f32 %v6254_v30 }
 0xa7f   :  { %v6267_v59 = vand.u32 2147483648, %v6253_v17  ;;  %vm6266_vm6 = vcmp.eq.f32.partialorder %v6265_v43, 8.507059e+37 }
 0xa80   :  { %vm6281_vm7 = vcmp.eq.f32.partialorder %v6280_v27, 8.507059e+37 }
 0xa81   :  { %v9814_v4 = vpop.eup %9813 }
 0xa82   :  { %v12603_v50 = vadd.f32 1.0, %v9814_v4 }
 0xa83   :  { %v9816_v8 = vpop.eup %9815 }
 0xa84   :  { %v9818_v40 = vpop.eup %9817  ;;  %v6257_v45 = vmul.f32 %v9816_v8, %v6253_v17  ;;  %9819 = vrcp.f32 %v12603_v50  ;;  %vm6262_vm0 = vweird.f32 %v9816_v8  ;;  %v6297_v27 = vand.u32 2147483648, %v12603_v50 }
 0xa85   :  { %v6272_v56 = vmul.f32 %v9818_v40, %v6254_v30  ;;  %9821 = vtanh.f32 %v6181_v9  ;;  %vm6277_vm1 = vweird.f32 %v9818_v40  ;;  %vm6263_vm4 = vmor %vm6261_vm3, %vm6262_vm0  ;;  %vm6291_vm9 = vweird.f32 %v12603_v50 }
 0xa86   :  { %v6258_v55 = vsub.f32 1.0, %v6257_v45  ;;  %v6197_v39 = vpop.f32.mrf.mxu0  ;;  %v6210_v20 = vpop.f32.mrf.mxu1  ;;  %v13784_v45 = vld [vmem:[#allocation41_spill] sm:$0xff]  ;;  %vm6278_vm5 = vmor %vm6276_vm2, %vm6277_vm1  ;;  %v6298_v43 = vor.u32 1.1754944e-38, %v6297_v27 }
 0xa87   :  { %v6273_v37 = vsub.f32 1.0, %v6272_v56  ;;  %v6240_v4 = vadd.f32 %v6197_v39, %v6184_v54  ;;  %v6241_v21 = vadd.f32 %v6210_v20, %v6185_v63  ;;  %v6186_v9 = vunpack.c.l.bf16 %v13784_v45 }
 0xa88   :  { %v6259_v49 = vmul.f32 %v9816_v8, %v6258_v55  ;;  %v6268_v56 = vor.u32 1.1754944e-38, %v6267_v59  ;;  %v6283_v55 = vor.u32 1.1754944e-38, %v6282_v3 }
 0xa89   :  { %v6274_v2 = vmul.f32 %v9818_v40, %v6273_v37  ;;  %v8897_v57 = vmul.f32 -1.442695, %v6240_v4  ;;  %v8898_v19 = vmul.f32 -1.442695, %v6241_v21 }
 0xa8a   :  { %v9820_v41 = vpop.eup %9819  ;;  %v6260_v0 = vadd.f32 %v9816_v8, %v6259_v49 }
 0xa8b   :  { %v6287_v16 = vmul.f32 %v9820_v41, %v12603_v50  ;;  %v6275_v54 = vadd.f32 %v9818_v40, %v6274_v2  ;;  %9823 = vpow2.f32 %v8897_v57  ;;  %v9822_v63 = vpop.eup %9821  ;;  %vm6292_vm8 = vweird.f32 %v9820_v41 }
 0xa8c   :  { %v6264_v39 = vsel %vm6263_vm4, %v9816_v8, %v6260_v0  ;;  %9825 = vpow2.f32 %v8898_v19  ;;  %vm6293_vm10 = vmor %vm6291_vm9, %vm6292_vm8 }
 0xa8d   :  { %v6288_v20 = vsub.f32 1.0, %v6287_v16  ;;  %v6269_v21 = vsel %vm6266_vm6, %v6268_v56, %v6264_v39  ;;  %v6279_v37 = vsel %vm6278_vm5, %v9818_v40, %v6275_v54  ;;  %v6223_v30 = vpop.f32.mrf.mxu2  ;;  %v6236_v17 = vpop.f32.mrf.mxu3 }
 0xa8e   :  { %v6284_v4 = vsel %vm6281_vm7, %v6283_v55, %v6279_v37  ;;  %v6303_v49 = vmul.f32 %v9822_v63, %v6269_v21  ;;  %v6242_v28 = vadd.f32 %v6223_v30, %v6186_v9  ;;  %v6199_v44 = vpop.f32.mrf.mxu0  ;;  %v6212_v35 = vpop.f32.mrf.mxu1 }
 0xa8f   :  { %v6289_v59 = vmul.f32 %v9820_v41, %v6288_v20  ;;  %v6302_v57 = vmul.f32 %v6284_v4, %v12509_v36  ;;  %v6295_v35 = vand.u32 2147483647, %v12603_v50 }
 0xa90   :  { %v8899_v2 = vmul.f32 -1.442695, %v6242_v28 }
 0xa91   :  { %v9824_v60 = vpop.eup %9823  ;;  %v12611_v3 = vadd.f32 %v6303_v49, %v6302_v57  ;;  %v6290_v19 = vadd.f32 %v9820_v41, %v6289_v59  ;;  %vm6296_vm11 = vcmp.eq.f32.partialorder %v6295_v35, 8.507059e+37 }
 0xa92   :  { %v9826_v8 = vpop.eup %9825  ;;  %v6316_v16 = vadd.f32 1.0, %v9824_v60  ;;  %9827 = vpow2.f32 %v8899_v2  ;;  %v6187_v60 = vunpack.c.h.bf16 %v13784_v45 }
 0xa93   :  { %9829 = vtanh.f32 %v12611_v3  ;;  %v6317_v40 = vadd.f32 1.0, %v9826_v8  ;;  %v6294_v28 = vsel %vm6293_vm10, %v9820_v41, %v6290_v19 }
 0xa94   :  { %9831 = vrcp.f32 %v6316_v16  ;;  %v6299_v54 = vsel %vm6296_vm11, %v6298_v43, %v6294_v28  ;;  %v6243_v55 = vadd.f32 %v6236_v17, %v6187_v60  ;;  %v6330_v4 = vand.u32 2147483648, %v6316_v16 }
 0xa95   :  { %9833 = vrcp.f32 %v6317_v40  ;;  %v6225_v36 = vpop.f32.mrf.mxu2  ;;  %v6238_v44 = vpop.f32.mrf.mxu3  ;;  %v6345_v49 = vand.u32 2147483648, %v6317_v40  ;;  %v6328_v59 = vand.u32 2147483647, %v6316_v16  ;;  %v6343_v17 = vand.u32 2147483647, %v6317_v40 }
 0xa96   :  { %vm6324_vm14 = vweird.f32 %v6316_v16  ;;  %vm6339_vm15 = vweird.f32 %v6317_v40  ;;  %v6331_v27 = vor.u32 1.1754944e-38, %v6330_v4  ;;  %v13786_v4 = vld [vmem:[#allocation65_spill] sm:$0xff] }
 0xa97   :  { %v6346_v36 = vor.u32 1.1754944e-38, %v6345_v49  ;;  %vm6329_vm2 = vcmp.eq.f32.partialorder %v6328_v59, 8.507059e+37  ;;  %vm6344_vm3 = vcmp.eq.f32.partialorder %v6343_v17, 8.507059e+37  ;;  %v13787_v49 = vld [vmem:[#allocation52_spill] sm:$0xff]  ;;  %v13789_v59 = vld [vmem:[#allocation54_spill] sm:$0xff]  ;;  %v13791_v17 = vld [vmem:[#allocation57_spill] sm:$0xff] }
 0xa98   :  { %v9828_v0 = vpop.eup %9827 }
 0xa99   :  { %v9830_v9 = vpop.eup %9829  ;;  %v12618_v56 = vadd.f32 1.0, %v9828_v0 }
 0xa9a   :  { %v9832_v63 = vpop.eup %9831  ;;  %v6306_v39 = vmul.f32 %v9830_v9, %v6299_v54 }
 0xa9b   :  { %v9834_v20 = vpop.eup %9833  ;;  %v6320_v50 = vmul.f32 %v9832_v63, %v6316_v16  ;;  %9835 = vrcp.f32 %v12618_v56  ;;  %vm6325_vm12 = vweird.f32 %v9832_v63  ;;  %vm6354_vm5 = vweird.f32 %v12618_v56 }
 0xa9c   :  { %v6335_v21 = vmul.f32 %v9834_v20, %v6317_v40  ;;  %v6370_v30 = vpack.c.bf16 %v6306_v39, %v6306_v39  ;;  %9837 = vtanh.f32 %v6243_v55  ;;  %vm6340_vm13 = vweird.f32 %v9834_v20  ;;  %vm6326_vm0 = vmor %vm6324_vm14, %vm6325_vm12 }
 0xa9d   :  { %v6321_v37 = vsub.f32 1.0, %v6320_v50  ;;  %vm6341_vm1 = vmor %vm6339_vm15, %vm6340_vm13  ;;  %v6360_v39 = vand.u32 2147483648, %v12618_v56 }
 0xa9e   :  { %v6336_v41 = vsub.f32 1.0, %v6335_v21  ;;  %6388 = vmatmul.bf16.vlgmr.msra.gmra.mxu0 %v6370_v30  ;;  %6401 = vmatmul.bf16.vlgmr.msra.gmra.mxu1 %v6370_v30 }
 0xa9f   :  { %v6322_v45 = vmul.f32 %v9832_v63, %v6321_v37  ;;  %6414 = vmatmul.bf16.vlgmr.msra.gmra.mxu2 %v6370_v30  ;;  %6427 = vmatmul.bf16.vlgmr.msra.gmra.mxu3 %v6370_v30  ;;  %v6361_v50 = vor.u32 1.1754944e-38, %v6360_v39  ;;  %v13808_v39 = vld [vmem:[#allocation55_spill] sm:$0xff] }
 0xaa0   :  { %v6337_v57 = vmul.f32 %v9834_v20, %v6336_v41  ;;  %6634 = vmatpush.bf16.msra.mxu0 %v13629_v26  ;;  %6647 = vmatpush.bf16.msra.mxu1 %v13593_v14  ;;  %v13785_v41 = vld [vmem:[#allocation53_spill] sm:$0xff] }
 0xaa1   :  { %v9836_v2 = vpop.eup %9835  ;;  %v6323_v8 = vadd.f32 %v9832_v63, %v6322_v45  ;;  %6660 = vmatpush.bf16.msra.mxu2 %v13630_v24  ;;  %6673 = vmatpush.bf16.msra.mxu3 %v13594_v34  ;;  %v13788_v45 = vld [vmem:[#allocation35_spill] sm:$0xff] }
 0xaa2   :  { %v6350_v19 = vmul.f32 %v9836_v2, %v12618_v56  ;;  %v6338_v35 = vadd.f32 %v9834_v20, %v6337_v57  ;;  %v9838_v16 = vpop.eup %9837  ;;  %vm6355_vm4 = vweird.f32 %v9836_v2  ;;  %v13790_v57 = vld [vmem:[#allocation83_spill] sm:$0xff] }
 0xaa3   :  { %v6327_v44 = vsel %vm6326_vm0, %v9832_v63, %v6323_v8  ;;  %vm6356_vm6 = vmor %vm6354_vm5, %vm6355_vm4  ;;  %v13793_v8 = vld [vmem:[#allocation56_spill] sm:$0xff] }
 0xaa4   :  { %v6351_v28 = vsub.f32 1.0, %v6350_v19  ;;  %v6332_v43 = vsel %vm6329_vm2, %v6331_v27, %v6327_v44  ;;  %v6342_v0 = vsel %vm6341_vm1, %v9834_v20, %v6338_v35  ;;  %6635 = vmatpush.bf16.msra.mxu0 %v13631_v42  ;;  %6648 = vmatpush.bf16.msra.mxu1 %v13595_v7  ;;  %v13794_v19 = vld [vmem:[#allocation80_spill] sm:$0xff]  ;;  %v13795_v27 = vld [vmem:[#allocation71_spill] sm:$0xff]  ;;  %v13796_v35 = vld [vmem:[#allocation42_spill] sm:$0xff] }
 0xaa5   :  { %v6347_v40 = vsel %vm6344_vm3, %v6346_v36, %v6342_v0  ;;  %v6366_v60 = vmul.f32 %v9838_v16, %v6332_v43  ;;  %6661 = vmatpush.bf16.msra.mxu2 %v13632_v62  ;;  %6674 = vmatpush.bf16.msra.mxu3 %v11773_v31  ;;  %v13797_v36 = vld [vmem:[#allocation76_spill] sm:$0xff]  ;;  %v13798_v44 = vld [vmem:[#allocation27_spill] sm:$0xff]  ;;  %v13801_v43 = vld [vmem:[#allocation73_spill] sm:$0xff] }
 0xaa6   :  { %v6352_v9 = vmul.f32 %v9836_v2, %v6351_v28  ;;  %v6365_v54 = vmul.f32 %v6347_v40, %v12537_v48  ;;  %v6358_v48 = vand.u32 2147483647, %v12618_v56  ;;  %v13799_v16 = vld [vmem:[#allocation72_spill] sm:$0xff]  ;;  %v13800_v28 = vld [vmem:[#allocation47_spill] sm:$0xff]  ;;  %v13802_v0 = vld [vmem:[#allocation78_spill] sm:$0xff] }
 0xaa7   :  { %v13803_v40 = vld [vmem:[#allocation75_spill] sm:$0xff] }
 0xaa8   :  { %v12633_v63 = vadd.f32 %v6366_v60, %v6365_v54  ;;  %v6353_v55 = vadd.f32 %v9836_v2, %v6352_v9  ;;  %6636 = vmatpush.bf16.msra.mxu0 %v13633_v51  ;;  %6649 = vmatpush.bf16.msra.mxu1 %v13597_v61  ;;  %vm6359_vm7 = vcmp.eq.f32.partialorder %v6358_v48, 8.507059e+37  ;;  %v13804_v60 = vld [vmem:[#allocation50_spill] sm:$0xff]  ;;  %v13805_v9 = vld [vmem:[#allocation88_spill] sm:$0xff]  ;;  %v13806_v54 = vld [vmem:[#allocation29_spill] sm:$0xff] }
 0xaa9   :  { %6662 = vmatpush.bf16.msra.mxu2 %v13634_v10  ;;  %6675 = vmatpush.bf16.msra.mxu3 %v11789_v29  ;;  %v13809_v48 = vld [vmem:[#allocation90_spill] sm:$0xff] }
 0xaaa   :  { %9839 = vtanh.f32 %v12633_v63  ;;  %v6357_v20 = vsel %vm6356_vm6, %v9836_v2, %v6353_v55  ;;  %v13792_v2 = vld [vmem:[#allocation39_spill] sm:$0xff]  ;;  %v13807_v55 = vld [vmem:[#allocation89_spill] sm:$0xff] }
 0xaab   :  { %v6362_v37 = vsel %vm6359_vm7, %v6361_v50, %v6357_v20  ;;  %v13810_v20 = vld [vmem:[#allocation26_spill] sm:$0xff]  ;;  %v13811_v50 = vld [vmem:[#allocation92_spill] sm:$0xff] }
 0xaac   :  { %6637 = vmatpush.bf16.msra.mxu0 %v13635_v6  ;;  %6650 = vmatpush.bf16.msra.mxu1 %v13599_v15 }
 0xaad   :  { %6663 = vmatpush.bf16.msra.mxu2 %v13636_v5  ;;  %6676 = vmatpush.bf16.msra.mxu3 %v13600_v25 }
 0xab0   :  { %v9840_v21 = vpop.eup %9839  ;;  %6638 = vmatpush.bf16.msra.mxu0 %v13637_v12  ;;  %6651 = vmatpush.bf16.msra.mxu1 %v13603_v13 }
 0xab1   :  { %v6369_v30 = vmul.f32 %v9840_v21, %v6362_v37  ;;  %6664 = vmatpush.bf16.msra.mxu2 %v13587_v23  ;;  %6677 = vmatpush.bf16.msra.mxu3 %v13604_v47  ;;  %v13812_v21 = vld [vmem:[#allocation58_spill] sm:$0xff]  ;;  %v13813_v37 = vld [vmem:[#allocation93_spill] sm:$0xff] }
 0xab3   :  { %v6372_v56 = vpack.c.bf16 %v6369_v30, %v6369_v30  ;;  %v13814_v30 = vld [vmem:[#allocation30_spill] sm:$0xff] }
 0xab4   :  { %6639 = vmatpush.bf16.msra.mxu0 %v13638_v53  ;;  %6652 = vmatpush.bf16.msra.mxu1 %v13605_v1 }
 0xab5   :  { %6450 = vmatmul.bf16.vlgmr.msrb.gmra.mxu0 %v6372_v56  ;;  %6463 = vmatmul.bf16.vlgmr.msrb.gmra.mxu1 %v6372_v56 }
 0xab6   :  { %6476 = vmatmul.bf16.vlgmr.msrb.gmra.mxu2 %v6372_v56  ;;  %6489 = vmatmul.bf16.vlgmr.msrb.gmra.mxu3 %v6372_v56  ;;  %v13815_v56 = vld [vmem:[#allocation94_spill] sm:$0xff] }
 0xab7   :  { %6665 = vmatpush.bf16.msra.mxu2 %v13588_v52  ;;  %6678 = vmatpush.bf16.msra.mxu3 %v13606_v38 }
 0xab8   :  { %6640 = vmatpush.bf16.msra.mxu0 %v13639_v32  ;;  %6653 = vmatpush.bf16.msra.mxu1 %v13608_v58 }
 0xabb   :  { %6666 = vmatpush.bf16.msra.mxu2 %v13590_v33  ;;  %6679 = vmatpush.bf16.msra.mxu3 %v13640_v18 }
 0xabc   :  { %6641 = vmatpush.bf16.msra.mxu0 %v13641_v11  ;;  %6654 = vmatpush.bf16.msra.mxu1 %v11863_v22 }
 0xabf   :  { %6667 = vmatpush.bf16.msra.mxu2 %v13749_v46  ;;  %6680 = vmatpush.bf16.msra.mxu3 %v13785_v41 }
 0xac0   :  { %6696 = vmatpush.bf16.msrb.mxu0 %v13786_v4  ;;  %6709 = vmatpush.bf16.msrb.mxu1 %v13787_v49 }
 0xac3   :  { %6722 = vmatpush.bf16.msrb.mxu2 %v13788_v45  ;;  %6735 = vmatpush.bf16.msrb.mxu3 %v13789_v59 }
 0xac4   :  { %6697 = vmatpush.bf16.msrb.mxu0 %v13790_v57  ;;  %6710 = vmatpush.bf16.msrb.mxu1 %v13791_v17  ;;  %v13821_v57 = vld [vmem:[#allocation38_spill] sm:$0xff] }
 0xac7   :  { %6723 = vmatpush.bf16.msrb.mxu2 %v13792_v2  ;;  %6736 = vmatpush.bf16.msrb.mxu3 %v13793_v8 }
 0xac8   :  { %6698 = vmatpush.bf16.msrb.mxu0 %v13794_v19  ;;  %6711 = vmatpush.bf16.msrb.mxu1 %v13795_v27 }
 0xacb   :  { %6724 = vmatpush.bf16.msrb.mxu2 %v13796_v35  ;;  %6737 = vmatpush.bf16.msrb.mxu3 %v13797_v36 }
 0xacc   :  { %6699 = vmatpush.bf16.msrb.mxu0 %v13798_v44  ;;  %6712 = vmatpush.bf16.msrb.mxu1 %v13799_v16 }
 0xacf   :  { %6725 = vmatpush.bf16.msrb.mxu2 %v13800_v28  ;;  %6738 = vmatpush.bf16.msrb.mxu3 %v13801_v43 }
 0xad0   :  { %6700 = vmatpush.bf16.msrb.mxu0 %v13802_v0  ;;  %6713 = vmatpush.bf16.msrb.mxu1 %v13803_v40 }
 0xad3   :  { %6726 = vmatpush.bf16.msrb.mxu2 %v13804_v60  ;;  %6739 = vmatpush.bf16.msrb.mxu3 %v13805_v9  ;;  %v13816_v9 = vld [vmem:[#allocation77_spill] sm:$0xff] }
 0xad4   :  { %6701 = vmatpush.bf16.msrb.mxu0 %v13806_v54  ;;  %6714 = vmatpush.bf16.msrb.mxu1 %v13807_v55  ;;  %v13817_v54 = vld [vmem:[#allocation95_spill] sm:$0xff]  ;;  %v13818_v55 = vld [vmem:[#allocation28_spill] sm:$0xff] }
 0xad7   :  { %6727 = vmatpush.bf16.msrb.mxu2 %v13808_v39  ;;  %6740 = vmatpush.bf16.msrb.mxu3 %v13809_v48  ;;  %v6376_v39 = vunpack.c.l.bf16 %v13818_v55  ;;  %v6377_v48 = vunpack.c.h.bf16 %v13818_v55 }
 0xad8   :  { %6702 = vmatpush.bf16.msrb.mxu0 %v13810_v20  ;;  %6715 = vmatpush.bf16.msrb.mxu1 %v13811_v50 }
 0xadb   :  { %6728 = vmatpush.bf16.msrb.mxu2 %v13812_v21  ;;  %6741 = vmatpush.bf16.msrb.mxu3 %v13813_v37  ;;  %v13819_v37 = vld [vmem:[#allocation96_spill] sm:$0xff] }
 0xadc   :  { %6703 = vmatpush.bf16.msrb.mxu0 %v13814_v30  ;;  %6716 = vmatpush.bf16.msrb.mxu1 %v13815_v56  ;;  %v6378_v30 = vunpack.c.l.bf16 %v13819_v37 }
 0xadf   :  { %6729 = vmatpush.bf16.msrb.mxu2 %v13816_v9  ;;  %6742 = vmatpush.bf16.msrb.mxu3 %v13817_v54 }
 0xb1b   :  { %v6389_v60 = vpop.f32.mrf.mxu0  ;;  %v6402_v20 = vpop.f32.mrf.mxu1 }
 0xb1c   :  { %v6432_v40 = vadd.f32 %v6389_v60, %v6376_v39  ;;  %v6433_v50 = vadd.f32 %v6402_v20, %v6377_v48 }
 0xb1e   :  { %v8900_v0 = vmul.f32 -1.442695, %v6432_v40  ;;  %v8901_v21 = vmul.f32 -1.442695, %v6433_v50 }
 0xb20   :  { %9841 = vpow2.f32 %v8900_v0  ;;  %v6379_v0 = vunpack.c.h.bf16 %v13819_v37 }
 0xb21   :  { %9843 = vpow2.f32 %v8901_v21 }
 0xb22   :  { %v6415_v43 = vpop.f32.mrf.mxu2  ;;  %v6428_v56 = vpop.f32.mrf.mxu3 }
 0xb23   :  { %v6434_v28 = vadd.f32 %v6415_v43, %v6378_v30  ;;  %v6391_v9 = vpop.f32.mrf.mxu0  ;;  %v6404_v16 = vpop.f32.mrf.mxu1  ;;  %v6435_v48 = vadd.f32 %v6428_v56, %v6379_v0 }
 0xb24   :  { %v13820_v16 = vld [vmem:[#allocation31_spill] sm:$0xff] }
 0xb25   :  { %v8902_v54 = vmul.f32 -1.442695, %v6434_v28  ;;  %v6438_v28 = vunpack.c.l.bf16 %v13820_v16 }
 0xb26   :  { %v9842_v44 = vpop.eup %9841 }
 0xb27   :  { %v9844_v36 = vpop.eup %9843  ;;  %v6507_v35 = vadd.f32 1.0, %v9842_v44  ;;  %9845 = vpow2.f32 %v8902_v54  ;;  %v6439_v44 = vunpack.c.h.bf16 %v13820_v16  ;;  %v6440_v16 = vunpack.c.l.bf16 %v13821_v57 }
 0xb28   :  { %v6508_v55 = vadd.f32 1.0, %v9844_v36 }
 0xb29   :  { %9847 = vrcp.f32 %v6507_v35  ;;  %vm6515_vm11 = vweird.f32 %v6507_v35 }
 0xb2a   :  { %9849 = vrcp.f32 %v6508_v55  ;;  %v6417_v60 = vpop.f32.mrf.mxu2  ;;  %v6430_v40 = vpop.f32.mrf.mxu3  ;;  %v6536_v0 = vand.u32 2147483648, %v6508_v55  ;;  %v6534_v27 = vand.u32 2147483647, %v6508_v55  ;;  %vm6530_vm10 = vweird.f32 %v6508_v55 }
 0xb2b   :  { %v6519_v60 = vand.u32 2147483647, %v6507_v35 }
 0xb2c   :  { %vm6535_vm15 = vcmp.eq.f32.partialorder %v6534_v27, 8.507059e+37 }
 0xb2d   :  { %v9846_v39 = vpop.eup %9845  ;;  %vm6520_vm14 = vcmp.eq.f32.partialorder %v6519_v60, 8.507059e+37 }
 0xb2e   :  { %v12699_v20 = vadd.f32 1.0, %v9846_v39  ;;  %v6521_v39 = vand.u32 2147483648, %v6507_v35 }
 0xb2f   :  { %v9848_v50 = vpop.eup %9847 }
 0xb30   :  { %v9850_v43 = vpop.eup %9849  ;;  %v6511_v9 = vmul.f32 %v9848_v50, %v6507_v35  ;;  %9851 = vrcp.f32 %v12699_v20  ;;  %vm6516_vm8 = vweird.f32 %v9848_v50  ;;  %v6551_v60 = vand.u32 2147483648, %v12699_v20 }
 0xb31   :  { %v6526_v36 = vmul.f32 %v9850_v43, %v6508_v55  ;;  %9853 = vtanh.f32 %v6435_v48  ;;  %vm6531_vm9 = vweird.f32 %v9850_v43  ;;  %vm6517_vm12 = vmor %vm6515_vm11, %vm6516_vm8  ;;  %vm6545_vm1 = vweird.f32 %v12699_v20 }
 0xb32   :  { %v6451_v54 = vpop.f32.mrf.mxu0  ;;  %v6464_v21 = vpop.f32.mrf.mxu1  ;;  %v6512_v30 = vsub.f32 1.0, %v6511_v9  ;;  %vm6532_vm13 = vmor %vm6530_vm10, %vm6531_vm9 }
 0xb33   :  { %v6494_v37 = vadd.f32 %v6451_v54, %v6438_v28  ;;  %v6495_v40 = vadd.f32 %v6464_v21, %v6439_v44  ;;  %v6527_v56 = vsub.f32 1.0, %v6526_v36  ;;  %v6522_v44 = vor.u32 1.1754944e-38, %v6521_v39 }
 0xb34   :  { %v6513_v19 = vmul.f32 %v9848_v50, %v6512_v30  ;;  %v6537_v54 = vor.u32 1.1754944e-38, %v6536_v0 }
 0xb35   :  { %v8903_v8 = vmul.f32 -1.442695, %v6494_v37  ;;  %v8904_v2 = vmul.f32 -1.442695, %v6495_v40  ;;  %v6528_v17 = vmul.f32 %v9850_v43, %v6527_v56 }
 0xb36   :  { %v9852_v59 = vpop.eup %9851  ;;  %v6514_v48 = vadd.f32 %v9848_v50, %v6513_v19 }
 0xb37   :  { %9855 = vpow2.f32 %v8903_v8  ;;  %v9854_v9 = vpop.eup %9853  ;;  %v6541_v28 = vmul.f32 %v9852_v59, %v12699_v20  ;;  %v6529_v36 = vadd.f32 %v9850_v43, %v6528_v17  ;;  %vm6546_vm0 = vweird.f32 %v9852_v59 }
 0xb38   :  { %9857 = vpow2.f32 %v8904_v2  ;;  %v6518_v21 = vsel %vm6517_vm12, %v9848_v50, %v6514_v48  ;;  %vm6547_vm2 = vmor %vm6545_vm1, %vm6546_vm0 }
 0xb39   :  { %v6477_v30 = vpop.f32.mrf.mxu2  ;;  %v6490_v37 = vpop.f32.mrf.mxu3  ;;  %v6542_v40 = vsub.f32 1.0, %v6541_v28  ;;  %v6523_v56 = vsel %vm6520_vm14, %v6522_v44, %v6518_v21  ;;  %v6533_v55 = vsel %vm6532_vm13, %v9850_v43, %v6529_v36  ;;  %v6441_v28 = vunpack.c.h.bf16 %v13821_v57 }
 0xb3a   :  { %v6496_v19 = vadd.f32 %v6477_v30, %v6440_v16  ;;  %v6453_v35 = vpop.f32.mrf.mxu0  ;;  %v6466_v8 = vpop.f32.mrf.mxu1  ;;  %v6538_v45 = vsel %vm6535_vm15, %v6537_v54, %v6533_v55  ;;  %v6557_v49 = vmul.f32 %v9854_v9, %v6523_v56 }
 0xb3b   :  { %v6543_v4 = vmul.f32 %v9852_v59, %v6542_v40  ;;  %v6556_v39 = vmul.f32 %v6538_v45, %v12611_v3  ;;  %v6549_v3 = vand.u32 2147483647, %v12699_v20  ;;  %v6497_v36 = vadd.f32 %v6490_v37, %v6441_v28 }
 0xb3c   :  { %v8905_v17 = vmul.f32 -1.442695, %v6496_v19 }
 0xb3d   :  { %v9856_v2 = vpop.eup %9855  ;;  %v12707_v0 = vadd.f32 %v6557_v49, %v6556_v39  ;;  %v6544_v43 = vadd.f32 %v9852_v59, %v6543_v4  ;;  %vm6550_vm3 = vcmp.eq.f32.partialorder %v6549_v3, 8.507059e+37 }
 0xb3e   :  { %v9858_v41 = vpop.eup %9857  ;;  %v6570_v50 = vadd.f32 1.0, %v9856_v2  ;;  %9859 = vpow2.f32 %v8905_v17 }
 0xb3f   :  { %v12709_v27 = vadd.f32 1.0, %v9858_v41  ;;  %9861 = vtanh.f32 %v12707_v0  ;;  %v6548_v45 = vsel %vm6547_vm2, %v9852_v59, %v6544_v43  ;;  %v6552_v41 = vor.u32 1.1754944e-38, %v6551_v60 }
 0xb40   :  { %9863 = vrcp.f32 %v6570_v50  ;;  %v6584_v19 = vand.u32 2147483648, %v6570_v50  ;;  %v6582_v8 = vand.u32 2147483647, %v6570_v50  ;;  %vm6578_vm6 = vweird.f32 %v6570_v50 }
 0xb41   :  { %v6479_v16 = vpop.f32.mrf.mxu2  ;;  %v6492_v48 = vpop.f32.mrf.mxu3  ;;  %9865 = vrcp.f32 %v12709_v27  ;;  %v6553_v54 = vsel %vm6550_vm3, %v6552_v41, %v6548_v45  ;;  %v6599_v35 = vand.u32 2147483648, %v12709_v27  ;;  %v6597_v17 = vand.u32 2147483647, %v12709_v27 }
 0xb42   :  { %vm6593_vm7 = vweird.f32 %v12709_v27  ;;  %v6585_v60 = vor.u32 1.1754944e-38, %v6584_v19  ;;  %vm6583_vm10 = vcmp.eq.f32.partialorder %v6582_v8, 8.507059e+37  ;;  %v13854_v19 = vld [vmem:[#allocation95_spill] sm:$0xff] }
 0xb43   :  { %v6600_v48 = vor.u32 1.1754944e-38, %v6599_v35  ;;  %vm6598_vm11 = vcmp.eq.f32.partialorder %v6597_v17, 8.507059e+37  ;;  %v13855_v35 = vld [vmem:[#allocation32_spill] sm:$0xff] }
 0xb44   :  { %v9860_v49 = vpop.eup %9859  ;;  %v6631_v8 = vunpack.c.h.bf16 %v13855_v35 }
 0xb45   :  { %v12716_v9 = vadd.f32 1.0, %v9860_v49  ;;  %v9862_v4 = vpop.eup %9861 }
 0xb46   :  { %v9864_v44 = vpop.eup %9863  ;;  %v6560_v20 = vmul.f32 %v9862_v4, %v6553_v54  ;;  %v13846_v54 = vld [vmem:[#allocation90_spill] sm:$0xff] }
 0xb47   :  { %9867 = vrcp.f32 %v12716_v9  ;;  %v9866_v21 = vpop.eup %9865  ;;  %v6574_v30 = vmul.f32 %v9864_v44, %v6570_v50  ;;  %vm6579_vm4 = vweird.f32 %v9864_v44  ;;  %v6614_v4 = vand.u32 2147483648, %v12716_v9 }
 0xb48   :  { %v6589_v40 = vmul.f32 %v9866_v21, %v12709_v27  ;;  %v6624_v55 = vpack.c.bf16 %v6560_v20, %v6560_v20  ;;  %9869 = vtanh.f32 %v6497_v36  ;;  %vm6594_vm5 = vweird.f32 %v9866_v21  ;;  %vm6580_vm8 = vmor %vm6578_vm6, %vm6579_vm4  ;;  %v13845_v36 = vld [vmem:[#allocation55_spill] sm:$0xff]  ;;  %v13849_v20 = vld [vmem:[#allocation58_spill] sm:$0xff] }
 0xb49   :  { %v6575_v56 = vsub.f32 1.0, %v6574_v30  ;;  %vm6595_vm9 = vmor %vm6593_vm7, %vm6594_vm5  ;;  %vm6608_vm13 = vweird.f32 %v12716_v9  ;;  %v13848_v30 = vld [vmem:[#allocation92_spill] sm:$0xff] }
 0xb4a   :  { %v6590_v59 = vsub.f32 1.0, %v6589_v40  ;;  %6642 = vmatmul.bf16.vlgmr.msra.gmra.mxu0 %v6624_v55  ;;  %6655 = vmatmul.bf16.vlgmr.msra.gmra.mxu1 %v6624_v55  ;;  %v13850_v40 = vld [vmem:[#allocation93_spill] sm:$0xff] }
 0xb4b   :  { %v6576_v57 = vmul.f32 %v9864_v44, %v6575_v56  ;;  %6668 = vmatmul.bf16.vlgmr.msra.gmra.mxu2 %v6624_v55  ;;  %6681 = vmatmul.bf16.vlgmr.msra.gmra.mxu3 %v6624_v55  ;;  %v13851_v56 = vld [vmem:[#allocation30_spill] sm:$0xff] }
 0xb4c   :  { %v6591_v37 = vmul.f32 %v9866_v21, %v6590_v59  ;;  %6888 = vmatpush.bf16.msra.mxu0 %v13629_v26  ;;  %6901 = vmatpush.bf16.msra.mxu1 %v13593_v14  ;;  %v13852_v55 = vld [vmem:[#allocation94_spill] sm:$0xff]  ;;  %v13853_v59 = vld [vmem:[#allocation77_spill] sm:$0xff] }
 0xb4d   :  { %v9868_v39 = vpop.eup %9867  ;;  %v6577_v43 = vadd.f32 %v9864_v44, %v6576_v57  ;;  %6914 = vmatpush.bf16.msra.mxu2 %v13630_v24  ;;  %6927 = vmatpush.bf16.msra.mxu3 %v13594_v34  ;;  %v6630_v57 = vunpack.c.l.bf16 %v13855_v35 }
 0xb4e   :  { %v6604_v2 = vmul.f32 %v9868_v39, %v12716_v9  ;;  %v6592_v16 = vadd.f32 %v9866_v21, %v6591_v37  ;;  %v9870_v50 = vpop.eup %9869  ;;  %vm6609_vm12 = vweird.f32 %v9868_v39 }
 0xb4f   :  { %v6581_v49 = vsel %vm6580_vm8, %v9864_v44, %v6577_v43  ;;  %vm6610_vm14 = vmor %vm6608_vm13, %vm6609_vm12  ;;  %v13844_v44 = vld [vmem:[#allocation89_spill] sm:$0xff] }
 0xb50   :  { %v6605_v3 = vsub.f32 1.0, %v6604_v2  ;;  %v6586_v26 = vsel %vm6583_vm10, %v6585_v60, %v6581_v49  ;;  %v6596_v45 = vsel %vm6595_vm9, %v9866_v21, %v6592_v16  ;;  %6889 = vmatpush.bf16.msra.mxu0 %v13631_v42  ;;  %6902 = vmatpush.bf16.msra.mxu1 %v13595_v7  ;;  %v6615_v42 = vor.u32 1.1754944e-38, %v6614_v4  ;;  %v13847_v21 = vld [vmem:[#allocation26_spill] sm:$0xff]  ;;  %v13856_v16 = vld [vmem:[#allocation64_spill] sm:$0xff] }
 0xb51   :  { %v6601_v27 = vsel %vm6598_vm11, %v6600_v48, %v6596_v45  ;;  %v6620_v41 = vmul.f32 %v9870_v50, %v6586_v26  ;;  %6915 = vmatpush.bf16.msra.mxu2 %v13632_v62  ;;  %6928 = vmatpush.bf16.msra.mxu3 %v11773_v31  ;;  %v6612_v31 = vand.u32 2147483647, %v12716_v9  ;;  %v13843_v9 = vld [vmem:[#allocation29_spill] sm:$0xff]  ;;  %v6632_v48 = vunpack.c.l.bf16 %v13856_v16 }
 0xb52   :  { %v6606_v14 = vmul.f32 %v9868_v39, %v6605_v3  ;;  %v6619_v24 = vmul.f32 %v6601_v27, %v12633_v63  ;;  %v13842_v63 = vld [vmem:[#allocation88_spill] sm:$0xff] }
 0xb53   :  { %vm6613_vm15 = vcmp.eq.f32.partialorder %v6612_v31, 8.507059e+37 }
 0xb54   :  { %v12736_v34 = vadd.f32 %v6620_v41, %v6619_v24  ;;  %v6607_v28 = vadd.f32 %v9868_v39, %v6606_v14  ;;  %6890 = vmatpush.bf16.msra.mxu0 %v13633_v51  ;;  %6903 = vmatpush.bf16.msra.mxu1 %v13597_v61 }
 0xb55   :  { %6916 = vmatpush.bf16.msra.mxu2 %v13634_v10  ;;  %6929 = vmatpush.bf16.msra.mxu3 %v11789_v29  ;;  %v13833_v10 = vld [vmem:[#allocation42_spill] sm:$0xff] }
 0xb56   :  { %9871 = vtanh.f32 %v12736_v34  ;;  %v6611_v7 = vsel %vm6610_vm14, %v9868_v39, %v6607_v28 }
 0xb57   :  { %v6616_v62 = vsel %vm6613_vm15, %v6615_v42, %v6611_v7  ;;  %v6633_v7 = vunpack.c.h.bf16 %v13856_v16 }
 0xb58   :  { %6891 = vmatpush.bf16.msra.mxu0 %v13635_v6  ;;  %6904 = vmatpush.bf16.msra.mxu1 %v13599_v15  ;;  %v13822_v15 = vld [vmem:[#allocation53_spill] sm:$0xff]  ;;  %v13834_v6 = vld [vmem:[#allocation76_spill] sm:$0xff] }
 0xb59   :  { %6917 = vmatpush.bf16.msra.mxu2 %v13636_v5  ;;  %6930 = vmatpush.bf16.msra.mxu3 %v13600_v25  ;;  %v13823_v25 = vld [vmem:[#allocation65_spill] sm:$0xff]  ;;  %v13835_v5 = vld [vmem:[#allocation27_spill] sm:$0xff] }
 0xb5c   :  { %v9872_v61 = vpop.eup %9871  ;;  %6892 = vmatpush.bf16.msra.mxu0 %v13637_v12  ;;  %6905 = vmatpush.bf16.msra.mxu1 %v13603_v13  ;;  %v13826_v13 = vld [vmem:[#allocation54_spill] sm:$0xff]  ;;  %v13836_v12 = vld [vmem:[#allocation72_spill] sm:$0xff] }
 0xb5d   :  { %v6623_v51 = vmul.f32 %v9872_v61, %v6616_v62  ;;  %6918 = vmatpush.bf16.msra.mxu2 %v13587_v23  ;;  %6931 = vmatpush.bf16.msra.mxu3 %v13604_v47  ;;  %v13824_v23 = vld [vmem:[#allocation52_spill] sm:$0xff]  ;;  %v13829_v47 = vld [vmem:[#allocation39_spill] sm:$0xff] }
 0xb5f   :  { %v6626_v29 = vpack.c.bf16 %v6623_v51, %v6623_v51 }
 0xb60   :  { %6893 = vmatpush.bf16.msra.mxu0 %v13638_v53  ;;  %6906 = vmatpush.bf16.msra.mxu1 %v13605_v1  ;;  %v13830_v1 = vld [vmem:[#allocation56_spill] sm:$0xff]  ;;  %v13837_v53 = vld [vmem:[#allocation47_spill] sm:$0xff] }
 0xb61   :  { %6704 = vmatmul.bf16.vlgmr.msrb.gmra.mxu0 %v6626_v29  ;;  %6717 = vmatmul.bf16.vlgmr.msrb.gmra.mxu1 %v6626_v29 }
 0xb62   :  { %6730 = vmatmul.bf16.vlgmr.msrb.gmra.mxu2 %v6626_v29  ;;  %6743 = vmatmul.bf16.vlgmr.msrb.gmra.mxu3 %v6626_v29 }
 0xb63   :  { %6919 = vmatpush.bf16.msra.mxu2 %v13588_v52  ;;  %6932 = vmatpush.bf16.msra.mxu3 %v13606_v38  ;;  %v13825_v52 = vld [vmem:[#allocation35_spill] sm:$0xff] }
 0xb64   :  { %6894 = vmatpush.bf16.msra.mxu0 %v13639_v32  ;;  %6907 = vmatpush.bf16.msra.mxu1 %v13608_v58  ;;  %v13827_v58 = vld [vmem:[#allocation83_spill] sm:$0xff]  ;;  %v13838_v32 = vld [vmem:[#allocation73_spill] sm:$0xff] }
 0xb65   :  { %v13832_v38 = vld [vmem:[#allocation71_spill] sm:$0xff] }
 0xb67   :  { %6920 = vmatpush.bf16.msra.mxu2 %v13590_v33  ;;  %6933 = vmatpush.bf16.msra.mxu3 %v13640_v18  ;;  %v13828_v33 = vld [vmem:[#allocation57_spill] sm:$0xff]  ;;  %v13839_v18 = vld [vmem:[#allocation78_spill] sm:$0xff] }
 0xb68   :  { %6895 = vmatpush.bf16.msra.mxu0 %v13641_v11  ;;  %6908 = vmatpush.bf16.msra.mxu1 %v11863_v22  ;;  %v13831_v22 = vld [vmem:[#allocation80_spill] sm:$0xff]  ;;  %v13840_v11 = vld [vmem:[#allocation75_spill] sm:$0xff] }
 0xb6b   :  { %6921 = vmatpush.bf16.msra.mxu2 %v13749_v46  ;;  %6934 = vmatpush.bf16.msra.mxu3 %v13822_v15  ;;  %v13841_v46 = vld [vmem:[#allocation50_spill] sm:$0xff] }
 0xb6c   :  { %6950 = vmatpush.bf16.msrb.mxu0 %v13823_v25  ;;  %6963 = vmatpush.bf16.msrb.mxu1 %v13824_v23  ;;  %v13857_v25 = vld [vmem:[#allocation69_spill] sm:$0xff] }
 0xb6d   :  { %v6692_v23 = vunpack.c.l.bf16 %v13857_v25 }
 0xb6f   :  { %6976 = vmatpush.bf16.msrb.mxu2 %v13825_v52  ;;  %6989 = vmatpush.bf16.msrb.mxu3 %v13826_v13  ;;  %v6693_v52 = vunpack.c.h.bf16 %v13857_v25 }
 0xb70   :  { %6951 = vmatpush.bf16.msrb.mxu0 %v13827_v58  ;;  %6964 = vmatpush.bf16.msrb.mxu1 %v13828_v33 }
 0xb73   :  { %6977 = vmatpush.bf16.msrb.mxu2 %v13829_v47  ;;  %6990 = vmatpush.bf16.msrb.mxu3 %v13830_v1 }
 0xb74   :  { %6952 = vmatpush.bf16.msrb.mxu0 %v13831_v22  ;;  %6965 = vmatpush.bf16.msrb.mxu1 %v13832_v38 }
 0xb77   :  { %6978 = vmatpush.bf16.msrb.mxu2 %v13833_v10  ;;  %6991 = vmatpush.bf16.msrb.mxu3 %v13834_v6 }
 0xb78   :  { %6953 = vmatpush.bf16.msrb.mxu0 %v13835_v5  ;;  %6966 = vmatpush.bf16.msrb.mxu1 %v13836_v12 }
 0xb7b   :  { %6979 = vmatpush.bf16.msrb.mxu2 %v13837_v53  ;;  %6992 = vmatpush.bf16.msrb.mxu3 %v13838_v32 }
 0xb7c   :  { %6954 = vmatpush.bf16.msrb.mxu0 %v13839_v18  ;;  %6967 = vmatpush.bf16.msrb.mxu1 %v13840_v11 }
 0xb7f   :  { %6980 = vmatpush.bf16.msrb.mxu2 %v13841_v46  ;;  %6993 = vmatpush.bf16.msrb.mxu3 %v13842_v63  ;;  %v13858_v46 = vld [vmem:[#allocation44_spill] sm:$0xff] }
 0xb80   :  { %6955 = vmatpush.bf16.msrb.mxu0 %v13843_v9  ;;  %6968 = vmatpush.bf16.msrb.mxu1 %v13844_v44  ;;  %v6694_v63 = vunpack.c.l.bf16 %v13858_v46 }
 0xb83   :  { %6981 = vmatpush.bf16.msrb.mxu2 %v13845_v36  ;;  %6994 = vmatpush.bf16.msrb.mxu3 %v13846_v54 }
 0xb84   :  { %6956 = vmatpush.bf16.msrb.mxu0 %v13847_v21  ;;  %6969 = vmatpush.bf16.msrb.mxu1 %v13848_v30 }
 0xb87   :  { %6982 = vmatpush.bf16.msrb.mxu2 %v13849_v20  ;;  %6995 = vmatpush.bf16.msrb.mxu3 %v13850_v40 }
 0xb88   :  { %6957 = vmatpush.bf16.msrb.mxu0 %v13851_v56  ;;  %6970 = vmatpush.bf16.msrb.mxu1 %v13852_v55 }
 0xb8b   :  { %6983 = vmatpush.bf16.msrb.mxu2 %v13853_v59  ;;  %6996 = vmatpush.bf16.msrb.mxu3 %v13854_v19 }
 0xbc7   :  { %v6643_v39 = vpop.f32.mrf.mxu0  ;;  %v6656_v37 = vpop.f32.mrf.mxu1 }
 0xbc8   :  { %v6686_v17 = vadd.f32 %v6643_v39, %v6630_v57  ;;  %v6687_v2 = vadd.f32 %v6656_v37, %v6631_v8 }
 0xbca   :  { %v8906_v43 = vmul.f32 -1.442695, %v6686_v17  ;;  %v8907_v60 = vmul.f32 -1.442695, %v6687_v2 }
 0xbcc   :  { %9873 = vpow2.f32 %v8906_v43 }
 0xbcd   :  { %9875 = vpow2.f32 %v8907_v60 }
 0xbce   :  { %v6669_v3 = vpop.f32.mrf.mxu2  ;;  %v6682_v49 = vpop.f32.mrf.mxu3 }
 0xbcf   :  { %v6688_v50 = vadd.f32 %v6669_v3, %v6632_v48  ;;  %v6645_v26 = vpop.f32.mrf.mxu0  ;;  %v6658_v45 = vpop.f32.mrf.mxu1  ;;  %v6689_v61 = vadd.f32 %v6682_v49, %v6633_v7 }
 0xbd1   :  { %v8908_v14 = vmul.f32 -1.442695, %v6688_v50 }
 0xbd2   :  { %v9874_v27 = vpop.eup %9873 }
 0xbd3   :  { %v9876_v41 = vpop.eup %9875  ;;  %v6761_v24 = vadd.f32 1.0, %v9874_v27  ;;  %9877 = vpow2.f32 %v8908_v14 }
 0xbd4   :  { %v6762_v28 = vadd.f32 1.0, %v9876_v41 }
 0xbd5   :  { %9879 = vrcp.f32 %v6761_v24  ;;  %v6773_v1 = vand.u32 2147483647, %v6761_v24  ;;  %v6775_v5 = vand.u32 2147483648, %v6761_v24  ;;  %vm6769_vm3 = vweird.f32 %v6761_v24 }
 0xbd6   :  { %9881 = vrcp.f32 %v6762_v28  ;;  %v6671_v4 = vpop.f32.mrf.mxu2  ;;  %v6684_v31 = vpop.f32.mrf.mxu3  ;;  %v6790_v6 = vand.u32 2147483648, %v6762_v28  ;;  %v6788_v12 = vand.u32 2147483647, %v6762_v28  ;;  %vm6784_vm2 = vweird.f32 %v6762_v28 }
 0xbd7   :  { %v6776_v21 = vor.u32 1.1754944e-38, %v6775_v5  ;;  %vm6774_vm6 = vcmp.eq.f32.partialorder %v6773_v1, 8.507059e+37  ;;  %v6695_v31 = vunpack.c.h.bf16 %v13858_v46 }
 0xbd8   :  { %v6791_v20 = vor.u32 1.1754944e-38, %v6790_v6  ;;  %vm6789_vm7 = vcmp.eq.f32.partialorder %v6788_v12, 8.507059e+37 }
 0xbd9   :  { %v9878_v42 = vpop.eup %9877 }
 0xbda   :  { %v12802_v62 = vadd.f32 1.0, %v9878_v42 }
 0xbdb   :  { %v9880_v51 = vpop.eup %9879 }
 0xbdc   :  { %v9882_v29 = vpop.eup %9881  ;;  %v6765_v15 = vmul.f32 %v9880_v51, %v6761_v24  ;;  %9883 = vrcp.f32 %v12802_v62  ;;  %vm6770_vm0 = vweird.f32 %v9880_v51  ;;  %v6805_v45 = vand.u32 2147483648, %v12802_v62 }
 0xbdd   :  { %v6780_v13 = vmul.f32 %v9882_v29, %v6762_v28  ;;  %9885 = vtanh.f32 %v6689_v61  ;;  %vm6785_vm1 = vweird.f32 %v9882_v29  ;;  %vm6771_vm4 = vmor %vm6769_vm3, %vm6770_vm0  ;;  %vm6799_vm9 = vweird.f32 %v12802_v62 }
 0xbde   :  { %v6705_v58 = vpop.f32.mrf.mxu0  ;;  %v6718_v33 = vpop.f32.mrf.mxu1  ;;  %v6766_v47 = vsub.f32 1.0, %v6765_v15  ;;  %vm6786_vm5 = vmor %vm6784_vm2, %vm6785_vm1  ;;  %v6806_v28 = vor.u32 1.1754944e-38, %v6805_v45  ;;  %v9408_v45 = vld [vmem:[#allocation15 + $0xf0] sm:$0xff] }
 0xbdf   :  { %v6748_v22 = vadd.f32 %v6705_v58, %v6692_v23  ;;  %v6749_v38 = vadd.f32 %v6718_v33, %v6693_v52  ;;  %v6781_v10 = vsub.f32 1.0, %v6780_v13 }
 0xbe0   :  { %v6767_v53 = vmul.f32 %v9880_v51, %v6766_v47 }
 0xbe1   :  { %v8909_v32 = vmul.f32 -1.442695, %v6748_v22  ;;  %v8910_v18 = vmul.f32 -1.442695, %v6749_v38  ;;  %v6782_v11 = vmul.f32 %v9882_v29, %v6781_v10 }
 0xbe2   :  { %v9884_v9 = vpop.eup %9883  ;;  %v6768_v44 = vadd.f32 %v9880_v51, %v6767_v53 }
 0xbe3   :  { %9887 = vpow2.f32 %v8909_v32  ;;  %v9886_v36 = vpop.eup %9885  ;;  %v6795_v54 = vmul.f32 %v9884_v9, %v12802_v62  ;;  %v6783_v30 = vadd.f32 %v9882_v29, %v6782_v11  ;;  %vm6800_vm8 = vweird.f32 %v9884_v9 }
 0xbe4   :  { %9889 = vpow2.f32 %v8910_v18  ;;  %v6772_v40 = vsel %vm6771_vm4, %v9880_v51, %v6768_v44  ;;  %vm6801_vm10 = vmor %vm6799_vm9, %vm6800_vm8 }
 0xbe5   :  { %v6731_v56 = vpop.f32.mrf.mxu2  ;;  %v6744_v55 = vpop.f32.mrf.mxu3  ;;  %v6796_v59 = vsub.f32 1.0, %v6795_v54  ;;  %v6777_v19 = vsel %vm6774_vm6, %v6776_v21, %v6772_v40  ;;  %v6787_v35 = vsel %vm6786_vm5, %v9882_v29, %v6783_v30 }
 0xbe6   :  { %v6750_v57 = vadd.f32 %v6731_v56, %v6694_v63  ;;  %v6707_v8 = vpop.f32.mrf.mxu0  ;;  %v6720_v39 = vpop.f32.mrf.mxu1  ;;  %v6792_v37 = vsel %vm6789_vm7, %v6791_v20, %v6787_v35  ;;  %v6811_v17 = vmul.f32 %v9886_v36, %v6777_v19  ;;  %v6751_v61 = vadd.f32 %v6744_v55, %v6695_v31  ;;  %v9399_v31 = vld [vmem:[#allocation15 + $0xa8] sm:$0xff] }
 0xbe7   :  { %v6797_v2 = vmul.f32 %v9884_v9, %v6796_v59  ;;  %v6810_v43 = vmul.f32 %v6792_v37, %v12707_v0  ;;  %v6803_v0 = vand.u32 2147483647, %v12802_v62 }
 0xbe8   :  { %v8911_v60 = vmul.f32 -1.442695, %v6750_v57 }
 0xbe9   :  { %v9888_v16 = vpop.eup %9887  ;;  %v12810_v3 = vadd.f32 %v6811_v17, %v6810_v43  ;;  %v6798_v26 = vadd.f32 %v9884_v9, %v6797_v2  ;;  %vm6804_vm11 = vcmp.eq.f32.partialorder %v6803_v0, 8.507059e+37 }
 0xbea   :  { %v9890_v48 = vpop.eup %9889  ;;  %v6824_v49 = vadd.f32 1.0, %v9888_v16  ;;  %9891 = vpow2.f32 %v8911_v60  ;;  %v9401_v16 = vld [vmem:[#allocation15 + $0xb8] sm:$0xff] }
 0xbeb   :  { %v6825_v50 = vadd.f32 1.0, %v9890_v48  ;;  %9893 = vtanh.f32 %v12810_v3  ;;  %v6802_v24 = vsel %vm6801_vm10, %v9884_v9, %v6798_v26  ;;  %v9409_v48 = vld [vmem:[#allocation15 + $0xf8] sm:$0xff]  ;;  %v9400_v26 = vld [vmem:[#allocation15 + $0xb0] sm:$0xff] }
 0xbec   :  { %9895 = vrcp.f32 %v6824_v49  ;;  %v6807_v51 = vsel %vm6804_vm11, %v6806_v28, %v6802_v24  ;;  %v6838_v58 = vand.u32 2147483648, %v6824_v49  ;;  %v6836_v1 = vand.u32 2147483647, %v6824_v49 }
 0xbed   :  { %v6733_v14 = vpop.f32.mrf.mxu2  ;;  %v6746_v27 = vpop.f32.mrf.mxu3  ;;  %9897 = vrcp.f32 %v6825_v50  ;;  %v6853_v33 = vand.u32 2147483648, %v6825_v50  ;;  %v6851_v10 = vand.u32 2147483647, %v6825_v50  ;;  %vm6832_vm14 = vweird.f32 %v6824_v49 }
 0xbee   :  { %vm6847_vm15 = vweird.f32 %v6825_v50  ;;  %v6839_v12 = vor.u32 1.1754944e-38, %v6838_v58  ;;  %vm6837_vm2 = vcmp.eq.f32.partialorder %v6836_v1, 8.507059e+37  ;;  %v13860_v14 = vld [vmem:[#allocation82_spill] sm:$0xff]  ;;  %v9385_v58 = vld [vmem:[#allocation15 + $0x38] sm:$0xff] }
 0xbef   :  { %v6854_v32 = vor.u32 1.1754944e-38, %v6853_v33  ;;  %vm6852_vm3 = vcmp.eq.f32.partialorder %v6851_v10, 8.507059e+37  ;;  %v6886_v27 = vunpack.c.l.bf16 %v13860_v14  ;;  %v9393_v33 = vld [vmem:[#allocation15 + $0x78] sm:$0xff] }
 0xbf0   :  { %v9892_v41 = vpop.eup %9891 }
 0xbf1   :  { %v6826_v4 = vadd.f32 1.0, %v9892_v41  ;;  %v9894_v7 = vpop.eup %9893 }
 0xbf2   :  { %v9896_v42 = vpop.eup %9895  ;;  %v6814_v25 = vmul.f32 %v9894_v7, %v6807_v51  ;;  %v9407_v7 = vld [vmem:[#allocation15 + $0xe8] sm:$0xff] }
 0xbf3   :  { %9899 = vrcp.f32 %v6826_v4  ;;  %v9898_v29 = vpop.eup %9897  ;;  %v6828_v15 = vmul.f32 %v9896_v42, %v6824_v49  ;;  %vm6833_vm12 = vweird.f32 %v9896_v42  ;;  %v6868_v40 = vand.u32 2147483648, %v6826_v4 }
 0xbf4   :  { %v6843_v23 = vmul.f32 %v9898_v29, %v6825_v50  ;;  %v6878_v62 = vpack.c.bf16 %v6814_v25, %v6814_v25  ;;  %9901 = vtanh.f32 %v6751_v61  ;;  %vm6848_vm13 = vweird.f32 %v9898_v29  ;;  %vm6834_vm0 = vmor %vm6832_vm14, %vm6833_vm12  ;;  %v9398_v25 = vld [vmem:[#allocation15 + $0xa0] sm:$0xff] }
 0xbf5   :  { %v6829_v52 = vsub.f32 1.0, %v6828_v15  ;;  %vm6849_vm1 = vmor %vm6847_vm15, %vm6848_vm13  ;;  %vm6862_vm5 = vweird.f32 %v6826_v4  ;;  %v6866_v56 = vand.u32 2147483647, %v6826_v4  ;;  %v6869_v59 = vor.u32 1.1754944e-38, %v6868_v40 }
 0xbf6   :  { %v6844_v13 = vsub.f32 1.0, %v6843_v23  ;;  %6896 = vmatmul.bf16.vlgmr.msra.gmra.mxu0 %v6878_v62  ;;  %6909 = vmatmul.bf16.vlgmr.msra.gmra.mxu1 %v6878_v62  ;;  %v9406_v23 = vld [vmem:[#allocation15 + $0xe0] sm:$0xff] }
 0xbf7   :  { %v6830_v47 = vmul.f32 %v9896_v42, %v6829_v52  ;;  %6922 = vmatmul.bf16.vlgmr.msra.gmra.mxu2 %v6878_v62  ;;  %6935 = vmatmul.bf16.vlgmr.msra.gmra.mxu3 %v6878_v62  ;;  %vm6867_vm7 = vcmp.eq.f32.partialorder %v6866_v56, 8.507059e+37 }
 0xbf8   :  { %v6845_v38 = vmul.f32 %v9898_v29, %v6844_v13  ;;  %7438 = vmatpush.bf16.msra.mxu2 %v9401_v16  ;;  %7451 = vmatpush.bf16.msra.mxu3 %v9409_v48  ;;  %v6887_v13 = vunpack.c.h.bf16 %v13860_v14  ;;  %v9403_v16 = vld [vmem:[#allocation15 + $0xc8] sm:$0xff] }
 0xbf9   :  { %v9900_v22 = vpop.eup %9899  ;;  %v6831_v5 = vadd.f32 %v9896_v42, %v6830_v47  ;;  %v9397_v47 = vld [vmem:[#allocation15 + $0x98] sm:$0xff]  ;;  %7412 = vmatpush.bf16.msra.mxu0 %v9385_v58  ;;  %7425 = vmatpush.bf16.msra.mxu1 %v9393_v33 }
 0xbfa   :  { %v6858_v6 = vmul.f32 %v9900_v22, %v6826_v4  ;;  %v6846_v53 = vadd.f32 %v9898_v29, %v6845_v38  ;;  %v9902_v46 = vpop.eup %9901  ;;  %vm6863_vm4 = vweird.f32 %v9900_v22  ;;  %v9405_v38 = vld [vmem:[#allocation15 + $0xd8] sm:$0xff] }
 0xbfb   :  { %v6835_v11 = vsel %vm6834_vm0, %v9896_v42, %v6831_v5  ;;  %vm6864_vm6 = vmor %vm6862_vm5, %vm6863_vm4 }
 0xbfc   :  { %v6859_v18 = vsub.f32 1.0, %v6858_v6  ;;  %v6840_v63 = vsel %vm6837_vm2, %v6839_v12, %v6835_v11  ;;  %v6850_v9 = vsel %vm6849_vm1, %v9898_v29, %v6846_v53  ;;  %7439 = vmatpush.bf16.msra.mxu2 %v9400_v26  ;;  %7452 = vmatpush.bf16.msra.mxu3 %v9408_v45  ;;  %v13861_v53 = vld [vmem:[#allocation67_spill] sm:$0xff]  ;;  %v9384_v11 = vld [vmem:[#allocation15 + $0x30] sm:$0xff] }
 0xbfd   :  { %v6855_v36 = vsel %vm6852_vm3, %v6854_v32, %v6850_v9  ;;  %v6874_v54 = vmul.f32 %v9902_v46, %v6840_v63  ;;  %v6946_v32 = vunpack.c.l.bf16 %v13861_v53  ;;  %v9392_v46 = vld [vmem:[#allocation15 + $0x70] sm:$0xff]  ;;  %7413 = vmatpush.bf16.msra.mxu0 %v9384_v11 }
 0xbfe   :  { %v6860_v44 = vmul.f32 %v9900_v22, %v6859_v18  ;;  %v6873_v21 = vmul.f32 %v6855_v36, %v12736_v34  ;;  %v13859_v34 = vld [vmem:[#allocation37_spill] sm:$0xff]  ;;  %v6947_v18 = vunpack.c.h.bf16 %v13861_v53  ;;  %v9396_v63 = vld [vmem:[#allocation15 + $0x90] sm:$0xff]  ;;  %7426 = vmatpush.bf16.msra.mxu1 %v9392_v46 }
 0xbff   :  { %v6884_v39 = vunpack.c.l.bf16 %v13859_v34  ;;  %v6885_v37 = vunpack.c.h.bf16 %v13859_v34 }
 0xc00   :  { %v12818_v30 = vadd.f32 %v6874_v54, %v6873_v21  ;;  %v6861_v20 = vadd.f32 %v9900_v22, %v6860_v44  ;;  %7440 = vmatpush.bf16.msra.mxu2 %v9399_v31  ;;  %7453 = vmatpush.bf16.msra.mxu3 %v9407_v7  ;;  %v9404_v54 = vld [vmem:[#allocation15 + $0xd0] sm:$0xff]  ;;  %v9382_v31 = vld [vmem:[#allocation15 + $0x20] sm:$0xff] }
 0xc01   :  { %v9390_v7 = vld [vmem:[#allocation15 + $0x60] sm:$0xff] }
 0xc02   :  { %9903 = vtanh.f32 %v12818_v30  ;;  %v6865_v55 = vsel %vm6864_vm6, %v9900_v22, %v6861_v20 }
 0xc03   :  { %v6870_v35 = vsel %vm6867_vm7, %v6869_v59, %v6865_v55 }
 0xc04   :  { %7441 = vmatpush.bf16.msra.mxu2 %v9398_v25  ;;  %7454 = vmatpush.bf16.msra.mxu3 %v9406_v23  ;;  %v9394_v23 = vld [vmem:[#allocation15 + $0x80] sm:$0xff] }
 0xc08   :  { %v9904_v19 = vpop.eup %9903  ;;  %7442 = vmatpush.bf16.msra.mxu2 %v9397_v47  ;;  %7455 = vmatpush.bf16.msra.mxu3 %v9405_v38  ;;  %v9389_v38 = vld [vmem:[#allocation15 + $0x58] sm:$0xff] }
 0xc09   :  { %v6877_v57 = vmul.f32 %v9904_v19, %v6870_v35 }
 0xc0b   :  { %v6880_v8 = vpack.c.bf16 %v6877_v57, %v6877_v57 }
 0xc0c   :  { %7443 = vmatpush.bf16.msra.mxu2 %v9396_v63  ;;  %7456 = vmatpush.bf16.msra.mxu3 %v9404_v54  ;;  %v9380_v63 = vld [vmem:[#allocation15 + $0x10] sm:$0xff]  ;;  %v9387_v54 = vld [vmem:[#allocation15 + $0x48] sm:$0xff] }
 0xc0d   :  { %6958 = vmatmul.bf16.vlgmr.msrb.gmra.mxu0 %v6880_v8  ;;  %6971 = vmatmul.bf16.vlgmr.msrb.gmra.mxu1 %v6880_v8 }
 0xc0e   :  { %6984 = vmatmul.bf16.vlgmr.msrb.gmra.mxu2 %v6880_v8  ;;  %6997 = vmatmul.bf16.vlgmr.msrb.gmra.mxu3 %v6880_v8 }
 0xc10   :  { %7457 = vmatpush.bf16.msra.mxu3 %v9403_v16 }
 0xc73   :  { %v6897_v17 = vpop.f32.mrf.mxu0  ;;  %v6910_v2 = vpop.f32.mrf.mxu1 }
 0xc74   :  { %v6940_v43 = vadd.f32 %v6897_v17, %v6884_v39  ;;  %v6941_v60 = vadd.f32 %v6910_v2, %v6885_v37  ;;  %v9383_v39 = vld [vmem:[#allocation15 + $0x28] sm:$0xff]  ;;  %v13862_v2 = vld [vmem:[#allocation36_spill] sm:$0xff] }
 0xc75   :  { %v9391_v37 = vld [vmem:[#allocation15 + $0x68] sm:$0xff]  ;;  %7414 = vmatpush.bf16.msra.mxu0 %v9383_v39 }
 0xc76   :  { %v8912_v49 = vmul.f32 -1.442695, %v6940_v43  ;;  %v8913_v50 = vmul.f32 -1.442695, %v6941_v60  ;;  %v6948_v43 = vunpack.c.l.bf16 %v13862_v2  ;;  %v9395_v60 = vld [vmem:[#allocation15 + $0x88] sm:$0xff]  ;;  %7427 = vmatpush.bf16.msra.mxu1 %v9391_v37 }
 0xc77   :  { %7444 = vmatpush.bf16.msra.mxu2 %v9395_v60 }
 0xc78   :  { %9905 = vpow2.f32 %v8912_v49 }
 0xc79   :  { %9907 = vpow2.f32 %v8913_v50  ;;  %7415 = vmatpush.bf16.msra.mxu0 %v9382_v31 }
 0xc7a   :  { %v6923_v0 = vpop.f32.mrf.mxu2  ;;  %v6936_v41 = vpop.f32.mrf.mxu3  ;;  %7428 = vmatpush.bf16.msra.mxu1 %v9390_v7 }
 0xc7b   :  { %v6942_v24 = vadd.f32 %v6923_v0, %v6886_v27  ;;  %v6899_v28 = vpop.f32.mrf.mxu0  ;;  %v6912_v4 = vpop.f32.mrf.mxu1  ;;  %v6943_v22 = vadd.f32 %v6936_v41, %v6887_v13  ;;  %7445 = vmatpush.bf16.msra.mxu2 %v9394_v23 }
 0xc7d   :  { %v8914_v42 = vmul.f32 -1.442695, %v6942_v24 }
 0xc7e   :  { %v9906_v61 = vpop.eup %9905  ;;  %7429 = vmatpush.bf16.msra.mxu1 %v9389_v38 }
 0xc7f   :  { %v9908_v51 = vpop.eup %9907  ;;  %v12824_v29 = vadd.f32 1.0, %v9906_v61  ;;  %9909 = vpow2.f32 %v8914_v42 }
 0xc80   :  { %v12826_v15 = vadd.f32 1.0, %v9908_v51 }
 0xc81   :  { %9911 = vrcp.f32 %v12824_v29  ;;  %v7027_v20 = vand.u32 2147483647, %v12824_v29  ;;  %v7029_v19 = vand.u32 2147483648, %v12824_v29  ;;  %vm7023_vm11 = vweird.f32 %v12824_v29 }
 0xc82   :  { %9913 = vrcp.f32 %v12826_v15  ;;  %v6925_v52 = vpop.f32.mrf.mxu2  ;;  %v6938_v62 = vpop.f32.mrf.mxu3  ;;  %v7044_v59 = vand.u32 2147483648, %v12826_v15  ;;  %v7042_v35 = vand.u32 2147483647, %v12826_v15  ;;  %vm7038_vm10 = vweird.f32 %v12826_v15 }
 0xc83   :  { %v7030_v14 = vor.u32 1.1754944e-38, %v7029_v19  ;;  %vm7028_vm14 = vcmp.eq.f32.partialorder %v7027_v20, 8.507059e+37  ;;  %v9402_v52 = vld [vmem:[#allocation15 + $0xc0] sm:$0xff] }
 0xc84   :  { %v7045_v41 = vor.u32 1.1754944e-38, %v7044_v59  ;;  %vm7043_vm15 = vcmp.eq.f32.partialorder %v7042_v35, 8.507059e+37  ;;  %7458 = vmatpush.bf16.msra.mxu3 %v9402_v52 }
 0xc85   :  { %v9910_v1 = vpop.eup %9909 }
 0xc86   :  { %v12831_v10 = vadd.f32 1.0, %v9910_v1 }
 0xc87   :  { %v12833_v6 = vpop.eup %9911 }
 0xc88   :  { %v12835_v5 = vpop.eup %9913  ;;  %v7019_v12 = vmul.f32 %v12833_v6, %v12824_v29  ;;  %9915 = vrcp.f32 %v12831_v10  ;;  %vm7024_vm8 = vweird.f32 %v12833_v6  ;;  %vm7053_vm1 = vweird.f32 %v12831_v10 }
 0xc89   :  { %v7034_v9 = vmul.f32 %v12835_v5, %v12826_v15  ;;  %9917 = vtanh.f32 %v6943_v22  ;;  %vm7039_vm9 = vweird.f32 %v12835_v5  ;;  %vm12862_vm12 = vmor %vm7023_vm11, %vm7024_vm8  ;;  %v9381_v22 = vld [vmem:[#allocation15 + $0x18] sm:$0xff] }
 0xc8a   :  { %v6959_v44 = vpop.f32.mrf.mxu0  ;;  %v6972_v36 = vpop.f32.mrf.mxu1  ;;  %v7020_v21 = vsub.f32 1.0, %v7019_v12  ;;  %vm12869_vm13 = vmor %vm7038_vm10, %vm7039_vm9  ;;  %7416 = vmatpush.bf16.msra.mxu0 %v9381_v22 }
 0xc8b   :  { %v7002_v40 = vadd.f32 %v6959_v44, %v6946_v32  ;;  %v7003_v56 = vadd.f32 %v6972_v36, %v6947_v18  ;;  %v7035_v55 = vsub.f32 1.0, %v7034_v9  ;;  %v7057_v18 = vand.u32 2147483647, %v12831_v10  ;;  %v9388_v9 = vld [vmem:[#allocation15 + $0x50] sm:$0xff]  ;;  %v9379_v36 = vld [vmem:[#allocation15 + $0x8] sm:$0xff] }
 0xc8c   :  { %v7021_v57 = vmul.f32 %v12833_v6, %v7020_v21  ;;  %7430 = vmatpush.bf16.msra.mxu1 %v9388_v9 }
 0xc8d   :  { %v8915_v8 = vmul.f32 -1.442695, %v7002_v40  ;;  %v8916_v34 = vmul.f32 -1.442695, %v7003_v56  ;;  %v7036_v17 = vmul.f32 %v12835_v5, %v7035_v55  ;;  %vm7058_vm3 = vcmp.eq.f32.partialorder %v7057_v18, 8.507059e+37 }
 0xc8e   :  { %v12853_v48 = vpop.eup %9915  ;;  %v7022_v49 = vadd.f32 %v12833_v6, %v7021_v57  ;;  %7417 = vmatpush.bf16.msra.mxu0 %v9380_v63  ;;  %v9378_v57 = vld [vmem:[#allocation15] sm:$0xff] }
 0xc8f   :  { %9919 = vpow2.f32 %v8915_v8  ;;  %v9918_v50 = vpop.eup %9917  ;;  %v7049_v26 = vmul.f32 %v12853_v48, %v12831_v10  ;;  %v7037_v27 = vadd.f32 %v12835_v5, %v7036_v17  ;;  %vm7054_vm0 = vweird.f32 %v12853_v48  ;;  %v9386_v8 = vld [vmem:[#allocation15 + $0x40] sm:$0xff] }
 0xc90   :  { %9921 = vpow2.f32 %v8916_v34  ;;  %v7026_v24 = vsel %vm12862_vm12, %v12833_v6, %v7022_v49  ;;  %vm7055_vm2 = vmor %vm7053_vm1, %vm7054_vm0  ;;  %7431 = vmatpush.bf16.msra.mxu1 %v9387_v54 }
 0xc91   :  { %v6985_v28 = vpop.f32.mrf.mxu2  ;;  %v6998_v4 = vpop.f32.mrf.mxu3  ;;  %v7050_v42 = vsub.f32 1.0, %v7049_v26  ;;  %v7031_v61 = vsel %vm7028_vm14, %v7030_v14, %v7026_v24  ;;  %v7041_v51 = vsel %vm12869_vm13, %v12835_v5, %v7037_v27 }
 0xc92   :  { %v7004_v29 = vadd.f32 %v6985_v28, %v6948_v43  ;;  %v6961_v15 = vpop.f32.mrf.mxu0  ;;  %v6974_v25 = vpop.f32.mrf.mxu1  ;;  %v7046_v62 = vsel %vm7043_vm15, %v7045_v41, %v7041_v51  ;;  %v7065_v13 = vmul.f32 %v9918_v50, %v7031_v61  ;;  %7418 = vmatpush.bf16.msra.mxu0 %v9379_v36  ;;  %v9424_v36 = vld [vmem:[%s12926_s10] ss:$0 sm:$0xff] }
 0xc93   :  { %v7051_v58 = vmul.f32 %v12853_v48, %v7050_v42  ;;  %v7064_v33 = vmul.f32 %v7046_v62, %v12810_v3  ;;  %v7059_v3 = vand.u32 2147483648, %v12831_v10  ;;  %v6949_v10 = vunpack.c.h.bf16 %v13862_v2 }
 0xc94   :  { %v8917_v47 = vmul.f32 -1.442695, %v7004_v29  ;;  %7432 = vmatpush.bf16.msra.mxu1 %v9386_v8 }
 0xc95   :  { %v9920_v1 = vpop.eup %9919  ;;  %v7066_v5 = vadd.f32 %v7065_v13, %v7064_v33  ;;  %v7052_v53 = vadd.f32 %v12853_v48, %v7051_v58  ;;  %v7060_v20 = vor.u32 1.1754944e-38, %v7059_v3  ;;  %v7005_v35 = vadd.f32 %v6998_v4, %v6949_v10 }
 0xc96   :  { %v9922_v6 = vpop.eup %9921  ;;  %v12881_v12 = vadd.f32 1.0, %v9920_v1  ;;  %9923 = vpow2.f32 %v8917_v47  ;;  %7419 = vmatpush.bf16.msra.mxu0 %v9378_v57 }
 0xc97   :  { %v12885_v32 = vadd.f32 1.0, %v9922_v6  ;;  %9925 = vtanh.f32 %v7066_v5  ;;  %v7056_v44 = vsel %vm7055_vm2, %v12853_v48, %v7052_v53 }
 0xc98   :  { %9927 = vrcp.f32 %v12881_v12  ;;  %v7061_v55 = vsel %vm7058_vm3, %v7060_v20, %v7056_v44  ;;  %v7092_v60 = vand.u32 2147483648, %v12881_v12  ;;  %v7090_v49 = vand.u32 2147483647, %v12881_v12 }
 0xc99   :  { %v6987_v11 = vpop.f32.mrf.mxu2  ;;  %v7000_v46 = vpop.f32.mrf.mxu3  ;;  %9929 = vrcp.f32 %v12885_v32  ;;  %v7107_v16 = vand.u32 2147483648, %v12885_v32  ;;  %v7105_v45 = vand.u32 2147483647, %v12885_v32  ;;  %vm7086_vm6 = vweird.f32 %v12881_v12 }
 0xc9a   :  { %vm7101_vm7 = vweird.f32 %v12885_v32  ;;  %v7093_v0 = vor.u32 1.1754944e-38, %v7092_v60  ;;  %vm7091_vm10 = vcmp.eq.f32.partialorder %v7090_v49, 8.507059e+37 }
 0xc9b   :  { %v7108_v24 = vor.u32 1.1754944e-38, %v7107_v16  ;;  %vm7106_vm11 = vcmp.eq.f32.partialorder %v7105_v45, 8.507059e+37 }
 0xc9c   :  { %v9924_v21 = vpop.eup %9923 }
 0xc9d   :  { %v12893_v40 = vadd.f32 1.0, %v9924_v21  ;;  %v9926_v56 = vpop.eup %9925 }
 0xc9e   :  { %v9928_v59 = vpop.eup %9927  ;;  %v7068_v19 = vmul.f32 %v9926_v56, %v7061_v55 }
 0xc9f   :  { %9931 = vrcp.f32 %v12893_v40  ;;  %v9930_v34 = vpop.eup %9929  ;;  %v7082_v39 = vmul.f32 %v9928_v59, %v12881_v12  ;;  %vm7087_vm4 = vweird.f32 %v9928_v59  ;;  %v7122_v47 = vand.u32 2147483648, %v12893_v40 }
 0xca0   :  { %v7132_v37 = vpack.c.bf16 %v7068_v19, %v7068_v19  ;;  %v7097_v17 = vmul.f32 %v9930_v34, %v12885_v32  ;;  %9933 = vtanh.f32 %v7005_v35  ;;  %vm7102_vm5 = vweird.f32 %v9930_v34  ;;  %vm7088_vm8 = vmor %vm7086_vm6, %vm7087_vm4 }
 0xca1   :  { %v7083_v43 = vsub.f32 1.0, %v7082_v39  ;;  %vm7103_vm9 = vmor %vm7101_vm7, %vm7102_vm5  ;;  %vm7116_vm13 = vweird.f32 %v12893_v40  ;;  %v7120_v1 = vand.u32 2147483647, %v12893_v40  ;;  %v7123_v38 = vor.u32 1.1754944e-38, %v7122_v47 }
 0xca2   :  { %7133 = vst [vmem:[#allocation3 + $0x38] sm:$0xf] %v7132_v37  ;;  %v7098_v2 = vsub.f32 1.0, %v7097_v17 }
 0xca3   :  { %v7084_v48 = vmul.f32 %v9928_v59, %v7083_v43  ;;  %vm7121_vm15 = vcmp.eq.f32.partialorder %v7120_v1, 8.507059e+37 }
 0xca4   :  { %v7099_v26 = vmul.f32 %v9930_v34, %v7098_v2 }
 0xca5   :  { %v9932_v50 = vpop.eup %9931  ;;  %v7085_v27 = vadd.f32 %v9928_v59, %v7084_v48 }
 0xca6   :  { %v7112_v14 = vmul.f32 %v9932_v50, %v12893_v40  ;;  %v7100_v41 = vadd.f32 %v9930_v34, %v7099_v26  ;;  %v9934_v31 = vpop.eup %9933  ;;  %vm7117_vm12 = vweird.f32 %v9932_v50 }
 0xca7   :  { %v7089_v4 = vsel %vm7088_vm8, %v9928_v59, %v7085_v27  ;;  %vm7118_vm14 = vmor %vm7116_vm13, %vm7117_vm12 }
 0xca8   :  { %v7113_v28 = vsub.f32 1.0, %v7112_v14  ;;  %v7094_v7 = vsel %vm7091_vm10, %v7093_v0, %v7089_v4  ;;  %v7104_v42 = vsel %vm7103_vm9, %v9930_v34, %v7100_v41 }
 0xca9   :  { %v7109_v51 = vsel %vm7106_vm11, %v7108_v24, %v7104_v42  ;;  %v7128_v29 = vmul.f32 %v9934_v31, %v7094_v7  ;;  %v7137_v15 = vld [vmem:[#allocation3 + $0x38] sm:$0xff] }
 0xcaa   :  { %v7114_v61 = vmul.f32 %v9932_v50, %v7113_v28  ;;  %v7127_v25 = vmul.f32 %v7109_v51, %v12818_v30  ;;  %v7146_v23 = vunpack.c.l.b16 %v7137_v15  ;;  %v7147_v52 = vunpack.c.h.b16 %v7137_v15 }
 0xcac   :  { %v7129_v62 = vadd.f32 %v7128_v29, %v7127_v25  ;;  %v7148_v13 = vpack.c.b16 %v7146_v23, %v7146_v23  ;;  %v7149_v58 = vpack.c.b16 %v7147_v52, %v7147_v52  ;;  %v7115_v33 = vadd.f32 %v9932_v50, %v7114_v61 }
 0xcae   :  { %9935 = vtanh.f32 %v7129_v62  ;;  %7446 = vmatmul.bf16.vlgmr.msra.gmra.mxu2 %v7148_v13  ;;  %7459 = vmatmul.bf16.vlgmr.msra.gmra.mxu3 %v7149_v58  ;;  %v7119_v22 = vsel %vm7118_vm14, %v9932_v50, %v7115_v33 }
 0xcaf   :  { %v7124_v6 = vsel %vm7121_vm15, %v7123_v38, %v7119_v22 }
 0xcb4   :  { %v9936_v30 = vpop.eup %9935 }
 0xcb5   :  { %v7131_v5 = vmul.f32 %v9936_v30, %v7124_v6 }
 0xcb7   :  { %v7134_v12 = vpack.c.bf16 %v7131_v5, %v7131_v5 }
 0xcb9   :  { %7135 = vst [vmem:[#allocation3 + $0x4] sm:$0xf] %v7134_v12 }
 0xcc0   :  { %v7136_v53 = vld [vmem:[#allocation3] sm:$0xff] }
 0xcc1   :  { %v7139_v32 = vunpack.c.l.b16 %v7136_v53  ;;  %v7140_v3 = vunpack.c.h.b16 %v7136_v53 }
 0xcc3   :  { %v7141_v18 = vpack.c.b16 %v7139_v32, %v7139_v32  ;;  %v7142_v11 = vpack.c.b16 %v7140_v3, %v7140_v3 }
 0xcc5   :  { %7420 = vmatmul.bf16.vlgmr.msra.gmra.mxu0 %v7141_v18  ;;  %7433 = vmatmul.bf16.vlgmr.msra.gmra.mxu1 %v7142_v11 }
 0xd31   :  { %v7447_v46 = vpop.f32.mrf.mxu2  ;;  %v7460_v63 = vpop.f32.mrf.mxu3 }
 0xd39   :  { %v7449_v9 = vpop.f32.mrf.mxu2  ;;  %v7462_v44 = vpop.f32.mrf.mxu3 }
 0xd42   :  { %v7421_v54 = vpop.f32.mrf.mxu0  ;;  %v7434_v21 = vpop.f32.mrf.mxu1 }
 0xd43   :  { %v7422_v20 = vadd.f32 %v9424_v36, %v7421_v54 }
 0xd45   :  { %v7435_v40 = vadd.f32 %v7434_v21, %v7422_v20 }
 0xd47   :  { %v7448_v10 = vadd.f32 %v7447_v46, %v7435_v40 }
 0xd49   :  { %v7461_v56 = vadd.f32 %v7460_v63, %v7448_v10 }
 0xd4a   :  { %v7423_v55 = vpop.f32.mrf.mxu0  ;;  %v7436_v59 = vpop.f32.mrf.mxu1 }
 0xd4b   :  { %7464 = vst [vmem:[%s12927_s11] sm:$0xff] %v7461_v56 }
 0xd4c   :  { %7469 = vsyncpa [#allocation6], 1 }
 0xd4d   :  { %7470 = vsyncpa [#allocation8], 1 }
 0xd4e   :  { %7471 = vsyncpa [#allocation11], 1 }
 0xd4f   :  { %7472 = vsyncpa [#allocation14], 1 }

</bundles_post_ra>
